<compile_context>
chip_gen: v7x
topology: tpu7x:2x2x1
jax: 0.10.0
libtpu: 0.0.40
codegen_flags: <defaults>
</compile_context>

<pallas_src>
import functools

import jax
import jax.numpy as jnp
from jax.experimental import pallas as pl
from jax.experimental.pallas import tpu as pltpu


NUM_CLASSES = 10


def _round_up(x, m):
    return (x + m - 1) // m * m


def _attack_kernel(x_ref, l_ref,
                   w1a, w2, b2,
                   wl1a, w3s, wl2s, b3s,
                   wc1, bc1, wc2, bc2, wc3, bc3, wc4v, bc4,
                   out_ref):
    f32 = jnp.float32
    bf16 = jnp.bfloat16

    def epilogue(z, b_ref=None):
        # f32 MXU accumulator -> bf16 once, then bias add + ReLU in bf16
        # (2 elems/lane on the VPU for the wide layers).
        zb = z.astype(bf16)
        if b_ref is not None:
            zb = zb + b_ref[...]
        return jnp.maximum(zb, 0)

    # ---- features branch (bias of layer 1 folded into the ones-column of x) --
    x = x_ref[...]                                                   # (C_pad, TB) bf16
    h = epilogue(jnp.dot(w1a[...], x, preferred_element_type=f32))   # (1024, TB)
    h = epilogue(jnp.dot(w2[...], h, preferred_element_type=f32), b2)  # (512, TB)

    # ---- labels branch (bias folded the same way) -----------------------------
    g = epilogue(jnp.dot(wl1a[...], l_ref[...], preferred_element_type=f32))  # (128, TB)

    # ---- block-diagonally fused branch outputs --------------------------------
    #   rows 0:64   = relu(w3  @ h + b3)   (features)
    #   rows 64:128 = relu(wl2 @ g + bl2)  (labels)
    z = (jnp.dot(w3s[...], h, preferred_element_type=f32)
         + jnp.dot(wl2s[...], g, preferred_element_type=f32))
    fused = epilogue(z, b3s)                                         # (128, TB)

    # ---- combine MLP (wc1 is now a single K=128 dot, no in-kernel slicing) ----
    c = epilogue(jnp.dot(wc1[...], fused, preferred_element_type=f32), bc1)  # (256, TB)
    c = epilogue(jnp.dot(wc2[...], c, preferred_element_type=f32), bc2)      # (128, TB)
    c = epilogue(jnp.dot(wc3[...], c, preferred_element_type=f32), bc3)      # (64,  TB)

    # ---- final 1-row layer on VPU/XLU (mul + sublane reduce), not the MXU -----
    logit = jnp.sum(c.astype(f32) * wc4v[...], axis=0, keepdims=True) + bc4[...]  # (1, TB)
    sig = jax.nn.sigmoid(logit)

    # Lane-dense, unmasked store: fill the full (8, TB) block (row 0 = result).
    out_ref[...] = jnp.broadcast_to(sig, out_ref.shape).astype(out_ref.dtype)


@functools.partial(jax.jit, static_argnames=("tile_b",))
def inference_attack_forward(attack_input, infer_input_one_hot, params, *, tile_b=512):
    """Fused forward pass.  attack_input, infer_input_one_hot: (B, C) float."""
    B, C = attack_input.shape
    assert infer_input_one_hot.shape == (B, C)
    assert tile_b % 128 == 0 and tile_b >= 128

    (w1, b1, w2, b2, w3, b3,
     wl1, bl1, wl2, bl2,
     wc1, bc1, wc2, bc2, wc3, bc3, wc4, bc4) = params

    # --- batch tiling: always a multiple of 128 (lane-dense stores, full MXU N)
    b128 = _round_up(B, 128)
    if b128 <= tile_b:
        tile = b128
    else:
        tile = tile_b
        n = pl.cdiv(b128, tile)
        # Prefer an even number of tiles so both v7x TensorCores get equal work.
        if n % 2 == 1 and tile // 2 >= 128 and pl.cdiv(b128, tile // 2) % 2 == 0:
            tile = tile // 2
    B_pad = _round_up(b128, tile)
    n_tiles = B_pad // tile

    # Class dim padded to a bf16 sublane multiple (16), with one extra column
    # reserved for the folded first-layer bias ("ones trick").
    C_pad = _round_up(C + 1, 16)

    # --- one-time (outside-kernel) operand preparation -----------------------
    def prep_act(a):
        a = jnp.pad(a.astype(jnp.bfloat16), ((0, B_pad - B), (0, C_pad - C)))
        a = a.at[:, C].set(1.0)            # ones column -> folded bias term
        return a.T                         # (C_pad, B_pad)

    def fold_bias(w, b):
        # (out, C) weight + (out,) bias -> (out, C_pad) with bias in column C.
        out = jnp.zeros((w.shape[0], C_pad), jnp.float32)
        out = out.at[:, :C].set(w.astype(jnp.float32))
        out = out.at[:, C].set(b.astype(jnp.float32))
        return out.astype(jnp.bfloat16)

    def as_col(b):
        return b.astype(jnp.bfloat16).reshape(-1, 1)     # (out, 1) bf16

    w1a = fold_bias(w1, b1)                                              # (1024, C_pad)
    wl1a = fold_bias(wl1, bl1)                                           # (128,  C_pad)
    w3s = jnp.concatenate([w3, jnp.zeros_like(w3)], axis=0)              # (128, 512)
    wl2s = jnp.concatenate([jnp.zeros_like(wl2), wl2], axis=0)           # (128, 128)
    b3s = jnp.concatenate([b3, bl2], axis=0)                             # (128,)

    prepped = (
        w1a, w2.astype(jnp.bfloat16), as_col(b2),
        wl1a, w3s.astype(jnp.bfloat16), wl2s.astype(jnp.bfloat16), as_col(b3s),
        wc1.astype(jnp.bfloat16), as_col(bc1),
        wc2.astype(jnp.bfloat16), as_col(bc2),
        wc3.astype(jnp.bfloat16), as_col(bc3),
        wc4.astype(jnp.float32).reshape(-1, 1),     # (64, 1) f32 (VPU/XLU layer)
        bc4.astype(jnp.float32).reshape(1, 1),      # (1, 1)  f32
    )
    xT = prep_act(attack_input)
    lT = prep_act(infer_input_one_hot)

    # --- specs ---------------------------------------------------------------
    act_spec = pl.BlockSpec((C_pad, tile), lambda i: (0, i))
    out_spec = pl.BlockSpec((8, tile), lambda i: (0, i))
    param_specs = [pl.BlockSpec(p.shape, lambda i: (0, 0)) for p in prepped]

    # --- cost estimate (helps XLA scheduling around the custom call) ---------
    macs = (C_pad * 1024 + 1024 * 512 + 512 * 128       # features (+ fused pad)
            + C_pad * 128 + 128 * 128                   # labels  (+ fused pad)
            + 128 * 256 + 256 * 128 + 128 * 64 + 64)    # combine
    flops = 2 * B_pad * macs
    bytes_accessed = (sum(int(p.size) * p.dtype.itemsize for p in prepped)
                      + 2 * B_pad * C_pad * 2 + 8 * B_pad * 4)
    cost = pl.CostEstimate(flops=flops, transcendentals=B_pad,
                           bytes_accessed=bytes_accessed)

    out = pl.pallas_call(
        _attack_kernel,
        out_shape=jax.ShapeDtypeStruct((8, B_pad), jnp.float32),
        grid_spec=pltpu.PrefetchScalarGridSpec(
            num_scalar_prefetch=0,
            grid=(n_tiles,),
            in_specs=[act_spec, act_spec] + param_specs,
            out_specs=out_spec,
        ),
        compiler_params=pltpu.CompilerParams(
            dimension_semantics=("parallel",),
            # Actual need is ~12-15 MiB at tile=512; don't request all of v7x's
            # 64 MiB VMEM.
            vmem_limit_bytes=24 * 1024 * 1024,
        ),
        cost_estimate=cost,
    )(xT, lT, *prepped)

    # Row 0 holds the result; drop batch padding and restore (B, 1).
    return out[0, :B].reshape(B, 1)


def init_params(key, num_classes=NUM_CLASSES):
    """PyTorch nn.Linear layout: W (out,in), b (out,), uniform(+/- 1/sqrt(fan_in))."""
    dims = [
        # features
        (1024, num_classes), (512, 1024), (64, 512),
        # labels
        (128, num_classes), (64, 128),
        # combine
        (256, 128), (128, 256), (64, 128), (1, 64),
    ]
    params = []
    for (fan_out, fan_in) in dims:
        key, kw, kb = jax.random.split(key, 3)
        bound = 1.0 / jnp.sqrt(jnp.float32(fan_in))
        w = jax.random.uniform(kw, (fan_out, fan_in), jnp.float32, -bound, bound)
        b = jax.random.uniform(kb, (fan_out,), jnp.float32, -bound, bound)
        params.extend([w, b])
    return tuple(params)


def reference_forward(attack_input, infer_input_one_hot, params):
    (w1, b1, w2, b2, w3, b3,
     wl1, bl1, wl2, bl2,
     wc1, bc1, wc2, bc2, wc3, bc3, wc4, bc4) = params
    relu = jax.nn.relu
    h = relu(attack_input @ w1.T + b1)
    h = relu(h @ w2.T + b2)
    feat = relu(h @ w3.T + b3)
    g = relu(infer_input_one_hot @ wl1.T + bl1)
    lab = relu(g @ wl2.T + bl2)
    c = relu(jnp.concatenate([feat, lab], axis=1) @ wc1.T + bc1)
    c = relu(c @ wc2.T + bc2)
    c = relu(c @ wc3.T + bc3)
    return jax.nn.sigmoid(c @ wc4.T + bc4)


if __name__ == "__main__":
    key = jax.random.PRNGKey(0)
    k_params, k_x, k_lbl = jax.random.split(key, 3)

    B, C = 500, NUM_CLASSES          # B not a tile multiple: exercises padding
    params = init_params(k_params, C)

    logits = jax.random.normal(k_x, (B, C), jnp.float32)
    attack_input = jax.nn.softmax(logits, axis=-1)
    labels = jax.random.randint(k_lbl, (B,), 0, C)
    infer_input_one_hot = jax.nn.one_hot(labels, C, dtype=jnp.float32)

    out = inference_attack_forward(attack_input, infer_input_one_hot, params,
                                   tile_b=512)
    out = jax.block_until_ready(out)

    ref = reference_forward(attack_input, infer_input_one_hot, params)
    assert out.shape == (B, 1)
    max_err = float(jnp.max(jnp.abs(out - ref)))
    # bf16 matmul inputs + bf16 bias/ReLU epilogue vs f32 ref -> loose tolerance.
    assert jnp.allclose(out, ref, atol=3e-2, rtol=3e-2), ("max_err", max_err)

    print("KERNEL_OK")
</pallas_src>

<mosaic_0001>
module attributes {stable_mosaic.version = 11 : i64} {
  func.func @_attack_kernel(%arg0: i32, %arg1: memref<16x512xbf16, #tpu.memory_space<vmem>>, %arg2: memref<16x512xbf16, #tpu.memory_space<vmem>>, %arg3: memref<1024x16xbf16, #tpu.memory_space<vmem>>, %arg4: memref<512x1024xbf16, #tpu.memory_space<vmem>>, %arg5: memref<512x1xbf16, #tpu.memory_space<vmem>>, %arg6: memref<128x16xbf16, #tpu.memory_space<vmem>>, %arg7: memref<128x512xbf16, #tpu.memory_space<vmem>>, %arg8: memref<128x128xbf16, #tpu.memory_space<vmem>>, %arg9: memref<128x1xbf16, #tpu.memory_space<vmem>>, %arg10: memref<256x128xbf16, #tpu.memory_space<vmem>>, %arg11: memref<256x1xbf16, #tpu.memory_space<vmem>>, %arg12: memref<128x256xbf16, #tpu.memory_space<vmem>>, %arg13: memref<128x1xbf16, #tpu.memory_space<vmem>>, %arg14: memref<64x128xbf16, #tpu.memory_space<vmem>>, %arg15: memref<64x1xbf16, #tpu.memory_space<vmem>>, %arg16: memref<64x1xf32, #tpu.memory_space<vmem>>, %arg17: memref<1x1xf32, #tpu.memory_space<vmem>>, %arg18: memref<8x512xf32, #tpu.memory_space<vmem>>) attributes {dimension_semantics = [#tpu.dimension_semantics<parallel>], iteration_bounds = array<i64: 1>, scalar_prefetch = 0 : i64, scratch_operands = 0 : i64, tpu.core_type = #tpu.core_type<tc>, window_params = [{transform_indices = @transform_0, window_bounds = array<i64: 16, 512>}, {transform_indices = @transform_1, window_bounds = array<i64: 16, 512>}, {pipeline_mode = #tpu.pipeline_mode<synchronous>, transform_indices = @transform_2, window_bounds = array<i64: 1024, 16>}, {pipeline_mode = #tpu.pipeline_mode<synchronous>, transform_indices = @transform_3, window_bounds = array<i64: 512, 1024>}, {pipeline_mode = #tpu.pipeline_mode<synchronous>, transform_indices = @transform_4, window_bounds = array<i64: 512, 1>}, {pipeline_mode = #tpu.pipeline_mode<synchronous>, transform_indices = @transform_5, window_bounds = array<i64: 128, 16>}, {pipeline_mode = #tpu.pipeline_mode<synchronous>, transform_indices = @transform_6, window_bounds = array<i64: 128, 512>}, {pipeline_mode = #tpu.pipeline_mode<synchronous>, transform_indices = @transform_7, window_bounds = array<i64: 128, 128>}, {pipeline_mode = #tpu.pipeline_mode<synchronous>, transform_indices = @transform_8, window_bounds = array<i64: 128, 1>}, {pipeline_mode = #tpu.pipeline_mode<synchronous>, transform_indices = @transform_9, window_bounds = array<i64: 256, 128>}, {pipeline_mode = #tpu.pipeline_mode<synchronous>, transform_indices = @transform_10, window_bounds = array<i64: 256, 1>}, {pipeline_mode = #tpu.pipeline_mode<synchronous>, transform_indices = @transform_11, window_bounds = array<i64: 128, 256>}, {pipeline_mode = #tpu.pipeline_mode<synchronous>, transform_indices = @transform_12, window_bounds = array<i64: 128, 1>}, {pipeline_mode = #tpu.pipeline_mode<synchronous>, transform_indices = @transform_13, window_bounds = array<i64: 64, 128>}, {pipeline_mode = #tpu.pipeline_mode<synchronous>, transform_indices = @transform_14, window_bounds = array<i64: 64, 1>}, {pipeline_mode = #tpu.pipeline_mode<synchronous>, transform_indices = @transform_15, window_bounds = array<i64: 64, 1>}, {pipeline_mode = #tpu.pipeline_mode<synchronous>, transform_indices = @transform_16, window_bounds = array<i64: 1, 1>}, {transform_indices = @transform_17, window_bounds = array<i64: 8, 512>}]} {
    %c0 = arith.constant 0 : index
    %c0_0 = arith.constant 0 : index
    %0 = vector.load %arg1[%c0, %c0_0] : memref<16x512xbf16, #tpu.memory_space<vmem>>, vector<16x512xbf16>
    %c0_1 = arith.constant 0 : index
    %c0_2 = arith.constant 0 : index
    %1 = vector.load %arg3[%c0_1, %c0_2] : memref<1024x16xbf16, #tpu.memory_space<vmem>>, vector<1024x16xbf16>
    %cst = arith.constant dense<0.000000e+00> : vector<1024x512xf32>
    %2 = tpu.matmul %1, %0, %cst {dimension_numbers = #tpu.dot_dimension_numbers<[1], [0], [0], [1], [0, 0, 1, 1], [], []>} : vector<1024x16xbf16>, vector<16x512xbf16>, vector<1024x512xf32> -> vector<1024x512xf32>
    %3 = arith.truncf %2 : vector<1024x512xf32> to vector<1024x512xbf16>
    %cst_3 = arith.constant 0.000000e+00 : bf16
    %4 = vector.broadcast %cst_3 : bf16 to vector<1024x512xbf16>
    %5 = arith.maximumf %3, %4 : vector<1024x512xbf16>
    %c0_4 = arith.constant 0 : index
    %c0_5 = arith.constant 0 : index
    %6 = vector.load %arg4[%c0_4, %c0_5] : memref<512x1024xbf16, #tpu.memory_space<vmem>>, vector<512x1024xbf16>
    %cst_6 = arith.constant dense<0.000000e+00> : vector<512x512xf32>
    %7 = tpu.matmul %6, %5, %cst_6 {dimension_numbers = #tpu.dot_dimension_numbers<[1], [0], [0], [1], [0, 0, 1, 1], [], []>} : vector<512x1024xbf16>, vector<1024x512xbf16>, vector<512x512xf32> -> vector<512x512xf32>
    %8 = arith.truncf %7 : vector<512x512xf32> to vector<512x512xbf16>
    %c0_7 = arith.constant 0 : index
    %c0_8 = arith.constant 0 : index
    %9 = vector.load %arg5[%c0_7, %c0_8] : memref<512x1xbf16, #tpu.memory_space<vmem>>, vector<512x1xbf16>
    %10 = vector.broadcast %9 : vector<512x1xbf16> to vector<512x512xbf16>
    %11 = arith.addf %8, %10 : vector<512x512xbf16>
    %cst_9 = arith.constant 0.000000e+00 : bf16
    %12 = vector.broadcast %cst_9 : bf16 to vector<512x512xbf16>
    %13 = arith.maximumf %11, %12 : vector<512x512xbf16>
    %c0_10 = arith.constant 0 : index
    %c0_11 = arith.constant 0 : index
    %14 = vector.load %arg6[%c0_10, %c0_11] : memref<128x16xbf16, #tpu.memory_space<vmem>>, vector<128x16xbf16>
    %c0_12 = arith.constant 0 : index
    %c0_13 = arith.constant 0 : index
    %15 = vector.load %arg2[%c0_12, %c0_13] : memref<16x512xbf16, #tpu.memory_space<vmem>>, vector<16x512xbf16>
    %cst_14 = arith.constant dense<0.000000e+00> : vector<128x512xf32>
    %16 = tpu.matmul %14, %15, %cst_14 {dimension_numbers = #tpu.dot_dimension_numbers<[1], [0], [0], [1], [0, 0, 1, 1], [], []>} : vector<128x16xbf16>, vector<16x512xbf16>, vector<128x512xf32> -> vector<128x512xf32>
    %17 = arith.truncf %16 : vector<128x512xf32> to vector<128x512xbf16>
    %cst_15 = arith.constant 0.000000e+00 : bf16
    %18 = vector.broadcast %cst_15 : bf16 to vector<128x512xbf16>
    %19 = arith.maximumf %17, %18 : vector<128x512xbf16>
    %c0_16 = arith.constant 0 : index
    %c0_17 = arith.constant 0 : index
    %20 = vector.load %arg7[%c0_16, %c0_17] : memref<128x512xbf16, #tpu.memory_space<vmem>>, vector<128x512xbf16>
    %cst_18 = arith.constant dense<0.000000e+00> : vector<128x512xf32>
    %21 = tpu.matmul %20, %13, %cst_18 {dimension_numbers = #tpu.dot_dimension_numbers<[1], [0], [0], [1], [0, 0, 1, 1], [], []>} : vector<128x512xbf16>, vector<512x512xbf16>, vector<128x512xf32> -> vector<128x512xf32>
    %c0_19 = arith.constant 0 : index
    %c0_20 = arith.constant 0 : index
    %22 = vector.load %arg8[%c0_19, %c0_20] : memref<128x128xbf16, #tpu.memory_space<vmem>>, vector<128x128xbf16>
    %cst_21 = arith.constant dense<0.000000e+00> : vector<128x512xf32>
    %23 = tpu.matmul %22, %19, %cst_21 {dimension_numbers = #tpu.dot_dimension_numbers<[1], [0], [0], [1], [0, 0, 1, 1], [], []>} : vector<128x128xbf16>, vector<128x512xbf16>, vector<128x512xf32> -> vector<128x512xf32>
    %24 = arith.addf %21, %23 : vector<128x512xf32>
    %25 = arith.truncf %24 : vector<128x512xf32> to vector<128x512xbf16>
    %c0_22 = arith.constant 0 : index
    %c0_23 = arith.constant 0 : index
    %26 = vector.load %arg9[%c0_22, %c0_23] : memref<128x1xbf16, #tpu.memory_space<vmem>>, vector<128x1xbf16>
    %27 = vector.broadcast %26 : vector<128x1xbf16> to vector<128x512xbf16>
    %28 = arith.addf %25, %27 : vector<128x512xbf16>
    %cst_24 = arith.constant 0.000000e+00 : bf16
    %29 = vector.broadcast %cst_24 : bf16 to vector<128x512xbf16>
    %30 = arith.maximumf %28, %29 : vector<128x512xbf16>
    %c0_25 = arith.constant 0 : index
    %c0_26 = arith.constant 0 : index
    %31 = vector.load %arg10[%c0_25, %c0_26] : memref<256x128xbf16, #tpu.memory_space<vmem>>, vector<256x128xbf16>
    %cst_27 = arith.constant dense<0.000000e+00> : vector<256x512xf32>
    %32 = tpu.matmul %31, %30, %cst_27 {dimension_numbers = #tpu.dot_dimension_numbers<[1], [0], [0], [1], [0, 0, 1, 1], [], []>} : vector<256x128xbf16>, vector<128x512xbf16>, vector<256x512xf32> -> vector<256x512xf32>
    %33 = arith.truncf %32 : vector<256x512xf32> to vector<256x512xbf16>
    %c0_28 = arith.constant 0 : index
    %c0_29 = arith.constant 0 : index
    %34 = vector.load %arg11[%c0_28, %c0_29] : memref<256x1xbf16, #tpu.memory_space<vmem>>, vector<256x1xbf16>
    %35 = vector.broadcast %34 : vector<256x1xbf16> to vector<256x512xbf16>
    %36 = arith.addf %33, %35 : vector<256x512xbf16>
    %cst_30 = arith.constant 0.000000e+00 : bf16
    %37 = vector.broadcast %cst_30 : bf16 to vector<256x512xbf16>
    %38 = arith.maximumf %36, %37 : vector<256x512xbf16>
    %c0_31 = arith.constant 0 : index
    %c0_32 = arith.constant 0 : index
    %39 = vector.load %arg12[%c0_31, %c0_32] : memref<128x256xbf16, #tpu.memory_space<vmem>>, vector<128x256xbf16>
    %cst_33 = arith.constant dense<0.000000e+00> : vector<128x512xf32>
    %40 = tpu.matmul %39, %38, %cst_33 {dimension_numbers = #tpu.dot_dimension_numbers<[1], [0], [0], [1], [0, 0, 1, 1], [], []>} : vector<128x256xbf16>, vector<256x512xbf16>, vector<128x512xf32> -> vector<128x512xf32>
    %41 = arith.truncf %40 : vector<128x512xf32> to vector<128x512xbf16>
    %c0_34 = arith.constant 0 : index
    %c0_35 = arith.constant 0 : index
    %42 = vector.load %arg13[%c0_34, %c0_35] : memref<128x1xbf16, #tpu.memory_space<vmem>>, vector<128x1xbf16>
    %43 = vector.broadcast %42 : vector<128x1xbf16> to vector<128x512xbf16>
    %44 = arith.addf %41, %43 : vector<128x512xbf16>
    %cst_36 = arith.constant 0.000000e+00 : bf16
    %45 = vector.broadcast %cst_36 : bf16 to vector<128x512xbf16>
    %46 = arith.maximumf %44, %45 : vector<128x512xbf16>
    %c0_37 = arith.constant 0 : index
    %c0_38 = arith.constant 0 : index
    %47 = vector.load %arg14[%c0_37, %c0_38] : memref<64x128xbf16, #tpu.memory_space<vmem>>, vector<64x128xbf16>
    %cst_39 = arith.constant dense<0.000000e+00> : vector<64x512xf32>
    %48 = tpu.matmul %47, %46, %cst_39 {dimension_numbers = #tpu.dot_dimension_numbers<[1], [0], [0], [1], [0, 0, 1, 1], [], []>} : vector<64x128xbf16>, vector<128x512xbf16>, vector<64x512xf32> -> vector<64x512xf32>
    %49 = arith.truncf %48 : vector<64x512xf32> to vector<64x512xbf16>
    %c0_40 = arith.constant 0 : index
    %c0_41 = arith.constant 0 : index
    %50 = vector.load %arg15[%c0_40, %c0_41] : memref<64x1xbf16, #tpu.memory_space<vmem>>, vector<64x1xbf16>
    %51 = vector.broadcast %50 : vector<64x1xbf16> to vector<64x512xbf16>
    %52 = arith.addf %49, %51 : vector<64x512xbf16>
    %cst_42 = arith.constant 0.000000e+00 : bf16
    %53 = vector.broadcast %cst_42 : bf16 to vector<64x512xbf16>
    %54 = arith.maximumf %52, %53 : vector<64x512xbf16>
    %55 = arith.extf %54 : vector<64x512xbf16> to vector<64x512xf32>
    %c0_43 = arith.constant 0 : index
    %c0_44 = arith.constant 0 : index
    %56 = vector.load %arg16[%c0_43, %c0_44] : memref<64x1xf32, #tpu.memory_space<vmem>>, vector<64x1xf32>
    %57 = vector.broadcast %56 : vector<64x1xf32> to vector<64x512xf32>
    %58 = arith.mulf %55, %57 : vector<64x512xf32>
    %cst_45 = arith.constant dense<0.000000e+00> : vector<512xf32>
    %59 = vector.multi_reduction <add>, %58, %cst_45 [0] : vector<64x512xf32> to vector<512xf32>
    %60 = vector.shape_cast %59 : vector<512xf32> to vector<1x512xf32>
    %c0_46 = arith.constant 0 : index
    %c0_47 = arith.constant 0 : index
    %61 = vector.load %arg17[%c0_46, %c0_47] : memref<1x1xf32, #tpu.memory_space<vmem>>, vector<1x1xf32>
    %62 = vector.broadcast %61 : vector<1x1xf32> to vector<1x512xf32>
    %63 = arith.addf %60, %62 : vector<1x512xf32>
    %64 = arith.negf %63 : vector<1x512xf32>
    %65 = math.exp %64 : vector<1x512xf32>
    %cst_48 = arith.constant 1.000000e+00 : f32
    %66 = vector.broadcast %cst_48 : f32 to vector<1x512xf32>
    %67 = arith.addf %66, %65 : vector<1x512xf32>
    %68 = arith.divf %66, %67 : vector<1x512xf32>
    %69 = vector.shape_cast %68 : vector<1x512xf32> to vector<1x512xf32>
    %70 = vector.broadcast %69 : vector<1x512xf32> to vector<8x512xf32>
    %c0_49 = arith.constant 0 : index
    %c0_50 = arith.constant 0 : index
    %71 = vector.load %arg18[%c0_49, %c0_50] : memref<8x512xf32, #tpu.memory_space<vmem>>, vector<8x512xf32>
    tpu.vector_store %arg18[%c0_49, %c0_50], %70 {strides = array<i32>} : memref<8x512xf32, #tpu.memory_space<vmem>>, vector<8x512xf32>,
    return
  }
  func.func @transform_0(%arg0: i32) -> (i32, i32) {
    %c0_i32 = arith.constant 0 : i32
    %c0_i32_0 = arith.constant 0 : i32
    return %c0_i32, %arg0 : i32, i32
  }
  func.func @transform_1(%arg0: i32) -> (i32, i32) {
    %c0_i32 = arith.constant 0 : i32
    %c0_i32_0 = arith.constant 0 : i32
    return %c0_i32, %arg0 : i32, i32
  }
  func.func @transform_2(%arg0: i32) -> (i32, i32) {
    %c0_i32 = arith.constant 0 : i32
    %c0_i32_0 = arith.constant 0 : i32
    %c0_i32_1 = arith.constant 0 : i32
    return %c0_i32, %c0_i32_0 : i32, i32
  }
  func.func @transform_3(%arg0: i32) -> (i32, i32) {
    %c0_i32 = arith.constant 0 : i32
    %c0_i32_0 = arith.constant 0 : i32
    %c0_i32_1 = arith.constant 0 : i32
    return %c0_i32, %c0_i32_0 : i32, i32
  }
  func.func @transform_4(%arg0: i32) -> (i32, i32) {
    %c0_i32 = arith.constant 0 : i32
    %c0_i32_0 = arith.constant 0 : i32
    %c0_i32_1 = arith.constant 0 : i32
    return %c0_i32, %c0_i32_0 : i32, i32
  }
  func.func @transform_5(%arg0: i32) -> (i32, i32) {
    %c0_i32 = arith.constant 0 : i32
    %c0_i32_0 = arith.constant 0 : i32
    %c0_i32_1 = arith.constant 0 : i32
    return %c0_i32, %c0_i32_0 : i32, i32
  }
  func.func @transform_6(%arg0: i32) -> (i32, i32) {
    %c0_i32 = arith.constant 0 : i32
    %c0_i32_0 = arith.constant 0 : i32
    %c0_i32_1 = arith.constant 0 : i32
    return %c0_i32, %c0_i32_0 : i32, i32
  }
  func.func @transform_7(%arg0: i32) -> (i32, i32) {
    %c0_i32 = arith.constant 0 : i32
    %c0_i32_0 = arith.constant 0 : i32
    %c0_i32_1 = arith.constant 0 : i32
    return %c0_i32, %c0_i32_0 : i32, i32
  }
  func.func @transform_8(%arg0: i32) -> (i32, i32) {
    %c0_i32 = arith.constant 0 : i32
    %c0_i32_0 = arith.constant 0 : i32
    %c0_i32_1 = arith.constant 0 : i32
    return %c0_i32, %c0_i32_0 : i32, i32
  }
  func.func @transform_9(%arg0: i32) -> (i32, i32) {
    %c0_i32 = arith.constant 0 : i32
    %c0_i32_0 = arith.constant 0 : i32
    %c0_i32_1 = arith.constant 0 : i32
    return %c0_i32, %c0_i32_0 : i32, i32
  }
  func.func @transform_10(%arg0: i32) -> (i32, i32) {
    %c0_i32 = arith.constant 0 : i32
    %c0_i32_0 = arith.constant 0 : i32
    %c0_i32_1 = arith.constant 0 : i32
    return %c0_i32, %c0_i32_0 : i32, i32
  }
  func.func @transform_11(%arg0: i32) -> (i32, i32) {
    %c0_i32 = arith.constant 0 : i32
    %c0_i32_0 = arith.constant 0 : i32
    %c0_i32_1 = arith.constant 0 : i32
    return %c0_i32, %c0_i32_0 : i32, i32
  }
  func.func @transform_12(%arg0: i32) -> (i32, i32) {
    %c0_i32 = arith.constant 0 : i32
    %c0_i32_0 = arith.constant 0 : i32
    %c0_i32_1 = arith.constant 0 : i32
    return %c0_i32, %c0_i32_0 : i32, i32
  }
  func.func @transform_13(%arg0: i32) -> (i32, i32) {
    %c0_i32 = arith.constant 0 : i32
    %c0_i32_0 = arith.constant 0 : i32
    %c0_i32_1 = arith.constant 0 : i32
    return %c0_i32, %c0_i32_0 : i32, i32
  }
  func.func @transform_14(%arg0: i32) -> (i32, i32) {
    %c0_i32 = arith.constant 0 : i32
    %c0_i32_0 = arith.constant 0 : i32
    %c0_i32_1 = arith.constant 0 : i32
    return %c0_i32, %c0_i32_0 : i32, i32
  }
  func.func @transform_15(%arg0: i32) -> (i32, i32) {
    %c0_i32 = arith.constant 0 : i32
    %c0_i32_0 = arith.constant 0 : i32
    %c0_i32_1 = arith.constant 0 : i32
    return %c0_i32, %c0_i32_0 : i32, i32
  }
  func.func @transform_16(%arg0: i32) -> (i32, i32) {
    %c0_i32 = arith.constant 0 : i32
    %c0_i32_0 = arith.constant 0 : i32
    %c0_i32_1 = arith.constant 0 : i32
    return %c0_i32, %c0_i32_0 : i32, i32
  }
  func.func @transform_17(%arg0: i32) -> (i32, i32) {
    %c0_i32 = arith.constant 0 : i32
    %c0_i32_0 = arith.constant 0 : i32
    return %c0_i32, %arg0 : i32, i32
  }
}

</mosaic_0001>

<bundles_post_ra>
// kernel: inference_attack_forward.1
= control target key start
LH: loop header
LB: loop body
LE: loop exit
PB: predicated region body
PF: predicated region fallthrough
CT: control target
= control target key end

     0   :  { %v20105_v1 = vmov 0   ;;  %vm531_vm0 = vcmask 130048   ;;  %s20085_s0 = inlined_call_operand.vmem [shape: bf16[16,512], index: 0, kind: input, shape index: {}]   ;;  %s20086_s2 = inlined_call_operand.vmem [shape: bf16[1024,16], index: 2, kind: input, shape index: {}]   ;;  %s20087_s3 = inlined_call_operand.vmem [shape: bf16[512,1024], index: 3, kind: input, shape index: {}]   ;;  %s20088_s4 = inlined_call_operand.vmem [shape: bf16[512,1], index: 4, kind: input, shape index: {}]   ;;  %s20089_s1 = inlined_call_operand.vmem [shape: bf16[16,512], index: 1, kind: input, shape index: {}]   ;;  %s20090_s8 = inlined_call_operand.vmem [shape: bf16[128,1], index: 8, kind: input, shape index: {}]   ;;  %s20091_s5 = inlined_call_operand.vmem [shape: bf16[128,16], index: 5, kind: input, shape index: {}]   ;;  %s20092_s10 = inlined_call_operand.vmem [shape: bf16[256,1], index: 10, kind: input, shape index: {}]   ;;  %s20093_s12 = inlined_call_operand.vmem [shape: bf16[128,1], index: 12, kind: input, shape index: {}]   ;;  %s20094_s14 = inlined_call_operand.vmem [shape: bf16[64,1], index: 14, kind: input, shape index: {}]   ;;  %s20095_s15 = inlined_call_operand.vmem [shape: f32[64,1], index: 15, kind: input, shape index: {}]   ;;  %s20096_s16 = inlined_call_operand.<no memory space> [shape: f32[1,1], index: 16, kind: input, shape index: {}]   ;;  %s20097_s7 = inlined_call_operand.vmem [shape: bf16[128,128], index: 7, kind: input, shape index: {}]   ;;  %s20098_s6 = inlined_call_operand.vmem [shape: bf16[128,512], index: 6, kind: input, shape index: {}]   ;;  %s20099_s9 = inlined_call_operand.vmem [shape: bf16[256,128], index: 9, kind: input, shape index: {}]   ;;  %s20100_s11 = inlined_call_operand.vmem [shape: bf16[128,256], index: 11, kind: input, shape index: {}]   ;;  %s20101_s13 = inlined_call_operand.vmem [shape: bf16[64,128], index: 13, kind: input, shape index: {}]   ;;  %s20102_s17 = inlined_call_operand.vmem [shape: f32[8,512], index: 17, kind: output, shape index: {}]  }
   0x1   :  { %20624 = sst [smem:[#allocation264_spill]] %s20085_s0  ;;  %756 = vmatprep.mubr.bf16.mxu0 %v20105_v1  ;;  %1429 = vmatprep.mubr.bf16.mxu1 %v20105_v1 }
   0x2   :  { %20625 = sst [smem:[#allocation265_spill]] %s20086_s2  ;;  %s20626_s26 = sld [smem:[#allocation264_spill]]  ;;  %14012 = vset.pattern.permute.xlu0 %v20105_v1  ;;  %14013 = vset.pattern.permute.xlu1 %v20105_v1 }
   0x3   :  { %s20627_s20 = sld [smem:[#allocation265_spill]] }
   0x8   :  { %v14014_v0 = vld [vmem:[%s20626_s26 + $0x4] ss:$16 sps:$4 sm:$0xff]   ;;  %v14016_v2 = vld [vmem:[%s20626_s26 + $0xc] ss:$16 sps:$4 sm:$0xff]   ;;  %v14018_v3 = vld [vmem:[%s20626_s26] ss:$16 sps:$4 sm:$0xff]  }
   0x9   :  { %724 = vmatprep.subr.bf16.mxu0 %v14014_v0  ;;  %v14019_v4 = vld [vmem:[%s20626_s26 + $0x8] ss:$16 sps:$4 sm:$0xff]   ;;  %1397 = vmatprep.subr.bf16.mxu1 %v14016_v2  ;;  %v14020_v5 = vld [vmem:[%s20627_s20] sm:$0xff]   ;;  %v14022_v7 = vld [vmem:[%s20627_s20 + $0x10] sm:$0xff]  }
   0xa   :  { %725 = vmatpush1.bf16.msra.mxu0 %v14018_v3  ;;  %1398 = vmatpush1.bf16.msra.mxu1 %v14019_v4  ;;  %v14021_v6 = vld [vmem:[%s20627_s20 + $0x8] sm:$0xff]   ;;  %v14023_v8 = vld [vmem:[%s20627_s20 + $0x18] sm:$0xff]   ;;  %v14024_v9 = vld [vmem:[%s20627_s20 + $0x20] sm:$0xff]  }
   0xb   :  { %v14025_v10 = vld [vmem:[%s20627_s20 + $0x28] sm:$0xff]   ;;  %v14026_v11 = vld [vmem:[%s20627_s20 + $0x30] sm:$0xff]   ;;  %v14027_v12 = vld [vmem:[%s20627_s20 + $0x38] sm:$0xff]  }
   0xc   :  { %v14028_v13 = vld [vmem:[%s20627_s20 + $0x40] sm:$0xff]   ;;  %v14029_v14 = vld [vmem:[%s20627_s20 + $0x48] sm:$0xff]   ;;  %v14030_v15 = vld [vmem:[%s20627_s20 + $0x50] sm:$0xff]  }
   0xd   :  { %12554 = vmatmul.mubr.msk.bf16.vlgmr.msra.gmra.mrb[0].mxu0 %vm531_vm0, %v14020_v5  ;;  %12618 = vmatmul.mubr.msk.bf16.vlgmr.msra.gmra.mrb[0].mxu1 %vm531_vm0, %v14020_v5  ;;  %v14031_v16 = vld [vmem:[%s20627_s20 + $0x58] sm:$0xff]   ;;  %v14032_v17 = vld [vmem:[%s20627_s20 + $0x60] sm:$0xff]   ;;  %v14033_v18 = vld [vmem:[%s20627_s20 + $0x68] sm:$0xff]  }
   0xe   :  { %766 = vmatprep.mubr.bf16.mxu0 %v20105_v1  ;;  %1439 = vmatprep.mubr.bf16.mxu1 %v20105_v1  ;;  %v14034_v19 = vld [vmem:[%s20627_s20 + $0x70] sm:$0xff]   ;;  %v14035_v20 = vld [vmem:[%s20627_s20 + $0x78] sm:$0xff]   ;;  %v14036_v21 = vld [vmem:[%s20627_s20 + $0x80] sm:$0xff]  }
   0xf   :  { %v14037_v22 = vld [vmem:[%s20627_s20 + $0x88] sm:$0xff]   ;;  %v14038_v23 = vld [vmem:[%s20627_s20 + $0x90] sm:$0xff]   ;;  %v14039_v24 = vld [vmem:[%s20627_s20 + $0x98] sm:$0xff]  }
  0x10   :  { %v14040_v25 = vld [vmem:[%s20627_s20 + $0xa0] sm:$0xff]   ;;  %v14041_v26 = vld [vmem:[%s20627_s20 + $0xa8] sm:$0xff]   ;;  %v14042_v27 = vld [vmem:[%s20627_s20 + $0xb0] sm:$0xff]  }
  0x11   :  { %v14043_v28 = vld [vmem:[%s20627_s20 + $0xb8] sm:$0xff]   ;;  %v14044_v29 = vld [vmem:[%s20627_s20 + $0xc0] sm:$0xff]   ;;  %v14045_v30 = vld [vmem:[%s20627_s20 + $0xc8] sm:$0xff]  }
  0x12   :  { %v14046_v31 = vld [vmem:[%s20627_s20 + $0xd0] sm:$0xff]   ;;  %v14047_v36 = vld [vmem:[%s20627_s20 + $0xd8] sm:$0xff]   ;;  %v14048_v51 = vld [vmem:[%s20627_s20 + $0xe0] sm:$0xff]  }
  0x13   :  { %v14049_v5 = vld [vmem:[%s20627_s20 + $0xe8] sm:$0xff]  }
  0x15   :  { %12555 = vmatmul.mubr.msk.bf16.gmra.mrb[4].mxu0 %vm531_vm0, %v14021_v6  ;;  %12619 = vmatmul.mubr.msk.bf16.gmra.mrb[4].mxu1 %vm531_vm0, %v14021_v6 }
  0x16   :  { %776 = vmatprep.mubr.bf16.mxu0 %v20105_v1  ;;  %1449 = vmatprep.mubr.bf16.mxu1 %v20105_v1 }
  0x1d   :  { %12556 = vmatmul.mubr.msk.bf16.gmra.mrb[8].mxu0 %vm531_vm0, %v14022_v7  ;;  %12620 = vmatmul.mubr.msk.bf16.gmra.mrb[8].mxu1 %vm531_vm0, %v14022_v7 }
  0x1e   :  { %786 = vmatprep.mubr.bf16.mxu0 %v20105_v1  ;;  %1459 = vmatprep.mubr.bf16.mxu1 %v20105_v1 }
  0x25   :  { %12557 = vmatmul.mubr.msk.bf16.gmra.mrb[12].mxu0 %vm531_vm0, %v14023_v8  ;;  %12621 = vmatmul.mubr.msk.bf16.gmra.mrb[12].mxu1 %vm531_vm0, %v14023_v8 }
  0x26   :  { %796 = vmatprep.mubr.bf16.mxu0 %v20105_v1  ;;  %1469 = vmatprep.mubr.bf16.mxu1 %v20105_v1 }
  0x2d   :  { %12558 = vmatmul.mubr.msk.bf16.gmra.mrb[16].mxu0 %vm531_vm0, %v14024_v9  ;;  %12622 = vmatmul.mubr.msk.bf16.gmra.mrb[16].mxu1 %vm531_vm0, %v14024_v9 }
  0x2e   :  { %806 = vmatprep.mubr.bf16.mxu0 %v20105_v1  ;;  %1479 = vmatprep.mubr.bf16.mxu1 %v20105_v1 }
  0x35   :  { %12559 = vmatmul.mubr.msk.bf16.gmra.mrb[20].mxu0 %vm531_vm0, %v14025_v10  ;;  %12623 = vmatmul.mubr.msk.bf16.gmra.mrb[20].mxu1 %vm531_vm0, %v14025_v10 }
  0x36   :  { %816 = vmatprep.mubr.bf16.mxu0 %v20105_v1  ;;  %1489 = vmatprep.mubr.bf16.mxu1 %v20105_v1 }
  0x3d   :  { %12560 = vmatmul.mubr.msk.bf16.gmra.mrb[24].mxu0 %vm531_vm0, %v14026_v11  ;;  %12624 = vmatmul.mubr.msk.bf16.gmra.mrb[24].mxu1 %vm531_vm0, %v14026_v11 }
  0x3e   :  { %826 = vmatprep.mubr.bf16.mxu0 %v20105_v1  ;;  %1499 = vmatprep.mubr.bf16.mxu1 %v20105_v1 }
  0x45   :  { %12561 = vmatmul.mubr.msk.bf16.gmra.mrb[28].mxu0 %vm531_vm0, %v14027_v12  ;;  %12625 = vmatmul.mubr.msk.bf16.gmra.mrb[28].mxu1 %vm531_vm0, %v14027_v12 }
  0x46   :  { %836 = vmatprep.mubr.bf16.mxu0 %v20105_v1  ;;  %1509 = vmatprep.mubr.bf16.mxu1 %v20105_v1 }
  0x4d   :  { %12562 = vmatmul.mubr.msk.bf16.gmra.mrb[32].mxu0 %vm531_vm0, %v14028_v13  ;;  %12626 = vmatmul.mubr.msk.bf16.gmra.mrb[32].mxu1 %vm531_vm0, %v14028_v13 }
  0x4e   :  { %846 = vmatprep.mubr.bf16.mxu0 %v20105_v1  ;;  %1519 = vmatprep.mubr.bf16.mxu1 %v20105_v1 }
  0x55   :  { %12563 = vmatmul.mubr.msk.bf16.gmra.mrb[36].mxu0 %vm531_vm0, %v14029_v14  ;;  %12627 = vmatmul.mubr.msk.bf16.gmra.mrb[36].mxu1 %vm531_vm0, %v14029_v14 }
  0x56   :  { %856 = vmatprep.mubr.bf16.mxu0 %v20105_v1  ;;  %1529 = vmatprep.mubr.bf16.mxu1 %v20105_v1 }
  0x5d   :  { %12564 = vmatmul.mubr.msk.bf16.gmra.mrb[40].mxu0 %vm531_vm0, %v14030_v15  ;;  %12628 = vmatmul.mubr.msk.bf16.gmra.mrb[40].mxu1 %vm531_vm0, %v14030_v15 }
  0x5e   :  { %866 = vmatprep.mubr.bf16.mxu0 %v20105_v1  ;;  %1539 = vmatprep.mubr.bf16.mxu1 %v20105_v1 }
  0x65   :  { %12565 = vmatmul.mubr.msk.bf16.gmra.mrb[44].mxu0 %vm531_vm0, %v14031_v16  ;;  %12629 = vmatmul.mubr.msk.bf16.gmra.mrb[44].mxu1 %vm531_vm0, %v14031_v16 }
  0x66   :  { %876 = vmatprep.mubr.bf16.mxu0 %v20105_v1  ;;  %1549 = vmatprep.mubr.bf16.mxu1 %v20105_v1 }
  0x6d   :  { %12566 = vmatmul.mubr.msk.bf16.gmra.mrb[48].mxu0 %vm531_vm0, %v14032_v17  ;;  %12630 = vmatmul.mubr.msk.bf16.gmra.mrb[48].mxu1 %vm531_vm0, %v14032_v17 }
  0x6e   :  { %886 = vmatprep.mubr.bf16.mxu0 %v20105_v1  ;;  %1559 = vmatprep.mubr.bf16.mxu1 %v20105_v1 }
  0x75   :  { %12567 = vmatmul.mubr.msk.bf16.gmra.mrb[52].mxu0 %vm531_vm0, %v14033_v18  ;;  %12631 = vmatmul.mubr.msk.bf16.gmra.mrb[52].mxu1 %vm531_vm0, %v14033_v18 }
  0x76   :  { %896 = vmatprep.mubr.bf16.mxu0 %v20105_v1  ;;  %1569 = vmatprep.mubr.bf16.mxu1 %v20105_v1 }
  0x7d   :  { %12568 = vmatmul.mubr.msk.bf16.gmra.mrb[56].mxu0 %vm531_vm0, %v14034_v19  ;;  %12632 = vmatmul.mubr.msk.bf16.gmra.mrb[56].mxu1 %vm531_vm0, %v14034_v19 }
  0x7e   :  { %906 = vmatprep.mubr.bf16.mxu0 %v20105_v1  ;;  %1579 = vmatprep.mubr.bf16.mxu1 %v20105_v1 }
  0x85   :  { %12569 = vmatmul.mubr.msk.bf16.gmra.mrb[60].mxu0 %vm531_vm0, %v14035_v20  ;;  %12633 = vmatmul.mubr.msk.bf16.gmra.mrb[60].mxu1 %vm531_vm0, %v14035_v20 }
  0x86   :  { %916 = vmatprep.mubr.bf16.mxu0 %v20105_v1  ;;  %1589 = vmatprep.mubr.bf16.mxu1 %v20105_v1 }
  0x8d   :  { %12570 = vmatmul.mubr.msk.bf16.gmra.mrb[64].mxu0 %vm531_vm0, %v14036_v21  ;;  %12634 = vmatmul.mubr.msk.bf16.gmra.mrb[64].mxu1 %vm531_vm0, %v14036_v21 }
  0x8e   :  { %926 = vmatprep.mubr.bf16.mxu0 %v20105_v1  ;;  %1599 = vmatprep.mubr.bf16.mxu1 %v20105_v1 }
  0x95   :  { %12571 = vmatmul.mubr.msk.bf16.gmra.mrb[68].mxu0 %vm531_vm0, %v14037_v22  ;;  %12635 = vmatmul.mubr.msk.bf16.gmra.mrb[68].mxu1 %vm531_vm0, %v14037_v22  ;;  %v14050_v22 = vld [vmem:[%s20627_s20 + $0xf0] sm:$0xff]  }
  0x96   :  { %936 = vmatprep.mubr.bf16.mxu0 %v20105_v1  ;;  %1609 = vmatprep.mubr.bf16.mxu1 %v20105_v1 }
  0x9d   :  { %12572 = vmatmul.mubr.msk.bf16.gmra.mrb[72].mxu0 %vm531_vm0, %v14038_v23  ;;  %12636 = vmatmul.mubr.msk.bf16.gmra.mrb[72].mxu1 %vm531_vm0, %v14038_v23 }
  0x9e   :  { %946 = vmatprep.mubr.bf16.mxu0 %v20105_v1  ;;  %1619 = vmatprep.mubr.bf16.mxu1 %v20105_v1 }
  0xa5   :  { %12573 = vmatmul.mubr.msk.bf16.gmra.mrb[76].mxu0 %vm531_vm0, %v14039_v24  ;;  %12637 = vmatmul.mubr.msk.bf16.gmra.mrb[76].mxu1 %vm531_vm0, %v14039_v24 }
  0xa6   :  { %956 = vmatprep.mubr.bf16.mxu0 %v20105_v1  ;;  %1629 = vmatprep.mubr.bf16.mxu1 %v20105_v1 }
  0xad   :  { %12574 = vmatmul.mubr.msk.bf16.gmra.mrb[80].mxu0 %vm531_vm0, %v14040_v25  ;;  %12638 = vmatmul.mubr.msk.bf16.gmra.mrb[80].mxu1 %vm531_vm0, %v14040_v25 }
  0xae   :  { %966 = vmatprep.mubr.bf16.mxu0 %v20105_v1  ;;  %1639 = vmatprep.mubr.bf16.mxu1 %v20105_v1 }
  0xb5   :  { %12575 = vmatmul.mubr.msk.bf16.gmra.mrb[84].mxu0 %vm531_vm0, %v14041_v26  ;;  %12639 = vmatmul.mubr.msk.bf16.gmra.mrb[84].mxu1 %vm531_vm0, %v14041_v26 }
  0xb6   :  { %976 = vmatprep.mubr.bf16.mxu0 %v20105_v1  ;;  %1649 = vmatprep.mubr.bf16.mxu1 %v20105_v1 }
  0xbd   :  { %12576 = vmatmul.mubr.msk.bf16.gmra.mrb[88].mxu0 %vm531_vm0, %v14042_v27  ;;  %12640 = vmatmul.mubr.msk.bf16.gmra.mrb[88].mxu1 %vm531_vm0, %v14042_v27 }
  0xbe   :  { %986 = vmatprep.mubr.bf16.mxu0 %v20105_v1  ;;  %1659 = vmatprep.mubr.bf16.mxu1 %v20105_v1 }
  0xc5   :  { %12577 = vmatmul.mubr.msk.bf16.gmra.mrb[92].mxu0 %vm531_vm0, %v14043_v28  ;;  %12641 = vmatmul.mubr.msk.bf16.gmra.mrb[92].mxu1 %vm531_vm0, %v14043_v28 }
  0xc6   :  { %996 = vmatprep.mubr.bf16.mxu0 %v20105_v1  ;;  %1669 = vmatprep.mubr.bf16.mxu1 %v20105_v1 }
  0xcd   :  { %12578 = vmatmul.mubr.msk.bf16.gmra.mrb[96].mxu0 %vm531_vm0, %v14044_v29  ;;  %12642 = vmatmul.mubr.msk.bf16.gmra.mrb[96].mxu1 %vm531_vm0, %v14044_v29 }
  0xce   :  { %1006 = vmatprep.mubr.bf16.mxu0 %v20105_v1  ;;  %1679 = vmatprep.mubr.bf16.mxu1 %v20105_v1 }
  0xd5   :  { %12579 = vmatmul.mubr.msk.bf16.gmra.mrb[100].mxu0 %vm531_vm0, %v14045_v30  ;;  %12643 = vmatmul.mubr.msk.bf16.gmra.mrb[100].mxu1 %vm531_vm0, %v14045_v30 }
  0xd6   :  { %1016 = vmatprep.mubr.bf16.mxu0 %v20105_v1  ;;  %1689 = vmatprep.mubr.bf16.mxu1 %v20105_v1 }
  0xdd   :  { %12580 = vmatmul.mubr.msk.bf16.gmra.mrb[104].mxu0 %vm531_vm0, %v14046_v31  ;;  %12644 = vmatmul.mubr.msk.bf16.gmra.mrb[104].mxu1 %vm531_vm0, %v14046_v31 }
  0xde   :  { %1026 = vmatprep.mubr.bf16.mxu0 %v20105_v1  ;;  %1699 = vmatprep.mubr.bf16.mxu1 %v20105_v1 }
  0xe0   :  { %v758_v32 = vpop.f32.mrb[0].mxu0  ;;  %v1431_v33 = vpop.f32.mrb[0].mxu1 }
  0xe1   :  { %v760_v34 = vpop.f32.mrb[1].mxu0  ;;  %v1433_v35 = vpop.f32.mrb[1].mxu1 }
  0xe2   :  { %v762_v37 = vpop.f32.mrb[2].mxu0  ;;  %v1435_v38 = vpop.f32.mrb[2].mxu1 }
  0xe3   :  { %v764_v39 = vpop.f32.mrb[3].mxu0  ;;  %v1437_v40 = vpop.f32.mrb[3].mxu1  ;;  %v2070_v41 = vpack.c.bf16 %v762_v37, %v758_v32  ;;  %v2072_v42 = vpack.c.bf16 %v1435_v38, %v1431_v33 }
  0xe4   :  { %v2071_v43 = vpack.c.bf16 %v764_v39, %v760_v34  ;;  %v2073_v44 = vpack.c.bf16 %v1437_v40, %v1433_v35  ;;  %v14051_v39 = vld [vmem:[%s20627_s20 + $0xf8] sm:$0xff]  }
  0xe5   :  { %12581 = vmatmul.mubr.msk.bf16.gmra.mrb[108].mxu0 %vm531_vm0, %v14047_v36  ;;  %12645 = vmatmul.mubr.msk.bf16.gmra.mrb[108].mxu1 %vm531_vm0, %v14047_v36  ;;  %v2326_v47 = vmax.bf16 %v20105_v1, %v2070_v41  ;;  %v2328_v48 = vmax.bf16 %v20105_v1, %v2072_v42 }
  0xe6   :  { %v2327_v45 = vmax.bf16 %v20105_v1, %v2071_v43  ;;  %v2329_v46 = vmax.bf16 %v20105_v1, %v2073_v44  ;;  %1036 = vmatprep.mubr.bf16.mxu0 %v20105_v1  ;;  %1709 = vmatprep.mubr.bf16.mxu1 %v20105_v1 }
  0xe8   :  { %4118 = vmatprep.subr.bf16.mxu0 %v2327_v45  ;;  %5530 = vmatprep.subr.bf16.mxu1 %v2329_v46  ;;  %v768_v49 = vpop.f32.mrb[4].mxu0  ;;  %v1441_v50 = vpop.f32.mrb[4].mxu1 }
  0xe9   :  { %4119 = vmatpush1.bf16.msra.mxu0 %v2326_v47  ;;  %5531 = vmatpush1.bf16.msra.mxu1 %v2328_v48  ;;  %v770_v52 = vpop.f32.mrb[5].mxu0  ;;  %v1443_v53 = vpop.f32.mrb[5].mxu1 }
  0xea   :  { %v772_v54 = vpop.f32.mrb[6].mxu0  ;;  %v1445_v55 = vpop.f32.mrb[6].mxu1 }
  0xeb   :  { %v774_v56 = vpop.f32.mrb[7].mxu0  ;;  %v1447_v57 = vpop.f32.mrb[7].mxu1  ;;  %v2074_v58 = vpack.c.bf16 %v772_v54, %v768_v49  ;;  %v2076_v59 = vpack.c.bf16 %v1445_v55, %v1441_v50 }
  0xec   :  { %v2075_v60 = vpack.c.bf16 %v774_v56, %v770_v52  ;;  %v2077_v61 = vpack.c.bf16 %v1447_v57, %v1443_v53  ;;  %v14052_v56 = vld [vmem:[%s20627_s20 + $0x100] sm:$0xff]  }
  0xed   :  { %12582 = vmatmul.mubr.msk.bf16.gmra.mrb[112].mxu0 %vm531_vm0, %v14048_v51  ;;  %12646 = vmatmul.mubr.msk.bf16.gmra.mrb[112].mxu1 %vm531_vm0, %v14048_v51  ;;  %v2330_v0 = vmax.bf16 %v20105_v1, %v2074_v58  ;;  %v2332_v2 = vmax.bf16 %v20105_v1, %v2076_v59 }
  0xee   :  { %1046 = vmatprep.mubr.bf16.mxu0 %v20105_v1  ;;  %1719 = vmatprep.mubr.bf16.mxu1 %v20105_v1  ;;  %v2331_v62 = vmax.bf16 %v20105_v1, %v2075_v60  ;;  %v2333_v63 = vmax.bf16 %v20105_v1, %v2077_v61 }
  0xf0   :  { %4120 = vmatprep.subr.bf16.mxu0 %v2331_v62  ;;  %5532 = vmatprep.subr.bf16.mxu1 %v2333_v63  ;;  %v778_v3 = vpop.f32.mrb[8].mxu0  ;;  %v1451_v4 = vpop.f32.mrb[8].mxu1 }
  0xf1   :  { %4121 = vmatpush1.bf16.msra.mxu0 %v2330_v0  ;;  %5533 = vmatpush1.bf16.msra.mxu1 %v2332_v2  ;;  %v780_v6 = vpop.f32.mrb[9].mxu0  ;;  %v1453_v7 = vpop.f32.mrb[9].mxu1 }
  0xf2   :  { %v782_v8 = vpop.f32.mrb[10].mxu0  ;;  %v1455_v9 = vpop.f32.mrb[10].mxu1 }
  0xf3   :  { %v784_v10 = vpop.f32.mrb[11].mxu0  ;;  %v1457_v11 = vpop.f32.mrb[11].mxu1  ;;  %v2078_v12 = vpack.c.bf16 %v782_v8, %v778_v3  ;;  %v2080_v13 = vpack.c.bf16 %v1455_v9, %v1451_v4 }
  0xf4   :  { %v2079_v14 = vpack.c.bf16 %v784_v10, %v780_v6  ;;  %v2081_v15 = vpack.c.bf16 %v1457_v11, %v1453_v7  ;;  %v14053_v10 = vld [vmem:[%s20627_s20 + $0x108] sm:$0xff]  }
  0xf5   :  { %12583 = vmatmul.mubr.msk.bf16.gmra.mrb[116].mxu0 %vm531_vm0, %v14049_v5  ;;  %12647 = vmatmul.mubr.msk.bf16.gmra.mrb[116].mxu1 %vm531_vm0, %v14049_v5  ;;  %v2334_v18 = vmax.bf16 %v20105_v1, %v2078_v12  ;;  %v2336_v19 = vmax.bf16 %v20105_v1, %v2080_v13 }
  0xf6   :  { %1056 = vmatprep.mubr.bf16.mxu0 %v20105_v1  ;;  %1729 = vmatprep.mubr.bf16.mxu1 %v20105_v1  ;;  %v2335_v16 = vmax.bf16 %v20105_v1, %v2079_v14  ;;  %v2337_v17 = vmax.bf16 %v20105_v1, %v2081_v15 }
  0xf8   :  { %4122 = vmatprep.subr.bf16.mxu0 %v2335_v16  ;;  %5534 = vmatprep.subr.bf16.mxu1 %v2337_v17  ;;  %v788_v20 = vpop.f32.mrb[12].mxu0  ;;  %v1461_v21 = vpop.f32.mrb[12].mxu1 }
  0xf9   :  { %4123 = vmatpush1.bf16.msra.mxu0 %v2334_v18  ;;  %5535 = vmatpush1.bf16.msra.mxu1 %v2336_v19  ;;  %v790_v23 = vpop.f32.mrb[13].mxu0  ;;  %v1463_v24 = vpop.f32.mrb[13].mxu1 }
  0xfa   :  { %v792_v25 = vpop.f32.mrb[14].mxu0  ;;  %v1465_v26 = vpop.f32.mrb[14].mxu1 }
  0xfb   :  { %v794_v27 = vpop.f32.mrb[15].mxu0  ;;  %v1467_v28 = vpop.f32.mrb[15].mxu1  ;;  %v2082_v29 = vpack.c.bf16 %v792_v25, %v788_v20  ;;  %v2084_v30 = vpack.c.bf16 %v1465_v26, %v1461_v21 }
  0xfc   :  { %v2083_v31 = vpack.c.bf16 %v794_v27, %v790_v23  ;;  %v2085_v32 = vpack.c.bf16 %v1467_v28, %v1463_v24  ;;  %v14054_v27 = vld [vmem:[%s20627_s20 + $0x110] sm:$0xff]  }
  0xfd   :  { %12584 = vmatmul.mubr.msk.bf16.gmra.mrb[120].mxu0 %vm531_vm0, %v14050_v22  ;;  %12648 = vmatmul.mubr.msk.bf16.gmra.mrb[120].mxu1 %vm531_vm0, %v14050_v22  ;;  %v2338_v35 = vmax.bf16 %v20105_v1, %v2082_v29  ;;  %v2340_v36 = vmax.bf16 %v20105_v1, %v2084_v30 }
  0xfe   :  { %1066 = vmatprep.mubr.bf16.mxu0 %v20105_v1  ;;  %1739 = vmatprep.mubr.bf16.mxu1 %v20105_v1  ;;  %v2339_v33 = vmax.bf16 %v20105_v1, %v2083_v31  ;;  %v2341_v34 = vmax.bf16 %v20105_v1, %v2085_v32 }
 0x100   :  { %4124 = vmatprep.subr.bf16.mxu0 %v2339_v33  ;;  %5536 = vmatprep.subr.bf16.mxu1 %v2341_v34  ;;  %v798_v37 = vpop.f32.mrb[16].mxu0  ;;  %v1471_v38 = vpop.f32.mrb[16].mxu1 }
 0x101   :  { %4125 = vmatpush1.bf16.msra.mxu0 %v2338_v35  ;;  %5537 = vmatpush1.bf16.msra.mxu1 %v2340_v36  ;;  %v800_v40 = vpop.f32.mrb[17].mxu0  ;;  %v1473_v41 = vpop.f32.mrb[17].mxu1 }
 0x102   :  { %v802_v42 = vpop.f32.mrb[18].mxu0  ;;  %v1475_v43 = vpop.f32.mrb[18].mxu1 }
 0x103   :  { %v804_v44 = vpop.f32.mrb[19].mxu0  ;;  %v1477_v45 = vpop.f32.mrb[19].mxu1  ;;  %v2086_v46 = vpack.c.bf16 %v802_v42, %v798_v37  ;;  %v2088_v47 = vpack.c.bf16 %v1475_v43, %v1471_v38 }
 0x104   :  { %v2087_v48 = vpack.c.bf16 %v804_v44, %v800_v40  ;;  %v2089_v49 = vpack.c.bf16 %v1477_v45, %v1473_v41  ;;  %v14055_v44 = vld [vmem:[%s20627_s20 + $0x118] sm:$0xff]  }
 0x105   :  { %12585 = vmatmul.mubr.msk.bf16.gmra.mrb[124].mxu0 %vm531_vm0, %v14051_v39  ;;  %12649 = vmatmul.mubr.msk.bf16.gmra.mrb[124].mxu1 %vm531_vm0, %v14051_v39  ;;  %v2342_v52 = vmax.bf16 %v20105_v1, %v2086_v46  ;;  %v2344_v53 = vmax.bf16 %v20105_v1, %v2088_v47 }
 0x106   :  { %1076 = vmatprep.mubr.bf16.mxu0 %v20105_v1  ;;  %1749 = vmatprep.mubr.bf16.mxu1 %v20105_v1  ;;  %v2343_v50 = vmax.bf16 %v20105_v1, %v2087_v48  ;;  %v2345_v51 = vmax.bf16 %v20105_v1, %v2089_v49 }
 0x108   :  { %4126 = vmatprep.subr.bf16.mxu0 %v2343_v50  ;;  %5538 = vmatprep.subr.bf16.mxu1 %v2345_v51  ;;  %v808_v54 = vpop.f32.mrb[20].mxu0  ;;  %v1481_v55 = vpop.f32.mrb[20].mxu1 }
 0x109   :  { %4127 = vmatpush1.bf16.msra.mxu0 %v2342_v52  ;;  %5539 = vmatpush1.bf16.msra.mxu1 %v2344_v53  ;;  %v810_v57 = vpop.f32.mrb[21].mxu0  ;;  %v1483_v58 = vpop.f32.mrb[21].mxu1 }
 0x10a   :  { %v812_v59 = vpop.f32.mrb[22].mxu0  ;;  %v1485_v60 = vpop.f32.mrb[22].mxu1 }
 0x10b   :  { %v814_v61 = vpop.f32.mrb[23].mxu0  ;;  %v1487_v62 = vpop.f32.mrb[23].mxu1  ;;  %v2090_v63 = vpack.c.bf16 %v812_v59, %v808_v54  ;;  %v2092_v0 = vpack.c.bf16 %v1485_v60, %v1481_v55 }
 0x10c   :  { %v2091_v2 = vpack.c.bf16 %v814_v61, %v810_v57  ;;  %v2093_v3 = vpack.c.bf16 %v1487_v62, %v1483_v58  ;;  %v14056_v61 = vld [vmem:[%s20627_s20 + $0x120] sm:$0xff]  }
 0x10d   :  { %12586 = vmatmul.mubr.msk.bf16.gmra.mrb[128].mxu0 %vm531_vm0, %v14052_v56  ;;  %12650 = vmatmul.mubr.msk.bf16.gmra.mrb[128].mxu1 %vm531_vm0, %v14052_v56  ;;  %v2346_v6 = vmax.bf16 %v20105_v1, %v2090_v63  ;;  %v2348_v7 = vmax.bf16 %v20105_v1, %v2092_v0 }
 0x10e   :  { %1086 = vmatprep.mubr.bf16.mxu0 %v20105_v1  ;;  %1759 = vmatprep.mubr.bf16.mxu1 %v20105_v1  ;;  %v2347_v4 = vmax.bf16 %v20105_v1, %v2091_v2  ;;  %v2349_v5 = vmax.bf16 %v20105_v1, %v2093_v3 }
 0x110   :  { %4128 = vmatprep.subr.bf16.mxu0 %v2347_v4  ;;  %5540 = vmatprep.subr.bf16.mxu1 %v2349_v5  ;;  %v818_v8 = vpop.f32.mrb[24].mxu0  ;;  %v1491_v9 = vpop.f32.mrb[24].mxu1 }
 0x111   :  { %4129 = vmatpush1.bf16.msra.mxu0 %v2346_v6  ;;  %5541 = vmatpush1.bf16.msra.mxu1 %v2348_v7  ;;  %v820_v11 = vpop.f32.mrb[25].mxu0  ;;  %v1493_v12 = vpop.f32.mrb[25].mxu1 }
 0x112   :  { %v822_v13 = vpop.f32.mrb[26].mxu0  ;;  %v1495_v14 = vpop.f32.mrb[26].mxu1 }
 0x113   :  { %v824_v15 = vpop.f32.mrb[27].mxu0  ;;  %v1497_v16 = vpop.f32.mrb[27].mxu1  ;;  %v2094_v17 = vpack.c.bf16 %v822_v13, %v818_v8  ;;  %v2096_v18 = vpack.c.bf16 %v1495_v14, %v1491_v9 }
 0x114   :  { %v2095_v19 = vpack.c.bf16 %v824_v15, %v820_v11  ;;  %v2097_v20 = vpack.c.bf16 %v1497_v16, %v1493_v12  ;;  %v14057_v15 = vld [vmem:[%s20627_s20 + $0x128] sm:$0xff]  }
 0x115   :  { %12587 = vmatmul.mubr.msk.bf16.gmra.mrb[132].mxu0 %vm531_vm0, %v14053_v10  ;;  %12651 = vmatmul.mubr.msk.bf16.gmra.mrb[132].mxu1 %vm531_vm0, %v14053_v10  ;;  %v2350_v23 = vmax.bf16 %v20105_v1, %v2094_v17  ;;  %v2352_v24 = vmax.bf16 %v20105_v1, %v2096_v18 }
 0x116   :  { %1096 = vmatprep.mubr.bf16.mxu0 %v20105_v1  ;;  %1769 = vmatprep.mubr.bf16.mxu1 %v20105_v1  ;;  %v2351_v21 = vmax.bf16 %v20105_v1, %v2095_v19  ;;  %v2353_v22 = vmax.bf16 %v20105_v1, %v2097_v20 }
 0x118   :  { %4130 = vmatprep.subr.bf16.mxu0 %v2351_v21  ;;  %5542 = vmatprep.subr.bf16.mxu1 %v2353_v22  ;;  %v828_v25 = vpop.f32.mrb[28].mxu0  ;;  %v1501_v26 = vpop.f32.mrb[28].mxu1 }
 0x119   :  { %4131 = vmatpush1.bf16.msra.mxu0 %v2350_v23  ;;  %5543 = vmatpush1.bf16.msra.mxu1 %v2352_v24  ;;  %v830_v28 = vpop.f32.mrb[29].mxu0  ;;  %v1503_v29 = vpop.f32.mrb[29].mxu1 }
 0x11a   :  { %v832_v30 = vpop.f32.mrb[30].mxu0  ;;  %v1505_v31 = vpop.f32.mrb[30].mxu1 }
 0x11b   :  { %v834_v32 = vpop.f32.mrb[31].mxu0  ;;  %v1507_v33 = vpop.f32.mrb[31].mxu1  ;;  %v2098_v34 = vpack.c.bf16 %v832_v30, %v828_v25  ;;  %v2100_v35 = vpack.c.bf16 %v1505_v31, %v1501_v26 }
 0x11c   :  { %v2099_v36 = vpack.c.bf16 %v834_v32, %v830_v28  ;;  %v2101_v37 = vpack.c.bf16 %v1507_v33, %v1503_v29  ;;  %v14058_v32 = vld [vmem:[%s20627_s20 + $0x130] sm:$0xff]  }
 0x11d   :  { %12588 = vmatmul.mubr.msk.bf16.gmra.mrb[136].mxu0 %vm531_vm0, %v14054_v27  ;;  %12652 = vmatmul.mubr.msk.bf16.gmra.mrb[136].mxu1 %vm531_vm0, %v14054_v27  ;;  %v2354_v40 = vmax.bf16 %v20105_v1, %v2098_v34  ;;  %v2356_v41 = vmax.bf16 %v20105_v1, %v2100_v35 }
 0x11e   :  { %1106 = vmatprep.mubr.bf16.mxu0 %v20105_v1  ;;  %1779 = vmatprep.mubr.bf16.mxu1 %v20105_v1  ;;  %v2355_v38 = vmax.bf16 %v20105_v1, %v2099_v36  ;;  %v2357_v39 = vmax.bf16 %v20105_v1, %v2101_v37 }
 0x120   :  { %4132 = vmatprep.subr.bf16.mxu0 %v2355_v38  ;;  %5544 = vmatprep.subr.bf16.mxu1 %v2357_v39  ;;  %v838_v42 = vpop.f32.mrb[32].mxu0  ;;  %v1511_v43 = vpop.f32.mrb[32].mxu1 }
 0x121   :  { %4133 = vmatpush1.bf16.msra.mxu0 %v2354_v40  ;;  %5545 = vmatpush1.bf16.msra.mxu1 %v2356_v41  ;;  %v840_v45 = vpop.f32.mrb[33].mxu0  ;;  %v1513_v46 = vpop.f32.mrb[33].mxu1 }
 0x122   :  { %v842_v47 = vpop.f32.mrb[34].mxu0  ;;  %v1515_v48 = vpop.f32.mrb[34].mxu1 }
 0x123   :  { %v844_v49 = vpop.f32.mrb[35].mxu0  ;;  %v1517_v50 = vpop.f32.mrb[35].mxu1  ;;  %v2102_v51 = vpack.c.bf16 %v842_v47, %v838_v42  ;;  %v2104_v52 = vpack.c.bf16 %v1515_v48, %v1511_v43 }
 0x124   :  { %v2103_v53 = vpack.c.bf16 %v844_v49, %v840_v45  ;;  %v2105_v54 = vpack.c.bf16 %v1517_v50, %v1513_v46  ;;  %v14059_v49 = vld [vmem:[%s20627_s20 + $0x138] sm:$0xff]  }
 0x125   :  { %12589 = vmatmul.mubr.msk.bf16.gmra.mrb[140].mxu0 %vm531_vm0, %v14055_v44  ;;  %12653 = vmatmul.mubr.msk.bf16.gmra.mrb[140].mxu1 %vm531_vm0, %v14055_v44  ;;  %v2358_v57 = vmax.bf16 %v20105_v1, %v2102_v51  ;;  %v2360_v58 = vmax.bf16 %v20105_v1, %v2104_v52 }
 0x126   :  { %1116 = vmatprep.mubr.bf16.mxu0 %v20105_v1  ;;  %1789 = vmatprep.mubr.bf16.mxu1 %v20105_v1  ;;  %v2359_v55 = vmax.bf16 %v20105_v1, %v2103_v53  ;;  %v2361_v56 = vmax.bf16 %v20105_v1, %v2105_v54 }
 0x128   :  { %4134 = vmatprep.subr.bf16.mxu0 %v2359_v55  ;;  %5546 = vmatprep.subr.bf16.mxu1 %v2361_v56  ;;  %v848_v59 = vpop.f32.mrb[36].mxu0  ;;  %v1521_v60 = vpop.f32.mrb[36].mxu1 }
 0x129   :  { %4135 = vmatpush1.bf16.msra.mxu0 %v2358_v57  ;;  %5547 = vmatpush1.bf16.msra.mxu1 %v2360_v58  ;;  %v850_v62 = vpop.f32.mrb[37].mxu0  ;;  %v1523_v63 = vpop.f32.mrb[37].mxu1 }
 0x12a   :  { %v852_v0 = vpop.f32.mrb[38].mxu0  ;;  %v1525_v2 = vpop.f32.mrb[38].mxu1 }
 0x12b   :  { %v854_v3 = vpop.f32.mrb[39].mxu0  ;;  %v1527_v4 = vpop.f32.mrb[39].mxu1  ;;  %v2106_v5 = vpack.c.bf16 %v852_v0, %v848_v59  ;;  %v2108_v6 = vpack.c.bf16 %v1525_v2, %v1521_v60 }
 0x12c   :  { %v2107_v7 = vpack.c.bf16 %v854_v3, %v850_v62  ;;  %v2109_v8 = vpack.c.bf16 %v1527_v4, %v1523_v63  ;;  %v14060_v3 = vld [vmem:[%s20627_s20 + $0x140] sm:$0xff]  }
 0x12d   :  { %12590 = vmatmul.mubr.msk.bf16.gmra.mrb[144].mxu0 %vm531_vm0, %v14056_v61  ;;  %12654 = vmatmul.mubr.msk.bf16.gmra.mrb[144].mxu1 %vm531_vm0, %v14056_v61  ;;  %v2362_v11 = vmax.bf16 %v20105_v1, %v2106_v5  ;;  %v2364_v12 = vmax.bf16 %v20105_v1, %v2108_v6 }
 0x12e   :  { %1126 = vmatprep.mubr.bf16.mxu0 %v20105_v1  ;;  %1799 = vmatprep.mubr.bf16.mxu1 %v20105_v1  ;;  %v2363_v9 = vmax.bf16 %v20105_v1, %v2107_v7  ;;  %v2365_v10 = vmax.bf16 %v20105_v1, %v2109_v8 }
 0x130   :  { %v858_v13 = vpop.f32.mrb[40].mxu0  ;;  %v1531_v14 = vpop.f32.mrb[40].mxu1  ;;  %4136 = vmatprep.subr.bf16.mxu0 %v2363_v9  ;;  %5548 = vmatprep.subr.bf16.mxu1 %v2365_v10 }
 0x131   :  { %v860_v16 = vpop.f32.mrb[41].mxu0  ;;  %v1533_v17 = vpop.f32.mrb[41].mxu1  ;;  %4137 = vmatpush1.bf16.msra.mxu0 %v2362_v11  ;;  %5549 = vmatpush1.bf16.msra.mxu1 %v2364_v12 }
 0x132   :  { %v862_v18 = vpop.f32.mrb[42].mxu0  ;;  %v1535_v19 = vpop.f32.mrb[42].mxu1 }
 0x133   :  { %v864_v20 = vpop.f32.mrb[43].mxu0  ;;  %v1537_v21 = vpop.f32.mrb[43].mxu1  ;;  %v2110_v22 = vpack.c.bf16 %v862_v18, %v858_v13  ;;  %v2112_v23 = vpack.c.bf16 %v1535_v19, %v1531_v14 }
 0x134   :  { %v2111_v24 = vpack.c.bf16 %v864_v20, %v860_v16  ;;  %v2113_v25 = vpack.c.bf16 %v1537_v21, %v1533_v17  ;;  %v14061_v20 = vld [vmem:[%s20627_s20 + $0x148] sm:$0xff]  }
 0x135   :  { %12591 = vmatmul.mubr.msk.bf16.gmra.mrb[148].mxu0 %vm531_vm0, %v14057_v15  ;;  %12655 = vmatmul.mubr.msk.bf16.gmra.mrb[148].mxu1 %vm531_vm0, %v14057_v15  ;;  %v2366_v28 = vmax.bf16 %v20105_v1, %v2110_v22  ;;  %v2368_v29 = vmax.bf16 %v20105_v1, %v2112_v23 }
 0x136   :  { %1136 = vmatprep.mubr.bf16.mxu0 %v20105_v1  ;;  %1809 = vmatprep.mubr.bf16.mxu1 %v20105_v1  ;;  %v2367_v26 = vmax.bf16 %v20105_v1, %v2111_v24  ;;  %v2369_v27 = vmax.bf16 %v20105_v1, %v2113_v25 }
 0x138   :  { %v868_v30 = vpop.f32.mrb[44].mxu0  ;;  %v1541_v31 = vpop.f32.mrb[44].mxu1  ;;  %4138 = vmatprep.subr.bf16.mxu0 %v2367_v26  ;;  %5550 = vmatprep.subr.bf16.mxu1 %v2369_v27 }
 0x139   :  { %v870_v33 = vpop.f32.mrb[45].mxu0  ;;  %v1543_v34 = vpop.f32.mrb[45].mxu1  ;;  %4139 = vmatpush1.bf16.msra.mxu0 %v2366_v28  ;;  %5551 = vmatpush1.bf16.msra.mxu1 %v2368_v29 }
 0x13a   :  { %v872_v35 = vpop.f32.mrb[46].mxu0  ;;  %v1545_v36 = vpop.f32.mrb[46].mxu1 }
 0x13b   :  { %v874_v37 = vpop.f32.mrb[47].mxu0  ;;  %v1547_v38 = vpop.f32.mrb[47].mxu1  ;;  %v2114_v39 = vpack.c.bf16 %v872_v35, %v868_v30  ;;  %v2116_v40 = vpack.c.bf16 %v1545_v36, %v1541_v31 }
 0x13c   :  { %v2115_v41 = vpack.c.bf16 %v874_v37, %v870_v33  ;;  %v2117_v42 = vpack.c.bf16 %v1547_v38, %v1543_v34  ;;  %v14062_v37 = vld [vmem:[%s20627_s20 + $0x150] sm:$0xff]  }
 0x13d   :  { %12592 = vmatmul.mubr.msk.bf16.gmra.mrb[152].mxu0 %vm531_vm0, %v14058_v32  ;;  %12656 = vmatmul.mubr.msk.bf16.gmra.mrb[152].mxu1 %vm531_vm0, %v14058_v32  ;;  %v2370_v45 = vmax.bf16 %v20105_v1, %v2114_v39  ;;  %v2372_v46 = vmax.bf16 %v20105_v1, %v2116_v40 }
 0x13e   :  { %1146 = vmatprep.mubr.bf16.mxu0 %v20105_v1  ;;  %1819 = vmatprep.mubr.bf16.mxu1 %v20105_v1  ;;  %v2371_v43 = vmax.bf16 %v20105_v1, %v2115_v41  ;;  %v2373_v44 = vmax.bf16 %v20105_v1, %v2117_v42 }
 0x140   :  { %v878_v47 = vpop.f32.mrb[48].mxu0  ;;  %v1551_v48 = vpop.f32.mrb[48].mxu1  ;;  %4140 = vmatprep.subr.bf16.mxu0 %v2371_v43  ;;  %5552 = vmatprep.subr.bf16.mxu1 %v2373_v44 }
 0x141   :  { %v880_v50 = vpop.f32.mrb[49].mxu0  ;;  %v1553_v51 = vpop.f32.mrb[49].mxu1  ;;  %4141 = vmatpush1.bf16.msra.mxu0 %v2370_v45  ;;  %5553 = vmatpush1.bf16.msra.mxu1 %v2372_v46 }
 0x142   :  { %v882_v52 = vpop.f32.mrb[50].mxu0  ;;  %v1555_v53 = vpop.f32.mrb[50].mxu1 }
 0x143   :  { %v884_v54 = vpop.f32.mrb[51].mxu0  ;;  %v1557_v55 = vpop.f32.mrb[51].mxu1  ;;  %v2118_v56 = vpack.c.bf16 %v882_v52, %v878_v47  ;;  %v2120_v57 = vpack.c.bf16 %v1555_v53, %v1551_v48 }
 0x144   :  { %v2119_v58 = vpack.c.bf16 %v884_v54, %v880_v50  ;;  %v2121_v59 = vpack.c.bf16 %v1557_v55, %v1553_v51  ;;  %v14063_v54 = vld [vmem:[%s20627_s20 + $0x158] sm:$0xff]  }
 0x145   :  { %12593 = vmatmul.mubr.msk.bf16.gmra.mrb[156].mxu0 %vm531_vm0, %v14059_v49  ;;  %12657 = vmatmul.mubr.msk.bf16.gmra.mrb[156].mxu1 %vm531_vm0, %v14059_v49  ;;  %v2374_v62 = vmax.bf16 %v20105_v1, %v2118_v56  ;;  %v2376_v63 = vmax.bf16 %v20105_v1, %v2120_v57 }
 0x146   :  { %1156 = vmatprep.mubr.bf16.mxu0 %v20105_v1  ;;  %1829 = vmatprep.mubr.bf16.mxu1 %v20105_v1  ;;  %v2375_v60 = vmax.bf16 %v20105_v1, %v2119_v58  ;;  %v2377_v61 = vmax.bf16 %v20105_v1, %v2121_v59 }
 0x148   :  { %v888_v0 = vpop.f32.mrb[52].mxu0  ;;  %v1561_v2 = vpop.f32.mrb[52].mxu1  ;;  %4142 = vmatprep.subr.bf16.mxu0 %v2375_v60  ;;  %5554 = vmatprep.subr.bf16.mxu1 %v2377_v61  ;;  %v14071_v61 = vld [vmem:[%s20627_s20 + $0x198] sm:$0xff]  }
 0x149   :  { %v890_v4 = vpop.f32.mrb[53].mxu0  ;;  %v1563_v5 = vpop.f32.mrb[53].mxu1  ;;  %4143 = vmatpush1.bf16.msra.mxu0 %v2374_v62  ;;  %5555 = vmatpush1.bf16.msra.mxu1 %v2376_v63 }
 0x14a   :  { %v892_v6 = vpop.f32.mrb[54].mxu0  ;;  %v1565_v7 = vpop.f32.mrb[54].mxu1 }
 0x14b   :  { %v894_v8 = vpop.f32.mrb[55].mxu0  ;;  %v1567_v9 = vpop.f32.mrb[55].mxu1  ;;  %v2122_v10 = vpack.c.bf16 %v892_v6, %v888_v0  ;;  %v2124_v11 = vpack.c.bf16 %v1565_v7, %v1561_v2  ;;  %v14064_v6 = vld [vmem:[%s20627_s20 + $0x160] sm:$0xff]  }
 0x14c   :  { %v2123_v12 = vpack.c.bf16 %v894_v8, %v890_v4  ;;  %v2125_v13 = vpack.c.bf16 %v1567_v9, %v1563_v5 }
 0x14d   :  { %12594 = vmatmul.mubr.msk.bf16.gmra.mrb[160].mxu0 %vm531_vm0, %v14060_v3  ;;  %12658 = vmatmul.mubr.msk.bf16.gmra.mrb[160].mxu1 %vm531_vm0, %v14060_v3  ;;  %v2378_v16 = vmax.bf16 %v20105_v1, %v2122_v10  ;;  %v2380_v17 = vmax.bf16 %v20105_v1, %v2124_v11 }
 0x14e   :  { %1166 = vmatprep.mubr.bf16.mxu0 %v20105_v1  ;;  %1839 = vmatprep.mubr.bf16.mxu1 %v20105_v1  ;;  %v2379_v14 = vmax.bf16 %v20105_v1, %v2123_v12  ;;  %v2381_v15 = vmax.bf16 %v20105_v1, %v2125_v13 }
 0x150   :  { %v898_v18 = vpop.f32.mrb[56].mxu0  ;;  %v1571_v19 = vpop.f32.mrb[56].mxu1  ;;  %4144 = vmatprep.subr.bf16.mxu0 %v2379_v14  ;;  %5556 = vmatprep.subr.bf16.mxu1 %v2381_v15 }
 0x151   :  { %v900_v21 = vpop.f32.mrb[57].mxu0  ;;  %v1573_v22 = vpop.f32.mrb[57].mxu1  ;;  %4145 = vmatpush1.bf16.msra.mxu0 %v2378_v16  ;;  %5557 = vmatpush1.bf16.msra.mxu1 %v2380_v17 }
 0x152   :  { %v902_v23 = vpop.f32.mrb[58].mxu0  ;;  %v1575_v24 = vpop.f32.mrb[58].mxu1 }
 0x153   :  { %v904_v25 = vpop.f32.mrb[59].mxu0  ;;  %v1577_v26 = vpop.f32.mrb[59].mxu1  ;;  %v2126_v27 = vpack.c.bf16 %v902_v23, %v898_v18  ;;  %v2128_v28 = vpack.c.bf16 %v1575_v24, %v1571_v19  ;;  %v14065_v19 = vld [vmem:[%s20627_s20 + $0x168] sm:$0xff]  }
 0x154   :  { %v2127_v29 = vpack.c.bf16 %v904_v25, %v900_v21  ;;  %v2129_v30 = vpack.c.bf16 %v1577_v26, %v1573_v22  ;;  %v14070_v26 = vld [vmem:[%s20627_s20 + $0x190] sm:$0xff]  }
 0x155   :  { %12595 = vmatmul.mubr.msk.bf16.gmra.mrb[164].mxu0 %vm531_vm0, %v14061_v20  ;;  %12659 = vmatmul.mubr.msk.bf16.gmra.mrb[164].mxu1 %vm531_vm0, %v14061_v20  ;;  %v2382_v33 = vmax.bf16 %v20105_v1, %v2126_v27  ;;  %v2384_v34 = vmax.bf16 %v20105_v1, %v2128_v28 }
 0x156   :  { %1176 = vmatprep.mubr.bf16.mxu0 %v20105_v1  ;;  %1849 = vmatprep.mubr.bf16.mxu1 %v20105_v1  ;;  %v2383_v31 = vmax.bf16 %v20105_v1, %v2127_v29  ;;  %v2385_v32 = vmax.bf16 %v20105_v1, %v2129_v30 }
 0x158   :  { %v908_v35 = vpop.f32.mrb[60].mxu0  ;;  %v1581_v36 = vpop.f32.mrb[60].mxu1  ;;  %4146 = vmatprep.subr.bf16.mxu0 %v2383_v31  ;;  %5558 = vmatprep.subr.bf16.mxu1 %v2385_v32  ;;  %v14066_v32 = vld [vmem:[%s20627_s20 + $0x170] sm:$0xff]  }
 0x159   :  { %v910_v38 = vpop.f32.mrb[61].mxu0  ;;  %v1583_v39 = vpop.f32.mrb[61].mxu1  ;;  %4147 = vmatpush1.bf16.msra.mxu0 %v2382_v33  ;;  %5559 = vmatpush1.bf16.msra.mxu1 %v2384_v34 }
 0x15a   :  { %v912_v40 = vpop.f32.mrb[62].mxu0  ;;  %v1585_v41 = vpop.f32.mrb[62].mxu1 }
 0x15b   :  { %v914_v42 = vpop.f32.mrb[63].mxu0  ;;  %v1587_v43 = vpop.f32.mrb[63].mxu1  ;;  %v2130_v44 = vpack.c.bf16 %v912_v40, %v908_v35  ;;  %v2132_v45 = vpack.c.bf16 %v1585_v41, %v1581_v36 }
 0x15c   :  { %v2131_v46 = vpack.c.bf16 %v914_v42, %v910_v38  ;;  %v2133_v47 = vpack.c.bf16 %v1587_v43, %v1583_v39 }
 0x15d   :  { %12596 = vmatmul.mubr.msk.bf16.gmra.mrb[168].mxu0 %vm531_vm0, %v14062_v37  ;;  %12660 = vmatmul.mubr.msk.bf16.gmra.mrb[168].mxu1 %vm531_vm0, %v14062_v37  ;;  %v2386_v50 = vmax.bf16 %v20105_v1, %v2130_v44  ;;  %v2388_v51 = vmax.bf16 %v20105_v1, %v2132_v45  ;;  %v14067_v45 = vld [vmem:[%s20627_s20 + $0x178] sm:$0xff]  }
 0x15e   :  { %1186 = vmatprep.mubr.bf16.mxu0 %v20105_v1  ;;  %1859 = vmatprep.mubr.bf16.mxu1 %v20105_v1  ;;  %v2387_v48 = vmax.bf16 %v20105_v1, %v2131_v46  ;;  %v2389_v49 = vmax.bf16 %v20105_v1, %v2133_v47 }
 0x160   :  { %4148 = vmatprep.subr.bf16.mxu0 %v2387_v48  ;;  %5560 = vmatprep.subr.bf16.mxu1 %v2389_v49  ;;  %v14687_v52 = vpop.f32.mrb[64].mxu0  ;;  %v14689_v53 = vpop.f32.mrb[64].mxu1 }
 0x161   :  { %4149 = vmatpush1.bf16.msra.mxu0 %v2386_v50  ;;  %5561 = vmatpush1.bf16.msra.mxu1 %v2388_v51  ;;  %v920_v55 = vpop.f32.mrb[65].mxu0  ;;  %v1593_v56 = vpop.f32.mrb[65].mxu1 }
 0x162   :  { %v14694_v57 = vpop.f32.mrb[66].mxu0  ;;  %v14696_v58 = vpop.f32.mrb[66].mxu1 }
 0x163   :  { %v924_v59 = vpop.f32.mrb[67].mxu0  ;;  %v1597_v60 = vpop.f32.mrb[67].mxu1 }
 0x164   :  { %v2135_v63 = vpack.c.bf16 %v924_v59, %v920_v55  ;;  %v2137_v0 = vpack.c.bf16 %v1597_v60, %v1593_v56 }
 0x165   :  { %12597 = vmatmul.mubr.msk.bf16.gmra.mrb[172].mxu0 %vm531_vm0, %v14063_v54  ;;  %12661 = vmatmul.mubr.msk.bf16.gmra.mrb[172].mxu1 %vm531_vm0, %v14063_v54  ;;  %v14069_v54 = vld [vmem:[%s20627_s20 + $0x188] sm:$0xff]  }
 0x166   :  { %1196 = vmatprep.mubr.bf16.mxu0 %v20105_v1  ;;  %1869 = vmatprep.mubr.bf16.mxu1 %v20105_v1  ;;  %v2391_v2 = vmax.bf16 %v20105_v1, %v2135_v63  ;;  %v2393_v3 = vmax.bf16 %v20105_v1, %v2137_v0  ;;  %v14068_v0 = vld [vmem:[%s20627_s20 + $0x180] sm:$0xff]  }
 0x168   :  { %v14708_v4 = vpop.f32.mrb[68].mxu0  ;;  %v14710_v5 = vpop.f32.mrb[68].mxu1  ;;  %4471 = vmatprep.subr.bf16.mxu0 %v2391_v2  ;;  %5883 = vmatprep.subr.bf16.mxu1 %v2393_v3 }
 0x169   :  { %v14715_v7 = vpop.f32.mrb[69].mxu0  ;;  %v14717_v8 = vpop.f32.mrb[69].mxu1 }
 0x16a   :  { %v14719_v9 = vpop.f32.mrb[70].mxu0  ;;  %v14721_v10 = vpop.f32.mrb[70].mxu1 }
 0x16b   :  { %v14723_v11 = vpop.f32.mrb[71].mxu0  ;;  %v14725_v12 = vpop.f32.mrb[71].mxu1 }
 0x16d   :  { %12598 = vmatmul.mubr.msk.bf16.gmra.mrb[176].mxu0 %vm531_vm0, %v14064_v6  ;;  %12662 = vmatmul.mubr.msk.bf16.gmra.mrb[176].mxu1 %vm531_vm0, %v14064_v6 }
 0x16e   :  { %1206 = vmatprep.mubr.bf16.mxu0 %v20105_v1  ;;  %1879 = vmatprep.mubr.bf16.mxu1 %v20105_v1 }
 0x170   :  { %v14739_v17 = vpop.f32.mrb[72].mxu0  ;;  %v14741_v18 = vpop.f32.mrb[72].mxu1 }
 0x171   :  { %v14746_v20 = vpop.f32.mrb[73].mxu0  ;;  %v14748_v21 = vpop.f32.mrb[73].mxu1 }
 0x172   :  { %v14750_v22 = vpop.f32.mrb[74].mxu0  ;;  %v14752_v23 = vpop.f32.mrb[74].mxu1 }
 0x173   :  { %v14754_v24 = vpop.f32.mrb[75].mxu0  ;;  %v14756_v25 = vpop.f32.mrb[75].mxu1 }
 0x175   :  { %12599 = vmatmul.mubr.msk.bf16.gmra.mrb[180].mxu0 %vm531_vm0, %v14065_v19  ;;  %12663 = vmatmul.mubr.msk.bf16.gmra.mrb[180].mxu1 %vm531_vm0, %v14065_v19 }
 0x176   :  { %1216 = vmatprep.mubr.bf16.mxu0 %v20105_v1  ;;  %1889 = vmatprep.mubr.bf16.mxu1 %v20105_v1 }
 0x178   :  { %v14770_v30 = vpop.f32.mrb[76].mxu0  ;;  %v14772_v31 = vpop.f32.mrb[76].mxu1 }
 0x179   :  { %v14777_v33 = vpop.f32.mrb[77].mxu0  ;;  %v14779_v34 = vpop.f32.mrb[77].mxu1 }
 0x17a   :  { %v14781_v35 = vpop.f32.mrb[78].mxu0  ;;  %v14783_v36 = vpop.f32.mrb[78].mxu1 }
 0x17b   :  { %v14785_v37 = vpop.f32.mrb[79].mxu0  ;;  %v14787_v38 = vpop.f32.mrb[79].mxu1 }
 0x17d   :  { %12600 = vmatmul.mubr.msk.bf16.gmra.mrb[184].mxu0 %vm531_vm0, %v14066_v32  ;;  %12664 = vmatmul.mubr.msk.bf16.gmra.mrb[184].mxu1 %vm531_vm0, %v14066_v32 }
 0x17e   :  { %1226 = vmatprep.mubr.bf16.mxu0 %v20105_v1  ;;  %1899 = vmatprep.mubr.bf16.mxu1 %v20105_v1 }
 0x180   :  { %v14801_v43 = vpop.f32.mrb[80].mxu0  ;;  %v14803_v44 = vpop.f32.mrb[80].mxu1 }
 0x181   :  { %v14808_v46 = vpop.f32.mrb[81].mxu0  ;;  %v14810_v47 = vpop.f32.mrb[81].mxu1 }
 0x182   :  { %v14812_v48 = vpop.f32.mrb[82].mxu0  ;;  %v14814_v49 = vpop.f32.mrb[82].mxu1 }
 0x183   :  { %v14816_v50 = vpop.f32.mrb[83].mxu0  ;;  %v14818_v51 = vpop.f32.mrb[83].mxu1 }
 0x185   :  { %12601 = vmatmul.mubr.msk.bf16.gmra.mrb[188].mxu0 %vm531_vm0, %v14067_v45  ;;  %12665 = vmatmul.mubr.msk.bf16.gmra.mrb[188].mxu1 %vm531_vm0, %v14067_v45 }
 0x186   :  { %1236 = vmatprep.mubr.bf16.mxu0 %v20105_v1  ;;  %1909 = vmatprep.mubr.bf16.mxu1 %v20105_v1 }
 0x188   :  { %v14832_v60 = vpop.f32.mrb[84].mxu0  ;;  %v14834_v63 = vpop.f32.mrb[84].mxu1 }
 0x189   :  { %v14839_v2 = vpop.f32.mrb[85].mxu0  ;;  %v14841_v3 = vpop.f32.mrb[85].mxu1 }
 0x18a   :  { %v14843_v6 = vpop.f32.mrb[86].mxu0  ;;  %v14845_v19 = vpop.f32.mrb[86].mxu1 }
 0x18b   :  { %v14847_v32 = vpop.f32.mrb[87].mxu0  ;;  %v14849_v45 = vpop.f32.mrb[87].mxu1 }
 0x18d   :  { %12602 = vmatmul.mubr.msk.bf16.gmra.mrb[192].mxu0 %vm531_vm0, %v14068_v0  ;;  %12666 = vmatmul.mubr.msk.bf16.gmra.mrb[192].mxu1 %vm531_vm0, %v14068_v0 }
 0x18e   :  { %1246 = vmatprep.mubr.bf16.mxu0 %v20105_v1  ;;  %1919 = vmatprep.mubr.bf16.mxu1 %v20105_v1 }
 0x190   :  { %v14863_v40 = vpop.f32.mrb[88].mxu0  ;;  %v14865_v55 = vpop.f32.mrb[88].mxu1 }
 0x191   :  { %20628 = vst [vmem:[#allocation3_spill] sm:$0xff] %v14863_v40  ;;  %20629 = vst [vmem:[#allocation4_spill] sm:$0xff] %v14865_v55  ;;  %v14870_v59 = vpop.f32.mrb[89].mxu0  ;;  %v14872_v39 = vpop.f32.mrb[89].mxu1 }
 0x192   :  { %20630 = vst [vmem:[#allocation5_spill] sm:$0xff] %v14872_v39  ;;  %v14874_v56 = vpop.f32.mrb[90].mxu0  ;;  %v14876_v42 = vpop.f32.mrb[90].mxu1 }
 0x193   :  { %20631 = vst [vmem:[#allocation6_spill] sm:$0xff] %v14874_v56  ;;  %20632 = vst [vmem:[#allocation7_spill] sm:$0xff] %v14876_v42  ;;  %v14878_v0 = vpop.f32.mrb[91].mxu0  ;;  %v14880_v41 = vpop.f32.mrb[91].mxu1  ;;  %v20642_v42 = vmov 0  }
 0x194   :  { %20633 = vst [vmem:[#allocation8_spill] sm:$0xff] %v14880_v41  ;;  %v20749_v41 = vpack.c.bf16 %v14694_v57, %v14687_v52  ;;  %v2598_v52 = vld [vmem:[%s20087_s3 + $0x80] sm:$0xff] }
 0x195   :  { %12603 = vmatmul.mubr.msk.bf16.gmra.mrb[196].mxu0 %vm531_vm0, %v14069_v54  ;;  %12667 = vmatmul.mubr.msk.bf16.gmra.mrb[196].mxu1 %vm531_vm0, %v14069_v54 }
 0x196   :  { %1256 = vmatprep.mubr.bf16.mxu0 %v20105_v1  ;;  %1929 = vmatprep.mubr.bf16.mxu1 %v20105_v1 }
 0x198   :  { %v14894_v14 = vpop.f32.mrb[92].mxu0  ;;  %v14896_v27 = vpop.f32.mrb[92].mxu1 }
 0x199   :  { %20634 = vst [vmem:[#allocation9_spill] sm:$0xff] %v14894_v14  ;;  %20635 = vst [vmem:[#allocation10_spill] sm:$0xff] %v14896_v27  ;;  %v14901_v29 = vpop.f32.mrb[93].mxu0  ;;  %v14903_v13 = vpop.f32.mrb[93].mxu1 }
 0x19a   :  { %20636 = vst [vmem:[#allocation11_spill] sm:$0xff] %v14901_v29  ;;  %20637 = vst [vmem:[#allocation12_spill] sm:$0xff] %v14903_v13  ;;  %v14905_v28 = vpop.f32.mrb[94].mxu0  ;;  %v14907_v16 = vpop.f32.mrb[94].mxu1  ;;  %v14072_v13 = vld [vmem:[%s20627_s20 + $0x1a0] sm:$0xff]  }
 0x19b   :  { %20638 = vst [vmem:[#allocation13_spill] sm:$0xff] %v14905_v28  ;;  %20639 = vst [vmem:[#allocation14_spill] sm:$0xff] %v14907_v16  ;;  %v14909_v54 = vpop.f32.mrb[95].mxu0  ;;  %v14911_v15 = vpop.f32.mrb[95].mxu1 }
 0x19c   :  { %20640 = vst [vmem:[#allocation15_spill] sm:$0xff] %v14909_v54  ;;  %20641 = vst [vmem:[#allocation16_spill] sm:$0xff] %v14911_v15 }
 0x19d   :  { %12604 = vmatmul.mubr.msk.bf16.gmra.mrb[200].mxu0 %vm531_vm0, %v14070_v26  ;;  %12668 = vmatmul.mubr.msk.bf16.gmra.mrb[200].mxu1 %vm531_vm0, %v14070_v26 }
 0x19e   :  { %1266 = vmatprep.mubr.bf16.mxu0 %v20642_v42  ;;  %1939 = vmatprep.mubr.bf16.mxu1 %v20642_v42 }
 0x1a0   :  { %v14925_v40 = vpop.f32.mrb[96].mxu0  ;;  %v14927_v62 = vpop.f32.mrb[96].mxu1 }
 0x1a1   :  { %20643 = vst [vmem:[#allocation17_spill] sm:$0xff] %v14925_v40  ;;  %20644 = vst [vmem:[#allocation18_spill] sm:$0xff] %v14927_v62  ;;  %v14932_v1 = vpop.f32.mrb[97].mxu0  ;;  %v14934_v27 = vpop.f32.mrb[97].mxu1 }
 0x1a2   :  { %20645 = vst [vmem:[#allocation19_spill] sm:$0xff] %v14932_v1  ;;  %20646 = vst [vmem:[#allocation20_spill] sm:$0xff] %v14934_v27  ;;  %v14936_v55 = vpop.f32.mrb[98].mxu0  ;;  %v14938_v16 = vpop.f32.mrb[98].mxu1  ;;  %v14073_v27 = vld [vmem:[%s20627_s20 + $0x1a8] sm:$0xff]  }
 0x1a3   :  { %20647 = vst [vmem:[#allocation21_spill] sm:$0xff] %v14936_v55  ;;  %20648 = vst [vmem:[#allocation22_spill] sm:$0xff] %v14938_v16  ;;  %v14940_v26 = vpop.f32.mrb[99].mxu0  ;;  %v14942_v14 = vpop.f32.mrb[99].mxu1 }
 0x1a4   :  { %20649 = vst [vmem:[#allocation23_spill] sm:$0xff] %v14940_v26  ;;  %20650 = vst [vmem:[#allocation24_spill] sm:$0xff] %v14942_v14 }
 0x1a5   :  { %12605 = vmatmul.mubr.msk.bf16.gmra.mrb[204].mxu0 %vm531_vm0, %v14071_v61  ;;  %12669 = vmatmul.mubr.msk.bf16.gmra.mrb[204].mxu1 %vm531_vm0, %v14071_v61 }
 0x1a6   :  { %1276 = vmatprep.mubr.bf16.mxu0 %v20642_v42  ;;  %1949 = vmatprep.mubr.bf16.mxu1 %v20642_v42 }
 0x1a8   :  { %v14956_v54 = vpop.f32.mrb[100].mxu0  ;;  %v14958_v28 = vpop.f32.mrb[100].mxu1 }
 0x1a9   :  { %20651 = vst [vmem:[#allocation25_spill] sm:$0xff] %v14956_v54  ;;  %20652 = vst [vmem:[#allocation26_spill] sm:$0xff] %v14958_v28  ;;  %v14963_v15 = vpop.f32.mrb[101].mxu0  ;;  %v14965_v62 = vpop.f32.mrb[101].mxu1 }
 0x1aa   :  { %20653 = vst [vmem:[#allocation27_spill] sm:$0xff] %v14963_v15  ;;  %20654 = vst [vmem:[#allocation28_spill] sm:$0xff] %v14965_v62  ;;  %v14967_v29 = vpop.f32.mrb[102].mxu0  ;;  %v14969_v16 = vpop.f32.mrb[102].mxu1  ;;  %v14074_v62 = vld [vmem:[%s20627_s20 + $0x1b0] sm:$0xff]  }
 0x1ab   :  { %20655 = vst [vmem:[#allocation29_spill] sm:$0xff] %v14967_v29  ;;  %20656 = vst [vmem:[#allocation30_spill] sm:$0xff] %v14969_v16  ;;  %v14971_v61 = vpop.f32.mrb[103].mxu0  ;;  %v14973_v40 = vpop.f32.mrb[103].mxu1 }
 0x1ac   :  { %20657 = vst [vmem:[#allocation31_spill] sm:$0xff] %v14971_v61  ;;  %20658 = vst [vmem:[#allocation32_spill] sm:$0xff] %v14973_v40 }
 0x1ad   :  { %12606 = vmatmul.mubr.msk.bf16.gmra.mrb[208].mxu0 %vm531_vm0, %v14072_v13  ;;  %12670 = vmatmul.mubr.msk.bf16.gmra.mrb[208].mxu1 %vm531_vm0, %v14072_v13 }
 0x1ae   :  { %1286 = vmatprep.mubr.bf16.mxu0 %v20642_v42  ;;  %1959 = vmatprep.mubr.bf16.mxu1 %v20642_v42 }
 0x1b0   :  { %v14987_v26 = vpop.f32.mrb[104].mxu0  ;;  %v14989_v55 = vpop.f32.mrb[104].mxu1 }
 0x1b1   :  { %20659 = vst [vmem:[#allocation33_spill] sm:$0xff] %v14987_v26  ;;  %20660 = vst [vmem:[#allocation34_spill] sm:$0xff] %v14989_v55  ;;  %v14994_v14 = vpop.f32.mrb[105].mxu0  ;;  %v14996_v28 = vpop.f32.mrb[105].mxu1 }
 0x1b2   :  { %20661 = vst [vmem:[#allocation35_spill] sm:$0xff] %v14994_v14  ;;  %20662 = vst [vmem:[#allocation36_spill] sm:$0xff] %v14996_v28  ;;  %v14998_v1 = vpop.f32.mrb[106].mxu0  ;;  %v15000_v16 = vpop.f32.mrb[106].mxu1  ;;  %v14075_v28 = vld [vmem:[%s20627_s20 + $0x1b8] sm:$0xff]  }
 0x1b3   :  { %20663 = vst [vmem:[#allocation37_spill] sm:$0xff] %v14998_v1  ;;  %20664 = vst [vmem:[#allocation38_spill] sm:$0xff] %v15000_v16  ;;  %v15002_v13 = vpop.f32.mrb[107].mxu0  ;;  %v15004_v54 = vpop.f32.mrb[107].mxu1 }
 0x1b4   :  { %20665 = vst [vmem:[#allocation39_spill] sm:$0xff] %v15002_v13  ;;  %20666 = vst [vmem:[#allocation40_spill] sm:$0xff] %v15004_v54 }
 0x1b5   :  { %12607 = vmatmul.mubr.msk.bf16.gmra.mrb[212].mxu0 %vm531_vm0, %v14073_v27  ;;  %12671 = vmatmul.mubr.msk.bf16.gmra.mrb[212].mxu1 %vm531_vm0, %v14073_v27 }
 0x1b6   :  { %1296 = vmatprep.mubr.bf16.mxu0 %v20642_v42  ;;  %1969 = vmatprep.mubr.bf16.mxu1 %v20642_v42 }
 0x1b8   :  { %v15018_v61 = vpop.f32.mrb[108].mxu0  ;;  %v15020_v29 = vpop.f32.mrb[108].mxu1 }
 0x1b9   :  { %20667 = vst [vmem:[#allocation41_spill] sm:$0xff] %v15018_v61  ;;  %20668 = vst [vmem:[#allocation42_spill] sm:$0xff] %v15020_v29  ;;  %v15025_v40 = vpop.f32.mrb[109].mxu0  ;;  %v15027_v55 = vpop.f32.mrb[109].mxu1 }
 0x1ba   :  { %20669 = vst [vmem:[#allocation43_spill] sm:$0xff] %v15025_v40  ;;  %20670 = vst [vmem:[#allocation44_spill] sm:$0xff] %v15027_v55  ;;  %v15029_v15 = vpop.f32.mrb[110].mxu0  ;;  %v15031_v16 = vpop.f32.mrb[110].mxu1  ;;  %v14076_v55 = vld [vmem:[%s20627_s20 + $0x1c0] sm:$0xff]  }
 0x1bb   :  { %20671 = vst [vmem:[#allocation45_spill] sm:$0xff] %v15029_v15  ;;  %20672 = vst [vmem:[#allocation46_spill] sm:$0xff] %v15031_v16  ;;  %v15033_v27 = vpop.f32.mrb[111].mxu0  ;;  %v15035_v26 = vpop.f32.mrb[111].mxu1 }
 0x1bc   :  { %20673 = vst [vmem:[#allocation47_spill] sm:$0xff] %v15033_v27  ;;  %20674 = vst [vmem:[#allocation48_spill] sm:$0xff] %v15035_v26 }
 0x1bd   :  { %12608 = vmatmul.mubr.msk.bf16.gmra.mrb[216].mxu0 %vm531_vm0, %v14074_v62  ;;  %12672 = vmatmul.mubr.msk.bf16.gmra.mrb[216].mxu1 %vm531_vm0, %v14074_v62 }
 0x1be   :  { %1306 = vmatprep.mubr.bf16.mxu0 %v20642_v42  ;;  %1979 = vmatprep.mubr.bf16.mxu1 %v20642_v42 }
 0x1c0   :  { %v15049_v13 = vpop.f32.mrb[112].mxu0  ;;  %v15051_v1 = vpop.f32.mrb[112].mxu1 }
 0x1c1   :  { %20675 = vst [vmem:[#allocation49_spill] sm:$0xff] %v15049_v13  ;;  %20676 = vst [vmem:[#allocation50_spill] sm:$0xff] %v15051_v1  ;;  %v15056_v54 = vpop.f32.mrb[113].mxu0  ;;  %v15058_v29 = vpop.f32.mrb[113].mxu1 }
 0x1c2   :  { %20677 = vst [vmem:[#allocation51_spill] sm:$0xff] %v15056_v54  ;;  %20678 = vst [vmem:[#allocation52_spill] sm:$0xff] %v15058_v29  ;;  %v15060_v14 = vpop.f32.mrb[114].mxu0  ;;  %v15062_v16 = vpop.f32.mrb[114].mxu1  ;;  %v14077_v29 = vld [vmem:[%s20627_s20 + $0x1c8] sm:$0xff]  }
 0x1c3   :  { %20679 = vst [vmem:[#allocation53_spill] sm:$0xff] %v15060_v14  ;;  %20680 = vst [vmem:[#allocation54_spill] sm:$0xff] %v15062_v16  ;;  %v15064_v62 = vpop.f32.mrb[115].mxu0  ;;  %v15066_v61 = vpop.f32.mrb[115].mxu1 }
 0x1c4   :  { %20681 = vst [vmem:[#allocation55_spill] sm:$0xff] %v15064_v62  ;;  %20682 = vst [vmem:[#allocation56_spill] sm:$0xff] %v15066_v61 }
 0x1c5   :  { %12609 = vmatmul.mubr.msk.bf16.gmra.mrb[220].mxu0 %vm531_vm0, %v14075_v28  ;;  %12673 = vmatmul.mubr.msk.bf16.gmra.mrb[220].mxu1 %vm531_vm0, %v14075_v28 }
 0x1c6   :  { %1316 = vmatprep.mubr.bf16.mxu0 %v20642_v42  ;;  %1989 = vmatprep.mubr.bf16.mxu1 %v20642_v42 }
 0x1c8   :  { %v15080_v27 = vpop.f32.mrb[116].mxu0  ;;  %v15082_v15 = vpop.f32.mrb[116].mxu1 }
 0x1c9   :  { %20683 = vst [vmem:[#allocation57_spill] sm:$0xff] %v15080_v27  ;;  %20684 = vst [vmem:[#allocation58_spill] sm:$0xff] %v15082_v15  ;;  %v15087_v26 = vpop.f32.mrb[117].mxu0  ;;  %v15089_v1 = vpop.f32.mrb[117].mxu1 }
 0x1ca   :  { %20685 = vst [vmem:[#allocation59_spill] sm:$0xff] %v15087_v26  ;;  %20686 = vst [vmem:[#allocation60_spill] sm:$0xff] %v15089_v1  ;;  %v15091_v40 = vpop.f32.mrb[118].mxu0  ;;  %v15093_v16 = vpop.f32.mrb[118].mxu1  ;;  %v14078_v1 = vld [vmem:[%s20627_s20 + $0x1d0] sm:$0xff]  }
 0x1cb   :  { %20687 = vst [vmem:[#allocation61_spill] sm:$0xff] %v15091_v40  ;;  %20688 = vst [vmem:[#allocation62_spill] sm:$0xff] %v15093_v16  ;;  %v15095_v28 = vpop.f32.mrb[119].mxu0  ;;  %v15097_v13 = vpop.f32.mrb[119].mxu1 }
 0x1cc   :  { %20689 = vst [vmem:[#allocation63_spill] sm:$0xff] %v15095_v28  ;;  %20690 = vst [vmem:[#allocation64_spill] sm:$0xff] %v15097_v13 }
 0x1cd   :  { %12610 = vmatmul.mubr.msk.bf16.gmra.mrb[224].mxu0 %vm531_vm0, %v14076_v55  ;;  %12674 = vmatmul.mubr.msk.bf16.gmra.mrb[224].mxu1 %vm531_vm0, %v14076_v55 }
 0x1ce   :  { %1326 = vmatprep.mubr.bf16.mxu0 %v20642_v42  ;;  %1999 = vmatprep.mubr.bf16.mxu1 %v20642_v42 }
 0x1d0   :  { %v15111_v62 = vpop.f32.mrb[120].mxu0  ;;  %v15113_v14 = vpop.f32.mrb[120].mxu1 }
 0x1d1   :  { %20691 = vst [vmem:[#allocation65_spill] sm:$0xff] %v15111_v62  ;;  %20692 = vst [vmem:[#allocation66_spill] sm:$0xff] %v15113_v14  ;;  %v15118_v61 = vpop.f32.mrb[121].mxu0  ;;  %v15120_v15 = vpop.f32.mrb[121].mxu1 }
 0x1d2   :  { %20693 = vst [vmem:[#allocation67_spill] sm:$0xff] %v15118_v61  ;;  %20694 = vst [vmem:[#allocation68_spill] sm:$0xff] %v15120_v15  ;;  %v15122_v54 = vpop.f32.mrb[122].mxu0  ;;  %v15124_v16 = vpop.f32.mrb[122].mxu1  ;;  %v14079_v15 = vld [vmem:[%s20627_s20 + $0x1d8] sm:$0xff]  }
 0x1d3   :  { %20695 = vst [vmem:[#allocation69_spill] sm:$0xff] %v15122_v54  ;;  %20696 = vst [vmem:[#allocation70_spill] sm:$0xff] %v15124_v16  ;;  %v15126_v55 = vpop.f32.mrb[123].mxu0  ;;  %v15128_v27 = vpop.f32.mrb[123].mxu1 }
 0x1d4   :  { %20697 = vst [vmem:[#allocation71_spill] sm:$0xff] %v15126_v55  ;;  %20698 = vst [vmem:[#allocation72_spill] sm:$0xff] %v15128_v27 }
 0x1d5   :  { %12611 = vmatmul.mubr.msk.bf16.gmra.mrb[228].mxu0 %vm531_vm0, %v14077_v29  ;;  %12675 = vmatmul.mubr.msk.bf16.gmra.mrb[228].mxu1 %vm531_vm0, %v14077_v29 }
 0x1d6   :  { %1336 = vmatprep.mubr.bf16.mxu0 %v20642_v42  ;;  %2009 = vmatprep.mubr.bf16.mxu1 %v20642_v42 }
 0x1d8   :  { %v15142_v28 = vpop.f32.mrb[124].mxu0  ;;  %v15144_v40 = vpop.f32.mrb[124].mxu1 }
 0x1d9   :  { %20699 = vst [vmem:[#allocation73_spill] sm:$0xff] %v15142_v28  ;;  %20700 = vst [vmem:[#allocation74_spill] sm:$0xff] %v15144_v40  ;;  %v15149_v13 = vpop.f32.mrb[125].mxu0  ;;  %v15151_v14 = vpop.f32.mrb[125].mxu1 }
 0x1da   :  { %20701 = vst [vmem:[#allocation75_spill] sm:$0xff] %v15149_v13  ;;  %20702 = vst [vmem:[#allocation76_spill] sm:$0xff] %v15151_v14  ;;  %v15153_v26 = vpop.f32.mrb[126].mxu0  ;;  %v15155_v16 = vpop.f32.mrb[126].mxu1 }
 0x1db   :  { %20703 = vst [vmem:[#allocation77_spill] sm:$0xff] %v15153_v26  ;;  %20704 = vst [vmem:[#allocation78_spill] sm:$0xff] %v15155_v16  ;;  %v15157_v29 = vpop.f32.mrb[127].mxu0  ;;  %v15159_v62 = vpop.f32.mrb[127].mxu1 }
 0x1dc   :  { %20705 = vst [vmem:[#allocation79_spill] sm:$0xff] %v15157_v29  ;;  %20706 = vst [vmem:[#allocation80_spill] sm:$0xff] %v15159_v62 }
 0x1dd   :  { %12612 = vmatmul.mubr.msk.bf16.gmra.mrb[232].mxu0 %vm531_vm0, %v14078_v1  ;;  %12676 = vmatmul.mubr.msk.bf16.gmra.mrb[232].mxu1 %vm531_vm0, %v14078_v1 }
 0x1de   :  { %1346 = vmatprep.mubr.bf16.mxu0 %v20642_v42  ;;  %2019 = vmatprep.mubr.bf16.mxu1 %v20642_v42 }
 0x1e0   :  { %v15173_v55 = vpop.f32.mrb[128].mxu0  ;;  %v15175_v54 = vpop.f32.mrb[128].mxu1 }
 0x1e1   :  { %20707 = vst [vmem:[#allocation81_spill] sm:$0xff] %v15173_v55  ;;  %20708 = vst [vmem:[#allocation82_spill] sm:$0xff] %v15175_v54  ;;  %v15180_v27 = vpop.f32.mrb[129].mxu0  ;;  %v15182_v40 = vpop.f32.mrb[129].mxu1  ;;  %v14080_v54 = vld [vmem:[%s20627_s20 + $0x1e0] sm:$0xff]  }
 0x1e2   :  { %20709 = vst [vmem:[#allocation83_spill] sm:$0xff] %v15180_v27  ;;  %20710 = vst [vmem:[#allocation84_spill] sm:$0xff] %v15182_v40  ;;  %v15184_v61 = vpop.f32.mrb[130].mxu0  ;;  %v15186_v16 = vpop.f32.mrb[130].mxu1 }
 0x1e3   :  { %20711 = vst [vmem:[#allocation85_spill] sm:$0xff] %v15184_v61  ;;  %20712 = vst [vmem:[#allocation86_spill] sm:$0xff] %v15186_v16  ;;  %v15192_v26 = vpop.f32.mrb[131].mxu0  ;;  %v15194_v14 = vpop.f32.mrb[131].mxu1 }
 0x1e4   :  { %20713 = vst [vmem:[#allocation87_spill] sm:$0xff] %v15192_v26  ;;  %20714 = vst [vmem:[#allocation88_spill] sm:$0xff] %v15194_v14 }
 0x1e5   :  { %12613 = vmatmul.mubr.msk.bf16.gmra.mrb[236].mxu0 %vm531_vm0, %v14079_v15  ;;  %12677 = vmatmul.mubr.msk.bf16.gmra.mrb[236].mxu1 %vm531_vm0, %v14079_v15 }
 0x1e6   :  { %1356 = vmatprep.mubr.bf16.mxu0 %v20642_v42  ;;  %2029 = vmatprep.mubr.bf16.mxu1 %v20642_v42 }
 0x1e8   :  { %v15204_v1 = vpop.f32.mrb[132].mxu0  ;;  %v15206_v28 = vpop.f32.mrb[132].mxu1 }
 0x1e9   :  { %20715 = vst [vmem:[#allocation89_spill] sm:$0xff] %v15204_v1  ;;  %20716 = vst [vmem:[#allocation90_spill] sm:$0xff] %v15206_v28  ;;  %v15211_v62 = vpop.f32.mrb[133].mxu0  ;;  %v15213_v16 = vpop.f32.mrb[133].mxu1  ;;  %v14081_v28 = vld [vmem:[%s20627_s20 + $0x1e8] sm:$0xff]  }
 0x1ea   :  { %20717 = vst [vmem:[#allocation91_spill] sm:$0xff] %v15211_v62  ;;  %20718 = vst [vmem:[#allocation92_spill] sm:$0xff] %v15213_v16  ;;  %v15215_v13 = vpop.f32.mrb[134].mxu0  ;;  %v15217_v55 = vpop.f32.mrb[134].mxu1 }
 0x1eb   :  { %20719 = vst [vmem:[#allocation93_spill] sm:$0xff] %v15215_v13  ;;  %20720 = vst [vmem:[#allocation94_spill] sm:$0xff] %v15217_v55  ;;  %v15223_v40 = vpop.f32.mrb[135].mxu0  ;;  %v15225_v14 = vpop.f32.mrb[135].mxu1 }
 0x1ec   :  { %20721 = vst [vmem:[#allocation95_spill] sm:$0xff] %v15223_v40  ;;  %20722 = vst [vmem:[#allocation96_spill] sm:$0xff] %v15225_v14 }
 0x1ed   :  { %12614 = vmatmul.mubr.msk.bf16.gmra.mrb[240].mxu0 %vm531_vm0, %v14080_v54  ;;  %12678 = vmatmul.mubr.msk.bf16.gmra.mrb[240].mxu1 %vm531_vm0, %v14080_v54 }
 0x1ee   :  { %1366 = vmatprep.mubr.bf16.mxu0 %v20642_v42  ;;  %2039 = vmatprep.mubr.bf16.mxu1 %v20642_v42 }
 0x1f0   :  { %v15235_v15 = vpop.f32.mrb[136].mxu0  ;;  %v15237_v61 = vpop.f32.mrb[136].mxu1 }
 0x1f1   :  { %20723 = vst [vmem:[#allocation97_spill] sm:$0xff] %v15235_v15  ;;  %20724 = vst [vmem:[#allocation98_spill] sm:$0xff] %v15237_v61  ;;  %v15242_v27 = vpop.f32.mrb[137].mxu0  ;;  %v15244_v55 = vpop.f32.mrb[137].mxu1  ;;  %v14082_v61 = vld [vmem:[%s20627_s20 + $0x1f0] sm:$0xff]  }
 0x1f2   :  { %20725 = vst [vmem:[#allocation99_spill] sm:$0xff] %v15242_v27  ;;  %20726 = vst [vmem:[#allocation100_spill] sm:$0xff] %v15244_v55  ;;  %v15246_v26 = vpop.f32.mrb[138].mxu0  ;;  %v15248_v1 = vpop.f32.mrb[138].mxu1 }
 0x1f3   :  { %20727 = vst [vmem:[#allocation101_spill] sm:$0xff] %v15246_v26  ;;  %20728 = vst [vmem:[#allocation102_spill] sm:$0xff] %v15248_v1  ;;  %v15254_v16 = vpop.f32.mrb[139].mxu0  ;;  %v15256_v14 = vpop.f32.mrb[139].mxu1  ;;  %v2582_v26 = vld [vmem:[%s20087_s3] sm:$0xff] }
 0x1f4   :  { %20729 = vst [vmem:[#allocation103_spill] sm:$0xff] %v15254_v16  ;;  %20730 = vst [vmem:[#allocation104_spill] sm:$0xff] %v15256_v14 }
 0x1f5   :  { %12615 = vmatmul.mubr.msk.bf16.gmra.mrb[244].mxu0 %vm531_vm0, %v14081_v28  ;;  %12679 = vmatmul.mubr.msk.bf16.gmra.mrb[244].mxu1 %vm531_vm0, %v14081_v28  ;;  %v2586_v28 = vld [vmem:[%s20087_s3 + $0x20] sm:$0xff] }
 0x1f6   :  { %1376 = vmatprep.mubr.bf16.mxu0 %v20642_v42  ;;  %2049 = vmatprep.mubr.bf16.mxu1 %v20642_v42 }
 0x1f8   :  { %v15266_v54 = vpop.f32.mrb[140].mxu0  ;;  %v15268_v13 = vpop.f32.mrb[140].mxu1 }
 0x1f9   :  { %20731 = vst [vmem:[#allocation105_spill] sm:$0xff] %v15266_v54  ;;  %20732 = vst [vmem:[#allocation106_spill] sm:$0xff] %v15268_v13  ;;  %v15273_v62 = vpop.f32.mrb[141].mxu0  ;;  %v15275_v1 = vpop.f32.mrb[141].mxu1  ;;  %v12683_v54 = vcombine.high %v2582_v26, %v2586_v28 }
 0x1fa   :  { %20733 = vst [vmem:[#allocation107_spill] sm:$0xff] %v15273_v62  ;;  %20734 = vst [vmem:[#allocation108_spill] sm:$0xff] %v15275_v1  ;;  %v15277_v40 = vpop.f32.mrb[142].mxu0  ;;  %v15279_v15 = vpop.f32.mrb[142].mxu1  ;;  %v2590_v62 = vld [vmem:[%s20087_s3 + $0x40] sm:$0xff] }
 0x1fb   :  { %20735 = vst [vmem:[#allocation109_spill] sm:$0xff] %v15277_v40  ;;  %20736 = vst [vmem:[#allocation110_spill] sm:$0xff] %v15279_v15  ;;  %v15285_v55 = vpop.f32.mrb[143].mxu0  ;;  %v15287_v14 = vpop.f32.mrb[143].mxu1 }
 0x1fc   :  { %20737 = vst [vmem:[#allocation111_spill] sm:$0xff] %v15285_v55  ;;  %20738 = vst [vmem:[#allocation112_spill] sm:$0xff] %v15287_v14  ;;  %v2594_v14 = vld [vmem:[%s20087_s3 + $0x60] sm:$0xff] }
 0x1fd   :  { %12616 = vmatmul.mubr.msk.bf16.gmra.mrb[248].mxu0 %vm531_vm0, %v14082_v61  ;;  %12680 = vmatmul.mubr.msk.bf16.gmra.mrb[248].mxu1 %vm531_vm0, %v14082_v61  ;;  %v14083_v61 = vld [vmem:[%s20627_s20 + $0x1f8] sm:$0xff]  }
 0x1fe   :  { %1386 = vmatprep.mubr.bf16.mxu0 %v20642_v42  ;;  %2059 = vmatprep.mubr.bf16.mxu1 %v20642_v42 }
 0x200   :  { %v15303_v27 = vpop.f32.mrb[144].mxu0  ;;  %v15305_v13 = vpop.f32.mrb[144].mxu1 }
 0x201   :  { %20739 = vst [vmem:[#allocation113_spill] sm:$0xff] %v15303_v27  ;;  %20740 = vst [vmem:[#allocation114_spill] sm:$0xff] %v15305_v13  ;;  %v15310_v16 = vpop.f32.mrb[145].mxu0  ;;  %v15312_v15 = vpop.f32.mrb[145].mxu1 }
 0x202   :  { %20741 = vst [vmem:[#allocation115_spill] sm:$0xff] %v15310_v16  ;;  %20742 = vst [vmem:[#allocation116_spill] sm:$0xff] %v15312_v15  ;;  %v15314_v40 = vpop.f32.mrb[146].mxu0  ;;  %v15316_v1 = vpop.f32.mrb[146].mxu1  ;;  %v2390_v15 = vmax.bf16 %v20642_v42, %v20749_v41 }
 0x203   :  { %20743 = vst [vmem:[#allocation117_spill] sm:$0xff] %v15314_v40  ;;  %20744 = vst [vmem:[#allocation118_spill] sm:$0xff] %v15316_v1  ;;  %v15322_v55 = vpop.f32.mrb[147].mxu0  ;;  %v15324_v29 = vpop.f32.mrb[147].mxu1  ;;  %v12682_v1 = vcombine.low %v2582_v26, %v2586_v28  ;;  %v20751_v26 = vpack.c.bf16 %v14723_v11, %v14715_v7  ;;  %v12690_v7 = vcombine.low %v2590_v62, %v2594_v14 }
 0x204   :  { %20745 = vst [vmem:[#allocation119_spill] sm:$0xff] %v15322_v55  ;;  %20746 = vst [vmem:[#allocation120_spill] sm:$0xff] %v15324_v29  ;;  %v20750_v29 = vpack.c.bf16 %v14696_v58, %v14689_v53  ;;  %v2602_v53 = vld [vmem:[%s20087_s3 + $0xa0] sm:$0xff] }
 0x205   :  { %12617 = vmatmul.mubr.msk.bf16.gmra.mrb[252].mxu0 %vm531_vm0, %v14083_v61  ;;  %12681 = vmatmul.mubr.msk.bf16.gmra.mrb[252].mxu1 %vm531_vm0, %v14083_v61  ;;  %v12691_v61 = vcombine.high %v2590_v62, %v2594_v14 }
 0x206   :  { %4150 = vmatprep.mubr.bf16.mxu0 %v12683_v54  ;;  %5562 = vmatprep.mubr.bf16.mxu1 %v12683_v54 }
 0x208   :  { %v15338_v13 = vpop.f32.mrb[148].mxu0  ;;  %v15340_v56 = vpop.f32.mrb[148].mxu1 }
 0x209   :  { %20747 = vst [vmem:[#allocation121_spill] sm:$0xff] %v15340_v56  ;;  %v15342_v39 = vpop.f32.mrb[149].mxu0  ;;  %v15344_v27 = vpop.f32.mrb[149].mxu1  ;;  %v2392_v56 = vmax.bf16 %v20642_v42, %v20750_v29 }
 0x20a   :  { %v15346_v40 = vpop.f32.mrb[150].mxu0  ;;  %v15348_v54 = vpop.f32.mrb[150].mxu1 }
 0x20b   :  { %20748 = vst [vmem:[#allocation122_spill] sm:$0xff] %v15348_v54  ;;  %v15354_v16 = vpop.f32.mrb[151].mxu0  ;;  %v15356_v55 = vpop.f32.mrb[151].mxu1  ;;  %v2395_v54 = vmax.bf16 %v20642_v42, %v20751_v26  ;;  %v20757_v26 = vpack.c.bf16 %v14750_v22, %v14739_v17  ;;  %v2606_v17 = vld [vmem:[%s20087_s3 + $0xc0] sm:$0xff] }
 0x20d   :  { %4151 = vmatmul.mubr.bf16.vlgmr.msra.gmra.mrb[0].mxu0 %v12682_v1  ;;  %5563 = vmatmul.mubr.bf16.vlgmr.msra.gmra.mrb[0].mxu1 %v12682_v1  ;;  %v20752_v1 = vpack.c.bf16 %v14725_v12, %v14717_v8  ;;  %v20753_v8 = vpack.c.bf16 %v14719_v9, %v14708_v4  ;;  %v20754_v12 = vpack.c.bf16 %v14721_v10, %v14710_v5 }
 0x20e   :  { %4160 = vmatprep.mubr.bf16.mxu0 %v12691_v61  ;;  %5572 = vmatprep.mubr.bf16.mxu1 %v12691_v61  ;;  %v20755_v61 = vpack.c.bf16 %v14754_v24, %v14746_v20  ;;  %v20756_v4 = vpack.c.bf16 %v14756_v25, %v14748_v21 }
 0x20f   :  { %v2397_v28 = vmax.bf16 %v20642_v42, %v20752_v1  ;;  %4472 = vmatpush1.bf16.msra.mxu0 %v2390_v15  ;;  %5884 = vmatpush1.bf16.msra.mxu1 %v2392_v56  ;;  %v2394_v11 = vmax.bf16 %v20642_v42, %v20753_v8  ;;  %v2396_v41 = vmax.bf16 %v20642_v42, %v20754_v12 }
 0x210   :  { %4473 = vmatprep.subr.bf16.mxu0 %v2395_v54  ;;  %v15384_v57 = vpop.f32.mrb[152].mxu0  ;;  %v15386_v58 = vpop.f32.mrb[152].mxu1  ;;  %v12699_v15 = vcombine.high %v2598_v52, %v2602_v53  ;;  %v2399_v14 = vmax.bf16 %v20642_v42, %v20755_v61  ;;  %v2401_v9 = vmax.bf16 %v20642_v42, %v20756_v4  ;;  %v20758_v1 = vpack.c.bf16 %v14752_v23, %v14741_v18  ;;  %v2610_v18 = vld [vmem:[%s20087_s3 + $0xe0] sm:$0xff]  ;;  %v20824_v54 = vld [vmem:[#allocation36_spill] sm:$0xff] }
 0x211   :  { %5885 = vmatprep.subr.bf16.mxu1 %v2397_v28  ;;  %v15396_v29 = vpop.f32.mrb[153].mxu0  ;;  %v15398_v56 = vpop.f32.mrb[153].mxu1  ;;  %v2398_v28 = vmax.bf16 %v20642_v42, %v20757_v26  ;;  %v12707_v4 = vcombine.high %v2606_v17, %v2610_v18  ;;  %v20809_v26 = vld [vmem:[#allocation28_spill] sm:$0xff] }
 0x212   :  { %v15408_v62 = vpop.f32.mrb[154].mxu0  ;;  %v15410_v5 = vpop.f32.mrb[154].mxu1  ;;  %v2400_v8 = vmax.bf16 %v20642_v42, %v20758_v1 }
 0x213   :  { %4474 = vmatpush1.bf16.msra.mxu0 %v2394_v11  ;;  %5886 = vmatpush1.bf16.msra.mxu1 %v2396_v41  ;;  %v15416_v20 = vpop.f32.mrb[155].mxu0  ;;  %v15418_v24 = vpop.f32.mrb[155].mxu1  ;;  %v20759_v11 = vpack.c.bf16 %v14785_v37, %v14777_v33  ;;  %v12698_v33 = vcombine.low %v2598_v52, %v2602_v53 }
 0x214   :  { %4475 = vmatprep.subr.bf16.mxu0 %v2399_v14  ;;  %5887 = vmatprep.subr.bf16.mxu1 %v2401_v9  ;;  %v20763_v9 = vpack.c.bf16 %v14816_v50, %v14808_v46 }
 0x215   :  { %4161 = vmatmul.mubr.bf16.gmra.mrb[4].mxu0 %v12690_v7  ;;  %5573 = vmatmul.mubr.bf16.gmra.mrb[4].mxu1 %v12690_v7  ;;  %v2403_v12 = vmax.bf16 %v20642_v42, %v20759_v11  ;;  %v20760_v7 = vpack.c.bf16 %v14787_v38, %v14779_v34  ;;  %v20761_v34 = vpack.c.bf16 %v14781_v35, %v14770_v30 }
 0x216   :  { %4170 = vmatprep.mubr.bf16.mxu0 %v12699_v15  ;;  %5582 = vmatprep.mubr.bf16.mxu1 %v12699_v15  ;;  %v20762_v38 = vpack.c.bf16 %v14783_v36, %v14772_v31  ;;  %v2407_v52 = vmax.bf16 %v20642_v42, %v20763_v9  ;;  %v20764_v30 = vpack.c.bf16 %v14818_v51, %v14810_v47  ;;  %v20773_v9 = vld [vmem:[#allocation5_spill] sm:$0xff] }
 0x217   :  { %v2405_v41 = vmax.bf16 %v20642_v42, %v20760_v7  ;;  %4476 = vmatpush1.bf16.msra.mxu0 %v2398_v28  ;;  %5888 = vmatpush1.bf16.msra.mxu1 %v2400_v8  ;;  %v2402_v37 = vmax.bf16 %v20642_v42, %v20761_v34  ;;  %v20765_v28 = vpack.c.bf16 %v14812_v48, %v14801_v43  ;;  %v2614_v43 = vld [vmem:[%s20087_s3 + $0x100] sm:$0xff] }
 0x218   :  { %4477 = vmatprep.subr.bf16.mxu0 %v2403_v12  ;;  %v15446_v22 = vpop.f32.mrb[156].mxu0  ;;  %v15448_v23 = vpop.f32.mrb[156].mxu1  ;;  %v2404_v15 = vmax.bf16 %v20642_v42, %v20762_v38  ;;  %v2409_v35 = vmax.bf16 %v20642_v42, %v20764_v30  ;;  %v20766_v8 = vpack.c.bf16 %v14814_v49, %v14803_v44  ;;  %v20767_v12 = vpack.c.bf16 %v14847_v32, %v14839_v2  ;;  %v2618_v44 = vld [vmem:[%s20087_s3 + $0x120] sm:$0xff]  ;;  %v20797_v30 = vld [vmem:[#allocation20_spill] sm:$0xff] }
 0x219   :  { %5889 = vmatprep.subr.bf16.mxu1 %v2405_v41  ;;  %v15458_v61 = vpop.f32.mrb[157].mxu0  ;;  %v15460_v14 = vpop.f32.mrb[157].mxu1  ;;  %v2406_v1 = vmax.bf16 %v20642_v42, %v20765_v28  ;;  %v20768_v41 = vpack.c.bf16 %v14849_v45, %v14841_v3  ;;  %v12706_v2 = vcombine.low %v2606_v17, %v2610_v18  ;;  %v20769_v3 = vpack.c.bf16 %v14843_v6, %v14832_v60  ;;  %v20772_v18 = vld [vmem:[#allocation8_spill] sm:$0xff] }
 0x21a   :  { %v15470_v53 = vpop.f32.mrb[158].mxu0  ;;  %v15472_v31 = vpop.f32.mrb[158].mxu1  ;;  %v2408_v11 = vmax.bf16 %v20642_v42, %v20766_v8  ;;  %v2411_v7 = vmax.bf16 %v20642_v42, %v20767_v12  ;;  %v20770_v45 = vpack.c.bf16 %v14845_v19, %v14834_v63  ;;  %v20774_v60 = vpack.c.bf16 %v20772_v18, %v20773_v9  ;;  %v20776_v8 = vld [vmem:[#allocation3_spill] sm:$0xff]  ;;  %v20785_v18 = vld [vmem:[#allocation12_spill] sm:$0xff] }
 0x21b   :  { %4478 = vmatpush1.bf16.msra.mxu0 %v2402_v37  ;;  %5890 = vmatpush1.bf16.msra.mxu1 %v2404_v15  ;;  %v15478_v46 = vpop.f32.mrb[159].mxu0  ;;  %v15480_v50 = vpop.f32.mrb[159].mxu1  ;;  %v2410_v32 = vmax.bf16 %v20642_v42, %v20769_v3  ;;  %v12715_v15 = vcombine.high %v2614_v43, %v2618_v44 }
 0x21c   :  { %4479 = vmatprep.subr.bf16.mxu0 %v2407_v52  ;;  %5891 = vmatprep.subr.bf16.mxu1 %v2409_v35  ;;  %v2412_v34 = vmax.bf16 %v20642_v42, %v20770_v45  ;;  %v2417_v6 = vmax.bf16 %v20642_v42, %v20774_v60  ;;  %v20782_v45 = vld [vmem:[#allocation11_spill] sm:$0xff] }
 0x21d   :  { %4171 = vmatmul.mubr.bf16.gmra.mrb[8].mxu0 %v12698_v33  ;;  %5583 = vmatmul.mubr.bf16.gmra.mrb[8].mxu1 %v12698_v33  ;;  %v2413_v33 = vmax.bf16 %v20642_v42, %v20768_v41  ;;  %v20779_v41 = vld [vmem:[#allocation4_spill] sm:$0xff]  ;;  %v2622_v60 = vld [vmem:[%s20087_s3 + $0x140] sm:$0xff] }
 0x21e   :  { %4180 = vmatprep.mubr.bf16.mxu0 %v12707_v4  ;;  %5592 = vmatprep.mubr.bf16.mxu1 %v12707_v4  ;;  %v20771_v4 = vpack.c.bf16 %v14878_v0, %v14870_v59 }
 0x21f   :  { %4480 = vmatpush1.bf16.msra.mxu0 %v2406_v1  ;;  %5892 = vmatpush1.bf16.msra.mxu1 %v2408_v11  ;;  %v20775_v1 = vld [vmem:[#allocation6_spill] sm:$0xff] }
 0x220   :  { %4481 = vmatprep.subr.bf16.mxu0 %v2411_v7  ;;  %5893 = vmatprep.subr.bf16.mxu1 %v2413_v33  ;;  %v15508_v48 = vpop.f32.mrb[160].mxu0  ;;  %v15510_v49 = vpop.f32.mrb[160].mxu1  ;;  %v2415_v17 = vmax.bf16 %v20642_v42, %v20771_v4  ;;  %v20777_v11 = vpack.c.bf16 %v20775_v1, %v20776_v8  ;;  %v20778_v7 = vld [vmem:[#allocation7_spill] sm:$0xff]  ;;  %v12714_v8 = vcombine.low %v2614_v43, %v2618_v44  ;;  %v20796_v44 = vld [vmem:[#allocation24_spill] sm:$0xff] }
 0x221   :  { %v15520_v37 = vpop.f32.mrb[161].mxu0  ;;  %v15522_v38 = vpop.f32.mrb[161].mxu1  ;;  %v20780_v33 = vpack.c.bf16 %v20778_v7, %v20779_v41  ;;  %v20788_v7 = vld [vmem:[#allocation9_spill] sm:$0xff] }
 0x222   :  { %v15532_v52 = vpop.f32.mrb[162].mxu0  ;;  %v15534_v63 = vpop.f32.mrb[162].mxu1  ;;  %v2414_v12 = vmax.bf16 %v20642_v42, %v20777_v11  ;;  %v20787_v11 = vld [vmem:[#allocation13_spill] sm:$0xff] }
 0x223   :  { %4482 = vmatpush1.bf16.msra.mxu0 %v2410_v32  ;;  %5894 = vmatpush1.bf16.msra.mxu1 %v2412_v34  ;;  %v15540_v59 = vpop.f32.mrb[163].mxu0  ;;  %v15542_v0 = vpop.f32.mrb[163].mxu1  ;;  %v2416_v3 = vmax.bf16 %v20642_v42, %v20780_v33  ;;  %v20781_v32 = vld [vmem:[#allocation15_spill] sm:$0xff]  ;;  %v20789_v41 = vpack.c.bf16 %v20787_v11, %v20788_v7  ;;  %v20798_v11 = vpack.c.bf16 %v20796_v44, %v20797_v30 }
 0x224   :  { %4483 = vmatprep.subr.bf16.mxu0 %v2415_v17  ;;  %5895 = vmatprep.subr.bf16.mxu1 %v2417_v6  ;;  %v20783_v34 = vpack.c.bf16 %v20781_v32, %v20782_v45  ;;  %v20784_v17 = vld [vmem:[#allocation16_spill] sm:$0xff]  ;;  %v2626_v6 = vld [vmem:[%s20087_s3 + $0x160] sm:$0xff] }
 0x225   :  { %4181 = vmatmul.mubr.bf16.gmra.mrb[12].mxu0 %v12706_v2  ;;  %5593 = vmatmul.mubr.bf16.gmra.mrb[12].mxu1 %v12706_v2  ;;  %v20786_v2 = vpack.c.bf16 %v20784_v17, %v20785_v18  ;;  %v2418_v33 = vmax.bf16 %v20642_v42, %v20789_v41  ;;  %v20790_v32 = vld [vmem:[#allocation14_spill] sm:$0xff]  ;;  %v2425_v7 = vmax.bf16 %v20642_v42, %v20798_v11 }
 0x226   :  { %4190 = vmatprep.mubr.bf16.mxu0 %v12715_v15  ;;  %5602 = vmatprep.mubr.bf16.mxu1 %v12715_v15  ;;  %v2419_v4 = vmax.bf16 %v20642_v42, %v20783_v34  ;;  %v20791_v45 = vld [vmem:[#allocation10_spill] sm:$0xff] }
 0x227   :  { %v2421_v9 = vmax.bf16 %v20642_v42, %v20786_v2  ;;  %4484 = vmatpush1.bf16.msra.mxu0 %v2414_v12  ;;  %5896 = vmatpush1.bf16.msra.mxu1 %v2416_v3  ;;  %v20792_v34 = vpack.c.bf16 %v20790_v32, %v20791_v45  ;;  %v12723_v3 = vcombine.high %v2622_v60, %v2626_v6  ;;  %v20794_v2 = vld [vmem:[#allocation19_spill] sm:$0xff]  ;;  %v20803_v45 = vld [vmem:[#allocation18_spill] sm:$0xff] }
 0x228   :  { %4485 = vmatprep.subr.bf16.mxu0 %v2419_v4  ;;  %v15570_v15 = vpop.f32.mrb[164].mxu0  ;;  %v15572_v1 = vpop.f32.mrb[164].mxu1  ;;  %v20793_v4 = vld [vmem:[#allocation23_spill] sm:$0xff] }
 0x229   :  { %5897 = vmatprep.subr.bf16.mxu1 %v2421_v9  ;;  %v2420_v17 = vmax.bf16 %v20642_v42, %v20792_v34  ;;  %v15582_v18 = vpop.f32.mrb[165].mxu0  ;;  %v15584_v12 = vpop.f32.mrb[165].mxu1  ;;  %v20795_v9 = vpack.c.bf16 %v20793_v4, %v20794_v2  ;;  %v20802_v34 = vld [vmem:[#allocation22_spill] sm:$0xff] }
 0x22a   :  { %v15594_v41 = vpop.f32.mrb[166].mxu0  ;;  %v15596_v32 = vpop.f32.mrb[166].mxu1  ;;  %v20804_v19 = vpack.c.bf16 %v20802_v34, %v20803_v45  ;;  %v12722_v34 = vcombine.low %v2622_v60, %v2626_v6  ;;  %v20823_v6 = vld [vmem:[#allocation40_spill] sm:$0xff] }
 0x22b   :  { %v2423_v43 = vmax.bf16 %v20642_v42, %v20795_v9  ;;  %4486 = vmatpush1.bf16.msra.mxu0 %v2418_v33  ;;  %5898 = vmatpush1.bf16.msra.mxu1 %v2420_v17  ;;  %v15602_v4 = vpop.f32.mrb[167].mxu0  ;;  %v15604_v2 = vpop.f32.mrb[167].mxu1  ;;  %v20799_v33 = vld [vmem:[#allocation21_spill] sm:$0xff]  ;;  %v20808_v9 = vld [vmem:[#allocation32_spill] sm:$0xff] }
 0x22c   :  { %5899 = vmatprep.subr.bf16.mxu1 %v2425_v7  ;;  %v20800_v17 = vld [vmem:[#allocation17_spill] sm:$0xff]  ;;  %v2424_v28 = vmax.bf16 %v20642_v42, %v20804_v19  ;;  %v20806_v7 = vld [vmem:[#allocation27_spill] sm:$0xff] }
 0x22d   :  { %4487 = vmatprep.subr.bf16.mxu0 %v2423_v43  ;;  %4191 = vmatmul.mubr.bf16.gmra.mrb[16].mxu0 %v12714_v8  ;;  %v20801_v44 = vpack.c.bf16 %v20799_v33, %v20800_v17  ;;  %v20805_v43 = vld [vmem:[#allocation31_spill] sm:$0xff] }
 0x22e   :  { %5603 = vmatmul.mubr.bf16.gmra.mrb[16].mxu1 %v12714_v8  ;;  %4200 = vmatprep.mubr.bf16.mxu0 %v12723_v3  ;;  %v20807_v30 = vpack.c.bf16 %v20805_v43, %v20806_v7  ;;  %v20810_v8 = vpack.c.bf16 %v20808_v9, %v20809_v26  ;;  %v2630_v33 = vld [vmem:[%s20087_s3 + $0x180] sm:$0xff]  ;;  %v20813_v26 = vld [vmem:[#allocation29_spill] sm:$0xff] }
 0x22f   :  { %v2422_v11 = vmax.bf16 %v20642_v42, %v20801_v44  ;;  %5612 = vmatprep.mubr.bf16.mxu1 %v12723_v3  ;;  %v2634_v19 = vld [vmem:[%s20087_s3 + $0x1a0] sm:$0xff]  ;;  %5900 = vmatpush1.bf16.msra.mxu1 %v2424_v28 }
 0x230   :  { %v2427_v35 = vmax.bf16 %v20642_v42, %v20807_v30  ;;  %v2429_v36 = vmax.bf16 %v20642_v42, %v20810_v8  ;;  %v15632_v3 = vpop.f32.mrb[168].mxu0  ;;  %v15634_v45 = vpop.f32.mrb[168].mxu1  ;;  %v20814_v30 = vld [vmem:[#allocation25_spill] sm:$0xff]  ;;  %v20816_v44 = vld [vmem:[#allocation30_spill] sm:$0xff] }
 0x231   :  { %4488 = vmatpush1.bf16.msra.mxu0 %v2422_v11  ;;  %20811 = vst [vmem:[#allocation8_spill] sm:$0xff] %v15632_v3  ;;  %20812 = vst [vmem:[#allocation5_spill] sm:$0xff] %v15634_v45  ;;  %v20815_v9 = vpack.c.bf16 %v20813_v26, %v20814_v30  ;;  %v20817_v43 = vld [vmem:[#allocation26_spill] sm:$0xff]  ;;  %v15644_v51 = vpop.f32.mrb[169].mxu0  ;;  %v15646_v28 = vpop.f32.mrb[169].mxu1  ;;  %v20821_v11 = vld [vmem:[#allocation35_spill] sm:$0xff]  ;;  %v20825_v26 = vpack.c.bf16 %v20823_v6, %v20824_v54 }
 0x232   :  { %4489 = vmatprep.subr.bf16.mxu0 %v2427_v35  ;;  %5901 = vmatprep.subr.bf16.mxu1 %v2429_v36  ;;  %v20818_v7 = vpack.c.bf16 %v20816_v44, %v20817_v43  ;;  %20819 = vst [vmem:[#allocation6_spill] sm:$0xff] %v15646_v28  ;;  %v12731_v36 = vcombine.high %v2630_v33, %v2634_v19  ;;  %v20820_v35 = vld [vmem:[#allocation39_spill] sm:$0xff]  ;;  %v15658_v44 = vpop.f32.mrb[170].mxu1  ;;  %v20832_v43 = vld [vmem:[#allocation34_spill] sm:$0xff]  ;;  %v20838_v45 = vld [vmem:[#allocation44_spill] sm:$0xff] }
 0x233   :  { %v2426_v17 = vmax.bf16 %v20642_v42, %v20815_v9  ;;  %v20822_v47 = vpack.c.bf16 %v20820_v35, %v20821_v11  ;;  %v2433_v30 = vmax.bf16 %v20642_v42, %v20825_v26  ;;  %v15656_v9 = vpop.f32.mrb[170].mxu0  ;;  %20827 = vst [vmem:[#allocation7_spill] sm:$0xff] %v15658_v44  ;;  %v20837_v11 = vld [vmem:[#allocation48_spill] sm:$0xff] }
 0x234   :  { %v2428_v8 = vmax.bf16 %v20642_v42, %v20818_v7  ;;  %20826 = vst [vmem:[#allocation3_spill] sm:$0xff] %v15656_v9  ;;  %v15664_v35 = vpop.f32.mrb[171].mxu0  ;;  %v20831_v7 = vld [vmem:[#allocation38_spill] sm:$0xff]  ;;  %v20854_v28 = vld [vmem:[#allocation52_spill] sm:$0xff] }
 0x235   :  { %v2431_v60 = vmax.bf16 %v20642_v42, %v20822_v47  ;;  %4490 = vmatpush1.bf16.msra.mxu0 %v2426_v17  ;;  %v15666_v47 = vpop.f32.mrb[171].mxu1  ;;  %v20828_v17 = vld [vmem:[#allocation37_spill] sm:$0xff]  ;;  %v20833_v10 = vpack.c.bf16 %v20831_v7, %v20832_v43  ;;  %v12730_v7 = vcombine.low %v2630_v33, %v2634_v19  ;;  %v20853_v19 = vld [vmem:[#allocation56_spill] sm:$0xff] }
 0x236   :  { %5902 = vmatpush1.bf16.msra.mxu1 %v2428_v8  ;;  %4201 = vmatmul.mubr.bf16.gmra.mrb[20].mxu0 %v12722_v34  ;;  %v20829_v8 = vld [vmem:[#allocation33_spill] sm:$0xff] }
 0x237   :  { %4491 = vmatprep.subr.bf16.mxu0 %v2431_v60  ;;  %5903 = vmatprep.subr.bf16.mxu1 %v2433_v30  ;;  %v20830_v6 = vpack.c.bf16 %v20828_v17, %v20829_v8  ;;  %v2432_v25 = vmax.bf16 %v20642_v42, %v20833_v10  ;;  %v20834_v60 = vld [vmem:[#allocation47_spill] sm:$0xff] }
 0x238   :  { %5613 = vmatmul.mubr.bf16.gmra.mrb[20].mxu1 %v12722_v34  ;;  %4210 = vmatprep.mubr.bf16.mxu0 %v12731_v36  ;;  %v20835_v30 = vld [vmem:[#allocation43_spill] sm:$0xff]  ;;  %v20839_v34 = vpack.c.bf16 %v20837_v11, %v20838_v45  ;;  %v15696_v43 = vpop.f32.mrb[172].mxu1  ;;  %v20842_v45 = vld [vmem:[#allocation45_spill] sm:$0xff] }
 0x239   :  { %v2430_v26 = vmax.bf16 %v20642_v42, %v20830_v6  ;;  %5622 = vmatprep.mubr.bf16.mxu1 %v12731_v36  ;;  %v20836_v54 = vpack.c.bf16 %v20834_v60, %v20835_v30  ;;  %v2638_v17 = vld [vmem:[%s20087_s3 + $0x1c0] sm:$0xff]  ;;  %v15694_v36 = vpop.f32.mrb[172].mxu0  ;;  %20841 = vst [vmem:[#allocation15_spill] sm:$0xff] %v15696_v43 }
 0x23a   :  { %v2437_v44 = vmax.bf16 %v20642_v42, %v20839_v34  ;;  %v2642_v10 = vld [vmem:[%s20087_s3 + $0x1e0] sm:$0xff]  ;;  %5904 = vmatpush1.bf16.msra.mxu1 %v2432_v25  ;;  %20840 = vst [vmem:[#allocation4_spill] sm:$0xff] %v15694_v36  ;;  %v15706_v3 = vpop.f32.mrb[173].mxu0  ;;  %v15708_v25 = vpop.f32.mrb[173].mxu1 }
 0x23b   :  { %v2435_v21 = vmax.bf16 %v20642_v42, %v20836_v54  ;;  %4492 = vmatpush1.bf16.msra.mxu0 %v2430_v26  ;;  %v20843_v54 = vld [vmem:[#allocation41_spill] sm:$0xff]  ;;  %v20845_v6 = vld [vmem:[#allocation46_spill] sm:$0xff]  ;;  %20848 = vst [vmem:[#allocation11_spill] sm:$0xff] %v15706_v3  ;;  %20849 = vst [vmem:[#allocation16_spill] sm:$0xff] %v15708_v25 }
 0x23c   :  { %5905 = vmatprep.subr.bf16.mxu1 %v2437_v44  ;;  %v20844_v11 = vpack.c.bf16 %v20842_v45, %v20843_v54  ;;  %v20846_v60 = vld [vmem:[#allocation42_spill] sm:$0xff]  ;;  %v20850_v44 = vld [vmem:[#allocation55_spill] sm:$0xff]  ;;  %v20855_v45 = vpack.c.bf16 %v20853_v19, %v20854_v28 }
 0x23d   :  { %4493 = vmatprep.subr.bf16.mxu0 %v2435_v21  ;;  %v20847_v30 = vpack.c.bf16 %v20845_v6, %v20846_v60  ;;  %v12739_v21 = vcombine.high %v2638_v17, %v2642_v10  ;;  %v20851_v26 = vld [vmem:[#allocation51_spill] sm:$0xff]  ;;  %v15720_v6 = vpop.f32.mrb[174].mxu1  ;;  %v20864_v60 = vld [vmem:[#allocation50_spill] sm:$0xff] }
 0x23e   :  { %v2434_v8 = vmax.bf16 %v20642_v42, %v20844_v11  ;;  %v20852_v9 = vpack.c.bf16 %v20850_v44, %v20851_v26  ;;  %v2441_v54 = vmax.bf16 %v20642_v42, %v20855_v45  ;;  %v15718_v11 = vpop.f32.mrb[174].mxu0  ;;  %20857 = vst [vmem:[#allocation13_spill] sm:$0xff] %v15720_v6  ;;  %4211 = vmatmul.mubr.bf16.gmra.mrb[24].mxu0 %v12730_v7  ;;  %v20869_v26 = vld [vmem:[#allocation64_spill] sm:$0xff] }
 0x23f   :  { %v2436_v34 = vmax.bf16 %v20642_v42, %v20847_v30  ;;  %20856 = vst [vmem:[#allocation12_spill] sm:$0xff] %v15718_v11  ;;  %v15726_v44 = vpop.f32.mrb[175].mxu0  ;;  %v20863_v30 = vld [vmem:[#allocation54_spill] sm:$0xff]  ;;  %4220 = vmatprep.mubr.bf16.mxu0 %v12739_v21  ;;  %v20870_v11 = vld [vmem:[#allocation60_spill] sm:$0xff] }
 0x240   :  { %v2439_v33 = vmax.bf16 %v20642_v42, %v20852_v9  ;;  %4494 = vmatpush1.bf16.msra.mxu0 %v2434_v8  ;;  %20858 = vst [vmem:[#allocation9_spill] sm:$0xff] %v15726_v44  ;;  %v15728_v9 = vpop.f32.mrb[175].mxu1  ;;  %5623 = vmatmul.mubr.bf16.gmra.mrb[24].mxu1 %v12730_v7  ;;  %v20860_v8 = vld [vmem:[#allocation53_spill] sm:$0xff]  ;;  %v20865_v43 = vpack.c.bf16 %v20863_v30, %v20864_v60  ;;  %v20886_v44 = vld [vmem:[#allocation68_spill] sm:$0xff] }
 0x241   :  { %5906 = vmatpush1.bf16.msra.mxu1 %v2436_v34  ;;  %20859 = vst [vmem:[#allocation14_spill] sm:$0xff] %v15728_v9  ;;  %v20861_v34 = vld [vmem:[#allocation49_spill] sm:$0xff]  ;;  %5632 = vmatprep.mubr.bf16.mxu1 %v12739_v21  ;;  %v20871_v7 = vpack.c.bf16 %v20869_v26, %v20870_v11  ;;  %v15756_v21 = vpop.f32.mrb[176].mxu0  ;;  %v15758_v60 = vpop.f32.mrb[176].mxu1  ;;  %v12738_v30 = vcombine.low %v2638_v17, %v2642_v10  ;;  %v20885_v10 = vld [vmem:[#allocation72_spill] sm:$0xff] }
 0x242   :  { %4495 = vmatprep.subr.bf16.mxu0 %v2439_v33  ;;  %5907 = vmatprep.subr.bf16.mxu1 %v2441_v54  ;;  %v20862_v19 = vpack.c.bf16 %v20860_v8, %v20861_v34  ;;  %v2440_v6 = vmax.bf16 %v20642_v42, %v20865_v43  ;;  %v20866_v33 = vld [vmem:[#allocation63_spill] sm:$0xff]  ;;  %20872 = vst [vmem:[#allocation10_spill] sm:$0xff] %v15756_v21  ;;  %20873 = vst [vmem:[#allocation23_spill] sm:$0xff] %v15758_v60  ;;  %v20874_v11 = vld [vmem:[#allocation61_spill] sm:$0xff]  ;;  %v15768_v9 = vpop.f32.mrb[177].mxu0 }
 0x243   :  { %v20867_v54 = vld [vmem:[#allocation59_spill] sm:$0xff]  ;;  %v2445_v25 = vmax.bf16 %v20642_v42, %v20871_v7  ;;  %20880 = vst [vmem:[#allocation19_spill] sm:$0xff] %v15768_v9 }
 0x244   :  { %v2438_v45 = vmax.bf16 %v20642_v42, %v20862_v19  ;;  %v20868_v28 = vpack.c.bf16 %v20866_v33, %v20867_v54  ;;  %v2646_v8 = vld [vmem:[%s20087_s3 + $0x200] sm:$0xff] }
 0x245   :  { %v2650_v43 = vld [vmem:[%s20087_s3 + $0x220] sm:$0xff]  ;;  %5908 = vmatpush1.bf16.msra.mxu1 %v2440_v6  ;;  %v15770_v6 = vpop.f32.mrb[177].mxu1 }
 0x246   :  { %v2443_v36 = vmax.bf16 %v20642_v42, %v20868_v28  ;;  %4496 = vmatpush1.bf16.msra.mxu0 %v2438_v45  ;;  %5909 = vmatprep.subr.bf16.mxu1 %v2445_v25  ;;  %v20875_v28 = vld [vmem:[#allocation57_spill] sm:$0xff]  ;;  %v20877_v19 = vld [vmem:[#allocation62_spill] sm:$0xff]  ;;  %20881 = vst [vmem:[#allocation24_spill] sm:$0xff] %v15770_v6  ;;  %v20882_v25 = vld [vmem:[#allocation71_spill] sm:$0xff] }
 0x247   :  { %v20876_v26 = vpack.c.bf16 %v20874_v11, %v20875_v28  ;;  %v20878_v33 = vld [vmem:[#allocation58_spill] sm:$0xff]  ;;  %v20883_v45 = vld [vmem:[#allocation67_spill] sm:$0xff]  ;;  %v20887_v11 = vpack.c.bf16 %v20885_v10, %v20886_v44  ;;  %4221 = vmatmul.mubr.bf16.gmra.mrb[28].mxu0 %v12738_v30 }
 0x248   :  { %4497 = vmatprep.subr.bf16.mxu0 %v2443_v36  ;;  %v20879_v54 = vpack.c.bf16 %v20877_v19, %v20878_v33  ;;  %v12747_v36 = vcombine.high %v2646_v8, %v2650_v43  ;;  %v20884_v3 = vpack.c.bf16 %v20882_v25, %v20883_v45  ;;  %v15782_v19 = vpop.f32.mrb[178].mxu1  ;;  %5633 = vmatmul.mubr.bf16.gmra.mrb[28].mxu1 %v12738_v30  ;;  %v20896_v33 = vld [vmem:[#allocation66_spill] sm:$0xff]  ;;  %v20901_v45 = vld [vmem:[#allocation80_spill] sm:$0xff] }
 0x249   :  { %v2442_v34 = vmax.bf16 %v20642_v42, %v20876_v26  ;;  %v2449_v28 = vmax.bf16 %v20642_v42, %v20887_v11  ;;  %v15780_v26 = vpop.f32.mrb[178].mxu0  ;;  %20889 = vst [vmem:[#allocation21_spill] sm:$0xff] %v15782_v19 }
 0x24a   :  { %v2444_v7 = vmax.bf16 %v20642_v42, %v20879_v54  ;;  %v2447_v17 = vmax.bf16 %v20642_v42, %v20884_v3  ;;  %20888 = vst [vmem:[#allocation20_spill] sm:$0xff] %v15780_v26  ;;  %v15788_v25 = vpop.f32.mrb[179].mxu0  ;;  %v15790_v3 = vpop.f32.mrb[179].mxu1  ;;  %v20895_v54 = vld [vmem:[#allocation70_spill] sm:$0xff]  ;;  %4230 = vmatprep.mubr.bf16.mxu0 %v12747_v36  ;;  %5642 = vmatprep.mubr.bf16.mxu1 %v12747_v36  ;;  %v20902_v26 = vld [vmem:[#allocation76_spill] sm:$0xff] }
 0x24b   :  { %4498 = vmatpush1.bf16.msra.mxu0 %v2442_v34  ;;  %20890 = vst [vmem:[#allocation17_spill] sm:$0xff] %v15788_v25  ;;  %20891 = vst [vmem:[#allocation22_spill] sm:$0xff] %v15790_v3  ;;  %v20892_v34 = vld [vmem:[#allocation69_spill] sm:$0xff]  ;;  %v20897_v60 = vpack.c.bf16 %v20895_v54, %v20896_v33  ;;  %v20903_v30 = vpack.c.bf16 %v20901_v45, %v20902_v26  ;;  %v15818_v36 = vpop.f32.mrb[180].mxu0  ;;  %v15820_v33 = vpop.f32.mrb[180].mxu1  ;;  %v12746_v54 = vcombine.low %v2646_v8, %v2650_v43  ;;  %v20916_v43 = vld [vmem:[#allocation88_spill] sm:$0xff] }
 0x24c   :  { %5910 = vmatpush1.bf16.msra.mxu1 %v2444_v7  ;;  %4499 = vmatprep.subr.bf16.mxu0 %v2447_v17  ;;  %v20893_v7 = vld [vmem:[#allocation65_spill] sm:$0xff]  ;;  %v20898_v17 = vld [vmem:[#allocation79_spill] sm:$0xff]  ;;  %20904 = vst [vmem:[#allocation18_spill] sm:$0xff] %v15818_v36  ;;  %20905 = vst [vmem:[#allocation31_spill] sm:$0xff] %v15820_v33  ;;  %v15830_v3 = vpop.f32.mrb[181].mxu0 }
 0x24d   :  { %5911 = vmatprep.subr.bf16.mxu1 %v2449_v28  ;;  %v20894_v10 = vpack.c.bf16 %v20892_v34, %v20893_v7  ;;  %v2448_v19 = vmax.bf16 %v20642_v42, %v20897_v60  ;;  %v20899_v28 = vld [vmem:[#allocation75_spill] sm:$0xff]  ;;  %v2453_v6 = vmax.bf16 %v20642_v42, %v20903_v30  ;;  %v20906_v26 = vld [vmem:[#allocation77_spill] sm:$0xff]  ;;  %v20917_v25 = vld [vmem:[#allocation84_spill] sm:$0xff] }
 0x24e   :  { %v20900_v44 = vpack.c.bf16 %v20898_v17, %v20899_v28  ;;  %v2654_v34 = vld [vmem:[%s20087_s3 + $0x240] sm:$0xff]  ;;  %v21075_v36 = vld [vmem:[#allocation96_spill] sm:$0xff] }
 0x24f   :  { %v2446_v11 = vmax.bf16 %v20642_v42, %v20894_v10  ;;  %v2658_v60 = vld [vmem:[%s20087_s3 + $0x260] sm:$0xff]  ;;  %4231 = vmatmul.mubr.bf16.gmra.mrb[32].mxu0 %v12746_v54 }
 0x250   :  { %v2451_v21 = vmax.bf16 %v20642_v42, %v20900_v44  ;;  %5912 = vmatpush1.bf16.msra.mxu1 %v2448_v19  ;;  %v20907_v44 = vld [vmem:[#allocation73_spill] sm:$0xff]  ;;  %v20909_v10 = vld [vmem:[#allocation78_spill] sm:$0xff]  ;;  %v15832_v19 = vpop.f32.mrb[181].mxu1 }
 0x251   :  { %4500 = vmatpush1.bf16.msra.mxu0 %v2446_v11  ;;  %5913 = vmatprep.subr.bf16.mxu1 %v2453_v6  ;;  %v20908_v45 = vpack.c.bf16 %v20906_v26, %v20907_v44  ;;  %v20910_v17 = vld [vmem:[#allocation74_spill] sm:$0xff]  ;;  %20912 = vst [vmem:[#allocation27_spill] sm:$0xff] %v15832_v19  ;;  %v20913_v6 = vld [vmem:[#allocation87_spill] sm:$0xff]  ;;  %v20918_v26 = vpack.c.bf16 %v20916_v43, %v20917_v25 }
 0x252   :  { %4501 = vmatprep.subr.bf16.mxu0 %v2451_v21  ;;  %v20911_v28 = vpack.c.bf16 %v20909_v10, %v20910_v17  ;;  %v12755_v21 = vcombine.high %v2654_v34, %v2658_v60  ;;  %v20914_v11 = vld [vmem:[#allocation83_spill] sm:$0xff]  ;;  %v15844_v10 = vpop.f32.mrb[182].mxu1  ;;  %5643 = vmatmul.mubr.bf16.gmra.mrb[32].mxu1 %v12746_v54 }
 0x253   :  { %v2450_v7 = vmax.bf16 %v20642_v42, %v20908_v45  ;;  %v20915_v9 = vpack.c.bf16 %v20913_v6, %v20914_v11  ;;  %v2457_v44 = vmax.bf16 %v20642_v42, %v20918_v26  ;;  %v15842_v45 = vpop.f32.mrb[182].mxu0  ;;  %20920 = vst [vmem:[#allocation28_spill] sm:$0xff] %v15844_v10  ;;  %v12754_v26 = vcombine.low %v2654_v34, %v2658_v60  ;;  %v2670_v11 = vld [vmem:[%s20087_s3 + $0x2c0] sm:$0xff] }
 0x254   :  { %v2452_v30 = vmax.bf16 %v20642_v42, %v20911_v28  ;;  %20919 = vst [vmem:[#allocation32_spill] sm:$0xff] %v15842_v45  ;;  %v15850_v6 = vpop.f32.mrb[183].mxu0  ;;  %4240 = vmatprep.mubr.bf16.mxu0 %v12755_v21  ;;  %5652 = vmatprep.mubr.bf16.mxu1 %v12755_v21  ;;  %v2674_v25 = vld [vmem:[%s20087_s3 + $0x2e0] sm:$0xff]  ;;  %v21076_v45 = vld [vmem:[#allocation92_spill] sm:$0xff] }
 0x255   :  { %v2455_v8 = vmax.bf16 %v20642_v42, %v20915_v9  ;;  %4502 = vmatpush1.bf16.msra.mxu0 %v2450_v7  ;;  %v15852_v9 = vpop.f32.mrb[183].mxu1  ;;  %v2662_v7 = vld [vmem:[%s20087_s3 + $0x280] sm:$0xff]  ;;  %v21077_v19 = vpack.c.bf16 %v21075_v36, %v21076_v45 }
 0x256   :  { %5914 = vmatpush1.bf16.msra.mxu1 %v2452_v30  ;;  %20921 = vst [vmem:[#allocation29_spill] sm:$0xff] %v15852_v9  ;;  %v2666_v30 = vld [vmem:[%s20087_s3 + $0x2a0] sm:$0xff]  ;;  %v15866_v43 = vpop.f32.mrb[184].mxu1 }
 0x257   :  { %4824 = vmatprep.subr.bf16.mxu0 %v2455_v8  ;;  %6236 = vmatprep.subr.bf16.mxu1 %v2457_v44  ;;  %v15864_v8 = vpop.f32.mrb[184].mxu0  ;;  %20923 = vst [vmem:[#allocation30_spill] sm:$0xff] %v15866_v43  ;;  %v15870_v28 = vpop.f32.mrb[185].mxu1  ;;  %v12763_v54 = vcombine.high %v2662_v7, %v2666_v30  ;;  %v12762_v34 = vcombine.low %v2662_v7, %v2666_v30  ;;  %v21085_v36 = vld [vmem:[#allocation99_spill] sm:$0xff] }
 0x258   :  { %20922 = vst [vmem:[#allocation25_spill] sm:$0xff] %v15864_v8  ;;  %v15868_v44 = vpop.f32.mrb[185].mxu0  ;;  %20925 = vst [vmem:[#allocation39_spill] sm:$0xff] %v15870_v28  ;;  %v15874_v21 = vpop.f32.mrb[186].mxu1  ;;  %4241 = vmatmul.mubr.bf16.gmra.mrb[36].mxu0 %v12754_v26  ;;  %v2678_v28 = vld [vmem:[%s20087_s3 + $0x300] sm:$0xff]  ;;  %v12770_v7 = vcombine.low %v2670_v11, %v2674_v25 }
 0x259   :  { %20924 = vst [vmem:[#allocation26_spill] sm:$0xff] %v15868_v44  ;;  %v15872_v17 = vpop.f32.mrb[186].mxu0  ;;  %20927 = vst [vmem:[#allocation40_spill] sm:$0xff] %v15874_v21  ;;  %v15882_v10 = vpop.f32.mrb[187].mxu1  ;;  %4250 = vmatprep.mubr.bf16.mxu0 %v12763_v54 }
 0x25a   :  { %20926 = vst [vmem:[#allocation35_spill] sm:$0xff] %v15872_v17  ;;  %v15880_v33 = vpop.f32.mrb[187].mxu0  ;;  %20929 = vst [vmem:[#allocation37_spill] sm:$0xff] %v15882_v10  ;;  %5653 = vmatmul.mubr.bf16.gmra.mrb[36].mxu1 %v12754_v26  ;;  %v15896_v21 = vpop.f32.mrb[188].mxu1  ;;  %v12771_v26 = vcombine.high %v2670_v11, %v2674_v25  ;;  %v2682_v10 = vld [vmem:[%s20087_s3 + $0x320] sm:$0xff] }
 0x25b   :  { %20928 = vst [vmem:[#allocation36_spill] sm:$0xff] %v15880_v33  ;;  %5662 = vmatprep.mubr.bf16.mxu1 %v12763_v54  ;;  %v15894_v43 = vpop.f32.mrb[188].mxu0  ;;  %20931 = vst [vmem:[#allocation38_spill] sm:$0xff] %v15896_v21  ;;  %v15900_v60 = vpop.f32.mrb[189].mxu1  ;;  %v12778_v25 = vcombine.low %v2678_v28, %v2682_v10 }
 0x25c   :  { %20930 = vst [vmem:[#allocation33_spill] sm:$0xff] %v15894_v43  ;;  %v15898_v8 = vpop.f32.mrb[189].mxu0  ;;  %20933 = vst [vmem:[#allocation47_spill] sm:$0xff] %v15900_v60  ;;  %v15904_v54 = vpop.f32.mrb[190].mxu1  ;;  %v2686_v60 = vld [vmem:[%s20087_s3 + $0x340] sm:$0xff] }
 0x25d   :  { %20932 = vst [vmem:[#allocation34_spill] sm:$0xff] %v15898_v8  ;;  %v15902_v17 = vpop.f32.mrb[190].mxu0  ;;  %20935 = vst [vmem:[#allocation48_spill] sm:$0xff] %v15904_v54  ;;  %v15912_v33 = vpop.f32.mrb[191].mxu1 }
 0x25e   :  { %20934 = vst [vmem:[#allocation43_spill] sm:$0xff] %v15902_v17  ;;  %v15910_v44 = vpop.f32.mrb[191].mxu0  ;;  %20937 = vst [vmem:[#allocation45_spill] sm:$0xff] %v15912_v33  ;;  %v2690_v33 = vld [vmem:[%s20087_s3 + $0x360] sm:$0xff] }
 0x25f   :  { %20936 = vst [vmem:[#allocation44_spill] sm:$0xff] %v15910_v44 }
 0x260   :  { %4251 = vmatmul.mubr.bf16.gmra.mrb[40].mxu0 %v12762_v34  ;;  %v15924_v21 = vpop.f32.mrb[192].mxu0  ;;  %v15926_v54 = vpop.f32.mrb[192].mxu1 }
 0x261   :  { %4260 = vmatprep.mubr.bf16.mxu0 %v12771_v26  ;;  %20938 = vst [vmem:[#allocation41_spill] sm:$0xff] %v15924_v21  ;;  %20939 = vst [vmem:[#allocation46_spill] sm:$0xff] %v15926_v54  ;;  %v15928_v43 = vpop.f32.mrb[193].mxu0  ;;  %v15930_v30 = vpop.f32.mrb[193].mxu1 }
 0x262   :  { %5663 = vmatmul.mubr.bf16.gmra.mrb[40].mxu1 %v12762_v34  ;;  %20940 = vst [vmem:[#allocation42_spill] sm:$0xff] %v15928_v43  ;;  %20941 = vst [vmem:[#allocation55_spill] sm:$0xff] %v15930_v30  ;;  %v12779_v34 = vcombine.high %v2678_v28, %v2682_v10  ;;  %v15932_v17 = vpop.f32.mrb[194].mxu0  ;;  %v2694_v30 = vld [vmem:[%s20087_s3 + $0x380] sm:$0xff]  ;;  %v12786_v10 = vcombine.low %v2686_v60, %v2690_v33 }
 0x263   :  { %5672 = vmatprep.mubr.bf16.mxu1 %v12771_v26  ;;  %20942 = vst [vmem:[#allocation51_spill] sm:$0xff] %v15932_v17  ;;  %v15934_v26 = vpop.f32.mrb[194].mxu1  ;;  %v15940_v8 = vpop.f32.mrb[195].mxu0 }
 0x264   :  { %20943 = vst [vmem:[#allocation56_spill] sm:$0xff] %v15934_v26  ;;  %20944 = vst [vmem:[#allocation52_spill] sm:$0xff] %v15940_v8  ;;  %v15942_v44 = vpop.f32.mrb[195].mxu1 }
 0x265   :  { %20945 = vst [vmem:[#allocation53_spill] sm:$0xff] %v15942_v44  ;;  %v2698_v44 = vld [vmem:[%s20087_s3 + $0x3a0] sm:$0xff] }
 0x268   :  { %4261 = vmatmul.mubr.bf16.gmra.mrb[44].mxu0 %v12770_v7  ;;  %v15954_v54 = vpop.f32.mrb[196].mxu0  ;;  %v15956_v26 = vpop.f32.mrb[196].mxu1 }
 0x269   :  { %4270 = vmatprep.mubr.bf16.mxu0 %v12779_v34  ;;  %20946 = vst [vmem:[#allocation49_spill] sm:$0xff] %v15954_v54  ;;  %20947 = vst [vmem:[#allocation54_spill] sm:$0xff] %v15956_v26  ;;  %v15958_v21 = vpop.f32.mrb[197].mxu0  ;;  %v15960_v11 = vpop.f32.mrb[197].mxu1 }
 0x26a   :  { %5673 = vmatmul.mubr.bf16.gmra.mrb[44].mxu1 %v12770_v7  ;;  %20948 = vst [vmem:[#allocation50_spill] sm:$0xff] %v15958_v21  ;;  %20949 = vst [vmem:[#allocation63_spill] sm:$0xff] %v15960_v11  ;;  %v12787_v7 = vcombine.high %v2686_v60, %v2690_v33  ;;  %v15962_v17 = vpop.f32.mrb[198].mxu0  ;;  %v2702_v11 = vld [vmem:[%s20087_s3 + $0x3c0] sm:$0xff]  ;;  %v12794_v33 = vcombine.low %v2694_v30, %v2698_v44 }
 0x26b   :  { %5682 = vmatprep.mubr.bf16.mxu1 %v12779_v34  ;;  %20950 = vst [vmem:[#allocation59_spill] sm:$0xff] %v15962_v17  ;;  %v15964_v34 = vpop.f32.mrb[198].mxu1  ;;  %v15970_v43 = vpop.f32.mrb[199].mxu0 }
 0x26c   :  { %20951 = vst [vmem:[#allocation64_spill] sm:$0xff] %v15964_v34  ;;  %20952 = vst [vmem:[#allocation60_spill] sm:$0xff] %v15970_v43  ;;  %v15972_v8 = vpop.f32.mrb[199].mxu1 }
 0x26d   :  { %20953 = vst [vmem:[#allocation61_spill] sm:$0xff] %v15972_v8  ;;  %v2706_v8 = vld [vmem:[%s20087_s3 + $0x3e0] sm:$0xff] }
 0x270   :  { %4271 = vmatmul.mubr.bf16.gmra.mrb[48].mxu0 %v12778_v25  ;;  %v15984_v26 = vpop.f32.mrb[200].mxu0  ;;  %v15986_v34 = vpop.f32.mrb[200].mxu1 }
 0x271   :  { %4280 = vmatprep.mubr.bf16.mxu0 %v12787_v7  ;;  %20954 = vst [vmem:[#allocation57_spill] sm:$0xff] %v15984_v26  ;;  %20955 = vst [vmem:[#allocation62_spill] sm:$0xff] %v15986_v34  ;;  %v15988_v54 = vpop.f32.mrb[201].mxu0  ;;  %v15990_v28 = vpop.f32.mrb[201].mxu1 }
 0x272   :  { %5683 = vmatmul.mubr.bf16.gmra.mrb[48].mxu1 %v12778_v25  ;;  %20956 = vst [vmem:[#allocation58_spill] sm:$0xff] %v15988_v54  ;;  %20957 = vst [vmem:[#allocation71_spill] sm:$0xff] %v15990_v28  ;;  %v12795_v25 = vcombine.high %v2694_v30, %v2698_v44  ;;  %v15992_v17 = vpop.f32.mrb[202].mxu0  ;;  %v2710_v28 = vld [vmem:[%s20087_s3 + $0x400] sm:$0xff]  ;;  %v12802_v44 = vcombine.low %v2702_v11, %v2706_v8 }
 0x273   :  { %5692 = vmatprep.mubr.bf16.mxu1 %v12787_v7  ;;  %20958 = vst [vmem:[#allocation67_spill] sm:$0xff] %v15992_v17  ;;  %v15994_v7 = vpop.f32.mrb[202].mxu1  ;;  %v16000_v21 = vpop.f32.mrb[203].mxu0 }
 0x274   :  { %20959 = vst [vmem:[#allocation72_spill] sm:$0xff] %v15994_v7  ;;  %20960 = vst [vmem:[#allocation68_spill] sm:$0xff] %v16000_v21  ;;  %v16002_v43 = vpop.f32.mrb[203].mxu1 }
 0x275   :  { %20961 = vst [vmem:[#allocation69_spill] sm:$0xff] %v16002_v43  ;;  %v2714_v43 = vld [vmem:[%s20087_s3 + $0x420] sm:$0xff] }
 0x278   :  { %4281 = vmatmul.mubr.bf16.gmra.mrb[52].mxu0 %v12786_v10  ;;  %v16014_v34 = vpop.f32.mrb[204].mxu0  ;;  %v16016_v7 = vpop.f32.mrb[204].mxu1 }
 0x279   :  { %4290 = vmatprep.mubr.bf16.mxu0 %v12795_v25  ;;  %20962 = vst [vmem:[#allocation65_spill] sm:$0xff] %v16014_v34  ;;  %20963 = vst [vmem:[#allocation70_spill] sm:$0xff] %v16016_v7  ;;  %v16018_v26 = vpop.f32.mrb[205].mxu0  ;;  %v16020_v60 = vpop.f32.mrb[205].mxu1 }
 0x27a   :  { %5693 = vmatmul.mubr.bf16.gmra.mrb[52].mxu1 %v12786_v10  ;;  %20964 = vst [vmem:[#allocation66_spill] sm:$0xff] %v16018_v26  ;;  %20965 = vst [vmem:[#allocation79_spill] sm:$0xff] %v16020_v60  ;;  %v12803_v10 = vcombine.high %v2702_v11, %v2706_v8  ;;  %v16022_v17 = vpop.f32.mrb[206].mxu0  ;;  %v2718_v60 = vld [vmem:[%s20087_s3 + $0x440] sm:$0xff]  ;;  %v12810_v8 = vcombine.low %v2710_v28, %v2714_v43 }
 0x27b   :  { %5702 = vmatprep.mubr.bf16.mxu1 %v12795_v25  ;;  %20966 = vst [vmem:[#allocation75_spill] sm:$0xff] %v16022_v17  ;;  %v16024_v25 = vpop.f32.mrb[206].mxu1  ;;  %v16030_v54 = vpop.f32.mrb[207].mxu0 }
 0x27c   :  { %20967 = vst [vmem:[#allocation80_spill] sm:$0xff] %v16024_v25  ;;  %20968 = vst [vmem:[#allocation76_spill] sm:$0xff] %v16030_v54  ;;  %v16032_v21 = vpop.f32.mrb[207].mxu1 }
 0x27d   :  { %20969 = vst [vmem:[#allocation77_spill] sm:$0xff] %v16032_v21  ;;  %v2722_v21 = vld [vmem:[%s20087_s3 + $0x460] sm:$0xff] }
 0x280   :  { %4291 = vmatmul.mubr.bf16.gmra.mrb[56].mxu0 %v12794_v33  ;;  %v16044_v7 = vpop.f32.mrb[208].mxu0  ;;  %v16046_v25 = vpop.f32.mrb[208].mxu1 }
 0x281   :  { %4300 = vmatprep.mubr.bf16.mxu0 %v12803_v10  ;;  %20970 = vst [vmem:[#allocation73_spill] sm:$0xff] %v16044_v7  ;;  %20971 = vst [vmem:[#allocation78_spill] sm:$0xff] %v16046_v25  ;;  %v16048_v34 = vpop.f32.mrb[209].mxu0  ;;  %v16050_v30 = vpop.f32.mrb[209].mxu1 }
 0x282   :  { %5703 = vmatmul.mubr.bf16.gmra.mrb[56].mxu1 %v12794_v33  ;;  %20972 = vst [vmem:[#allocation74_spill] sm:$0xff] %v16048_v34  ;;  %20973 = vst [vmem:[#allocation87_spill] sm:$0xff] %v16050_v30  ;;  %v12811_v33 = vcombine.high %v2710_v28, %v2714_v43  ;;  %v16052_v17 = vpop.f32.mrb[210].mxu0  ;;  %v2726_v30 = vld [vmem:[%s20087_s3 + $0x480] sm:$0xff]  ;;  %v12818_v43 = vcombine.low %v2718_v60, %v2722_v21 }
 0x283   :  { %5712 = vmatprep.mubr.bf16.mxu1 %v12803_v10  ;;  %20974 = vst [vmem:[#allocation83_spill] sm:$0xff] %v16052_v17  ;;  %v16054_v10 = vpop.f32.mrb[210].mxu1  ;;  %v16060_v26 = vpop.f32.mrb[211].mxu0 }
 0x284   :  { %20975 = vst [vmem:[#allocation88_spill] sm:$0xff] %v16054_v10  ;;  %20976 = vst [vmem:[#allocation84_spill] sm:$0xff] %v16060_v26  ;;  %v16062_v54 = vpop.f32.mrb[211].mxu1 }
 0x285   :  { %20977 = vst [vmem:[#allocation123_spill] sm:$0xff] %v16062_v54  ;;  %v2730_v54 = vld [vmem:[%s20087_s3 + $0x4a0] sm:$0xff] }
 0x288   :  { %4301 = vmatmul.mubr.bf16.gmra.mrb[60].mxu0 %v12802_v44  ;;  %v16074_v25 = vpop.f32.mrb[212].mxu0  ;;  %v16076_v10 = vpop.f32.mrb[212].mxu1 }
 0x289   :  { %4310 = vmatprep.mubr.bf16.mxu0 %v12811_v33  ;;  %20978 = vst [vmem:[#allocation124_spill] sm:$0xff] %v16074_v25  ;;  %20979 = vst [vmem:[#allocation125_spill] sm:$0xff] %v16076_v10  ;;  %v16078_v7 = vpop.f32.mrb[213].mxu0  ;;  %v16080_v11 = vpop.f32.mrb[213].mxu1 }
 0x28a   :  { %5713 = vmatmul.mubr.bf16.gmra.mrb[60].mxu1 %v12802_v44  ;;  %20980 = vst [vmem:[#allocation126_spill] sm:$0xff] %v16078_v7  ;;  %20981 = vst [vmem:[#allocation127_spill] sm:$0xff] %v16080_v11  ;;  %v12819_v44 = vcombine.high %v2718_v60, %v2722_v21  ;;  %v16082_v17 = vpop.f32.mrb[214].mxu0  ;;  %v2734_v11 = vld [vmem:[%s20087_s3 + $0x4c0] sm:$0xff]  ;;  %v12826_v21 = vcombine.low %v2726_v30, %v2730_v54 }
 0x28b   :  { %5722 = vmatprep.mubr.bf16.mxu1 %v12811_v33  ;;  %20982 = vst [vmem:[#allocation128_spill] sm:$0xff] %v16082_v17  ;;  %v16084_v33 = vpop.f32.mrb[214].mxu1  ;;  %v16090_v34 = vpop.f32.mrb[215].mxu0 }
 0x28c   :  { %20983 = vst [vmem:[#allocation129_spill] sm:$0xff] %v16084_v33  ;;  %20984 = vst [vmem:[#allocation130_spill] sm:$0xff] %v16090_v34  ;;  %v16092_v26 = vpop.f32.mrb[215].mxu1 }
 0x28d   :  { %20985 = vst [vmem:[#allocation131_spill] sm:$0xff] %v16092_v26  ;;  %v2738_v26 = vld [vmem:[%s20087_s3 + $0x4e0] sm:$0xff] }
 0x290   :  { %4311 = vmatmul.mubr.bf16.gmra.mrb[64].mxu0 %v12810_v8  ;;  %v16104_v10 = vpop.f32.mrb[216].mxu0  ;;  %v16106_v33 = vpop.f32.mrb[216].mxu1 }
 0x291   :  { %4320 = vmatprep.mubr.bf16.mxu0 %v12819_v44  ;;  %20986 = vst [vmem:[#allocation132_spill] sm:$0xff] %v16104_v10  ;;  %20987 = vst [vmem:[#allocation133_spill] sm:$0xff] %v16106_v33  ;;  %v16108_v25 = vpop.f32.mrb[217].mxu0  ;;  %v16110_v28 = vpop.f32.mrb[217].mxu1 }
 0x292   :  { %5723 = vmatmul.mubr.bf16.gmra.mrb[64].mxu1 %v12810_v8  ;;  %20988 = vst [vmem:[#allocation134_spill] sm:$0xff] %v16108_v25  ;;  %20989 = vst [vmem:[#allocation135_spill] sm:$0xff] %v16110_v28  ;;  %v12827_v8 = vcombine.high %v2726_v30, %v2730_v54  ;;  %v16112_v17 = vpop.f32.mrb[218].mxu0  ;;  %v2742_v28 = vld [vmem:[%s20087_s3 + $0x500] sm:$0xff]  ;;  %v12834_v54 = vcombine.low %v2734_v11, %v2738_v26 }
 0x293   :  { %5732 = vmatprep.mubr.bf16.mxu1 %v12819_v44  ;;  %20990 = vst [vmem:[#allocation136_spill] sm:$0xff] %v16112_v17  ;;  %v16114_v44 = vpop.f32.mrb[218].mxu1  ;;  %v16120_v7 = vpop.f32.mrb[219].mxu0 }
 0x294   :  { %20991 = vst [vmem:[#allocation137_spill] sm:$0xff] %v16114_v44  ;;  %20992 = vst [vmem:[#allocation138_spill] sm:$0xff] %v16120_v7  ;;  %v16122_v34 = vpop.f32.mrb[219].mxu1 }
 0x295   :  { %20993 = vst [vmem:[#allocation139_spill] sm:$0xff] %v16122_v34  ;;  %v2746_v34 = vld [vmem:[%s20087_s3 + $0x520] sm:$0xff] }
 0x298   :  { %4321 = vmatmul.mubr.bf16.gmra.mrb[68].mxu0 %v12818_v43  ;;  %v16134_v33 = vpop.f32.mrb[220].mxu0  ;;  %v16136_v44 = vpop.f32.mrb[220].mxu1 }
 0x299   :  { %4330 = vmatprep.mubr.bf16.mxu0 %v12827_v8  ;;  %20994 = vst [vmem:[#allocation140_spill] sm:$0xff] %v16134_v33  ;;  %20995 = vst [vmem:[#allocation141_spill] sm:$0xff] %v16136_v44  ;;  %v16138_v10 = vpop.f32.mrb[221].mxu0  ;;  %v16140_v60 = vpop.f32.mrb[221].mxu1 }
 0x29a   :  { %5733 = vmatmul.mubr.bf16.gmra.mrb[68].mxu1 %v12818_v43  ;;  %20996 = vst [vmem:[#allocation142_spill] sm:$0xff] %v16138_v10  ;;  %20997 = vst [vmem:[#allocation143_spill] sm:$0xff] %v16140_v60  ;;  %v12835_v43 = vcombine.high %v2734_v11, %v2738_v26  ;;  %v16142_v17 = vpop.f32.mrb[222].mxu0  ;;  %v2750_v60 = vld [vmem:[%s20087_s3 + $0x540] sm:$0xff]  ;;  %v12842_v26 = vcombine.low %v2742_v28, %v2746_v34 }
 0x29b   :  { %5742 = vmatprep.mubr.bf16.mxu1 %v12827_v8  ;;  %20998 = vst [vmem:[#allocation144_spill] sm:$0xff] %v16142_v17  ;;  %v16144_v8 = vpop.f32.mrb[222].mxu1  ;;  %v16150_v25 = vpop.f32.mrb[223].mxu0 }
 0x29c   :  { %20999 = vst [vmem:[#allocation145_spill] sm:$0xff] %v16144_v8  ;;  %21000 = vst [vmem:[#allocation146_spill] sm:$0xff] %v16150_v25  ;;  %v16152_v7 = vpop.f32.mrb[223].mxu1 }
 0x29d   :  { %21001 = vst [vmem:[#allocation147_spill] sm:$0xff] %v16152_v7  ;;  %v2754_v7 = vld [vmem:[%s20087_s3 + $0x560] sm:$0xff] }
 0x2a0   :  { %4331 = vmatmul.mubr.bf16.gmra.mrb[72].mxu0 %v12826_v21  ;;  %v16164_v44 = vpop.f32.mrb[224].mxu0  ;;  %v16166_v8 = vpop.f32.mrb[224].mxu1 }
 0x2a1   :  { %4340 = vmatprep.mubr.bf16.mxu0 %v12835_v43  ;;  %21002 = vst [vmem:[#allocation148_spill] sm:$0xff] %v16164_v44  ;;  %21003 = vst [vmem:[#allocation149_spill] sm:$0xff] %v16166_v8  ;;  %v16168_v33 = vpop.f32.mrb[225].mxu0  ;;  %v16170_v30 = vpop.f32.mrb[225].mxu1 }
 0x2a2   :  { %5743 = vmatmul.mubr.bf16.gmra.mrb[72].mxu1 %v12826_v21  ;;  %21004 = vst [vmem:[#allocation150_spill] sm:$0xff] %v16168_v33  ;;  %21005 = vst [vmem:[#allocation151_spill] sm:$0xff] %v16170_v30  ;;  %v12843_v21 = vcombine.high %v2742_v28, %v2746_v34  ;;  %v16172_v17 = vpop.f32.mrb[226].mxu0  ;;  %v2758_v30 = vld [vmem:[%s20087_s3 + $0x580] sm:$0xff]  ;;  %v12850_v34 = vcombine.low %v2750_v60, %v2754_v7 }
 0x2a3   :  { %5752 = vmatprep.mubr.bf16.mxu1 %v12835_v43  ;;  %21006 = vst [vmem:[#allocation152_spill] sm:$0xff] %v16172_v17  ;;  %v16174_v43 = vpop.f32.mrb[226].mxu1  ;;  %v16180_v10 = vpop.f32.mrb[227].mxu0 }
 0x2a4   :  { %21007 = vst [vmem:[#allocation153_spill] sm:$0xff] %v16174_v43  ;;  %21008 = vst [vmem:[#allocation154_spill] sm:$0xff] %v16180_v10  ;;  %v16182_v25 = vpop.f32.mrb[227].mxu1 }
 0x2a5   :  { %21009 = vst [vmem:[#allocation155_spill] sm:$0xff] %v16182_v25  ;;  %v2762_v25 = vld [vmem:[%s20087_s3 + $0x5a0] sm:$0xff] }
 0x2a8   :  { %4341 = vmatmul.mubr.bf16.gmra.mrb[76].mxu0 %v12834_v54  ;;  %v16194_v8 = vpop.f32.mrb[228].mxu0  ;;  %v16196_v43 = vpop.f32.mrb[228].mxu1 }
 0x2a9   :  { %4350 = vmatprep.mubr.bf16.mxu0 %v12843_v21  ;;  %21010 = vst [vmem:[#allocation156_spill] sm:$0xff] %v16194_v8  ;;  %21011 = vst [vmem:[#allocation157_spill] sm:$0xff] %v16196_v43  ;;  %v16198_v44 = vpop.f32.mrb[229].mxu0  ;;  %v16200_v11 = vpop.f32.mrb[229].mxu1 }
 0x2aa   :  { %5753 = vmatmul.mubr.bf16.gmra.mrb[76].mxu1 %v12834_v54  ;;  %21012 = vst [vmem:[#allocation158_spill] sm:$0xff] %v16198_v44  ;;  %21013 = vst [vmem:[#allocation159_spill] sm:$0xff] %v16200_v11  ;;  %v12851_v54 = vcombine.high %v2750_v60, %v2754_v7  ;;  %v16202_v17 = vpop.f32.mrb[230].mxu0  ;;  %v2766_v11 = vld [vmem:[%s20087_s3 + $0x5c0] sm:$0xff]  ;;  %v12858_v7 = vcombine.low %v2758_v30, %v2762_v25 }
 0x2ab   :  { %5762 = vmatprep.mubr.bf16.mxu1 %v12843_v21  ;;  %21014 = vst [vmem:[#allocation160_spill] sm:$0xff] %v16202_v17  ;;  %v16204_v21 = vpop.f32.mrb[230].mxu1  ;;  %v16210_v33 = vpop.f32.mrb[231].mxu0 }
 0x2ac   :  { %21015 = vst [vmem:[#allocation161_spill] sm:$0xff] %v16204_v21  ;;  %21016 = vst [vmem:[#allocation162_spill] sm:$0xff] %v16210_v33  ;;  %v16212_v10 = vpop.f32.mrb[231].mxu1 }
 0x2ad   :  { %21017 = vst [vmem:[#allocation163_spill] sm:$0xff] %v16212_v10  ;;  %v2770_v10 = vld [vmem:[%s20087_s3 + $0x5e0] sm:$0xff] }
 0x2b0   :  { %4351 = vmatmul.mubr.bf16.gmra.mrb[80].mxu0 %v12842_v26  ;;  %v16224_v43 = vpop.f32.mrb[232].mxu0  ;;  %v16226_v21 = vpop.f32.mrb[232].mxu1 }
 0x2b1   :  { %4360 = vmatprep.mubr.bf16.mxu0 %v12851_v54  ;;  %21018 = vst [vmem:[#allocation164_spill] sm:$0xff] %v16224_v43  ;;  %21019 = vst [vmem:[#allocation165_spill] sm:$0xff] %v16226_v21  ;;  %v16228_v8 = vpop.f32.mrb[233].mxu0  ;;  %v16230_v28 = vpop.f32.mrb[233].mxu1 }
 0x2b2   :  { %5763 = vmatmul.mubr.bf16.gmra.mrb[80].mxu1 %v12842_v26  ;;  %21020 = vst [vmem:[#allocation166_spill] sm:$0xff] %v16228_v8  ;;  %21021 = vst [vmem:[#allocation167_spill] sm:$0xff] %v16230_v28  ;;  %v12859_v26 = vcombine.high %v2758_v30, %v2762_v25  ;;  %v16232_v17 = vpop.f32.mrb[234].mxu0  ;;  %v2774_v28 = vld [vmem:[%s20087_s3 + $0x600] sm:$0xff]  ;;  %v12866_v25 = vcombine.low %v2766_v11, %v2770_v10 }
 0x2b3   :  { %5772 = vmatprep.mubr.bf16.mxu1 %v12851_v54  ;;  %21022 = vst [vmem:[#allocation168_spill] sm:$0xff] %v16232_v17  ;;  %v16234_v54 = vpop.f32.mrb[234].mxu1  ;;  %v16240_v44 = vpop.f32.mrb[235].mxu0 }
 0x2b4   :  { %21023 = vst [vmem:[#allocation169_spill] sm:$0xff] %v16234_v54  ;;  %21024 = vst [vmem:[#allocation170_spill] sm:$0xff] %v16240_v44  ;;  %v16242_v33 = vpop.f32.mrb[235].mxu1 }
 0x2b5   :  { %21025 = vst [vmem:[#allocation171_spill] sm:$0xff] %v16242_v33  ;;  %v2778_v33 = vld [vmem:[%s20087_s3 + $0x620] sm:$0xff] }
 0x2b8   :  { %4361 = vmatmul.mubr.bf16.gmra.mrb[84].mxu0 %v12850_v34  ;;  %v16254_v21 = vpop.f32.mrb[236].mxu0  ;;  %v16256_v54 = vpop.f32.mrb[236].mxu1 }
 0x2b9   :  { %4370 = vmatprep.mubr.bf16.mxu0 %v12859_v26  ;;  %21026 = vst [vmem:[#allocation172_spill] sm:$0xff] %v16254_v21  ;;  %21027 = vst [vmem:[#allocation173_spill] sm:$0xff] %v16256_v54  ;;  %v16258_v43 = vpop.f32.mrb[237].mxu0  ;;  %v16260_v60 = vpop.f32.mrb[237].mxu1 }
 0x2ba   :  { %5773 = vmatmul.mubr.bf16.gmra.mrb[84].mxu1 %v12850_v34  ;;  %21028 = vst [vmem:[#allocation174_spill] sm:$0xff] %v16258_v43  ;;  %21029 = vst [vmem:[#allocation175_spill] sm:$0xff] %v16260_v60  ;;  %v12867_v34 = vcombine.high %v2766_v11, %v2770_v10  ;;  %v16262_v17 = vpop.f32.mrb[238].mxu0  ;;  %v2782_v60 = vld [vmem:[%s20087_s3 + $0x640] sm:$0xff]  ;;  %v12874_v10 = vcombine.low %v2774_v28, %v2778_v33 }
 0x2bb   :  { %5782 = vmatprep.mubr.bf16.mxu1 %v12859_v26  ;;  %21030 = vst [vmem:[#allocation176_spill] sm:$0xff] %v16262_v17  ;;  %v16264_v26 = vpop.f32.mrb[238].mxu1  ;;  %v16270_v8 = vpop.f32.mrb[239].mxu0 }
 0x2bc   :  { %21031 = vst [vmem:[#allocation177_spill] sm:$0xff] %v16264_v26  ;;  %21032 = vst [vmem:[#allocation178_spill] sm:$0xff] %v16270_v8  ;;  %v16272_v44 = vpop.f32.mrb[239].mxu1 }
 0x2bd   :  { %21033 = vst [vmem:[#allocation179_spill] sm:$0xff] %v16272_v44  ;;  %v2786_v44 = vld [vmem:[%s20087_s3 + $0x660] sm:$0xff] }
 0x2c0   :  { %4371 = vmatmul.mubr.bf16.gmra.mrb[88].mxu0 %v12858_v7  ;;  %v16284_v54 = vpop.f32.mrb[240].mxu0  ;;  %v16286_v26 = vpop.f32.mrb[240].mxu1 }
 0x2c1   :  { %4380 = vmatprep.mubr.bf16.mxu0 %v12867_v34  ;;  %21034 = vst [vmem:[#allocation180_spill] sm:$0xff] %v16284_v54  ;;  %21035 = vst [vmem:[#allocation181_spill] sm:$0xff] %v16286_v26  ;;  %v16288_v21 = vpop.f32.mrb[241].mxu0  ;;  %v16290_v30 = vpop.f32.mrb[241].mxu1 }
 0x2c2   :  { %5783 = vmatmul.mubr.bf16.gmra.mrb[88].mxu1 %v12858_v7  ;;  %21036 = vst [vmem:[#allocation182_spill] sm:$0xff] %v16288_v21  ;;  %21037 = vst [vmem:[#allocation183_spill] sm:$0xff] %v16290_v30  ;;  %v12875_v7 = vcombine.high %v2774_v28, %v2778_v33  ;;  %v16292_v17 = vpop.f32.mrb[242].mxu0  ;;  %v2790_v30 = vld [vmem:[%s20087_s3 + $0x680] sm:$0xff]  ;;  %v12882_v33 = vcombine.low %v2782_v60, %v2786_v44 }
 0x2c3   :  { %5792 = vmatprep.mubr.bf16.mxu1 %v12867_v34  ;;  %21038 = vst [vmem:[#allocation184_spill] sm:$0xff] %v16292_v17  ;;  %v16294_v34 = vpop.f32.mrb[242].mxu1  ;;  %v16300_v43 = vpop.f32.mrb[243].mxu0 }
 0x2c4   :  { %21039 = vst [vmem:[#allocation185_spill] sm:$0xff] %v16294_v34  ;;  %21040 = vst [vmem:[#allocation186_spill] sm:$0xff] %v16300_v43  ;;  %v16302_v8 = vpop.f32.mrb[243].mxu1 }
 0x2c5   :  { %21041 = vst [vmem:[#allocation187_spill] sm:$0xff] %v16302_v8  ;;  %v2794_v8 = vld [vmem:[%s20087_s3 + $0x6a0] sm:$0xff] }
 0x2c8   :  { %4381 = vmatmul.mubr.bf16.gmra.mrb[92].mxu0 %v12866_v25  ;;  %v16314_v26 = vpop.f32.mrb[244].mxu0  ;;  %v16316_v34 = vpop.f32.mrb[244].mxu1 }
 0x2c9   :  { %4390 = vmatprep.mubr.bf16.mxu0 %v12875_v7  ;;  %21042 = vst [vmem:[#allocation188_spill] sm:$0xff] %v16314_v26  ;;  %21043 = vst [vmem:[#allocation189_spill] sm:$0xff] %v16316_v34  ;;  %v16318_v54 = vpop.f32.mrb[245].mxu0  ;;  %v16320_v11 = vpop.f32.mrb[245].mxu1 }
 0x2ca   :  { %5793 = vmatmul.mubr.bf16.gmra.mrb[92].mxu1 %v12866_v25  ;;  %21044 = vst [vmem:[#allocation190_spill] sm:$0xff] %v16318_v54  ;;  %21045 = vst [vmem:[#allocation191_spill] sm:$0xff] %v16320_v11  ;;  %v12883_v25 = vcombine.high %v2782_v60, %v2786_v44  ;;  %v16322_v17 = vpop.f32.mrb[246].mxu0  ;;  %v2798_v11 = vld [vmem:[%s20087_s3 + $0x6c0] sm:$0xff]  ;;  %v12890_v44 = vcombine.low %v2790_v30, %v2794_v8 }
 0x2cb   :  { %5802 = vmatprep.mubr.bf16.mxu1 %v12875_v7  ;;  %21046 = vst [vmem:[#allocation192_spill] sm:$0xff] %v16322_v17  ;;  %v16324_v7 = vpop.f32.mrb[246].mxu1  ;;  %v16330_v21 = vpop.f32.mrb[247].mxu0 }
 0x2cc   :  { %21047 = vst [vmem:[#allocation193_spill] sm:$0xff] %v16324_v7  ;;  %21048 = vst [vmem:[#allocation194_spill] sm:$0xff] %v16330_v21  ;;  %v16332_v43 = vpop.f32.mrb[247].mxu1 }
 0x2cd   :  { %21049 = vst [vmem:[#allocation195_spill] sm:$0xff] %v16332_v43  ;;  %v2802_v43 = vld [vmem:[%s20087_s3 + $0x6e0] sm:$0xff] }
 0x2d0   :  { %4391 = vmatmul.mubr.bf16.gmra.mrb[96].mxu0 %v12874_v10  ;;  %v16344_v34 = vpop.f32.mrb[248].mxu0  ;;  %v16346_v7 = vpop.f32.mrb[248].mxu1 }
 0x2d1   :  { %4400 = vmatprep.mubr.bf16.mxu0 %v12883_v25  ;;  %21050 = vst [vmem:[#allocation196_spill] sm:$0xff] %v16344_v34  ;;  %21051 = vst [vmem:[#allocation197_spill] sm:$0xff] %v16346_v7  ;;  %v16348_v26 = vpop.f32.mrb[249].mxu0  ;;  %v16350_v28 = vpop.f32.mrb[249].mxu1 }
 0x2d2   :  { %5803 = vmatmul.mubr.bf16.gmra.mrb[96].mxu1 %v12874_v10  ;;  %21052 = vst [vmem:[#allocation198_spill] sm:$0xff] %v16348_v26  ;;  %21053 = vst [vmem:[#allocation199_spill] sm:$0xff] %v16350_v28  ;;  %v12891_v10 = vcombine.high %v2790_v30, %v2794_v8  ;;  %v16352_v17 = vpop.f32.mrb[250].mxu0  ;;  %v2806_v28 = vld [vmem:[%s20087_s3 + $0x700] sm:$0xff] }
 0x2d3   :  { %5812 = vmatprep.mubr.bf16.mxu1 %v12883_v25  ;;  %21054 = vst [vmem:[#allocation200_spill] sm:$0xff] %v16352_v17  ;;  %v16354_v25 = vpop.f32.mrb[250].mxu1  ;;  %v16360_v54 = vpop.f32.mrb[251].mxu0 }
 0x2d4   :  { %21055 = vst [vmem:[#allocation201_spill] sm:$0xff] %v16354_v25  ;;  %21056 = vst [vmem:[#allocation202_spill] sm:$0xff] %v16360_v54  ;;  %v16362_v21 = vpop.f32.mrb[251].mxu1 }
 0x2d5   :  { %21057 = vst [vmem:[#allocation203_spill] sm:$0xff] %v16362_v21  ;;  %v2810_v21 = vld [vmem:[%s20087_s3 + $0x720] sm:$0xff] }
 0x2d6   :  { %v12906_v30 = vcombine.low %v2806_v28, %v2810_v21 }
 0x2d8   :  { %4401 = vmatmul.mubr.bf16.gmra.mrb[100].mxu0 %v12882_v33  ;;  %v16374_v7 = vpop.f32.mrb[252].mxu0  ;;  %v16376_v25 = vpop.f32.mrb[252].mxu1 }
 0x2d9   :  { %4410 = vmatprep.mubr.bf16.mxu0 %v12891_v10  ;;  %21058 = vst [vmem:[#allocation204_spill] sm:$0xff] %v16374_v7  ;;  %21059 = vst [vmem:[#allocation205_spill] sm:$0xff] %v16376_v25  ;;  %v16378_v34 = vpop.f32.mrb[253].mxu0  ;;  %v16380_v60 = vpop.f32.mrb[253].mxu1  ;;  %v12898_v25 = vcombine.low %v2798_v11, %v2802_v43  ;;  %v21067_v7 = vld [vmem:[#allocation81_spill] sm:$0xff] }
 0x2da   :  { %5813 = vmatmul.mubr.bf16.gmra.mrb[100].mxu1 %v12882_v33  ;;  %21060 = vst [vmem:[#allocation206_spill] sm:$0xff] %v16378_v34  ;;  %21061 = vst [vmem:[#allocation207_spill] sm:$0xff] %v16380_v60  ;;  %v12899_v33 = vcombine.high %v2798_v11, %v2802_v43  ;;  %v16382_v17 = vpop.f32.mrb[254].mxu0  ;;  %v2822_v43 = vld [vmem:[%s20087_s3 + $0x780] sm:$0xff] }
 0x2db   :  { %5822 = vmatprep.mubr.bf16.mxu1 %v12891_v10  ;;  %21062 = vst [vmem:[#allocation208_spill] sm:$0xff] %v16382_v17  ;;  %v16384_v10 = vpop.f32.mrb[254].mxu1  ;;  %v16390_v26 = vpop.f32.mrb[255].mxu0  ;;  %v2826_v11 = vld [vmem:[%s20087_s3 + $0x7a0] sm:$0xff] }
 0x2dc   :  { %21063 = vst [vmem:[#allocation209_spill] sm:$0xff] %v16384_v10  ;;  %21064 = vst [vmem:[#allocation210_spill] sm:$0xff] %v16390_v26  ;;  %v16392_v54 = vpop.f32.mrb[255].mxu1  ;;  %v12907_v10 = vcombine.high %v2806_v28, %v2810_v21  ;;  %v2830_v21 = vld [vmem:[%s20087_s3 + $0x7c0] sm:$0xff] }
 0x2dd   :  { %21065 = vst [vmem:[#allocation211_spill] sm:$0xff] %v16392_v54  ;;  %v2834_v28 = vld [vmem:[%s20087_s3 + $0x7e0] sm:$0xff] }
 0x2e0   :  { %4411 = vmatmul.mubr.bf16.gmra.mrb[104].mxu0 %v12890_v44 }
 0x2e1   :  { %4420 = vmatprep.mubr.bf16.mxu0 %v12899_v33 }
 0x2e2   :  { %5823 = vmatmul.mubr.bf16.gmra.mrb[104].mxu1 %v12890_v44  ;;  %v2814_v44 = vld [vmem:[%s20087_s3 + $0x740] sm:$0xff] }
 0x2e3   :  { %5832 = vmatprep.mubr.bf16.mxu1 %v12899_v33  ;;  %v2818_v33 = vld [vmem:[%s20087_s3 + $0x760] sm:$0xff] }
 0x2e4   :  { %v12915_v8 = vcombine.high %v2814_v44, %v2818_v33 }
 0x2e8   :  { %4421 = vmatmul.mubr.bf16.gmra.mrb[108].mxu0 %v12898_v25 }
 0x2e9   :  { %4430 = vmatprep.mubr.bf16.mxu0 %v12907_v10 }
 0x2ea   :  { %5833 = vmatmul.mubr.bf16.gmra.mrb[108].mxu1 %v12898_v25  ;;  %v12914_v25 = vcombine.low %v2814_v44, %v2818_v33  ;;  %v2583_v44 = vld [vmem:[%s20087_s3 + $0x8] sm:$0xff] }
 0x2eb   :  { %5842 = vmatprep.mubr.bf16.mxu1 %v12907_v10  ;;  %v12923_v10 = vcombine.high %v2822_v43, %v2826_v11  ;;  %v2587_v33 = vld [vmem:[%s20087_s3 + $0x28] sm:$0xff] }
 0x2f0   :  { %4431 = vmatmul.mubr.bf16.gmra.mrb[112].mxu0 %v12906_v30 }
 0x2f1   :  { %4440 = vmatprep.mubr.bf16.mxu0 %v12915_v8 }
 0x2f2   :  { %5843 = vmatmul.mubr.bf16.gmra.mrb[112].mxu1 %v12906_v30  ;;  %v12931_v30 = vcombine.high %v2830_v21, %v2834_v28 }
 0x2f3   :  { %5852 = vmatprep.mubr.bf16.mxu1 %v12915_v8  ;;  %v12922_v8 = vcombine.low %v2822_v43, %v2826_v11  ;;  %v12684_v43 = vcombine.low %v2583_v44, %v2587_v33  ;;  %v2591_v11 = vld [vmem:[%s20087_s3 + $0x48] sm:$0xff] }
 0x2f8   :  { %4441 = vmatmul.mubr.bf16.gmra.mrb[116].mxu0 %v12914_v25 }
 0x2f9   :  { %4450 = vmatprep.mubr.bf16.mxu0 %v12923_v10 }
 0x2fa   :  { %5853 = vmatmul.mubr.bf16.gmra.mrb[116].mxu1 %v12914_v25  ;;  %v12930_v25 = vcombine.low %v2830_v21, %v2834_v28  ;;  %v21069_v21 = vld [vmem:[#allocation86_spill] sm:$0xff] }
 0x2fb   :  { %5862 = vmatprep.mubr.bf16.mxu1 %v12923_v10  ;;  %v12685_v10 = vcombine.high %v2583_v44, %v2587_v33  ;;  %v21070_v28 = vld [vmem:[#allocation82_spill] sm:$0xff]  ;;  %v21072_v44 = vld [vmem:[#allocation95_spill] sm:$0xff] }
 0x2fc   :  { %v21071_v54 = vpack.c.bf16 %v21069_v21, %v21070_v28  ;;  %v21073_v33 = vld [vmem:[#allocation91_spill] sm:$0xff]  ;;  %v21082_v28 = vld [vmem:[#allocation90_spill] sm:$0xff] }
 0x2fd   :  { %v21074_v34 = vpack.c.bf16 %v21072_v44, %v21073_v33 }
 0x2ff   :  { %v2459_v26 = vmax.bf16 %v20642_v42, %v21074_v34  ;;  %v21084_v34 = vld [vmem:[#allocation103_spill] sm:$0xff] }
 0x300   :  { %4451 = vmatmul.mubr.bf16.gmra.mrb[120].mxu0 %v12922_v8  ;;  %v21086_v45 = vpack.c.bf16 %v21084_v34, %v21085_v36  ;;  %v21094_v34 = vld [vmem:[#allocation98_spill] sm:$0xff] }
 0x301   :  { %4460 = vmatprep.mubr.bf16.mxu0 %v12931_v30 }
 0x302   :  { %5863 = vmatmul.mubr.bf16.gmra.mrb[120].mxu1 %v12922_v8  ;;  %v2595_v8 = vld [vmem:[%s20087_s3 + $0x68] sm:$0xff] }
 0x303   :  { %5872 = vmatprep.mubr.bf16.mxu1 %v12931_v30  ;;  %v21066_v30 = vld [vmem:[#allocation85_spill] sm:$0xff] }
 0x304   :  { %v21068_v17 = vpack.c.bf16 %v21066_v30, %v21067_v7  ;;  %v2461_v7 = vmax.bf16 %v20642_v42, %v21077_v19  ;;  %v21079_v30 = vld [vmem:[#allocation89_spill] sm:$0xff]  ;;  %v2463_v19 = vmax.bf16 %v20642_v42, %v21086_v45  ;;  %v21096_v45 = vld [vmem:[#allocation111_spill] sm:$0xff] }
 0x306   :  { %v2454_v60 = vmax.bf16 %v20642_v42, %v21068_v17  ;;  %v21078_v17 = vld [vmem:[#allocation93_spill] sm:$0xff] }
 0x308   :  { %4461 = vmatmul.mubr.bf16.gmra.mrb[124].mxu0 %v12930_v25 }
 0x309   :  { %4503 = vmatprep.mubr.bf16.mxu0 %v12685_v10 }
 0x30a   :  { %5873 = vmatmul.mubr.bf16.gmra.mrb[124].mxu1 %v12930_v25  ;;  %v2456_v25 = vmax.bf16 %v20642_v42, %v21071_v54  ;;  %v21080_v54 = vpack.c.bf16 %v21078_v17, %v21079_v30  ;;  %v2599_v17 = vld [vmem:[%s20087_s3 + $0x88] sm:$0xff]  ;;  %v21091_v30 = vld [vmem:[#allocation97_spill] sm:$0xff] }
 0x30b   :  { %5915 = vmatprep.mubr.bf16.mxu1 %v12685_v10  ;;  %v12693_v10 = vcombine.high %v2591_v11, %v2595_v8 }
 0x30c   :  { %v2458_v21 = vmax.bf16 %v20642_v42, %v21080_v54 }
 0x310   :  { %4504 = vmatmul.mubr.bf16.vlgmr.msra.gmra.mrb[0].mxu0 %v12684_v43 }
 0x311   :  { %4825 = vmatpush1.bf16.msra.mxu0 %v2454_v60  ;;  %4513 = vmatprep.mubr.bf16.mxu0 %v12693_v10  ;;  %v21087_v60 = vld [vmem:[#allocation104_spill] sm:$0xff] }
 0x312   :  { %5916 = vmatmul.mubr.bf16.vlgmr.msra.gmra.mrb[0].mxu1 %v12684_v43  ;;  %4826 = vmatprep.subr.bf16.mxu0 %v2459_v26  ;;  %v21081_v43 = vld [vmem:[#allocation94_spill] sm:$0xff]  ;;  %v21088_v26 = vld [vmem:[#allocation100_spill] sm:$0xff] }
 0x313   :  { %6237 = vmatpush1.bf16.msra.mxu1 %v2456_v25  ;;  %v21083_v9 = vpack.c.bf16 %v21081_v43, %v21082_v28  ;;  %5925 = vmatprep.mubr.bf16.mxu1 %v12693_v10  ;;  %v21089_v25 = vpack.c.bf16 %v21087_v60, %v21088_v26  ;;  %v21090_v10 = vld [vmem:[#allocation101_spill] sm:$0xff]  ;;  %v21093_v28 = vld [vmem:[#allocation102_spill] sm:$0xff]  ;;  %v21097_v60 = vld [vmem:[#allocation107_spill] sm:$0xff] }
 0x314   :  { %6238 = vmatprep.subr.bf16.mxu1 %v2461_v7  ;;  %v12692_v7 = vcombine.low %v2591_v11, %v2595_v8  ;;  %v21092_v54 = vpack.c.bf16 %v21090_v10, %v21091_v30  ;;  %v21095_v11 = vpack.c.bf16 %v21093_v28, %v21094_v34  ;;  %v21098_v26 = vpack.c.bf16 %v21096_v45, %v21097_v60  ;;  %v21102_v10 = vld [vmem:[#allocation109_spill] sm:$0xff]  ;;  %v21106_v34 = vld [vmem:[#allocation106_spill] sm:$0xff]  ;;  %v21108_v60 = vld [vmem:[#allocation119_spill] sm:$0xff] }
 0x315   :  { %v2460_v44 = vmax.bf16 %v20642_v42, %v21083_v9  ;;  %v2465_v33 = vmax.bf16 %v20642_v42, %v21089_v25  ;;  %v2603_v9 = vld [vmem:[%s20087_s3 + $0xa8] sm:$0xff]  ;;  %4827 = vmatpush1.bf16.msra.mxu0 %v2458_v21  ;;  %v21103_v30 = vld [vmem:[#allocation105_spill] sm:$0xff] }
 0x316   :  { %4828 = vmatprep.subr.bf16.mxu0 %v2463_v19  ;;  %v2462_v43 = vmax.bf16 %v20642_v42, %v21092_v54  ;;  %v2464_v8 = vmax.bf16 %v20642_v42, %v21095_v11  ;;  %v12701_v36 = vcombine.high %v2599_v17, %v2603_v9  ;;  %v2467_v21 = vmax.bf16 %v20642_v42, %v21098_v26  ;;  %v21100_v19 = vld [vmem:[#allocation108_spill] sm:$0xff]  ;;  %v21109_v26 = vld [vmem:[#allocation115_spill] sm:$0xff] }
 0x317   :  { %6239 = vmatpush1.bf16.msra.mxu1 %v2460_v44  ;;  %v21099_v44 = vld [vmem:[#allocation112_spill] sm:$0xff]  ;;  %v21104_v54 = vpack.c.bf16 %v21102_v10, %v21103_v30 }
 0x318   :  { %6240 = vmatprep.subr.bf16.mxu1 %v2465_v33  ;;  %4514 = vmatmul.mubr.bf16.gmra.mrb[4].mxu0 %v12692_v7  ;;  %v21101_v25 = vpack.c.bf16 %v21099_v44, %v21100_v19  ;;  %v21110_v44 = vpack.c.bf16 %v21108_v60, %v21109_v26  ;;  %v2607_v10 = vld [vmem:[%s20087_s3 + $0xc8] sm:$0xff]  ;;  %v21118_v60 = vld [vmem:[#allocation114_spill] sm:$0xff] }
 0x319   :  { %4829 = vmatpush1.bf16.msra.mxu0 %v2462_v43  ;;  %v2466_v28 = vmax.bf16 %v20642_v42, %v21104_v54  ;;  %4523 = vmatprep.mubr.bf16.mxu0 %v12701_v36  ;;  %v2611_v30 = vld [vmem:[%s20087_s3 + $0xe8] sm:$0xff]  ;;  %v21115_v54 = vld [vmem:[#allocation113_spill] sm:$0xff] }
 0x31a   :  { %5926 = vmatmul.mubr.bf16.gmra.mrb[4].mxu1 %v12692_v7  ;;  %v2469_v33 = vmax.bf16 %v20642_v42, %v21101_v25  ;;  %4830 = vmatprep.subr.bf16.mxu0 %v2467_v21  ;;  %v21105_v7 = vld [vmem:[#allocation110_spill] sm:$0xff]  ;;  %v2471_v43 = vmax.bf16 %v20642_v42, %v21110_v44  ;;  %v21112_v21 = vld [vmem:[#allocation116_spill] sm:$0xff]  ;;  %v12709_v26 = vcombine.high %v2607_v10, %v2611_v30 }
 0x31b   :  { %6241 = vmatpush1.bf16.msra.mxu1 %v2464_v8  ;;  %v21107_v11 = vpack.c.bf16 %v21105_v7, %v21106_v34  ;;  %5935 = vmatprep.mubr.bf16.mxu1 %v12701_v36  ;;  %v21111_v8 = vld [vmem:[#allocation120_spill] sm:$0xff]  ;;  %v21114_v36 = vld [vmem:[#allocation117_spill] sm:$0xff]  ;;  %v21120_v44 = vpack.c.bf16 %v15354_v16, %v15342_v39  ;;  %v21126_v39 = vpack.c.bf16 %v15416_v20, %v15396_v29 }
 0x31c   :  { %6242 = vmatprep.subr.bf16.mxu1 %v2469_v33  ;;  %v21113_v19 = vpack.c.bf16 %v21111_v8, %v21112_v21  ;;  %v12700_v33 = vcombine.low %v2599_v17, %v2603_v9  ;;  %v21116_v7 = vpack.c.bf16 %v21114_v36, %v21115_v54  ;;  %v21122_v8 = vpack.c.bf16 %v15346_v40, %v15338_v13  ;;  %v2615_v13 = vld [vmem:[%s20087_s3 + $0x108] sm:$0xff] }
 0x31d   :  { %v2468_v45 = vmax.bf16 %v20642_v42, %v21107_v11  ;;  %4831 = vmatpush1.bf16.msra.mxu0 %v2466_v28  ;;  %v21117_v11 = vld [vmem:[#allocation118_spill] sm:$0xff]  ;;  %v2475_v28 = vmax.bf16 %v20642_v42, %v21120_v44  ;;  %v12708_v40 = vcombine.low %v2607_v10, %v2611_v30  ;;  %v2619_v54 = vld [vmem:[%s20087_s3 + $0x128] sm:$0xff]  ;;  %v21128_v29 = vpack.c.bf16 %v15408_v62, %v15384_v57 }
 0x31e   :  { %v2473_v25 = vmax.bf16 %v20642_v42, %v21113_v19  ;;  %4832 = vmatprep.subr.bf16.mxu0 %v2471_v43  ;;  %v2470_v34 = vmax.bf16 %v20642_v42, %v21116_v7  ;;  %v21119_v17 = vpack.c.bf16 %v21117_v11, %v21118_v60  ;;  %v2474_v21 = vmax.bf16 %v20642_v42, %v21122_v8  ;;  %v21123_v19 = vld [vmem:[#allocation122_spill] sm:$0xff] }
 0x31f   :  { %6243 = vmatpush1.bf16.msra.mxu1 %v2468_v45  ;;  %v21121_v45 = vpack.c.bf16 %v15356_v55, %v15344_v27  ;;  %v2479_v27 = vmax.bf16 %v20642_v42, %v21126_v39  ;;  %v21127_v55 = vpack.c.bf16 %v15418_v24, %v15398_v56  ;;  %v2478_v56 = vmax.bf16 %v20642_v42, %v21128_v29  ;;  %v21154_v39 = vld [vmem:[#allocation14_spill] sm:$0xff] }
 0x320   :  { %6244 = vmatprep.subr.bf16.mxu1 %v2473_v25  ;;  %v2472_v9 = vmax.bf16 %v20642_v42, %v21119_v17  ;;  %4524 = vmatmul.mubr.bf16.gmra.mrb[8].mxu0 %v12700_v33  ;;  %v21124_v25 = vld [vmem:[#allocation121_spill] sm:$0xff]  ;;  %v21129_v20 = vpack.c.bf16 %v15410_v5, %v15386_v58  ;;  %v12717_v10 = vcombine.high %v2615_v13, %v2619_v54 }
 0x321   :  { %v2477_v43 = vmax.bf16 %v20642_v42, %v21121_v45  ;;  %4833 = vmatpush1.bf16.msra.mxu0 %v2470_v34  ;;  %4533 = vmatprep.mubr.bf16.mxu0 %v12709_v26  ;;  %v2481_v36 = vmax.bf16 %v20642_v42, %v21127_v55  ;;  %v21130_v30 = vpack.c.bf16 %v15478_v46, %v15458_v61  ;;  %v21149_v45 = vld [vmem:[#allocation5_spill] sm:$0xff] }
 0x322   :  { %5936 = vmatmul.mubr.bf16.gmra.mrb[8].mxu1 %v12700_v33  ;;  %4834 = vmatprep.subr.bf16.mxu0 %v2475_v28  ;;  %v21125_v33 = vpack.c.bf16 %v21123_v19, %v21124_v25  ;;  %v2480_v24 = vmax.bf16 %v20642_v42, %v21129_v20  ;;  %v21131_v34 = vpack.c.bf16 %v15480_v50, %v15460_v14  ;;  %v21148_v28 = vld [vmem:[#allocation7_spill] sm:$0xff]  ;;  %v21151_v19 = vld [vmem:[#allocation9_spill] sm:$0xff] }
 0x323   :  { %6245 = vmatpush1.bf16.msra.mxu1 %v2472_v9  ;;  %5945 = vmatprep.mubr.bf16.mxu1 %v12709_v26  ;;  %v2483_v7 = vmax.bf16 %v20642_v42, %v21130_v30  ;;  %v21132_v58 = vpack.c.bf16 %v15470_v53, %v15446_v22  ;;  %v21133_v5 = vpack.c.bf16 %v15472_v31, %v15448_v23  ;;  %v2623_v53 = vld [vmem:[%s20087_s3 + $0x148] sm:$0xff]  ;;  %v21163_v30 = vld [vmem:[#allocation17_spill] sm:$0xff] }
 0x324   :  { %6246 = vmatprep.subr.bf16.mxu1 %v2477_v43  ;;  %v2476_v16 = vmax.bf16 %v20642_v42, %v21125_v33  ;;  %v2485_v57 = vmax.bf16 %v20642_v42, %v21131_v34  ;;  %v21134_v14 = vpack.c.bf16 %v15540_v59, %v15520_v37  ;;  %v21135_v50 = vpack.c.bf16 %v15542_v0, %v15522_v38  ;;  %v2627_v23 = vld [vmem:[%s20087_s3 + $0x168] sm:$0xff] }
 0x325   :  { %4835 = vmatpush1.bf16.msra.mxu0 %v2474_v21  ;;  %v2482_v62 = vmax.bf16 %v20642_v42, %v21132_v58  ;;  %v2484_v61 = vmax.bf16 %v20642_v42, %v21133_v5  ;;  %v12716_v22 = vcombine.low %v2615_v13, %v2619_v54  ;;  %v21136_v31 = vpack.c.bf16 %v15532_v52, %v15508_v48  ;;  %v21152_v25 = vld [vmem:[#allocation11_spill] sm:$0xff]  ;;  %v21158_v13 = vld [vmem:[#allocation4_spill] sm:$0xff]  ;;  %v21166_v58 = vld [vmem:[#allocation22_spill] sm:$0xff] }
 0x326   :  { %4836 = vmatprep.subr.bf16.mxu0 %v2479_v27  ;;  %v2487_v46 = vmax.bf16 %v20642_v42, %v21134_v14  ;;  %v2489_v11 = vmax.bf16 %v20642_v42, %v21135_v50  ;;  %v21137_v38 = vpack.c.bf16 %v15534_v63, %v15510_v49  ;;  %v12725_v0 = vcombine.high %v2623_v53, %v2627_v23  ;;  %v21155_v27 = vld [vmem:[#allocation16_spill] sm:$0xff]  ;;  %v21161_v20 = vld [vmem:[#allocation15_spill] sm:$0xff] }
 0x327   :  { %6247 = vmatpush1.bf16.msra.mxu1 %v2476_v16  ;;  %v2486_v37 = vmax.bf16 %v20642_v42, %v21136_v31  ;;  %v21138_v60 = vpack.c.bf16 %v15602_v4, %v15582_v18  ;;  %v21139_v9 = vpack.c.bf16 %v15604_v2, %v15584_v12  ;;  %v21140_v49 = vpack.c.bf16 %v15594_v41, %v15570_v15  ;;  %v21143_v2 = vld [vmem:[#allocation6_spill] sm:$0xff]  ;;  %v2631_v41 = vld [vmem:[%s20087_s3 + $0x188] sm:$0xff]  ;;  %v21172_v31 = vld [vmem:[#allocation21_spill] sm:$0xff] }
 0x328   :  { %6248 = vmatprep.subr.bf16.mxu1 %v2481_v36  ;;  %4534 = vmatmul.mubr.bf16.gmra.mrb[12].mxu0 %v12708_v40  ;;  %v2488_v59 = vmax.bf16 %v20642_v42, %v21137_v38  ;;  %v21141_v63 = vpack.c.bf16 %v15596_v32, %v15572_v1  ;;  %v21142_v12 = vpack.c.bf16 %v15664_v35, %v15644_v51  ;;  %v2635_v1 = vld [vmem:[%s20087_s3 + $0x1a8] sm:$0xff] }
 0x329   :  { %4837 = vmatpush1.bf16.msra.mxu0 %v2478_v56  ;;  %4543 = vmatprep.mubr.bf16.mxu0 %v12717_v10  ;;  %v2491_v17 = vmax.bf16 %v20642_v42, %v21138_v60  ;;  %v2493_v48 = vmax.bf16 %v20642_v42, %v21139_v9  ;;  %v2490_v52 = vmax.bf16 %v20642_v42, %v21140_v49  ;;  %v21145_v51 = vld [vmem:[#allocation3_spill] sm:$0xff]  ;;  %v21146_v32 = vld [vmem:[#allocation8_spill] sm:$0xff]  ;;  %v21160_v56 = vld [vmem:[#allocation13_spill] sm:$0xff] }
 0x32a   :  { %5946 = vmatmul.mubr.bf16.gmra.mrb[12].mxu1 %v12708_v40  ;;  %4838 = vmatprep.subr.bf16.mxu0 %v2483_v7  ;;  %v2492_v18 = vmax.bf16 %v20642_v42, %v21141_v63  ;;  %v2495_v4 = vmax.bf16 %v20642_v42, %v21142_v12  ;;  %v21144_v26 = vpack.c.bf16 %v15666_v47, %v21143_v2  ;;  %v21157_v40 = vld [vmem:[#allocation12_spill] sm:$0xff]  ;;  %v21164_v7 = vld [vmem:[#allocation19_spill] sm:$0xff]  ;;  %v21176_v9 = vld [vmem:[#allocation29_spill] sm:$0xff] }
 0x32b   :  { %6249 = vmatpush1.bf16.msra.mxu1 %v2480_v24  ;;  %5955 = vmatprep.mubr.bf16.mxu1 %v12717_v10  ;;  %v12724_v15 = vcombine.low %v2623_v53, %v2627_v23  ;;  %v21147_v35 = vpack.c.bf16 %v21145_v51, %v21146_v32  ;;  %v21150_v43 = vpack.c.bf16 %v21148_v28, %v21149_v45  ;;  %v2643_v50 = vld [vmem:[%s20087_s3 + $0x1e8] sm:$0xff]  ;;  %v21188_v51 = vld [vmem:[#allocation37_spill] sm:$0xff] }
 0x32c   :  { %6250 = vmatprep.subr.bf16.mxu1 %v2485_v57  ;;  %v2497_v44 = vmax.bf16 %v20642_v42, %v21144_v26  ;;  %v12733_v21 = vcombine.high %v2631_v41, %v2635_v1  ;;  %v21153_v33 = vpack.c.bf16 %v21151_v19, %v21152_v25  ;;  %v21156_v55 = vpack.c.bf16 %v21154_v39, %v21155_v27  ;;  %v21179_v63 = vld [vmem:[#allocation32_spill] sm:$0xff]  ;;  %v21183_v26 = vld [vmem:[#allocation31_spill] sm:$0xff] }
 0x32d   :  { %4839 = vmatpush1.bf16.msra.mxu0 %v2482_v62  ;;  %v2494_v47 = vmax.bf16 %v20642_v42, %v21147_v35  ;;  %v2496_v8 = vmax.bf16 %v20642_v42, %v21150_v43  ;;  %v21159_v54 = vpack.c.bf16 %v21157_v40, %v21158_v13  ;;  %v21162_v24 = vpack.c.bf16 %v21160_v56, %v21161_v20  ;;  %v21167_v62 = vld [vmem:[#allocation24_spill] sm:$0xff]  ;;  %v21189_v32 = vld [vmem:[#allocation39_spill] sm:$0xff]  ;;  %v21198_v40 = vld [vmem:[#allocation34_spill] sm:$0xff] }
 0x32e   :  { %4840 = vmatprep.subr.bf16.mxu0 %v2487_v46  ;;  %v2499_v16 = vmax.bf16 %v20642_v42, %v21153_v33  ;;  %v2501_v36 = vmax.bf16 %v20642_v42, %v21156_v55  ;;  %v21165_v34 = vpack.c.bf16 %v21163_v30, %v21164_v7  ;;  %v21168_v5 = vpack.c.bf16 %v21166_v58, %v21167_v62  ;;  %v2639_v46 = vld [vmem:[%s20087_s3 + $0x1c8] sm:$0xff] }
 0x32f   :  { %6251 = vmatpush1.bf16.msra.mxu1 %v2484_v61  ;;  %v2498_v29 = vmax.bf16 %v20642_v42, %v21159_v54  ;;  %v2500_v10 = vmax.bf16 %v20642_v42, %v21162_v24  ;;  %v12732_v14 = vcombine.low %v2631_v41, %v2635_v1  ;;  %v21175_v60 = vpack.c.bf16 %v15850_v6, %v15830_v3  ;;  %v21182_v2 = vld [vmem:[#allocation28_spill] sm:$0xff]  ;;  %v21201_v56 = vld [vmem:[#allocation47_spill] sm:$0xff] }
 0x330   :  { %6252 = vmatprep.subr.bf16.mxu1 %v2489_v11  ;;  %4544 = vmatmul.mubr.bf16.gmra.mrb[16].mxu0 %v12716_v22  ;;  %v2503_v57 = vmax.bf16 %v20642_v42, %v21165_v34  ;;  %v2505_v61 = vmax.bf16 %v20642_v42, %v21168_v5  ;;  %v21169_v11 = vld [vmem:[#allocation20_spill] sm:$0xff]  ;;  %v21190_v35 = vpack.c.bf16 %v21188_v51, %v21189_v32  ;;  %v21203_v7 = vld [vmem:[#allocation43_spill] sm:$0xff]  ;;  %v21204_v34 = vld [vmem:[#allocation33_spill] sm:$0xff] }
 0x331   :  { %4841 = vmatpush1.bf16.msra.mxu0 %v2486_v37  ;;  %4553 = vmatprep.mubr.bf16.mxu0 %v12725_v0  ;;  %v21173_v37 = vld [vmem:[#allocation23_spill] sm:$0xff]  ;;  %v21185_v6 = vld [vmem:[#allocation36_spill] sm:$0xff]  ;;  %v12740_v28 = vcombine.low %v2639_v46, %v2643_v50  ;;  %v21207_v5 = vld [vmem:[#allocation38_spill] sm:$0xff] }
 0x332   :  { %5956 = vmatmul.mubr.bf16.gmra.mrb[16].mxu1 %v12716_v22  ;;  %4842 = vmatprep.subr.bf16.mxu0 %v2491_v17  ;;  %v21170_v22 = vld [vmem:[#allocation10_spill] sm:$0xff]  ;;  %v21174_v38 = vpack.c.bf16 %v21172_v31, %v21173_v37  ;;  %v2507_v17 = vmax.bf16 %v20642_v42, %v21175_v60  ;;  %v2647_v45 = vld [vmem:[%s20087_s3 + $0x208] sm:$0xff] }
 0x333   :  { %6253 = vmatpush1.bf16.msra.mxu1 %v2488_v59  ;;  %5965 = vmatprep.mubr.bf16.mxu1 %v12725_v0  ;;  %v21171_v53 = vpack.c.bf16 %v21169_v11, %v21170_v22  ;;  %v12741_v0 = vcombine.high %v2639_v46, %v2643_v50  ;;  %v2651_v43 = vld [vmem:[%s20087_s3 + $0x228] sm:$0xff]  ;;  %v21210_v50 = vld [vmem:[#allocation42_spill] sm:$0xff] }
 0x334   :  { %6254 = vmatprep.subr.bf16.mxu1 %v2493_v48  ;;  %v2504_v59 = vmax.bf16 %v20642_v42, %v21174_v38  ;;  %v21177_v48 = vld [vmem:[#allocation27_spill] sm:$0xff]  ;;  %v21194_v33 = vld [vmem:[#allocation40_spill] sm:$0xff]  ;;  %v12749_v55 = vcombine.high %v2647_v45, %v2651_v43  ;;  %v12748_v38 = vcombine.low %v2647_v45, %v2651_v43 }
 0x335   :  { %4843 = vmatpush1.bf16.msra.mxu0 %v2490_v52  ;;  %v2502_v23 = vmax.bf16 %v20642_v42, %v21171_v53  ;;  %v21178_v49 = vpack.c.bf16 %v21176_v9, %v21177_v48  ;;  %v2659_v30 = vld [vmem:[%s20087_s3 + $0x268] sm:$0xff]  ;;  %v21212_v53 = vld [vmem:[#allocation53_spill] sm:$0xff] }
 0x336   :  { %4844 = vmatprep.subr.bf16.mxu0 %v2495_v4  ;;  %v21206_v62 = vld [vmem:[#allocation48_spill] sm:$0xff] }
 0x337   :  { %6255 = vmatpush1.bf16.msra.mxu1 %v2492_v18  ;;  %v2509_v52 = vmax.bf16 %v20642_v42, %v21178_v49  ;;  %v21180_v18 = vld [vmem:[#allocation18_spill] sm:$0xff]  ;;  %v21209_v46 = vld [vmem:[#allocation52_spill] sm:$0xff] }
 0x338   :  { %6256 = vmatprep.subr.bf16.mxu1 %v2497_v44  ;;  %4554 = vmatmul.mubr.bf16.gmra.mrb[20].mxu0 %v12724_v15  ;;  %v21181_v12 = vpack.c.bf16 %v21179_v63, %v21180_v18  ;;  %v21184_v44 = vpack.c.bf16 %v21182_v2, %v21183_v26  ;;  %v21211_v11 = vpack.c.bf16 %v21209_v46, %v21210_v50  ;;  %v2667_v60 = vld [vmem:[%s20087_s3 + $0x2a8] sm:$0xff] }
 0x339   :  { %4845 = vmatpush1.bf16.msra.mxu0 %v2494_v47  ;;  %4563 = vmatprep.mubr.bf16.mxu0 %v12733_v21  ;;  %v2513_v47 = vmax.bf16 %v20642_v42, %v21190_v35  ;;  %v2671_v48 = vld [vmem:[%s20087_s3 + $0x2c8] sm:$0xff] }
 0x33a   :  { %5966 = vmatmul.mubr.bf16.gmra.mrb[20].mxu1 %v12724_v15  ;;  %4846 = vmatprep.subr.bf16.mxu0 %v2499_v16  ;;  %v2506_v4 = vmax.bf16 %v20642_v42, %v21181_v12  ;;  %v2508_v3 = vmax.bf16 %v20642_v42, %v21184_v44  ;;  %v21186_v15 = vld [vmem:[#allocation26_spill] sm:$0xff]  ;;  %v2519_v22 = vmax.bf16 %v20642_v42, %v21211_v11  ;;  %v2675_v49 = vld [vmem:[%s20087_s3 + $0x2e8] sm:$0xff] }
 0x33b   :  { %6257 = vmatpush1.bf16.msra.mxu1 %v2496_v8  ;;  %5975 = vmatprep.mubr.bf16.mxu1 %v12733_v21  ;;  %v21187_v41 = vpack.c.bf16 %v21185_v6, %v21186_v15  ;;  %v21191_v8 = vld [vmem:[#allocation35_spill] sm:$0xff]  ;;  %v21192_v21 = vld [vmem:[#allocation25_spill] sm:$0xff]  ;;  %v21195_v16 = vld [vmem:[#allocation30_spill] sm:$0xff]  ;;  %v12773_v63 = vcombine.high %v2671_v48, %v2675_v49 }
 0x33c   :  { %6258 = vmatprep.subr.bf16.mxu1 %v2501_v36  ;;  %v21193_v19 = vpack.c.bf16 %v21191_v8, %v21192_v21  ;;  %v21196_v39 = vpack.c.bf16 %v21194_v33, %v21195_v16  ;;  %v21197_v36 = vld [vmem:[#allocation44_spill] sm:$0xff] }
 0x33d   :  { %4847 = vmatpush1.bf16.msra.mxu0 %v2498_v29  ;;  %v2511_v1 = vmax.bf16 %v20642_v42, %v21187_v41  ;;  %v21199_v13 = vpack.c.bf16 %v21197_v36, %v21198_v40  ;;  %v21200_v29 = vld [vmem:[#allocation45_spill] sm:$0xff]  ;;  %v2679_v18 = vld [vmem:[%s20087_s3 + $0x308] sm:$0xff] }
 0x33e   :  { %4848 = vmatprep.subr.bf16.mxu0 %v2503_v57  ;;  %v2510_v25 = vmax.bf16 %v20642_v42, %v21193_v19  ;;  %v2512_v27 = vmax.bf16 %v20642_v42, %v21196_v39  ;;  %v21202_v20 = vpack.c.bf16 %v21200_v29, %v21201_v56  ;;  %v21205_v57 = vpack.c.bf16 %v21203_v7, %v21204_v34  ;;  %v2683_v12 = vld [vmem:[%s20087_s3 + $0x328] sm:$0xff] }
 0x33f   :  { %6259 = vmatpush1.bf16.msra.mxu1 %v2500_v10  ;;  %v2515_v54 = vmax.bf16 %v20642_v42, %v21199_v13  ;;  %v2655_v10 = vld [vmem:[%s20087_s3 + $0x248] sm:$0xff]  ;;  %v12781_v2 = vcombine.high %v2679_v18, %v2683_v12 }
 0x340   :  { %6260 = vmatprep.subr.bf16.mxu1 %v2505_v61  ;;  %4564 = vmatmul.mubr.bf16.gmra.mrb[24].mxu0 %v12732_v14  ;;  %v2517_v24 = vmax.bf16 %v20642_v42, %v21202_v20  ;;  %v2514_v58 = vmax.bf16 %v20642_v42, %v21205_v57  ;;  %v21208_v61 = vpack.c.bf16 %v21206_v62, %v21207_v5  ;;  %v2687_v26 = vld [vmem:[%s20087_s3 + $0x348] sm:$0xff] }
 0x341   :  { %4849 = vmatpush1.bf16.msra.mxu0 %v2502_v23  ;;  %4573 = vmatprep.mubr.bf16.mxu0 %v12741_v0  ;;  %v21213_v23 = vld [vmem:[#allocation55_spill] sm:$0xff] }
 0x342   :  { %5976 = vmatmul.mubr.bf16.gmra.mrb[24].mxu1 %v12732_v14  ;;  %4850 = vmatprep.subr.bf16.mxu0 %v2507_v17  ;;  %v2516_v14 = vmax.bf16 %v20642_v42, %v21208_v61  ;;  %v21214_v31 = vpack.c.bf16 %v21212_v53, %v21213_v23  ;;  %v12756_v17 = vcombine.low %v2655_v10, %v2659_v30  ;;  %v2691_v44 = vld [vmem:[%s20087_s3 + $0x368] sm:$0xff] }
 0x343   :  { %6261 = vmatpush1.bf16.msra.mxu1 %v2504_v59  ;;  %5985 = vmatprep.mubr.bf16.mxu1 %v12741_v0  ;;  %v12757_v59 = vcombine.high %v2655_v10, %v2659_v30  ;;  %v2663_v0 = vld [vmem:[%s20087_s3 + $0x288] sm:$0xff]  ;;  %v12789_v6 = vcombine.high %v2687_v26, %v2691_v44 }
 0x344   :  { %6262 = vmatprep.subr.bf16.mxu1 %v2509_v52  ;;  %v2521_v37 = vmax.bf16 %v20642_v42, %v21214_v31  ;;  %v12765_v9 = vcombine.high %v2663_v0, %v2667_v60  ;;  %v12764_v52 = vcombine.low %v2663_v0, %v2667_v60  ;;  %v2695_v15 = vld [vmem:[%s20087_s3 + $0x388] sm:$0xff] }
 0x345   :  { %4851 = vmatpush1.bf16.msra.mxu0 %v2506_v4  ;;  %v12772_v4 = vcombine.low %v2671_v48, %v2675_v49  ;;  %v2699_v41 = vld [vmem:[%s20087_s3 + $0x3a8] sm:$0xff] }
 0x346   :  { %4852 = vmatprep.subr.bf16.mxu0 %v2511_v1  ;;  %v12788_v1 = vcombine.low %v2687_v26, %v2691_v44  ;;  %v12797_v51 = vcombine.high %v2695_v15, %v2699_v41  ;;  %v2703_v32 = vld [vmem:[%s20087_s3 + $0x3c8] sm:$0xff] }
 0x347   :  { %6263 = vmatpush1.bf16.msra.mxu1 %v2508_v3  ;;  %v12780_v3 = vcombine.low %v2679_v18, %v2683_v12  ;;  %v2707_v35 = vld [vmem:[%s20087_s3 + $0x3e8] sm:$0xff] }
 0x348   :  { %6264 = vmatprep.subr.bf16.mxu1 %v2513_v47  ;;  %4574 = vmatmul.mubr.bf16.gmra.mrb[28].mxu0 %v12740_v28  ;;  %v12796_v47 = vcombine.low %v2695_v15, %v2699_v41  ;;  %v2711_v45 = vld [vmem:[%s20087_s3 + $0x408] sm:$0xff]  ;;  %v12804_v8 = vcombine.low %v2703_v32, %v2707_v35 }
 0x349   :  { %4853 = vmatpush1.bf16.msra.mxu0 %v2510_v25  ;;  %4583 = vmatprep.mubr.bf16.mxu0 %v12749_v55  ;;  %v2715_v43 = vld [vmem:[%s20087_s3 + $0x428] sm:$0xff] }
 0x34a   :  { %5986 = vmatmul.mubr.bf16.gmra.mrb[28].mxu1 %v12740_v28  ;;  %4854 = vmatprep.subr.bf16.mxu0 %v2515_v54  ;;  %v12805_v28 = vcombine.high %v2703_v32, %v2707_v35  ;;  %v12813_v21 = vcombine.high %v2711_v45, %v2715_v43  ;;  %v2719_v19 = vld [vmem:[%s20087_s3 + $0x448] sm:$0xff]  ;;  %v12812_v33 = vcombine.low %v2711_v45, %v2715_v43  ;;  %v2584_v43 = vld [vmem:[%s20087_s3 + $0x10] sm:$0xff] }
 0x34b   :  { %6265 = vmatpush1.bf16.msra.mxu1 %v2512_v27  ;;  %5995 = vmatprep.mubr.bf16.mxu1 %v12749_v55  ;;  %v2723_v25 = vld [vmem:[%s20087_s3 + $0x468] sm:$0xff] }
 0x34c   :  { %6266 = vmatprep.subr.bf16.mxu1 %v2517_v24  ;;  %v12821_v16 = vcombine.high %v2719_v19, %v2723_v25  ;;  %v2727_v39 = vld [vmem:[%s20087_s3 + $0x488] sm:$0xff]  ;;  %v12820_v55 = vcombine.low %v2719_v19, %v2723_v25 }
 0x34d   :  { %4855 = vmatpush1.bf16.msra.mxu0 %v2514_v58  ;;  %v2731_v27 = vld [vmem:[%s20087_s3 + $0x4a8] sm:$0xff] }
 0x34e   :  { %5177 = vmatprep.subr.bf16.mxu0 %v2519_v22  ;;  %v12829_v36 = vcombine.high %v2727_v39, %v2731_v27  ;;  %v2735_v40 = vld [vmem:[%s20087_s3 + $0x4c8] sm:$0xff]  ;;  %v12828_v54 = vcombine.low %v2727_v39, %v2731_v27  ;;  %v21216_v27 = vld [vmem:[#allocation41_spill] sm:$0xff] }
 0x34f   :  { %6267 = vmatpush1.bf16.msra.mxu1 %v2516_v14  ;;  %v2739_v13 = vld [vmem:[%s20087_s3 + $0x4e8] sm:$0xff] }
 0x350   :  { %6589 = vmatprep.subr.bf16.mxu1 %v2521_v37  ;;  %4584 = vmatmul.mubr.bf16.gmra.mrb[32].mxu0 %v12748_v38  ;;  %v12837_v29 = vcombine.high %v2735_v40, %v2739_v13  ;;  %v2743_v56 = vld [vmem:[%s20087_s3 + $0x508] sm:$0xff]  ;;  %v12836_v24 = vcombine.low %v2735_v40, %v2739_v13  ;;  %v21219_v13 = vld [vmem:[#allocation46_spill] sm:$0xff] }
 0x351   :  { %4593 = vmatprep.mubr.bf16.mxu0 %v12757_v59  ;;  %v2747_v20 = vld [vmem:[%s20087_s3 + $0x528] sm:$0xff] }
 0x352   :  { %5996 = vmatmul.mubr.bf16.gmra.mrb[32].mxu1 %v12748_v38  ;;  %v12845_v10 = vcombine.high %v2743_v56, %v2747_v20  ;;  %v2751_v30 = vld [vmem:[%s20087_s3 + $0x548] sm:$0xff]  ;;  %v12844_v34 = vcombine.low %v2743_v56, %v2747_v20 }
 0x353   :  { %6005 = vmatprep.mubr.bf16.mxu1 %v12757_v59  ;;  %v2755_v7 = vld [vmem:[%s20087_s3 + $0x568] sm:$0xff] }
 0x354   :  { %v12853_v57 = vcombine.high %v2751_v30, %v2755_v7  ;;  %v2759_v58 = vld [vmem:[%s20087_s3 + $0x588] sm:$0xff]  ;;  %v12852_v5 = vcombine.low %v2751_v30, %v2755_v7  ;;  %v21224_v7 = vld [vmem:[#allocation61_spill] sm:$0xff] }
 0x355   :  { %v2763_v62 = vld [vmem:[%s20087_s3 + $0x5a8] sm:$0xff] }
 0x356   :  { %v12861_v61 = vcombine.high %v2759_v58, %v2763_v62  ;;  %v2767_v14 = vld [vmem:[%s20087_s3 + $0x5c8] sm:$0xff]  ;;  %v12860_v50 = vcombine.low %v2759_v58, %v2763_v62 }
 0x357   :  { %v2771_v46 = vld [vmem:[%s20087_s3 + $0x5e8] sm:$0xff] }
 0x358   :  { %4594 = vmatmul.mubr.bf16.gmra.mrb[36].mxu0 %v12756_v17  ;;  %v12869_v11 = vcombine.high %v2767_v14, %v2771_v46  ;;  %v2775_v22 = vld [vmem:[%s20087_s3 + $0x608] sm:$0xff]  ;;  %v12868_v23 = vcombine.low %v2767_v14, %v2771_v46 }
 0x359   :  { %4603 = vmatprep.mubr.bf16.mxu0 %v12765_v9  ;;  %v2779_v53 = vld [vmem:[%s20087_s3 + $0x628] sm:$0xff] }
 0x35a   :  { %6006 = vmatmul.mubr.bf16.gmra.mrb[36].mxu1 %v12756_v17  ;;  %v12877_v31 = vcombine.high %v2775_v22, %v2779_v53  ;;  %v2783_v37 = vld [vmem:[%s20087_s3 + $0x648] sm:$0xff]  ;;  %v12876_v59 = vcombine.low %v2775_v22, %v2779_v53 }
 0x35b   :  { %6015 = vmatprep.mubr.bf16.mxu1 %v12765_v9  ;;  %v2787_v38 = vld [vmem:[%s20087_s3 + $0x668] sm:$0xff] }
 0x35c   :  { %v12885_v0 = vcombine.high %v2783_v37, %v2787_v38  ;;  %v2791_v60 = vld [vmem:[%s20087_s3 + $0x688] sm:$0xff]  ;;  %v12884_v9 = vcombine.low %v2783_v37, %v2787_v38  ;;  %v21236_v38 = vld [vmem:[#allocation69_spill] sm:$0xff] }
 0x35d   :  { %v2795_v17 = vld [vmem:[%s20087_s3 + $0x6a8] sm:$0xff] }
 0x35e   :  { %v12893_v48 = vcombine.high %v2791_v60, %v2795_v17  ;;  %v2799_v49 = vld [vmem:[%s20087_s3 + $0x6c8] sm:$0xff] }
 0x35f   :  { %v2807_v12 = vld [vmem:[%s20087_s3 + $0x708] sm:$0xff] }
 0x360   :  { %4604 = vmatmul.mubr.bf16.gmra.mrb[40].mxu0 %v12764_v52  ;;  %v2815_v44 = vld [vmem:[%s20087_s3 + $0x748] sm:$0xff] }
 0x361   :  { %4613 = vmatprep.mubr.bf16.mxu0 %v12773_v63  ;;  %v2823_v41 = vld [vmem:[%s20087_s3 + $0x788] sm:$0xff] }
 0x362   :  { %6016 = vmatmul.mubr.bf16.gmra.mrb[40].mxu1 %v12764_v52  ;;  %v2803_v52 = vld [vmem:[%s20087_s3 + $0x6e8] sm:$0xff] }
 0x363   :  { %6025 = vmatprep.mubr.bf16.mxu1 %v12773_v63  ;;  %v12892_v63 = vcombine.low %v2791_v60, %v2795_v17  ;;  %v12901_v18 = vcombine.high %v2799_v49, %v2803_v52  ;;  %v2831_v35 = vld [vmem:[%s20087_s3 + $0x7c8] sm:$0xff] }
 0x364   :  { %v21215_v39 = vld [vmem:[#allocation51_spill] sm:$0xff]  ;;  %v21218_v40 = vld [vmem:[#allocation56_spill] sm:$0xff] }
 0x365   :  { %v21221_v20 = vld [vmem:[#allocation60_spill] sm:$0xff]  ;;  %v21227_v62 = vld [vmem:[#allocation59_spill] sm:$0xff] }
 0x366   :  { %v21230_v46 = vld [vmem:[#allocation64_spill] sm:$0xff] }
 0x367   :  { %v21233_v53 = vld [vmem:[#allocation68_spill] sm:$0xff] }
 0x368   :  { %4614 = vmatmul.mubr.bf16.gmra.mrb[44].mxu0 %v12772_v4 }
 0x369   :  { %4623 = vmatprep.mubr.bf16.mxu0 %v12781_v2 }
 0x36a   :  { %6026 = vmatmul.mubr.bf16.gmra.mrb[44].mxu1 %v12772_v4  ;;  %v2811_v4 = vld [vmem:[%s20087_s3 + $0x728] sm:$0xff] }
 0x36b   :  { %6035 = vmatprep.mubr.bf16.mxu1 %v12781_v2  ;;  %v12900_v2 = vcombine.low %v2799_v49, %v2803_v52  ;;  %v12909_v26 = vcombine.high %v2807_v12, %v2811_v4  ;;  %v21239_v49 = vld [vmem:[#allocation67_spill] sm:$0xff]  ;;  %v21240_v52 = vld [vmem:[#allocation57_spill] sm:$0xff] }
 0x370   :  { %4624 = vmatmul.mubr.bf16.gmra.mrb[48].mxu0 %v12780_v3 }
 0x371   :  { %4633 = vmatprep.mubr.bf16.mxu0 %v12789_v6 }
 0x372   :  { %6036 = vmatmul.mubr.bf16.gmra.mrb[48].mxu1 %v12780_v3  ;;  %v2819_v3 = vld [vmem:[%s20087_s3 + $0x768] sm:$0xff] }
 0x373   :  { %6045 = vmatprep.mubr.bf16.mxu1 %v12789_v6  ;;  %v12908_v6 = vcombine.low %v2807_v12, %v2811_v4  ;;  %v12917_v15 = vcombine.high %v2815_v44, %v2819_v3  ;;  %v21242_v12 = vld [vmem:[#allocation72_spill] sm:$0xff]  ;;  %v21243_v4 = vld [vmem:[#allocation62_spill] sm:$0xff] }
 0x378   :  { %4634 = vmatmul.mubr.bf16.gmra.mrb[52].mxu0 %v12788_v1 }
 0x379   :  { %4643 = vmatprep.mubr.bf16.mxu0 %v12797_v51 }
 0x37a   :  { %6046 = vmatmul.mubr.bf16.gmra.mrb[52].mxu1 %v12788_v1  ;;  %v2827_v1 = vld [vmem:[%s20087_s3 + $0x7a8] sm:$0xff] }
 0x37b   :  { %6055 = vmatprep.mubr.bf16.mxu1 %v12797_v51  ;;  %v12916_v51 = vcombine.low %v2815_v44, %v2819_v3  ;;  %v12925_v32 = vcombine.high %v2823_v41, %v2827_v1  ;;  %v21245_v3 = vld [vmem:[#allocation76_spill] sm:$0xff] }
 0x380   :  { %4644 = vmatmul.mubr.bf16.gmra.mrb[56].mxu0 %v12796_v47 }
 0x381   :  { %4653 = vmatprep.mubr.bf16.mxu0 %v12805_v28 }
 0x382   :  { %6056 = vmatmul.mubr.bf16.gmra.mrb[56].mxu1 %v12796_v47  ;;  %v2835_v47 = vld [vmem:[%s20087_s3 + $0x7e8] sm:$0xff] }
 0x383   :  { %6065 = vmatprep.mubr.bf16.mxu1 %v12805_v28  ;;  %v12924_v28 = vcombine.low %v2823_v41, %v2827_v1  ;;  %v12933_v45 = vcombine.high %v2831_v35, %v2835_v47  ;;  %v21248_v1 = vld [vmem:[#allocation77_spill] sm:$0xff] }
 0x388   :  { %4654 = vmatmul.mubr.bf16.gmra.mrb[60].mxu0 %v12804_v8 }
 0x389   :  { %4663 = vmatprep.mubr.bf16.mxu0 %v12813_v21 }
 0x38a   :  { %6066 = vmatmul.mubr.bf16.gmra.mrb[60].mxu1 %v12804_v8  ;;  %v2588_v8 = vld [vmem:[%s20087_s3 + $0x30] sm:$0xff] }
 0x38b   :  { %6075 = vmatprep.mubr.bf16.mxu1 %v12813_v21  ;;  %v12932_v21 = vcombine.low %v2831_v35, %v2835_v47  ;;  %v12687_v19 = vcombine.high %v2584_v43, %v2588_v8  ;;  %v12686_v25 = vcombine.low %v2584_v43, %v2588_v8  ;;  %v21251_v47 = vld [vmem:[#allocation75_spill] sm:$0xff]  ;;  %v21254_v8 = vld [vmem:[#allocation80_spill] sm:$0xff] }
 0x390   :  { %4664 = vmatmul.mubr.bf16.gmra.mrb[64].mxu0 %v12812_v33 }
 0x391   :  { %4673 = vmatprep.mubr.bf16.mxu0 %v12821_v16 }
 0x392   :  { %6076 = vmatmul.mubr.bf16.gmra.mrb[64].mxu1 %v12812_v33  ;;  %v2592_v33 = vld [vmem:[%s20087_s3 + $0x50] sm:$0xff] }
 0x393   :  { %6085 = vmatprep.mubr.bf16.mxu1 %v12821_v16  ;;  %v2596_v16 = vld [vmem:[%s20087_s3 + $0x70] sm:$0xff] }
 0x394   :  { %v12695_v56 = vcombine.high %v2592_v33, %v2596_v16  ;;  %v12694_v17 = vcombine.low %v2592_v33, %v2596_v16  ;;  %v21257_v33 = vld [vmem:[#allocation84_spill] sm:$0xff]  ;;  %v21258_v16 = vld [vmem:[#allocation74_spill] sm:$0xff] }
 0x398   :  { %4674 = vmatmul.mubr.bf16.gmra.mrb[68].mxu0 %v12820_v55 }
 0x399   :  { %4683 = vmatprep.mubr.bf16.mxu0 %v12829_v36 }
 0x39a   :  { %6086 = vmatmul.mubr.bf16.gmra.mrb[68].mxu1 %v12820_v55  ;;  %v21217_v55 = vpack.c.bf16 %v21215_v39, %v21216_v27  ;;  %v21259_v39 = vpack.c.bf16 %v21257_v33, %v21258_v16  ;;  %v21299_v16 = vld [vmem:[#allocation144_spill] sm:$0xff] }
 0x39b   :  { %6095 = vmatprep.mubr.bf16.mxu1 %v12829_v36 }
 0x39c   :  { %v2518_v36 = vmax.bf16 %v20642_v42, %v21217_v55  ;;  %v2535_v27 = vmax.bf16 %v20642_v42, %v21259_v39  ;;  %v21260_v55 = vld [vmem:[#allocation123_spill] sm:$0xff]  ;;  %v21300_v39 = vld [vmem:[#allocation140_spill] sm:$0xff] }
 0x3a0   :  { %4684 = vmatmul.mubr.bf16.gmra.mrb[72].mxu0 %v12828_v54 }
 0x3a1   :  { %4693 = vmatprep.mubr.bf16.mxu0 %v12837_v29 }
 0x3a2   :  { %6096 = vmatmul.mubr.bf16.gmra.mrb[72].mxu1 %v12828_v54  ;;  %v21220_v54 = vpack.c.bf16 %v21218_v40, %v21219_v13 }
 0x3a3   :  { %6105 = vmatprep.mubr.bf16.mxu1 %v12837_v29 }
 0x3a4   :  { %v2520_v29 = vmax.bf16 %v20642_v42, %v21220_v54 }
 0x3a8   :  { %4694 = vmatmul.mubr.bf16.gmra.mrb[76].mxu0 %v12836_v24 }
 0x3a9   :  { %4703 = vmatprep.mubr.bf16.mxu0 %v12845_v10 }
 0x3aa   :  { %6106 = vmatmul.mubr.bf16.gmra.mrb[76].mxu1 %v12836_v24  ;;  %v21222_v24 = vld [vmem:[#allocation50_spill] sm:$0xff] }
 0x3ab   :  { %6115 = vmatprep.mubr.bf16.mxu1 %v12845_v10  ;;  %v21223_v10 = vpack.c.bf16 %v21221_v20, %v21222_v24  ;;  %v21263_v20 = vld [vmem:[#allocation83_spill] sm:$0xff]  ;;  %v21264_v24 = vld [vmem:[#allocation73_spill] sm:$0xff] }
 0x3ad   :  { %v2523_v30 = vmax.bf16 %v20642_v42, %v21223_v10  ;;  %v21265_v10 = vpack.c.bf16 %v21263_v20, %v21264_v24 }
 0x3b0   :  { %4704 = vmatmul.mubr.bf16.gmra.mrb[80].mxu0 %v12844_v34 }
 0x3b1   :  { %4713 = vmatprep.mubr.bf16.mxu0 %v12853_v57 }
 0x3b2   :  { %6116 = vmatmul.mubr.bf16.gmra.mrb[80].mxu1 %v12844_v34  ;;  %v21225_v34 = vld [vmem:[#allocation63_spill] sm:$0xff] }
 0x3b3   :  { %6125 = vmatprep.mubr.bf16.mxu1 %v12853_v57  ;;  %v21226_v57 = vpack.c.bf16 %v21224_v7, %v21225_v34  ;;  %v21266_v7 = vld [vmem:[#allocation88_spill] sm:$0xff]  ;;  %v21267_v34 = vld [vmem:[#allocation78_spill] sm:$0xff] }
 0x3b5   :  { %v2525_v58 = vmax.bf16 %v20642_v42, %v21226_v57  ;;  %v21268_v57 = vpack.c.bf16 %v21266_v7, %v21267_v34 }
 0x3b8   :  { %4714 = vmatmul.mubr.bf16.gmra.mrb[84].mxu0 %v12852_v5 }
 0x3b9   :  { %4723 = vmatprep.mubr.bf16.mxu0 %v12861_v61 }
 0x3ba   :  { %6126 = vmatmul.mubr.bf16.gmra.mrb[84].mxu1 %v12852_v5  ;;  %v21228_v5 = vld [vmem:[#allocation49_spill] sm:$0xff] }
 0x3bb   :  { %6135 = vmatprep.mubr.bf16.mxu1 %v12861_v61  ;;  %v21229_v61 = vpack.c.bf16 %v21227_v62, %v21228_v5  ;;  %v21269_v5 = vld [vmem:[#allocation130_spill] sm:$0xff] }
 0x3bd   :  { %v2522_v14 = vmax.bf16 %v20642_v42, %v21229_v61  ;;  %v21270_v61 = vld [vmem:[#allocation126_spill] sm:$0xff] }
 0x3c0   :  { %4724 = vmatmul.mubr.bf16.gmra.mrb[88].mxu0 %v12860_v50 }
 0x3c1   :  { %4733 = vmatprep.mubr.bf16.mxu0 %v12869_v11 }
 0x3c2   :  { %6136 = vmatmul.mubr.bf16.gmra.mrb[88].mxu1 %v12860_v50  ;;  %v21231_v50 = vld [vmem:[#allocation54_spill] sm:$0xff] }
 0x3c3   :  { %6145 = vmatprep.mubr.bf16.mxu1 %v12869_v11  ;;  %v21232_v11 = vpack.c.bf16 %v21230_v46, %v21231_v50  ;;  %v21272_v50 = vld [vmem:[#allocation131_spill] sm:$0xff] }
 0x3c5   :  { %v2524_v22 = vmax.bf16 %v20642_v42, %v21232_v11  ;;  %v21273_v11 = vld [vmem:[#allocation127_spill] sm:$0xff] }
 0x3c8   :  { %4734 = vmatmul.mubr.bf16.gmra.mrb[92].mxu0 %v12868_v23 }
 0x3c9   :  { %4743 = vmatprep.mubr.bf16.mxu0 %v12877_v31 }
 0x3ca   :  { %6146 = vmatmul.mubr.bf16.gmra.mrb[92].mxu1 %v12868_v23  ;;  %v21234_v23 = vld [vmem:[#allocation58_spill] sm:$0xff] }
 0x3cb   :  { %6155 = vmatprep.mubr.bf16.mxu1 %v12877_v31  ;;  %v21235_v31 = vpack.c.bf16 %v21233_v53, %v21234_v23  ;;  %v21275_v23 = vld [vmem:[#allocation128_spill] sm:$0xff] }
 0x3cd   :  { %v2527_v37 = vmax.bf16 %v20642_v42, %v21235_v31  ;;  %v21276_v31 = vld [vmem:[#allocation124_spill] sm:$0xff] }
 0x3d0   :  { %4744 = vmatmul.mubr.bf16.gmra.mrb[96].mxu0 %v12876_v59 }
 0x3d1   :  { %4753 = vmatprep.mubr.bf16.mxu0 %v12885_v0 }
 0x3d2   :  { %6156 = vmatmul.mubr.bf16.gmra.mrb[96].mxu1 %v12876_v59  ;;  %v21237_v59 = vld [vmem:[#allocation71_spill] sm:$0xff] }
 0x3d3   :  { %6165 = vmatprep.mubr.bf16.mxu1 %v12885_v0  ;;  %v21238_v0 = vpack.c.bf16 %v21236_v38, %v21237_v59  ;;  %v21278_v59 = vld [vmem:[#allocation129_spill] sm:$0xff] }
 0x3d5   :  { %v2529_v60 = vmax.bf16 %v20642_v42, %v21238_v0  ;;  %v21279_v0 = vld [vmem:[#allocation125_spill] sm:$0xff] }
 0x3d8   :  { %4754 = vmatmul.mubr.bf16.gmra.mrb[100].mxu0 %v12884_v9 }
 0x3d9   :  { %4763 = vmatprep.mubr.bf16.mxu0 %v12893_v48 }
 0x3da   :  { %6166 = vmatmul.mubr.bf16.gmra.mrb[100].mxu1 %v12884_v9  ;;  %v2600_v9 = vld [vmem:[%s20087_s3 + $0x90] sm:$0xff] }
 0x3db   :  { %6175 = vmatprep.mubr.bf16.mxu1 %v12893_v48  ;;  %v2604_v48 = vld [vmem:[%s20087_s3 + $0xb0] sm:$0xff] }
 0x3dc   :  { %v12703_v44 = vcombine.high %v2600_v9, %v2604_v48  ;;  %v12702_v54 = vcombine.low %v2600_v9, %v2604_v48  ;;  %v21281_v9 = vld [vmem:[#allocation138_spill] sm:$0xff] }
 0x3dd   :  { %v21282_v48 = vld [vmem:[#allocation134_spill] sm:$0xff] }
 0x3e0   :  { %4764 = vmatmul.mubr.bf16.gmra.mrb[104].mxu0 %v12892_v63 }
 0x3e1   :  { %4773 = vmatprep.mubr.bf16.mxu0 %v12901_v18 }
 0x3e2   :  { %6176 = vmatmul.mubr.bf16.gmra.mrb[104].mxu1 %v12892_v63  ;;  %v21241_v63 = vpack.c.bf16 %v21239_v49, %v21240_v52  ;;  %v21283_v49 = vpack.c.bf16 %v21281_v9, %v21282_v48  ;;  %v21323_v48 = vld [vmem:[#allocation160_spill] sm:$0xff] }
 0x3e3   :  { %6185 = vmatprep.mubr.bf16.mxu1 %v12901_v18 }
 0x3e4   :  { %v2526_v18 = vmax.bf16 %v20642_v42, %v21241_v63  ;;  %v2543_v52 = vmax.bf16 %v20642_v42, %v21283_v49  ;;  %v21284_v63 = vld [vmem:[#allocation139_spill] sm:$0xff]  ;;  %v21324_v49 = vld [vmem:[#allocation156_spill] sm:$0xff] }
 0x3e8   :  { %4774 = vmatmul.mubr.bf16.gmra.mrb[108].mxu0 %v12900_v2 }
 0x3e9   :  { %4783 = vmatprep.mubr.bf16.mxu0 %v12909_v26 }
 0x3ea   :  { %6186 = vmatmul.mubr.bf16.gmra.mrb[108].mxu1 %v12900_v2  ;;  %v21244_v2 = vpack.c.bf16 %v21242_v12, %v21243_v4 }
 0x3eb   :  { %6195 = vmatprep.mubr.bf16.mxu1 %v12909_v26 }
 0x3ec   :  { %v2528_v26 = vmax.bf16 %v20642_v42, %v21244_v2 }
 0x3f0   :  { %4784 = vmatmul.mubr.bf16.gmra.mrb[112].mxu0 %v12908_v6 }
 0x3f1   :  { %4793 = vmatprep.mubr.bf16.mxu0 %v12917_v15 }
 0x3f2   :  { %6196 = vmatmul.mubr.bf16.gmra.mrb[112].mxu1 %v12908_v6  ;;  %v21246_v6 = vld [vmem:[#allocation66_spill] sm:$0xff] }
 0x3f3   :  { %6205 = vmatprep.mubr.bf16.mxu1 %v12917_v15  ;;  %v21247_v15 = vpack.c.bf16 %v21245_v3, %v21246_v6  ;;  %v21287_v3 = vld [vmem:[#allocation136_spill] sm:$0xff] }
 0x3f4   :  { %v21288_v6 = vld [vmem:[#allocation132_spill] sm:$0xff] }
 0x3f5   :  { %v2531_v41 = vmax.bf16 %v20642_v42, %v21247_v15  ;;  %v21289_v15 = vpack.c.bf16 %v21287_v3, %v21288_v6 }
 0x3f8   :  { %4794 = vmatmul.mubr.bf16.gmra.mrb[116].mxu0 %v12916_v51 }
 0x3f9   :  { %4803 = vmatprep.mubr.bf16.mxu0 %v12925_v32 }
 0x3fa   :  { %6206 = vmatmul.mubr.bf16.gmra.mrb[116].mxu1 %v12916_v51  ;;  %v21249_v51 = vld [vmem:[#allocation79_spill] sm:$0xff] }
 0x3fb   :  { %6215 = vmatprep.mubr.bf16.mxu1 %v12925_v32  ;;  %v21250_v32 = vpack.c.bf16 %v21248_v1, %v21249_v51  ;;  %v21290_v1 = vld [vmem:[#allocation137_spill] sm:$0xff] }
 0x3fc   :  { %v21291_v51 = vld [vmem:[#allocation133_spill] sm:$0xff] }
 0x3fd   :  { %v2533_v35 = vmax.bf16 %v20642_v42, %v21250_v32  ;;  %v21292_v32 = vpack.c.bf16 %v21290_v1, %v21291_v51 }
 0x400   :  { %4804 = vmatmul.mubr.bf16.gmra.mrb[120].mxu0 %v12924_v28 }
 0x401   :  { %4813 = vmatprep.mubr.bf16.mxu0 %v12933_v45 }
 0x402   :  { %6216 = vmatmul.mubr.bf16.gmra.mrb[120].mxu1 %v12924_v28  ;;  %v21252_v28 = vld [vmem:[#allocation65_spill] sm:$0xff] }
 0x403   :  { %6225 = vmatprep.mubr.bf16.mxu1 %v12933_v45  ;;  %v21253_v45 = vpack.c.bf16 %v21251_v47, %v21252_v28  ;;  %v21293_v28 = vld [vmem:[#allocation146_spill] sm:$0xff] }
 0x405   :  { %v2530_v43 = vmax.bf16 %v20642_v42, %v21253_v45  ;;  %v21294_v45 = vld [vmem:[#allocation142_spill] sm:$0xff] }
 0x408   :  { %4814 = vmatmul.mubr.bf16.gmra.mrb[124].mxu0 %v12932_v21 }
 0x409   :  { %4856 = vmatprep.mubr.bf16.mxu0 %v12687_v19 }
 0x40a   :  { %6226 = vmatmul.mubr.bf16.gmra.mrb[124].mxu1 %v12932_v21  ;;  %v21255_v21 = vld [vmem:[#allocation70_spill] sm:$0xff] }
 0x40b   :  { %6268 = vmatprep.mubr.bf16.mxu1 %v12687_v19  ;;  %v21256_v19 = vpack.c.bf16 %v21254_v8, %v21255_v21  ;;  %v21296_v21 = vld [vmem:[#allocation147_spill] sm:$0xff] }
 0x410   :  { %4857 = vmatmul.mubr.bf16.vlgmr.msra.gmra.mrb[0].mxu0 %v12686_v25 }
 0x411   :  { %5178 = vmatpush1.bf16.msra.mxu0 %v2518_v36  ;;  %4866 = vmatprep.mubr.bf16.mxu0 %v12695_v56  ;;  %v21261_v36 = vld [vmem:[#allocation87_spill] sm:$0xff] }
 0x412   :  { %6269 = vmatmul.mubr.bf16.vlgmr.msra.gmra.mrb[0].mxu1 %v12686_v25  ;;  %5179 = vmatprep.subr.bf16.mxu0 %v2523_v30  ;;  %v2532_v25 = vmax.bf16 %v20642_v42, %v21256_v19  ;;  %v21262_v40 = vpack.c.bf16 %v21260_v55, %v21261_v36  ;;  %v2534_v30 = vmax.bf16 %v20642_v42, %v21265_v10  ;;  %v21297_v19 = vld [vmem:[#allocation143_spill] sm:$0xff]  ;;  %v21302_v36 = vld [vmem:[#allocation145_spill] sm:$0xff] }
 0x413   :  { %6590 = vmatpush1.bf16.msra.mxu1 %v2520_v29  ;;  %6278 = vmatprep.mubr.bf16.mxu1 %v12695_v56  ;;  %v2608_v29 = vld [vmem:[%s20087_s3 + $0xd0] sm:$0xff]  ;;  %v21308_v10 = vld [vmem:[#allocation155_spill] sm:$0xff] }
 0x414   :  { %6591 = vmatprep.subr.bf16.mxu1 %v2525_v58  ;;  %v2537_v13 = vmax.bf16 %v20642_v42, %v21262_v40  ;;  %v2612_v56 = vld [vmem:[%s20087_s3 + $0xf0] sm:$0xff]  ;;  %v2536_v58 = vmax.bf16 %v20642_v42, %v21268_v57 }
 0x415   :  { %5180 = vmatpush1.bf16.msra.mxu0 %v2522_v14  ;;  %v12711_v62 = vcombine.high %v2608_v29, %v2612_v56  ;;  %v21271_v14 = vpack.c.bf16 %v21269_v5, %v21270_v61  ;;  %v12710_v2 = vcombine.low %v2608_v29, %v2612_v56  ;;  %v21303_v40 = vld [vmem:[#allocation141_spill] sm:$0xff]  ;;  %v21305_v29 = vld [vmem:[#allocation154_spill] sm:$0xff]  ;;  %v21311_v5 = vld [vmem:[#allocation152_spill] sm:$0xff] }
 0x416   :  { %5181 = vmatprep.subr.bf16.mxu0 %v2527_v37  ;;  %v21277_v37 = vpack.c.bf16 %v21275_v23, %v21276_v31  ;;  %v21306_v56 = vld [vmem:[#allocation150_spill] sm:$0xff]  ;;  %v21312_v61 = vld [vmem:[#allocation148_spill] sm:$0xff] }
 0x417   :  { %6592 = vmatpush1.bf16.msra.mxu1 %v2524_v22  ;;  %v2539_v46 = vmax.bf16 %v20642_v42, %v21271_v14  ;;  %v21274_v22 = vpack.c.bf16 %v21272_v50, %v21273_v11  ;;  %v21307_v20 = vpack.c.bf16 %v21305_v29, %v21306_v56  ;;  %v21313_v14 = vpack.c.bf16 %v21311_v5, %v21312_v61  ;;  %v21314_v50 = vld [vmem:[#allocation153_spill] sm:$0xff]  ;;  %v21317_v31 = vld [vmem:[#allocation162_spill] sm:$0xff]  ;;  %v21347_v56 = vld [vmem:[#allocation176_spill] sm:$0xff] }
 0x418   :  { %6593 = vmatprep.subr.bf16.mxu1 %v2529_v60  ;;  %4867 = vmatmul.mubr.bf16.gmra.mrb[4].mxu0 %v12694_v17  ;;  %v2538_v38 = vmax.bf16 %v20642_v42, %v21277_v37  ;;  %v21280_v60 = vpack.c.bf16 %v21278_v59, %v21279_v0  ;;  %v21315_v11 = vld [vmem:[#allocation149_spill] sm:$0xff]  ;;  %v21318_v37 = vld [vmem:[#allocation158_spill] sm:$0xff]  ;;  %v21320_v0 = vld [vmem:[#allocation163_spill] sm:$0xff] }
 0x419   :  { %5182 = vmatpush1.bf16.msra.mxu0 %v2526_v18  ;;  %4876 = vmatprep.mubr.bf16.mxu0 %v12703_v44  ;;  %v2541_v53 = vmax.bf16 %v20642_v42, %v21274_v22  ;;  %v21285_v18 = vld [vmem:[#allocation135_spill] sm:$0xff]  ;;  %v2551_v24 = vmax.bf16 %v20642_v42, %v21307_v20  ;;  %v21316_v22 = vpack.c.bf16 %v21314_v50, %v21315_v11  ;;  %v21348_v20 = vld [vmem:[#allocation172_spill] sm:$0xff] }
 0x41a   :  { %6279 = vmatmul.mubr.bf16.gmra.mrb[4].mxu1 %v12694_v17  ;;  %5183 = vmatprep.subr.bf16.mxu0 %v2531_v41  ;;  %v2540_v17 = vmax.bf16 %v20642_v42, %v21280_v60  ;;  %v21286_v12 = vpack.c.bf16 %v21284_v63, %v21285_v18  ;;  %v2542_v41 = vmax.bf16 %v20642_v42, %v21289_v15  ;;  %v21321_v60 = vld [vmem:[#allocation159_spill] sm:$0xff]  ;;  %v21326_v18 = vld [vmem:[#allocation161_spill] sm:$0xff] }
 0x41b   :  { %6594 = vmatpush1.bf16.msra.mxu1 %v2528_v26  ;;  %6288 = vmatprep.mubr.bf16.mxu1 %v12703_v44  ;;  %v2616_v26 = vld [vmem:[%s20087_s3 + $0x110] sm:$0xff]  ;;  %v21332_v15 = vld [vmem:[#allocation171_spill] sm:$0xff] }
 0x41c   :  { %6595 = vmatprep.subr.bf16.mxu1 %v2533_v35  ;;  %v2545_v4 = vmax.bf16 %v20642_v42, %v21286_v12  ;;  %v2620_v44 = vld [vmem:[%s20087_s3 + $0x130] sm:$0xff]  ;;  %v2544_v35 = vmax.bf16 %v20642_v42, %v21292_v32 }
 0x41d   :  { %5184 = vmatpush1.bf16.msra.mxu0 %v2530_v43  ;;  %v12719_v47 = vcombine.high %v2616_v26, %v2620_v44  ;;  %v21295_v43 = vpack.c.bf16 %v21293_v28, %v21294_v45  ;;  %v12718_v57 = vcombine.low %v2616_v26, %v2620_v44  ;;  %v21327_v12 = vld [vmem:[#allocation157_spill] sm:$0xff]  ;;  %v21329_v26 = vld [vmem:[#allocation170_spill] sm:$0xff]  ;;  %v21335_v28 = vld [vmem:[#allocation168_spill] sm:$0xff] }
 0x41e   :  { %5185 = vmatprep.subr.bf16.mxu0 %v2535_v27  ;;  %v21301_v27 = vpack.c.bf16 %v21299_v16, %v21300_v39  ;;  %v21330_v44 = vld [vmem:[#allocation166_spill] sm:$0xff]  ;;  %v21336_v45 = vld [vmem:[#allocation164_spill] sm:$0xff] }
 0x41f   :  { %6596 = vmatpush1.bf16.msra.mxu1 %v2532_v25  ;;  %v2547_v8 = vmax.bf16 %v20642_v42, %v21295_v43  ;;  %v21298_v25 = vpack.c.bf16 %v21296_v21, %v21297_v19  ;;  %v21331_v3 = vpack.c.bf16 %v21329_v26, %v21330_v44  ;;  %v21337_v43 = vpack.c.bf16 %v21335_v28, %v21336_v45  ;;  %v21338_v21 = vld [vmem:[#allocation169_spill] sm:$0xff]  ;;  %v21341_v39 = vld [vmem:[#allocation178_spill] sm:$0xff]  ;;  %v21371_v44 = vld [vmem:[#allocation192_spill] sm:$0xff] }
 0x420   :  { %6597 = vmatprep.subr.bf16.mxu1 %v2537_v13  ;;  %4877 = vmatmul.mubr.bf16.gmra.mrb[8].mxu0 %v12702_v54  ;;  %v2546_v55 = vmax.bf16 %v20642_v42, %v21301_v27  ;;  %v21304_v13 = vpack.c.bf16 %v21302_v36, %v21303_v40  ;;  %v21339_v19 = vld [vmem:[#allocation165_spill] sm:$0xff]  ;;  %v21342_v27 = vld [vmem:[#allocation174_spill] sm:$0xff]  ;;  %v21344_v40 = vld [vmem:[#allocation179_spill] sm:$0xff] }
 0x421   :  { %5186 = vmatpush1.bf16.msra.mxu0 %v2534_v30  ;;  %4886 = vmatprep.mubr.bf16.mxu0 %v12711_v62  ;;  %v2549_v33 = vmax.bf16 %v20642_v42, %v21298_v25  ;;  %v21309_v30 = vld [vmem:[#allocation151_spill] sm:$0xff]  ;;  %v2559_v6 = vmax.bf16 %v20642_v42, %v21331_v3  ;;  %v21340_v25 = vpack.c.bf16 %v21338_v21, %v21339_v19  ;;  %v21372_v3 = vld [vmem:[#allocation188_spill] sm:$0xff] }
 0x422   :  { %6289 = vmatmul.mubr.bf16.gmra.mrb[8].mxu1 %v12702_v54  ;;  %5187 = vmatprep.subr.bf16.mxu0 %v2539_v46  ;;  %v2548_v54 = vmax.bf16 %v20642_v42, %v21304_v13  ;;  %v21310_v7 = vpack.c.bf16 %v21308_v10, %v21309_v30  ;;  %v2550_v46 = vmax.bf16 %v20642_v42, %v21313_v14  ;;  %v21345_v13 = vld [vmem:[#allocation175_spill] sm:$0xff]  ;;  %v21350_v30 = vld [vmem:[#allocation177_spill] sm:$0xff] }
 0x423   :  { %6598 = vmatpush1.bf16.msra.mxu1 %v2536_v58  ;;  %6298 = vmatprep.mubr.bf16.mxu1 %v12711_v62  ;;  %v2624_v58 = vld [vmem:[%s20087_s3 + $0x150] sm:$0xff]  ;;  %v21356_v14 = vld [vmem:[#allocation187_spill] sm:$0xff] }
 0x424   :  { %6599 = vmatprep.subr.bf16.mxu1 %v2541_v53  ;;  %v2553_v34 = vmax.bf16 %v20642_v42, %v21310_v7  ;;  %v2628_v62 = vld [vmem:[%s20087_s3 + $0x170] sm:$0xff]  ;;  %v2552_v53 = vmax.bf16 %v20642_v42, %v21316_v22 }
 0x425   :  { %5188 = vmatpush1.bf16.msra.mxu0 %v2538_v38  ;;  %v12727_v23 = vcombine.high %v2624_v58, %v2628_v62  ;;  %v21319_v38 = vpack.c.bf16 %v21317_v31, %v21318_v37  ;;  %v12726_v32 = vcombine.low %v2624_v58, %v2628_v62  ;;  %v21351_v7 = vld [vmem:[#allocation173_spill] sm:$0xff]  ;;  %v21353_v58 = vld [vmem:[#allocation186_spill] sm:$0xff]  ;;  %v21359_v31 = vld [vmem:[#allocation184_spill] sm:$0xff] }
 0x426   :  { %5189 = vmatprep.subr.bf16.mxu0 %v2543_v52  ;;  %v21325_v52 = vpack.c.bf16 %v21323_v48, %v21324_v49  ;;  %v21354_v62 = vld [vmem:[#allocation182_spill] sm:$0xff]  ;;  %v21360_v37 = vld [vmem:[#allocation180_spill] sm:$0xff] }
 0x427   :  { %6600 = vmatpush1.bf16.msra.mxu1 %v2540_v17  ;;  %v2555_v59 = vmax.bf16 %v20642_v42, %v21319_v38  ;;  %v21322_v17 = vpack.c.bf16 %v21320_v0, %v21321_v60  ;;  %v21355_v5 = vpack.c.bf16 %v21353_v58, %v21354_v62  ;;  %v21361_v38 = vpack.c.bf16 %v21359_v31, %v21360_v37  ;;  %v21362_v0 = vld [vmem:[#allocation185_spill] sm:$0xff]  ;;  %v21365_v49 = vld [vmem:[#allocation194_spill] sm:$0xff] }
 0x428   :  { %6601 = vmatprep.subr.bf16.mxu1 %v2545_v4  ;;  %4887 = vmatmul.mubr.bf16.gmra.mrb[12].mxu0 %v12710_v2  ;;  %v2554_v63 = vmax.bf16 %v20642_v42, %v21325_v52  ;;  %v21328_v4 = vpack.c.bf16 %v21326_v18, %v21327_v12  ;;  %v21363_v60 = vld [vmem:[#allocation181_spill] sm:$0xff]  ;;  %v21366_v52 = vld [vmem:[#allocation190_spill] sm:$0xff]  ;;  %v21368_v12 = vld [vmem:[#allocation195_spill] sm:$0xff] }
 0x429   :  { %5190 = vmatpush1.bf16.msra.mxu0 %v2542_v41  ;;  %4896 = vmatprep.mubr.bf16.mxu0 %v12719_v47  ;;  %v2557_v9 = vmax.bf16 %v20642_v42, %v21322_v17  ;;  %v21333_v41 = vld [vmem:[#allocation167_spill] sm:$0xff]  ;;  %v2567_v61 = vmax.bf16 %v20642_v42, %v21355_v5  ;;  %v21364_v17 = vpack.c.bf16 %v21362_v0, %v21363_v60  ;;  %v2656_v62 = vld [vmem:[%s20087_s3 + $0x250] sm:$0xff] }
 0x42a   :  { %6299 = vmatmul.mubr.bf16.gmra.mrb[12].mxu1 %v12710_v2  ;;  %5191 = vmatprep.subr.bf16.mxu0 %v2547_v8  ;;  %v2556_v2 = vmax.bf16 %v20642_v42, %v21328_v4  ;;  %v21334_v1 = vpack.c.bf16 %v21332_v15, %v21333_v41  ;;  %v2558_v8 = vmax.bf16 %v20642_v42, %v21337_v43  ;;  %v21369_v4 = vld [vmem:[#allocation191_spill] sm:$0xff]  ;;  %v21374_v41 = vld [vmem:[#allocation193_spill] sm:$0xff] }
 0x42b   :  { %6602 = vmatpush1.bf16.msra.mxu1 %v2544_v35  ;;  %6308 = vmatprep.mubr.bf16.mxu1 %v12719_v47  ;;  %v2632_v35 = vld [vmem:[%s20087_s3 + $0x190] sm:$0xff]  ;;  %v21380_v43 = vld [vmem:[#allocation203_spill] sm:$0xff] }
 0x42c   :  { %6603 = vmatprep.subr.bf16.mxu1 %v2549_v33  ;;  %v2561_v51 = vmax.bf16 %v20642_v42, %v21334_v1  ;;  %v2636_v47 = vld [vmem:[%s20087_s3 + $0x1b0] sm:$0xff]  ;;  %v2560_v33 = vmax.bf16 %v20642_v42, %v21340_v25 }
 0x42d   :  { %5192 = vmatpush1.bf16.msra.mxu0 %v2546_v55  ;;  %v12735_v16 = vcombine.high %v2632_v35, %v2636_v47  ;;  %v21343_v55 = vpack.c.bf16 %v21341_v39, %v21342_v27  ;;  %v12734_v22 = vcombine.low %v2632_v35, %v2636_v47  ;;  %v21375_v1 = vld [vmem:[#allocation189_spill] sm:$0xff]  ;;  %v21377_v35 = vld [vmem:[#allocation202_spill] sm:$0xff]  ;;  %v21383_v39 = vld [vmem:[#allocation200_spill] sm:$0xff] }
 0x42e   :  { %5193 = vmatprep.subr.bf16.mxu0 %v2551_v24  ;;  %v21349_v24 = vpack.c.bf16 %v21347_v56, %v21348_v20  ;;  %v21378_v47 = vld [vmem:[#allocation198_spill] sm:$0xff]  ;;  %v21384_v27 = vld [vmem:[#allocation196_spill] sm:$0xff] }
 0x42f   :  { %6604 = vmatpush1.bf16.msra.mxu1 %v2548_v54  ;;  %v2563_v36 = vmax.bf16 %v20642_v42, %v21343_v55  ;;  %v21346_v54 = vpack.c.bf16 %v21344_v40, %v21345_v13  ;;  %v21379_v28 = vpack.c.bf16 %v21377_v35, %v21378_v47  ;;  %v21385_v55 = vpack.c.bf16 %v21383_v39, %v21384_v27  ;;  %v21386_v40 = vld [vmem:[#allocation201_spill] sm:$0xff]  ;;  %v21389_v20 = vld [vmem:[#allocation210_spill] sm:$0xff] }
 0x430   :  { %6605 = vmatprep.subr.bf16.mxu1 %v2553_v34  ;;  %4897 = vmatmul.mubr.bf16.gmra.mrb[16].mxu0 %v12718_v57  ;;  %v2562_v10 = vmax.bf16 %v20642_v42, %v21349_v24  ;;  %v21352_v34 = vpack.c.bf16 %v21350_v30, %v21351_v7  ;;  %v21387_v13 = vld [vmem:[#allocation197_spill] sm:$0xff]  ;;  %v21390_v24 = vld [vmem:[#allocation206_spill] sm:$0xff]  ;;  %v21392_v7 = vld [vmem:[#allocation211_spill] sm:$0xff] }
 0x431   :  { %5194 = vmatpush1.bf16.msra.mxu0 %v2550_v46  ;;  %4906 = vmatprep.mubr.bf16.mxu0 %v12727_v23  ;;  %v2565_v29 = vmax.bf16 %v20642_v42, %v21346_v54  ;;  %v21357_v46 = vld [vmem:[#allocation183_spill] sm:$0xff]  ;;  %v2575_v45 = vmax.bf16 %v20642_v42, %v21379_v28  ;;  %v21388_v54 = vpack.c.bf16 %v21386_v40, %v21387_v13  ;;  %v2660_v5 = vld [vmem:[%s20087_s3 + $0x270] sm:$0xff] }
 0x432   :  { %6309 = vmatmul.mubr.bf16.gmra.mrb[16].mxu1 %v12718_v57  ;;  %5195 = vmatprep.subr.bf16.mxu0 %v2555_v59  ;;  %v2564_v57 = vmax.bf16 %v20642_v42, %v21352_v34  ;;  %v21358_v50 = vpack.c.bf16 %v21356_v14, %v21357_v46  ;;  %v2566_v59 = vmax.bf16 %v20642_v42, %v21361_v38  ;;  %v21393_v34 = vld [vmem:[#allocation207_spill] sm:$0xff]  ;;  %v21396_v14 = vld [vmem:[#allocation204_spill] sm:$0xff] }
 0x433   :  { %6606 = vmatpush1.bf16.msra.mxu1 %v2552_v53  ;;  %6318 = vmatprep.mubr.bf16.mxu1 %v12727_v23  ;;  %v2640_v53 = vld [vmem:[%s20087_s3 + $0x1d0] sm:$0xff]  ;;  %v12759_v37 = vcombine.high %v2656_v62, %v2660_v5  ;;  %v12758_v0 = vcombine.low %v2656_v62, %v2660_v5 }
 0x434   :  { %6607 = vmatprep.subr.bf16.mxu1 %v2557_v9  ;;  %v2569_v11 = vmax.bf16 %v20642_v42, %v21358_v50  ;;  %v2644_v23 = vld [vmem:[%s20087_s3 + $0x1f0] sm:$0xff]  ;;  %v2568_v9 = vmax.bf16 %v20642_v42, %v21364_v17 }
 0x435   :  { %5196 = vmatpush1.bf16.msra.mxu0 %v2554_v63  ;;  %v12743_v48 = vcombine.high %v2640_v53, %v2644_v23  ;;  %v21367_v63 = vpack.c.bf16 %v21365_v49, %v21366_v52  ;;  %v12742_v25 = vcombine.low %v2640_v53, %v2644_v23  ;;  %v2664_v38 = vld [vmem:[%s20087_s3 + $0x290] sm:$0xff] }
 0x436   :  { %5197 = vmatprep.subr.bf16.mxu0 %v2559_v6  ;;  %v21373_v6 = vpack.c.bf16 %v21371_v44, %v21372_v3  ;;  %v2672_v17 = vld [vmem:[%s20087_s3 + $0x2d0] sm:$0xff] }
 0x437   :  { %6608 = vmatpush1.bf16.msra.mxu1 %v2556_v2  ;;  %v2571_v18 = vmax.bf16 %v20642_v42, %v21367_v63  ;;  %v21370_v2 = vpack.c.bf16 %v21368_v12, %v21369_v4  ;;  %v2680_v52 = vld [vmem:[%s20087_s3 + $0x310] sm:$0xff] }
 0x438   :  { %6609 = vmatprep.subr.bf16.mxu1 %v2561_v51  ;;  %4907 = vmatmul.mubr.bf16.gmra.mrb[20].mxu0 %v12726_v32  ;;  %v2570_v15 = vmax.bf16 %v20642_v42, %v21373_v6  ;;  %v21376_v51 = vpack.c.bf16 %v21374_v41, %v21375_v1  ;;  %v2684_v63 = vld [vmem:[%s20087_s3 + $0x330] sm:$0xff] }
 0x439   :  { %5198 = vmatpush1.bf16.msra.mxu0 %v2558_v8  ;;  %4916 = vmatprep.mubr.bf16.mxu0 %v12735_v16  ;;  %v2573_v26 = vmax.bf16 %v20642_v42, %v21370_v2  ;;  %v21381_v8 = vld [vmem:[#allocation199_spill] sm:$0xff]  ;;  %v12783_v12 = vcombine.high %v2680_v52, %v2684_v63  ;;  %v2688_v4 = vld [vmem:[%s20087_s3 + $0x350] sm:$0xff] }
 0x43a   :  { %6319 = vmatmul.mubr.bf16.gmra.mrb[20].mxu1 %v12726_v32  ;;  %5199 = vmatprep.subr.bf16.mxu0 %v2563_v36  ;;  %v2572_v32 = vmax.bf16 %v20642_v42, %v21376_v51  ;;  %v21382_v21 = vpack.c.bf16 %v21380_v43, %v21381_v8  ;;  %v2574_v36 = vmax.bf16 %v20642_v42, %v21385_v55  ;;  %v2692_v2 = vld [vmem:[%s20087_s3 + $0x370] sm:$0xff] }
 0x43b   :  { %6610 = vmatpush1.bf16.msra.mxu1 %v2560_v33  ;;  %6328 = vmatprep.mubr.bf16.mxu1 %v12735_v16  ;;  %v2648_v33 = vld [vmem:[%s20087_s3 + $0x210] sm:$0xff]  ;;  %v12791_v44 = vcombine.high %v2688_v4, %v2692_v2 }
 0x43c   :  { %6611 = vmatprep.subr.bf16.mxu1 %v2565_v29  ;;  %v2577_v19 = vmax.bf16 %v20642_v42, %v21382_v21  ;;  %v2652_v16 = vld [vmem:[%s20087_s3 + $0x230] sm:$0xff]  ;;  %v2576_v29 = vmax.bf16 %v20642_v42, %v21388_v54 }
 0x43d   :  { %5200 = vmatpush1.bf16.msra.mxu0 %v2562_v10  ;;  %v12751_v56 = vcombine.high %v2648_v33, %v2652_v16  ;;  %v21391_v10 = vpack.c.bf16 %v21389_v20, %v21390_v24  ;;  %v12750_v31 = vcombine.low %v2648_v33, %v2652_v16  ;;  %v2696_v3 = vld [vmem:[%s20087_s3 + $0x390] sm:$0xff] }
 0x43e   :  { %5201 = vmatprep.subr.bf16.mxu0 %v2567_v61  ;;  %v21395_v61 = vld [vmem:[#allocation208_spill] sm:$0xff] }
 0x43f   :  { %6612 = vmatpush1.bf16.msra.mxu1 %v2564_v57  ;;  %v2579_v30 = vmax.bf16 %v20642_v42, %v21391_v10  ;;  %v21394_v57 = vpack.c.bf16 %v21392_v7, %v21393_v34  ;;  %v21397_v46 = vpack.c.bf16 %v21395_v61, %v21396_v14  ;;  %v2700_v6 = vld [vmem:[%s20087_s3 + $0x3b0] sm:$0xff] }
 0x440   :  { %6613 = vmatprep.subr.bf16.mxu1 %v2569_v11  ;;  %4917 = vmatmul.mubr.bf16.gmra.mrb[24].mxu0 %v12734_v22  ;;  %v21398_v11 = vld [vmem:[#allocation209_spill] sm:$0xff]  ;;  %v12799_v41 = vcombine.high %v2696_v3, %v2700_v6 }
 0x441   :  { %5202 = vmatpush1.bf16.msra.mxu0 %v2566_v59  ;;  %4926 = vmatprep.mubr.bf16.mxu0 %v12743_v48  ;;  %v2581_v58 = vmax.bf16 %v20642_v42, %v21394_v57  ;;  %v2578_v50 = vmax.bf16 %v20642_v42, %v21397_v46  ;;  %v2668_v59 = vld [vmem:[%s20087_s3 + $0x2b0] sm:$0xff] }
 0x442   :  { %6329 = vmatmul.mubr.bf16.gmra.mrb[24].mxu1 %v12734_v22  ;;  %5203 = vmatprep.subr.bf16.mxu0 %v2571_v18  ;;  %v21399_v22 = vld [vmem:[#allocation205_spill] sm:$0xff]  ;;  %v12767_v60 = vcombine.high %v2664_v38, %v2668_v59 }
 0x443   :  { %6614 = vmatpush1.bf16.msra.mxu1 %v2568_v9  ;;  %6338 = vmatprep.mubr.bf16.mxu1 %v12743_v48  ;;  %v21400_v53 = vpack.c.bf16 %v21398_v11, %v21399_v22  ;;  %v2676_v9 = vld [vmem:[%s20087_s3 + $0x2f0] sm:$0xff]  ;;  %v12766_v48 = vcombine.low %v2664_v38, %v2668_v59 }
 0x444   :  { %6615 = vmatprep.subr.bf16.mxu1 %v2573_v26  ;;  %v12775_v49 = vcombine.high %v2672_v17, %v2676_v9  ;;  %v12774_v18 = vcombine.low %v2672_v17, %v2676_v9  ;;  %v12782_v26 = vcombine.low %v2680_v52, %v2684_v63  ;;  %v2704_v1 = vld [vmem:[%s20087_s3 + $0x3d0] sm:$0xff] }
 0x445   :  { %5204 = vmatpush1.bf16.msra.mxu0 %v2570_v15  ;;  %v2580_v23 = vmax.bf16 %v20642_v42, %v21400_v53  ;;  %v12790_v15 = vcombine.low %v2688_v4, %v2692_v2  ;;  %v2708_v51 = vld [vmem:[%s20087_s3 + $0x3f0] sm:$0xff] }
 0x446   :  { %5205 = vmatprep.subr.bf16.mxu0 %v2575_v45  ;;  %v12807_v35 = vcombine.high %v2704_v1, %v2708_v51  ;;  %v2712_v47 = vld [vmem:[%s20087_s3 + $0x410] sm:$0xff]  ;;  %v12806_v45 = vcombine.low %v2704_v1, %v2708_v51 }
 0x447   :  { %6616 = vmatpush1.bf16.msra.mxu1 %v2572_v32  ;;  %v12798_v32 = vcombine.low %v2696_v3, %v2700_v6  ;;  %v2716_v28 = vld [vmem:[%s20087_s3 + $0x430] sm:$0xff]  ;;  %v7073_v3 = vld [vmem:[%s20088_s4 + $0xc] sm:$0xf] }
 0x448   :  { %6617 = vmatprep.subr.bf16.mxu1 %v2577_v19  ;;  %4927 = vmatmul.mubr.bf16.gmra.mrb[28].mxu0 %v12742_v25  ;;  %v12815_v43 = vcombine.high %v2712_v47, %v2716_v28  ;;  %v2720_v8 = vld [vmem:[%s20087_s3 + $0x450] sm:$0xff]  ;;  %v12814_v19 = vcombine.low %v2712_v47, %v2716_v28 }
 0x449   :  { %5206 = vmatpush1.bf16.msra.mxu0 %v2574_v36  ;;  %4936 = vmatprep.mubr.bf16.mxu0 %v12751_v56  ;;  %v2724_v21 = vld [vmem:[%s20087_s3 + $0x470] sm:$0xff] }
 0x44a   :  { %6339 = vmatmul.mubr.bf16.gmra.mrb[28].mxu1 %v12742_v25  ;;  %5207 = vmatprep.subr.bf16.mxu0 %v2579_v30  ;;  %v12823_v25 = vcombine.high %v2720_v8, %v2724_v21  ;;  %v2728_v33 = vld [vmem:[%s20087_s3 + $0x490] sm:$0xff]  ;;  %v12822_v39 = vcombine.low %v2720_v8, %v2724_v21  ;;  %v7076_v8 = vld [vmem:[%s20088_s4 + $0x18] sm:$0xf] }
 0x44b   :  { %6618 = vmatpush1.bf16.msra.mxu1 %v2576_v29  ;;  %6348 = vmatprep.mubr.bf16.mxu1 %v12751_v56  ;;  %v2732_v16 = vld [vmem:[%s20087_s3 + $0x4b0] sm:$0xff] }
 0x44c   :  { %6619 = vmatprep.subr.bf16.mxu1 %v2581_v58  ;;  %v12831_v27 = vcombine.high %v2728_v33, %v2732_v16  ;;  %v2736_v55 = vld [vmem:[%s20087_s3 + $0x4d0] sm:$0xff]  ;;  %v12830_v40 = vcombine.low %v2728_v33, %v2732_v16  ;;  %v7079_v16 = vld [vmem:[%s20088_s4 + $0x24] sm:$0xf] }
 0x44d   :  { %5208 = vmatpush1.bf16.msra.mxu0 %v2578_v50  ;;  %v2740_v36 = vld [vmem:[%s20087_s3 + $0x4f0] sm:$0xff] }
 0x44e   :  { %v12839_v13 = vcombine.high %v2736_v55, %v2740_v36  ;;  %v2744_v54 = vld [vmem:[%s20087_s3 + $0x510] sm:$0xff]  ;;  %v12838_v56 = vcombine.low %v2736_v55, %v2740_v36  ;;  %v2589_v55 = vld [vmem:[%s20087_s3 + $0x38] sm:$0xff] }
 0x44f   :  { %6620 = vmatpush1.bf16.msra.mxu1 %v2580_v23  ;;  %v2748_v29 = vld [vmem:[%s20087_s3 + $0x530] sm:$0xff] }
 0x450   :  { %4937 = vmatmul.mubr.bf16.gmra.mrb[32].mxu0 %v12750_v31  ;;  %v12847_v20 = vcombine.high %v2744_v54, %v2748_v29  ;;  %v2752_v24 = vld [vmem:[%s20087_s3 + $0x550] sm:$0xff]  ;;  %v12846_v30 = vcombine.low %v2744_v54, %v2748_v29  ;;  %v7080_v54 = vld [vmem:[%s20088_s4 + $0x28] sm:$0xf]  ;;  %v2593_v29 = vld [vmem:[%s20087_s3 + $0x58] sm:$0xff] }
 0x451   :  { %4946 = vmatprep.mubr.bf16.mxu0 %v12759_v37  ;;  %v2756_v10 = vld [vmem:[%s20087_s3 + $0x570] sm:$0xff] }
 0x452   :  { %6349 = vmatmul.mubr.bf16.gmra.mrb[32].mxu1 %v12750_v31  ;;  %v12855_v7 = vcombine.high %v2752_v24, %v2756_v10  ;;  %v2760_v34 = vld [vmem:[%s20087_s3 + $0x590] sm:$0xff]  ;;  %v12854_v58 = vcombine.low %v2752_v24, %v2756_v10 }
 0x453   :  { %6358 = vmatprep.mubr.bf16.mxu1 %v12759_v37  ;;  %v2764_v57 = vld [vmem:[%s20087_s3 + $0x5b0] sm:$0xff] }
 0x454   :  { %v12863_v62 = vcombine.high %v2760_v34, %v2764_v57  ;;  %v2768_v5 = vld [vmem:[%s20087_s3 + $0x5d0] sm:$0xff]  ;;  %v12862_v14 = vcombine.low %v2760_v34, %v2764_v57  ;;  %v2605_v34 = vld [vmem:[%s20087_s3 + $0xb8] sm:$0xff] }
 0x455   :  { %v2772_v61 = vld [vmem:[%s20087_s3 + $0x5f0] sm:$0xff] }
 0x456   :  { %v12871_v46 = vcombine.high %v2768_v5, %v2772_v61  ;;  %v2776_v50 = vld [vmem:[%s20087_s3 + $0x610] sm:$0xff]  ;;  %v12870_v22 = vcombine.low %v2768_v5, %v2772_v61  ;;  %v7084_v5 = vld [vmem:[%s20088_s4 + $0x38] sm:$0xf] }
 0x457   :  { %v2780_v11 = vld [vmem:[%s20087_s3 + $0x630] sm:$0xff]  ;;  %v2609_v61 = vld [vmem:[%s20087_s3 + $0xd8] sm:$0xff] }
 0x458   :  { %4947 = vmatmul.mubr.bf16.gmra.mrb[36].mxu0 %v12758_v0  ;;  %v12879_v53 = vcombine.high %v2776_v50, %v2780_v11  ;;  %v2784_v23 = vld [vmem:[%s20087_s3 + $0x650] sm:$0xff]  ;;  %v12878_v37 = vcombine.low %v2776_v50, %v2780_v11  ;;  %v7086_v50 = vld [vmem:[%s20088_s4 + $0x40] sm:$0xf] }
 0x459   :  { %4956 = vmatprep.mubr.bf16.mxu0 %v12767_v60  ;;  %v2788_v31 = vld [vmem:[%s20087_s3 + $0x670] sm:$0xff] }
 0x45a   :  { %6359 = vmatmul.mubr.bf16.gmra.mrb[36].mxu1 %v12758_v0  ;;  %v12887_v38 = vcombine.high %v2784_v23, %v2788_v31  ;;  %v2792_v59 = vld [vmem:[%s20087_s3 + $0x690] sm:$0xff] }
 0x45b   :  { %6368 = vmatprep.mubr.bf16.mxu1 %v12767_v60  ;;  %v2796_v0 = vld [vmem:[%s20087_s3 + $0x6b0] sm:$0xff]  ;;  %v12886_v60 = vcombine.low %v2784_v23, %v2788_v31  ;;  %v2617_v23 = vld [vmem:[%s20087_s3 + $0x118] sm:$0xff] }
 0x45c   :  { %v12895_v17 = vcombine.high %v2792_v59, %v2796_v0  ;;  %v2800_v9 = vld [vmem:[%s20087_s3 + $0x6d0] sm:$0xff]  ;;  %v12894_v52 = vcombine.low %v2792_v59, %v2796_v0  ;;  %v2621_v31 = vld [vmem:[%s20087_s3 + $0x138] sm:$0xff]  ;;  %v7089_v0 = vld [vmem:[%s20088_s4 + $0x4c] sm:$0xf] }
 0x45d   :  { %v2808_v4 = vld [vmem:[%s20087_s3 + $0x710] sm:$0xff]  ;;  %v12721_v59 = vcombine.high %v2617_v23, %v2621_v31 }
 0x45e   :  { %v2812_v2 = vld [vmem:[%s20087_s3 + $0x730] sm:$0xff] }
 0x45f   :  { %v2816_v6 = vld [vmem:[%s20087_s3 + $0x750] sm:$0xff] }
 0x460   :  { %4957 = vmatmul.mubr.bf16.gmra.mrb[40].mxu0 %v12766_v48  ;;  %v7075_v51 = vld [vmem:[%s20088_s4 + $0x14] sm:$0xf] }
 0x461   :  { %4966 = vmatprep.mubr.bf16.mxu0 %v12775_v49  ;;  %v2828_v47 = vld [vmem:[%s20087_s3 + $0x7b0] sm:$0xff] }
 0x462   :  { %6369 = vmatmul.mubr.bf16.gmra.mrb[40].mxu1 %v12766_v48  ;;  %v2804_v48 = vld [vmem:[%s20087_s3 + $0x6f0] sm:$0xff] }
 0x463   :  { %6378 = vmatprep.mubr.bf16.mxu1 %v12775_v49  ;;  %v7070_v49 = vld [vmem:[%s20088_s4] sm:$0xf]  ;;  %v12903_v63 = vcombine.high %v2800_v9, %v2804_v48  ;;  %v2832_v21 = vld [vmem:[%s20087_s3 + $0x7d0] sm:$0xff] }
 0x464   :  { %7136 = vperm.xlu0 %14012, %v7070_v49   ;;  %v7083_v10 = vld [vmem:[%s20088_s4 + $0x34] sm:$0xf] }
 0x465   :  { %v7091_v49 = vld [vmem:[%s20088_s4 + $0x54] sm:$0xf] }
 0x468   :  { %4967 = vmatmul.mubr.bf16.gmra.mrb[44].mxu0 %v12774_v18 }
 0x469   :  { %4976 = vmatprep.mubr.bf16.mxu0 %v12783_v12 }
 0x46a   :  { %6379 = vmatmul.mubr.bf16.gmra.mrb[44].mxu1 %v12774_v18  ;;  %v7071_v18 = vld [vmem:[%s20088_s4 + $0x4] sm:$0xf] }
 0x46b   :  { %6388 = vmatprep.mubr.bf16.mxu1 %v12783_v12  ;;  %v7072_v12 = vld [vmem:[%s20088_s4 + $0x8] sm:$0xf]  ;;  %7148 = vperm.xlu0 %14012, %v7071_v18   ;;  %v7093_v18 = vld [vmem:[%s20088_s4 + $0x5c] sm:$0xf] }
 0x46c   :  { %7160 = vperm.xlu1 %14013, %v7072_v12   ;;  %v7096_v12 = vld [vmem:[%s20088_s4 + $0x68] sm:$0xf] }
 0x470   :  { %4977 = vmatmul.mubr.bf16.gmra.mrb[48].mxu0 %v12782_v26  ;;  %7172 = vperm.xlu1 %14013, %v7073_v3   ;;  %v7098_v3 = vld [vmem:[%s20088_s4 + $0x70] sm:$0xf] }
 0x471   :  { %4986 = vmatprep.mubr.bf16.mxu0 %v12791_v44 }
 0x472   :  { %6389 = vmatmul.mubr.bf16.gmra.mrb[48].mxu1 %v12782_v26  ;;  %v12902_v26 = vcombine.low %v2800_v9, %v2804_v48  ;;  %v2629_v9 = vld [vmem:[%s20087_s3 + $0x178] sm:$0xff]  ;;  %v12720_v48 = vcombine.low %v2617_v23, %v2621_v31 }
 0x473   :  { %6398 = vmatprep.mubr.bf16.mxu1 %v12791_v44  ;;  %v12911_v44 = vcombine.high %v2808_v4, %v2812_v2  ;;  %v2681_v23 = vld [vmem:[%s20087_s3 + $0x318] sm:$0xff] }
 0x474   :  { %7196 = vperm.xlu1 %14013, %v7075_v51   ;;  %v2645_v51 = vld [vmem:[%s20087_s3 + $0x1f8] sm:$0xff] }
 0x475   :  { %v2685_v31 = vld [vmem:[%s20087_s3 + $0x338] sm:$0xff] }
 0x478   :  { %4987 = vmatmul.mubr.bf16.gmra.mrb[52].mxu0 %v12790_v15 }
 0x479   :  { %4996 = vmatprep.mubr.bf16.mxu0 %v12799_v41 }
 0x47a   :  { %6399 = vmatmul.mubr.bf16.gmra.mrb[52].mxu1 %v12790_v15  ;;  %v2820_v15 = vld [vmem:[%s20087_s3 + $0x770] sm:$0xff] }
 0x47b   :  { %6408 = vmatprep.mubr.bf16.mxu1 %v12799_v41  ;;  %v12910_v41 = vcombine.low %v2808_v4, %v2812_v2  ;;  %v12919_v1 = vcombine.high %v2816_v6, %v2820_v15  ;;  %v12918_v28 = vcombine.low %v2816_v6, %v2820_v15  ;;  %v2633_v4 = vld [vmem:[%s20087_s3 + $0x198] sm:$0xff]  ;;  %v7097_v15 = vld [vmem:[%s20088_s4 + $0x6c] sm:$0xf] }
 0x47c   :  { %v2637_v2 = vld [vmem:[%s20087_s3 + $0x1b8] sm:$0xff] }
 0x47d   :  { %v12737_v6 = vcombine.high %v2633_v4, %v2637_v2 }
 0x480   :  { %4997 = vmatmul.mubr.bf16.gmra.mrb[56].mxu0 %v12798_v32 }
 0x481   :  { %5006 = vmatprep.mubr.bf16.mxu0 %v12807_v35 }
 0x482   :  { %6409 = vmatmul.mubr.bf16.gmra.mrb[56].mxu1 %v12798_v32  ;;  %v7074_v32 = vld [vmem:[%s20088_s4 + $0x10] sm:$0xf] }
 0x483   :  { %6418 = vmatprep.mubr.bf16.mxu1 %v12807_v35  ;;  %v2824_v35 = vld [vmem:[%s20087_s3 + $0x790] sm:$0xff]  ;;  %7184 = vperm.xlu0 %14012, %v7074_v32   ;;  %v12736_v32 = vcombine.low %v2633_v4, %v2637_v2  ;;  %v14087_v4 = vld [vmem:[%s20089_s1 + $0x8] ss:$16 sps:$4 sm:$0xff]  }
 0x484   :  { %v7123_v2 = vld [vmem:[%s20088_s4 + $0xd4] sm:$0xf] }
 0x487   :  { %7208 = vperm.xlu0 %14012, %v7076_v8   ;;  %v2649_v8 = vld [vmem:[%s20087_s3 + $0x218] sm:$0xff] }
 0x488   :  { %5007 = vmatmul.mubr.bf16.gmra.mrb[60].mxu0 %v12806_v45 }
 0x489   :  { %5016 = vmatprep.mubr.bf16.mxu0 %v12815_v43 }
 0x48a   :  { %6419 = vmatmul.mubr.bf16.gmra.mrb[60].mxu1 %v12806_v45  ;;  %v12927_v45 = vcombine.high %v2824_v35, %v2828_v47 }
 0x48b   :  { %6428 = vmatprep.mubr.bf16.mxu1 %v12815_v43  ;;  %v7077_v43 = vld [vmem:[%s20088_s4 + $0x1c] sm:$0xf] }
 0x48c   :  { %7220 = vperm.xlu1 %14013, %v7077_v43   ;;  %v7104_v43 = vld [vmem:[%s20088_s4 + $0x88] sm:$0xf] }
 0x490   :  { %5017 = vmatmul.mubr.bf16.gmra.mrb[64].mxu0 %v12814_v19  ;;  %7244 = vperm.xlu1 %14013, %v7079_v16  }
 0x491   :  { %5026 = vmatprep.mubr.bf16.mxu0 %v12823_v25 }
 0x492   :  { %6429 = vmatmul.mubr.bf16.gmra.mrb[64].mxu1 %v12814_v19  ;;  %v2836_v19 = vld [vmem:[%s20087_s3 + $0x7f0] sm:$0xff] }
 0x493   :  { %6438 = vmatprep.mubr.bf16.mxu1 %v12823_v25  ;;  %v12926_v25 = vcombine.low %v2824_v35, %v2828_v47  ;;  %v12935_v33 = vcombine.high %v2832_v21, %v2836_v19  ;;  %v12934_v36 = vcombine.low %v2832_v21, %v2836_v19  ;;  %v7099_v35 = vld [vmem:[%s20088_s4 + $0x74] sm:$0xf]  ;;  %v7102_v47 = vld [vmem:[%s20088_s4 + $0x80] sm:$0xf]  ;;  %v2653_v21 = vld [vmem:[%s20087_s3 + $0x238] sm:$0xff] }
 0x494   :  { %v12753_v16 = vcombine.high %v2649_v8, %v2653_v21 }
 0x498   :  { %5027 = vmatmul.mubr.bf16.gmra.mrb[68].mxu0 %v12822_v39 }
 0x499   :  { %5036 = vmatprep.mubr.bf16.mxu0 %v12831_v27 }
 0x49a   :  { %6439 = vmatmul.mubr.bf16.gmra.mrb[68].mxu1 %v12822_v39  ;;  %v7078_v39 = vld [vmem:[%s20088_s4 + $0x20] sm:$0xf] }
 0x49b   :  { %6448 = vmatprep.mubr.bf16.mxu1 %v12831_v27  ;;  %v2585_v27 = vld [vmem:[%s20087_s3 + $0x18] sm:$0xff]  ;;  %7232 = vperm.xlu0 %14012, %v7078_v39   ;;  %v7105_v39 = vld [vmem:[%s20088_s4 + $0x8c] sm:$0xf] }
 0x49f   :  { %7256 = vperm.xlu0 %14012, %v7080_v54   ;;  %v7110_v54 = vld [vmem:[%s20088_s4 + $0xa0] sm:$0xf] }
 0x4a0   :  { %5037 = vmatmul.mubr.bf16.gmra.mrb[72].mxu0 %v12830_v40 }
 0x4a1   :  { %5046 = vmatprep.mubr.bf16.mxu0 %v12839_v13 }
 0x4a2   :  { %6449 = vmatmul.mubr.bf16.gmra.mrb[72].mxu1 %v12830_v40  ;;  %v12689_v40 = vcombine.high %v2585_v27, %v2589_v55 }
 0x4a3   :  { %6458 = vmatprep.mubr.bf16.mxu1 %v12839_v13  ;;  %v7081_v13 = vld [vmem:[%s20088_s4 + $0x2c] sm:$0xf] }
 0x4a4   :  { %7268 = vperm.xlu1 %14013, %v7081_v13   ;;  %v7107_v13 = vld [vmem:[%s20088_s4 + $0x94] sm:$0xf] }
 0x4a8   :  { %5047 = vmatmul.mubr.bf16.gmra.mrb[76].mxu0 %v12838_v56  ;;  %7292 = vperm.xlu1 %14013, %v7083_v10   ;;  %v2669_v10 = vld [vmem:[%s20087_s3 + $0x2b8] sm:$0xff] }
 0x4a9   :  { %5056 = vmatprep.mubr.bf16.mxu0 %v12847_v20 }
 0x4aa   :  { %6459 = vmatmul.mubr.bf16.gmra.mrb[76].mxu1 %v12838_v56  ;;  %v2597_v56 = vld [vmem:[%s20087_s3 + $0x78] sm:$0xff] }
 0x4ab   :  { %6468 = vmatprep.mubr.bf16.mxu1 %v12847_v20  ;;  %v12688_v20 = vcombine.low %v2585_v27, %v2589_v55  ;;  %v12697_v24 = vcombine.high %v2593_v29, %v2597_v56  ;;  %v12696_v57 = vcombine.low %v2593_v29, %v2597_v56  ;;  %v7108_v27 = vld [vmem:[%s20088_s4 + $0x98] sm:$0xf]  ;;  %v7109_v56 = vld [vmem:[%s20088_s4 + $0x9c] sm:$0xf] }
 0x4ac   :  { %v2657_v55 = vld [vmem:[%s20087_s3 + $0x258] sm:$0xff] }
 0x4b0   :  { %5057 = vmatmul.mubr.bf16.gmra.mrb[80].mxu0 %v12846_v30 }
 0x4b1   :  { %5066 = vmatprep.mubr.bf16.mxu0 %v12855_v7 }
 0x4b2   :  { %6469 = vmatmul.mubr.bf16.gmra.mrb[80].mxu1 %v12846_v30  ;;  %v7082_v30 = vld [vmem:[%s20088_s4 + $0x30] sm:$0xf] }
 0x4b3   :  { %6478 = vmatprep.mubr.bf16.mxu1 %v12855_v7  ;;  %v2601_v7 = vld [vmem:[%s20087_s3 + $0x98] sm:$0xff]  ;;  %7280 = vperm.xlu0 %14012, %v7082_v30  }
 0x4b7   :  { %7304 = vperm.xlu0 %14012, %v7084_v5   ;;  %v2673_v5 = vld [vmem:[%s20087_s3 + $0x2d8] sm:$0xff] }
 0x4b8   :  { %5067 = vmatmul.mubr.bf16.gmra.mrb[84].mxu0 %v12854_v58 }
 0x4b9   :  { %5076 = vmatprep.mubr.bf16.mxu0 %v12863_v62 }
 0x4ba   :  { %6479 = vmatmul.mubr.bf16.gmra.mrb[84].mxu1 %v12854_v58  ;;  %v12705_v58 = vcombine.high %v2601_v7, %v2605_v34 }
 0x4bb   :  { %6488 = vmatprep.mubr.bf16.mxu1 %v12863_v62  ;;  %v7085_v62 = vld [vmem:[%s20088_s4 + $0x3c] sm:$0xf]  ;;  %7328 = vperm.xlu0 %14012, %v7086_v50   ;;  %v7118_v50 = vld [vmem:[%s20088_s4 + $0xc0] sm:$0xf] }
 0x4bc   :  { %7316 = vperm.xlu1 %14013, %v7085_v62   ;;  %v7116_v62 = vld [vmem:[%s20088_s4 + $0xb8] sm:$0xf] }
 0x4c0   :  { %5077 = vmatmul.mubr.bf16.gmra.mrb[88].mxu0 %v12862_v14 }
 0x4c1   :  { %5086 = vmatprep.mubr.bf16.mxu0 %v12871_v46 }
 0x4c2   :  { %6489 = vmatmul.mubr.bf16.gmra.mrb[88].mxu1 %v12862_v14  ;;  %v2613_v14 = vld [vmem:[%s20087_s3 + $0xf8] sm:$0xff] }
 0x4c3   :  { %6498 = vmatprep.mubr.bf16.mxu1 %v12871_v46  ;;  %v12704_v46 = vcombine.low %v2601_v7, %v2605_v34  ;;  %v12713_v11 = vcombine.high %v2609_v61, %v2613_v14  ;;  %v7111_v7 = vld [vmem:[%s20088_s4 + $0xa4] sm:$0xf]  ;;  %v7114_v34 = vld [vmem:[%s20088_s4 + $0xb0] sm:$0xf] }
 0x4c8   :  { %5087 = vmatmul.mubr.bf16.gmra.mrb[92].mxu0 %v12870_v22 }
 0x4c9   :  { %5096 = vmatprep.mubr.bf16.mxu0 %v12879_v53 }
 0x4ca   :  { %6499 = vmatmul.mubr.bf16.gmra.mrb[92].mxu1 %v12870_v22  ;;  %v7087_v22 = vld [vmem:[%s20088_s4 + $0x44] sm:$0xf] }
 0x4cb   :  { %6508 = vmatprep.mubr.bf16.mxu1 %v12879_v53  ;;  %v7088_v53 = vld [vmem:[%s20088_s4 + $0x48] sm:$0xf]  ;;  %7340 = vperm.xlu1 %14013, %v7087_v22   ;;  %v7117_v22 = vld [vmem:[%s20088_s4 + $0xbc] sm:$0xf] }
 0x4cc   :  { %7352 = vperm.xlu0 %14012, %v7088_v53   ;;  %v7120_v53 = vld [vmem:[%s20088_s4 + $0xc8] sm:$0xf] }
 0x4cf   :  { %7364 = vperm.xlu1 %14013, %v7089_v0   ;;  %v12785_v0 = vcombine.high %v2681_v23, %v2685_v31 }
 0x4d0   :  { %5097 = vmatmul.mubr.bf16.gmra.mrb[96].mxu0 %v12878_v37 }
 0x4d1   :  { %5106 = vmatprep.mubr.bf16.mxu0 %v12887_v38 }
 0x4d2   :  { %6509 = vmatmul.mubr.bf16.gmra.mrb[96].mxu1 %v12878_v37  ;;  %v12712_v37 = vcombine.low %v2609_v61, %v2613_v14  ;;  %v2677_v61 = vld [vmem:[%s20087_s3 + $0x2f8] sm:$0xff] }
 0x4d3   :  { %6518 = vmatprep.mubr.bf16.mxu1 %v12887_v38  ;;  %v7090_v38 = vld [vmem:[%s20088_s4 + $0x50] sm:$0xf]  ;;  %7388 = vperm.xlu1 %14013, %v7091_v49   ;;  %v12784_v49 = vcombine.low %v2681_v23, %v2685_v31  ;;  %v9721_v31 = vld [vmem:[%s20090_s8 + $0x2c] sm:$0xf] }
 0x4d4   :  { %7376 = vperm.xlu0 %14012, %v7090_v38   ;;  %v7119_v38 = vld [vmem:[%s20088_s4 + $0xc4] sm:$0xf] }
 0x4d7   :  { %7412 = vperm.xlu1 %14013, %v7093_v18   ;;  %v14084_v18 = vld [vmem:[%s20089_s1] ss:$16 sps:$4 sm:$0xff]  }
 0x4d8   :  { %5107 = vmatmul.mubr.bf16.gmra.mrb[100].mxu0 %v12886_v60 }
 0x4d9   :  { %5116 = vmatprep.mubr.bf16.mxu0 %v12895_v17 }
 0x4da   :  { %6519 = vmatmul.mubr.bf16.gmra.mrb[100].mxu1 %v12886_v60  ;;  %v7092_v60 = vld [vmem:[%s20088_s4 + $0x58] sm:$0xf] }
 0x4db   :  { %6528 = vmatprep.mubr.bf16.mxu1 %v12895_v17  ;;  %v2625_v17 = vld [vmem:[%s20087_s3 + $0x158] sm:$0xff]  ;;  %7400 = vperm.xlu0 %14012, %v7092_v60   ;;  %v7121_v60 = vld [vmem:[%s20088_s4 + $0xcc] sm:$0xf] }
 0x4e0   :  { %5117 = vmatmul.mubr.bf16.gmra.mrb[104].mxu0 %v12894_v52 }
 0x4e1   :  { %5126 = vmatprep.mubr.bf16.mxu0 %v12903_v63 }
 0x4e2   :  { %6529 = vmatmul.mubr.bf16.gmra.mrb[104].mxu1 %v12894_v52  ;;  %v7094_v52 = vld [vmem:[%s20088_s4 + $0x60] sm:$0xf] }
 0x4e3   :  { %6538 = vmatprep.mubr.bf16.mxu1 %v12903_v63  ;;  %v12729_v63 = vcombine.high %v2625_v17, %v2629_v9  ;;  %7424 = vperm.xlu0 %14012, %v7094_v52  }
 0x4e7   :  { %7448 = vperm.xlu0 %14012, %v7096_v12   ;;  %v14089_v12 = vld [vmem:[%s20089_s1 + $0xc] ss:$16 sps:$4 sm:$0xff]  }
 0x4e8   :  { %5127 = vmatmul.mubr.bf16.gmra.mrb[108].mxu0 %v12902_v26  ;;  %8567 = vmatprep.subr.bf16.mxu1 %v14089_v12  ;;  %v10610_v12 = vld [vmem:[%s20092_s10 + $0x8] sm:$0xf] }
 0x4e9   :  { %5136 = vmatprep.mubr.bf16.mxu0 %v12911_v44 }
 0x4ea   :  { %6539 = vmatmul.mubr.bf16.gmra.mrb[108].mxu1 %v12902_v26  ;;  %v12728_v26 = vcombine.low %v2625_v17, %v2629_v9  ;;  %v7124_v17 = vld [vmem:[%s20088_s4 + $0xd8] sm:$0xf] }
 0x4eb   :  { %6548 = vmatprep.mubr.bf16.mxu1 %v12911_v44  ;;  %v7095_v44 = vld [vmem:[%s20088_s4 + $0x64] sm:$0xf]  ;;  %7472 = vperm.xlu0 %14012, %v7098_v3   ;;  %v2689_v9 = vld [vmem:[%s20087_s3 + $0x358] sm:$0xff] }
 0x4ec   :  { %7436 = vperm.xlu1 %14013, %v7095_v44   ;;  %v2697_v44 = vld [vmem:[%s20087_s3 + $0x398] sm:$0xff] }
 0x4ed   :  { %v2701_v3 = vld [vmem:[%s20087_s3 + $0x3b8] sm:$0xff] }
 0x4f0   :  { %5137 = vmatmul.mubr.bf16.gmra.mrb[112].mxu0 %v12910_v41  ;;  %7460 = vperm.xlu1 %14013, %v7097_v15   ;;  %v7125_v15 = vld [vmem:[%s20088_s4 + $0xdc] sm:$0xf] }
 0x4f1   :  { %5146 = vmatprep.mubr.bf16.mxu0 %v12919_v1 }
 0x4f2   :  { %6549 = vmatmul.mubr.bf16.gmra.mrb[112].mxu1 %v12910_v41  ;;  %v7100_v41 = vld [vmem:[%s20088_s4 + $0x78] sm:$0xf] }
 0x4f3   :  { %6558 = vmatprep.mubr.bf16.mxu1 %v12919_v1  ;;  %v2641_v1 = vld [vmem:[%s20087_s3 + $0x1d8] sm:$0xff]  ;;  %7496 = vperm.xlu0 %14012, %v7100_v41   ;;  %v12801_v41 = vcombine.high %v2697_v44, %v2701_v3 }
 0x4f4   :  { %7484 = vperm.xlu1 %14013, %v7099_v35   ;;  %v12744_v19 = vcombine.low %v2641_v1, %v2645_v51  ;;  %v2709_v35 = vld [vmem:[%s20087_s3 + $0x3f8] sm:$0xff] }
 0x4f7   :  { %7520 = vperm.xlu0 %14012, %v7102_v47   ;;  %v7130_v47 = vld [vmem:[%s20088_s4 + $0xf0] sm:$0xf] }
 0x4f8   :  { %5147 = vmatmul.mubr.bf16.gmra.mrb[116].mxu0 %v12918_v28 }
 0x4f9   :  { %5156 = vmatprep.mubr.bf16.mxu0 %v12927_v45 }
 0x4fa   :  { %6559 = vmatmul.mubr.bf16.gmra.mrb[116].mxu1 %v12918_v28  ;;  %v12745_v28 = vcombine.high %v2641_v1, %v2645_v51  ;;  %v7128_v1 = vld [vmem:[%s20088_s4 + $0xe8] sm:$0xf]  ;;  %v7127_v51 = vld [vmem:[%s20088_s4 + $0xe4] sm:$0xf] }
 0x4fb   :  { %6568 = vmatprep.mubr.bf16.mxu1 %v12927_v45  ;;  %v7101_v45 = vld [vmem:[%s20088_s4 + $0x7c] sm:$0xf]  ;;  %7544 = vperm.xlu0 %14012, %v7104_v43  }
 0x4fc   :  { %7508 = vperm.xlu1 %14013, %v7101_v45   ;;  %v7129_v45 = vld [vmem:[%s20088_s4 + $0xec] sm:$0xf] }
 0x500   :  { %5157 = vmatmul.mubr.bf16.gmra.mrb[120].mxu0 %v12926_v25 }
 0x501   :  { %5166 = vmatprep.mubr.bf16.mxu0 %v12935_v33 }
 0x502   :  { %6569 = vmatmul.mubr.bf16.gmra.mrb[120].mxu1 %v12926_v25  ;;  %v7103_v25 = vld [vmem:[%s20088_s4 + $0x84] sm:$0xf] }
 0x503   :  { %6578 = vmatprep.mubr.bf16.mxu1 %v12935_v33  ;;  %v7106_v33 = vld [vmem:[%s20088_s4 + $0x90] sm:$0xf]  ;;  %7532 = vperm.xlu1 %14013, %v7103_v25   ;;  %v2717_v25 = vld [vmem:[%s20087_s3 + $0x438] sm:$0xff] }
 0x504   :  { %7568 = vperm.xlu0 %14012, %v7106_v33   ;;  %v9710_v33 = vld [vmem:[%s20090_s8] sm:$0xf] }
 0x507   :  { %7556 = vperm.xlu1 %14013, %v7105_v39   ;;  %v7133_v39 = vld [vmem:[%s20088_s4 + $0xfc] sm:$0xf] }
 0x508   :  { %5167 = vmatmul.mubr.bf16.gmra.mrb[124].mxu0 %v12934_v36  ;;  %7592 = vperm.xlu0 %14012, %v7108_v27  }
 0x509   :  { %5209 = vmatprep.mubr.bf16.mxu0 %v12689_v40 }
 0x50a   :  { %6579 = vmatmul.mubr.bf16.gmra.mrb[124].mxu1 %v12934_v36  ;;  %v2661_v36 = vld [vmem:[%s20087_s3 + $0x278] sm:$0xff] }
 0x50b   :  { %6621 = vmatprep.mubr.bf16.mxu1 %v12689_v40  ;;  %v12752_v40 = vcombine.low %v2649_v8, %v2653_v21  ;;  %v12761_v29 = vcombine.high %v2657_v55, %v2661_v36  ;;  %7580 = vperm.xlu1 %14013, %v7107_v13   ;;  %v12760_v30 = vcombine.low %v2657_v55, %v2661_v36  ;;  %v7132_v8 = vld [vmem:[%s20088_s4 + $0xf8] sm:$0xf]  ;;  %v7131_v21 = vld [vmem:[%s20088_s4 + $0xf4] sm:$0xf]  ;;  %v9712_v55 = vld [vmem:[%s20090_s8 + $0x8] sm:$0xf] }
 0x50c   :  { %7616 = vperm.xlu0 %14012, %v7110_v54   ;;  %v9711_v36 = vld [vmem:[%s20090_s8 + $0x4] sm:$0xf]  ;;  %v2725_v13 = vld [vmem:[%s20087_s3 + $0x478] sm:$0xff]  ;;  %v9714_v54 = vld [vmem:[%s20090_s8 + $0x10] sm:$0xf] }
 0x50f   :  { %7604 = vperm.xlu1 %14013, %v7109_v56   ;;  %v9713_v56 = vld [vmem:[%s20090_s8 + $0xc] sm:$0xf] }
 0x510   :  { %5210 = vmatmul.mubr.bf16.vlgmr.msra.gmra.mrb[0].mxu0 %v12688_v20 }
 0x511   :  { %5219 = vmatprep.mubr.bf16.mxu0 %v12697_v24 }
 0x512   :  { %6622 = vmatmul.mubr.bf16.vlgmr.msra.gmra.mrb[0].mxu1 %v12688_v20  ;;  %v7112_v20 = vld [vmem:[%s20088_s4 + $0xa8] sm:$0xf] }
 0x513   :  { %6631 = vmatprep.mubr.bf16.mxu1 %v12697_v24  ;;  %v2665_v24 = vld [vmem:[%s20087_s3 + $0x298] sm:$0xff]  ;;  %7640 = vperm.xlu0 %14012, %v7112_v20  }
 0x514   :  { %7628 = vperm.xlu1 %14013, %v7111_v7   ;;  %v12768_v14 = vcombine.low %v2665_v24, %v2669_v10  ;;  %8568 = vmatpush1.bf16.msra.mxu1 %v14087_v4  ;;  %v9715_v7 = vld [vmem:[%s20090_s8 + $0x14] sm:$0xf] }
 0x517   :  { %7664 = vperm.xlu0 %14012, %v7114_v34   ;;  %v9718_v34 = vld [vmem:[%s20090_s8 + $0x20] sm:$0xf] }
 0x518   :  { %5220 = vmatmul.mubr.bf16.gmra.mrb[4].mxu0 %v12696_v57 }
 0x519   :  { %5229 = vmatprep.mubr.bf16.mxu0 %v12705_v58 }
 0x51a   :  { %6632 = vmatmul.mubr.bf16.gmra.mrb[4].mxu1 %v12696_v57  ;;  %v12769_v57 = vcombine.high %v2665_v24, %v2669_v10  ;;  %v9716_v24 = vld [vmem:[%s20090_s8 + $0x18] sm:$0xf] }
 0x51b   :  { %6641 = vmatprep.mubr.bf16.mxu1 %v12705_v58  ;;  %v7113_v58 = vld [vmem:[%s20088_s4 + $0xac] sm:$0xf]  ;;  %7688 = vperm.xlu0 %14012, %v7116_v62   ;;  %v2729_v10 = vld [vmem:[%s20087_s3 + $0x498] sm:$0xff] }
 0x51c   :  { %7652 = vperm.xlu1 %14013, %v7113_v58  }
 0x51f   :  { %7712 = vperm.xlu0 %14012, %v7118_v50   ;;  %v2737_v50 = vld [vmem:[%s20087_s3 + $0x4d8] sm:$0xff] }
 0x520   :  { %5230 = vmatmul.mubr.bf16.gmra.mrb[8].mxu0 %v12704_v46 }
 0x521   :  { %5239 = vmatprep.mubr.bf16.mxu0 %v12713_v11 }
 0x522   :  { %6642 = vmatmul.mubr.bf16.gmra.mrb[8].mxu1 %v12704_v46  ;;  %v7115_v46 = vld [vmem:[%s20088_s4 + $0xb4] sm:$0xf] }
 0x523   :  { %6651 = vmatprep.mubr.bf16.mxu1 %v12713_v11  ;;  %v12777_v11 = vcombine.high %v2673_v5, %v2677_v61  ;;  %7676 = vperm.xlu1 %14013, %v7115_v46   ;;  %v9719_v46 = vld [vmem:[%s20090_s8 + $0x24] sm:$0xf] }
 0x524   :  { %7736 = vperm.xlu0 %14012, %v7120_v53  }
 0x527   :  { %7700 = vperm.xlu1 %14013, %v7117_v22   ;;  %v9722_v22 = vld [vmem:[%s20090_s8 + $0x30] sm:$0xf] }
 0x528   :  { %5240 = vmatmul.mubr.bf16.gmra.mrb[12].mxu0 %v12712_v37 }
 0x529   :  { %5249 = vmatprep.mubr.bf16.mxu0 %v12721_v59 }
 0x52a   :  { %6652 = vmatmul.mubr.bf16.gmra.mrb[12].mxu1 %v12712_v37  ;;  %v12776_v37 = vcombine.low %v2673_v5, %v2677_v61  ;;  %v9717_v5 = vld [vmem:[%s20090_s8 + $0x1c] sm:$0xf]  ;;  %v9720_v61 = vld [vmem:[%s20090_s8 + $0x28] sm:$0xf] }
 0x52b   :  { %6661 = vmatprep.mubr.bf16.mxu1 %v12721_v59  ;;  %v7122_v59 = vld [vmem:[%s20088_s4 + $0xd0] sm:$0xf]  ;;  %7724 = vperm.xlu1 %14013, %v7119_v38   ;;  %v9724_v38 = vld [vmem:[%s20090_s8 + $0x38] sm:$0xf] }
 0x52c   :  { %7760 = vperm.xlu0 %14012, %v7122_v59  }
 0x52f   :  { %7748 = vperm.xlu1 %14013, %v7121_v60   ;;  %v2745_v60 = vld [vmem:[%s20087_s3 + $0x518] sm:$0xff] }
 0x530   :  { %5250 = vmatmul.mubr.bf16.gmra.mrb[16].mxu0 %v12720_v48  ;;  %7784 = vperm.xlu0 %14012, %v7124_v17   ;;  %v2749_v17 = vld [vmem:[%s20087_s3 + $0x538] sm:$0xff] }
 0x531   :  { %5259 = vmatprep.mubr.bf16.mxu0 %v12729_v63 }
 0x532   :  { %6662 = vmatmul.mubr.bf16.gmra.mrb[16].mxu1 %v12720_v48  ;;  %v2693_v48 = vld [vmem:[%s20087_s3 + $0x378] sm:$0xff] }
 0x533   :  { %6671 = vmatprep.mubr.bf16.mxu1 %v12729_v63  ;;  %v12793_v52 = vcombine.high %v2689_v9, %v2693_v48  ;;  %v14086_v63 = vld [vmem:[%s20089_s1 + $0x4] ss:$16 sps:$4 sm:$0xff]   ;;  %7772 = vperm.xlu1 %14013, %v7123_v2  }
 0x534   :  { %8454 = vmatprep.subr.bf16.mxu0 %v14086_v63  ;;  %v9725_v63 = vld [vmem:[%s20090_s8 + $0x3c] sm:$0xf] }
 0x535   :  { %8455 = vmatpush1.bf16.msra.mxu0 %v14084_v18  ;;  %v12849_v18 = vcombine.high %v2745_v60, %v2749_v17 }
 0x537   :  { %7796 = vperm.xlu1 %14013, %v7125_v15   ;;  %v12848_v15 = vcombine.low %v2745_v60, %v2749_v17  ;;  %v10628_v17 = vld [vmem:[%s20092_s10 + $0x50] sm:$0xf] }
 0x538   :  { %5260 = vmatmul.mubr.bf16.gmra.mrb[20].mxu0 %v12728_v26 }
 0x539   :  { %5269 = vmatprep.mubr.bf16.mxu0 %v12737_v6 }
 0x53a   :  { %6672 = vmatmul.mubr.bf16.gmra.mrb[20].mxu1 %v12728_v26  ;;  %v7126_v26 = vld [vmem:[%s20088_s4 + $0xe0] sm:$0xf] }
 0x53b   :  { %6681 = vmatprep.mubr.bf16.mxu1 %v12737_v6  ;;  %v12792_v6 = vcombine.low %v2689_v9, %v2693_v48  ;;  %7808 = vperm.xlu0 %14012, %v7126_v26   ;;  %v17693_v9 = vpop.permute.xlu1 %7160  ;;  %v10608_v48 = vld [vmem:[%s20092_s10] sm:$0xf]  ;;  %v10609_v26 = vld [vmem:[%s20092_s10 + $0x4] sm:$0xf] }
 0x53c   :  { %7820 = vperm.xlu1 %14013, %v7127_v51   ;;  %v10611_v51 = vld [vmem:[%s20092_s10 + $0xc] sm:$0xf] }
 0x53f   :  { %7832 = vperm.xlu0 %14012, %v7128_v1   ;;  %v17706_v4 = vpop.permute.xlu1 %7172 }
 0x540   :  { %5270 = vmatmul.mubr.bf16.gmra.mrb[24].mxu0 %v12736_v32  ;;  %7844 = vperm.xlu1 %14013, %v7129_v45   ;;  %v2761_v45 = vld [vmem:[%s20087_s3 + $0x598] sm:$0xff] }
 0x541   :  { %5279 = vmatprep.mubr.bf16.mxu0 %v12745_v28 }
 0x542   :  { %6682 = vmatmul.mubr.bf16.gmra.mrb[24].mxu1 %v12736_v32  ;;  %v2705_v32 = vld [vmem:[%s20087_s3 + $0x3d8] sm:$0xff] }
 0x543   :  { %6691 = vmatprep.mubr.bf16.mxu1 %v12745_v28  ;;  %v12800_v28 = vcombine.low %v2697_v44, %v2701_v3  ;;  %v12809_v43 = vcombine.high %v2705_v32, %v2709_v35  ;;  %7856 = vperm.xlu0 %14012, %v7130_v47   ;;  %v2753_v44 = vld [vmem:[%s20087_s3 + $0x558] sm:$0xff] }
 0x544   :  { %7868 = vperm.xlu1 %14013, %v7131_v21   ;;  %v2757_v3 = vld [vmem:[%s20087_s3 + $0x578] sm:$0xff]  ;;  %v10616_v21 = vld [vmem:[%s20092_s10 + $0x20] sm:$0xf] }
 0x547   :  { %7880 = vperm.xlu0 %14012, %v7132_v8  }
 0x548   :  { %5280 = vmatmul.mubr.bf16.gmra.mrb[28].mxu0 %v12744_v19  ;;  %7892 = vperm.xlu1 %14013, %v7133_v39   ;;  %v10618_v39 = vld [vmem:[%s20092_s10 + $0x28] sm:$0xf] }
 0x549   :  { %5289 = vmatprep.mubr.bf16.mxu0 %v12753_v16 }
 0x54a   :  { %6692 = vmatmul.mubr.bf16.gmra.mrb[28].mxu1 %v12744_v19  ;;  %v2713_v19 = vld [vmem:[%s20087_s3 + $0x418] sm:$0xff] }
 0x54b   :  { %6701 = vmatprep.mubr.bf16.mxu1 %v12753_v16  ;;  %v12808_v16 = vcombine.low %v2705_v32, %v2709_v35  ;;  %v12817_v27 = vcombine.high %v2713_v19, %v2717_v25  ;;  %9728 = vperm.xlu0 %14012, %v9710_v33   ;;  %v12857_v32 = vcombine.high %v2753_v44, %v2757_v3  ;;  %v10614_v35 = vld [vmem:[%s20092_s10 + $0x18] sm:$0xf]  ;;  %v10615_v33 = vld [vmem:[%s20092_s10 + $0x1c] sm:$0xf] }
 0x54c   :  { %9740 = vperm.xlu1 %14013, %v9711_v36   ;;  %v10617_v36 = vld [vmem:[%s20092_s10 + $0x24] sm:$0xf] }
 0x54f   :  { %9752 = vperm.xlu0 %14012, %v9712_v55  }
 0x550   :  { %5290 = vmatmul.mubr.bf16.gmra.mrb[32].mxu0 %v12752_v40  ;;  %9764 = vperm.xlu1 %14013, %v9713_v56  }
 0x551   :  { %5299 = vmatprep.mubr.bf16.mxu0 %v12761_v29 }
 0x552   :  { %6702 = vmatmul.mubr.bf16.gmra.mrb[32].mxu1 %v12752_v40  ;;  %v2721_v40 = vld [vmem:[%s20087_s3 + $0x458] sm:$0xff] }
 0x553   :  { %6711 = vmatprep.mubr.bf16.mxu1 %v12761_v29  ;;  %v12816_v29 = vcombine.low %v2713_v19, %v2717_v25  ;;  %v12825_v20 = vcombine.high %v2721_v40, %v2725_v13  ;;  %9776 = vperm.xlu0 %14012, %v9714_v54   ;;  %v12824_v58 = vcombine.low %v2721_v40, %v2725_v13  ;;  %v2769_v40 = vld [vmem:[%s20087_s3 + $0x5d8] sm:$0xff]  ;;  %v10620_v54 = vld [vmem:[%s20092_s10 + $0x30] sm:$0xf] }
 0x554   :  { %9788 = vperm.xlu1 %14013, %v9715_v7   ;;  %v12856_v19 = vcombine.low %v2753_v44, %v2757_v3  ;;  %v2773_v13 = vld [vmem:[%s20087_s3 + $0x5f8] sm:$0xff]  ;;  %v10629_v44 = vld [vmem:[%s20092_s10 + $0x54] sm:$0xf] }
 0x555   :  { %v2793_v3 = vld [vmem:[%s20087_s3 + $0x698] sm:$0xff] }
 0x557   :  { %9800 = vperm.xlu0 %14012, %v9716_v24   ;;  %v12873_v24 = vcombine.high %v2769_v40, %v2773_v13 }
 0x558   :  { %5300 = vmatmul.mubr.bf16.gmra.mrb[36].mxu0 %v12760_v30  ;;  %9812 = vperm.xlu1 %14013, %v9717_v5   ;;  %v10624_v5 = vld [vmem:[%s20092_s10 + $0x40] sm:$0xf] }
 0x559   :  { %5309 = vmatprep.mubr.bf16.mxu0 %v12769_v57 }
 0x55a   :  { %6712 = vmatmul.mubr.bf16.gmra.mrb[36].mxu1 %v12760_v30  ;;  %v2733_v30 = vld [vmem:[%s20087_s3 + $0x4b8] sm:$0xff] }
 0x55b   :  { %6721 = vmatprep.mubr.bf16.mxu1 %v12769_v57  ;;  %v17652_v57 = vpop.permute.xlu0 %7136  ;;  %v12833_v62 = vcombine.high %v2729_v10, %v2733_v30  ;;  %9824 = vperm.xlu0 %14012, %v9718_v34   ;;  %v12832_v53 = vcombine.low %v2729_v10, %v2733_v30  ;;  %v10622_v30 = vld [vmem:[%s20092_s10 + $0x38] sm:$0xf]  ;;  %v10621_v34 = vld [vmem:[%s20092_s10 + $0x34] sm:$0xf] }
 0x55c   :  { %9836 = vperm.xlu1 %14013, %v9719_v46  }
 0x55f   :  { %9848 = vperm.xlu0 %14012, %v9720_v61   ;;  %v12872_v61 = vcombine.low %v2769_v40, %v2773_v13  ;;  %v10635_v13 = vld [vmem:[%s20092_s10 + $0x6c] sm:$0xf] }
 0x560   :  { %5310 = vmatmul.mubr.bf16.gmra.mrb[40].mxu0 %v12768_v14  ;;  %9860 = vperm.xlu1 %14013, %v9721_v31   ;;  %v10625_v31 = vld [vmem:[%s20092_s10 + $0x44] sm:$0xf] }
 0x561   :  { %5319 = vmatprep.mubr.bf16.mxu0 %v12777_v11 }
 0x562   :  { %6722 = vmatmul.mubr.bf16.gmra.mrb[40].mxu1 %v12768_v14  ;;  %v17660_v14 = vpop.permute.xlu0 %7148 }
 0x563   :  { %6731 = vmatprep.mubr.bf16.mxu1 %v12777_v11  ;;  %v2741_v11 = vld [vmem:[%s20087_s3 + $0x4f8] sm:$0xff]  ;;  %9872 = vperm.xlu0 %14012, %v9722_v22  }
 0x566   :  { %v17674_v23 = vpop.permute.xlu0 %7184 }
 0x567   :  { %9896 = vperm.xlu0 %14012, %v9724_v38   ;;  %v2789_v38 = vld [vmem:[%s20087_s3 + $0x678] sm:$0xff] }
 0x568   :  { %5320 = vmatmul.mubr.bf16.gmra.mrb[44].mxu0 %v12776_v37 }
 0x569   :  { %5329 = vmatprep.mubr.bf16.mxu0 %v12785_v0 }
 0x56a   :  { %6732 = vmatmul.mubr.bf16.gmra.mrb[44].mxu1 %v12776_v37  ;;  %v12841_v37 = vcombine.high %v2737_v50, %v2741_v11  ;;  %v17682_v59 = vpop.permute.xlu0 %7208 }
 0x56b   :  { %6741 = vmatprep.mubr.bf16.mxu1 %v12785_v0  ;;  %v9723_v0 = vld [vmem:[%s20090_s8 + $0x34] sm:$0xf]  ;;  %10642 = vperm.xlu0 %14012, %v10608_v48  }
 0x56c   :  { %9884 = vperm.xlu1 %14013, %v9723_v0  }
 0x56f   :  { %10666 = vperm.xlu0 %14012, %v10610_v12  }
 0x570   :  { %5330 = vmatmul.mubr.bf16.gmra.mrb[48].mxu0 %v12784_v49  ;;  %9908 = vperm.xlu1 %14013, %v9725_v63  }
 0x571   :  { %5339 = vmatprep.mubr.bf16.mxu0 %v12793_v52 }
 0x572   :  { %6742 = vmatmul.mubr.bf16.gmra.mrb[48].mxu1 %v12784_v49  ;;  %v12840_v49 = vcombine.low %v2737_v50, %v2741_v11  ;;  %v10623_v11 = vld [vmem:[%s20092_s10 + $0x3c] sm:$0xf] }
 0x573   :  { %6751 = vmatprep.mubr.bf16.mxu1 %v12793_v52  ;;  %v17698_v52 = vpop.permute.xlu0 %7232 }
 0x574   :  { %10654 = vperm.xlu1 %14013, %v10609_v26  }
 0x577   :  { %v17708_v2 = vpop.permute.xlu0 %7256 }
 0x578   :  { %5340 = vmatmul.mubr.bf16.gmra.mrb[52].mxu0 %v12792_v6  ;;  %10678 = vperm.xlu1 %14013, %v10611_v51  }
 0x579   :  { %5349 = vmatprep.mubr.bf16.mxu0 %v12801_v41 }
 0x57a   :  { %6752 = vmatmul.mubr.bf16.gmra.mrb[52].mxu1 %v12792_v6  ;;  %v10612_v6 = vld [vmem:[%s20092_s10 + $0x10] sm:$0xf] }
 0x57b   :  { %6761 = vmatprep.mubr.bf16.mxu1 %v12801_v41  ;;  %v17722_v41 = vpop.permute.xlu1 %7196  ;;  %v17724_v1 = vpop.permute.xlu0 %7280  ;;  %10690 = vperm.xlu0 %14012, %v10612_v6   ;;  %v2797_v6 = vld [vmem:[%s20087_s3 + $0x6b8] sm:$0xff] }
 0x57c   :  { %21401 = vst [vmem:[#allocation85_spill] sm:$0xff] %v17724_v1 }
 0x57f   :  { %v17732_v47 = vpop.permute.xlu1 %7220  ;;  %v17743_v8 = vpop.permute.xlu0 %7304  ;;  %10714 = vperm.xlu0 %14012, %v10614_v35   ;;  %v12897_v35 = vcombine.high %v2793_v3, %v2797_v6 }
 0x580   :  { %5350 = vmatmul.mubr.bf16.gmra.mrb[56].mxu0 %v12800_v28  ;;  %21402 = vst [vmem:[#allocation81_spill] sm:$0xff] %v17743_v8  ;;  %v12118_v8 = vld [vmem:[%s20094_s14 + $0x8] sm:$0xf] }
 0x581   :  { %5359 = vmatprep.mubr.bf16.mxu0 %v12809_v43 }
 0x582   :  { %6762 = vmatmul.mubr.bf16.gmra.mrb[56].mxu1 %v12800_v28  ;;  %v10613_v28 = vld [vmem:[%s20092_s10 + $0x14] sm:$0xf] }
 0x583   :  { %6771 = vmatprep.mubr.bf16.mxu1 %v12809_v43  ;;  %v2765_v43 = vld [vmem:[%s20087_s3 + $0x5b8] sm:$0xff]  ;;  %10702 = vperm.xlu1 %14013, %v10613_v28   ;;  %v17748_v25 = vpop.permute.xlu1 %7244  ;;  %v17758_v55 = vpop.permute.xlu0 %7328 }
 0x584   :  { %10738 = vperm.xlu0 %14012, %v10616_v21   ;;  %21403 = vst [vmem:[#allocation86_spill] sm:$0xff] %v17758_v55  ;;  %v10633_v21 = vld [vmem:[%s20092_s10 + $0x64] sm:$0xf] }
 0x587   :  { %10726 = vperm.xlu1 %14013, %v10615_v33   ;;  %v17777_v10 = vpop.permute.xlu0 %7352  ;;  %v2805_v33 = vld [vmem:[%s20087_s3 + $0x6f8] sm:$0xff] }
 0x588   :  { %5360 = vmatmul.mubr.bf16.gmra.mrb[60].mxu0 %v12808_v16  ;;  %10762 = vperm.xlu0 %14012, %v10618_v39   ;;  %21405 = vst [vmem:[#allocation95_spill] sm:$0xff] %v17777_v10  ;;  %v12896_v39 = vcombine.low %v2793_v3, %v2797_v6  ;;  %v11604_v6 = vld [vmem:[%s20093_s12 + $0x8] sm:$0xf] }
 0x589   :  { %5369 = vmatprep.mubr.bf16.mxu0 %v12817_v27 }
 0x58a   :  { %6772 = vmatmul.mubr.bf16.gmra.mrb[60].mxu1 %v12808_v16  ;;  %v12865_v16 = vcombine.high %v2761_v45, %v2765_v43 }
 0x58b   :  { %6781 = vmatprep.mubr.bf16.mxu1 %v12817_v27  ;;  %v17756_v27 = vpop.permute.xlu1 %7268  ;;  %10750 = vperm.xlu1 %14013, %v10617_v36   ;;  %v17798_v50 = vpop.permute.xlu0 %7376 }
 0x58c   :  { %10786 = vperm.xlu0 %14012, %v10620_v54   ;;  %21408 = vst [vmem:[#allocation92_spill] sm:$0xff] %v17798_v50 }
 0x58f   :  { %v17772_v56 = vpop.permute.xlu1 %7292  ;;  %v17817_v60 = vpop.permute.xlu0 %7400 }
 0x590   :  { %5370 = vmatmul.mubr.bf16.gmra.mrb[64].mxu0 %v12816_v29  ;;  %21404 = vst [vmem:[#allocation82_spill] sm:$0xff] %v17772_v56  ;;  %10810 = vperm.xlu0 %14012, %v10622_v30   ;;  %21410 = vst [vmem:[#allocation89_spill] sm:$0xff] %v17817_v60  ;;  %v2813_v30 = vld [vmem:[%s20087_s3 + $0x738] sm:$0xff]  ;;  %v11615_v60 = vld [vmem:[%s20093_s12 + $0x34] sm:$0xf] }
 0x591   :  { %5379 = vmatprep.mubr.bf16.mxu0 %v12825_v20 }
 0x592   :  { %6782 = vmatmul.mubr.bf16.gmra.mrb[64].mxu1 %v12816_v29  ;;  %v12864_v29 = vcombine.low %v2761_v45, %v2765_v43  ;;  %v10634_v43 = vld [vmem:[%s20092_s10 + $0x68] sm:$0xf] }
 0x593   :  { %6791 = vmatprep.mubr.bf16.mxu1 %v12825_v20  ;;  %v10619_v20 = vld [vmem:[%s20092_s10 + $0x2c] sm:$0xf]  ;;  %v17782_v7 = vpop.permute.xlu1 %7316  ;;  %v17830_v26 = vpop.permute.xlu0 %7424 }
 0x594   :  { %10774 = vperm.xlu1 %14013, %v10619_v20   ;;  %21406 = vst [vmem:[#allocation91_spill] sm:$0xff] %v17782_v7  ;;  %10834 = vperm.xlu0 %14012, %v10624_v5   ;;  %21412 = vst [vmem:[#allocation90_spill] sm:$0xff] %v17830_v26  ;;  %v10637_v20 = vld [vmem:[%s20092_s10 + $0x74] sm:$0xf] }
 0x597   :  { %v17796_v46 = vpop.permute.xlu1 %7340  ;;  %v17849_v45 = vpop.permute.xlu0 %7448 }
 0x598   :  { %5380 = vmatmul.mubr.bf16.gmra.mrb[68].mxu0 %v12824_v58  ;;  %10798 = vperm.xlu1 %14013, %v10621_v34   ;;  %21407 = vst [vmem:[#allocation96_spill] sm:$0xff] %v17796_v46  ;;  %21414 = vst [vmem:[#allocation99_spill] sm:$0xff] %v17849_v45 }
 0x599   :  { %5389 = vmatprep.mubr.bf16.mxu0 %v12833_v62 }
 0x59a   :  { %6792 = vmatmul.mubr.bf16.gmra.mrb[68].mxu1 %v12824_v58  ;;  %v2777_v58 = vld [vmem:[%s20087_s3 + $0x618] sm:$0xff] }
 0x59b   :  { %6801 = vmatprep.mubr.bf16.mxu1 %v12833_v62  ;;  %v2781_v62 = vld [vmem:[%s20087_s3 + $0x638] sm:$0xff]  ;;  %v17815_v0 = vpop.permute.xlu1 %7364  ;;  %v17868_v40 = vpop.permute.xlu0 %7472 }
 0x59c   :  { %v12881_v22 = vcombine.high %v2777_v58, %v2781_v62  ;;  %10822 = vperm.xlu1 %14013, %v10623_v11   ;;  %21409 = vst [vmem:[#allocation93_spill] sm:$0xff] %v17815_v0  ;;  %v12880_v48 = vcombine.low %v2777_v58, %v2781_v62  ;;  %21416 = vst [vmem:[#allocation100_spill] sm:$0xff] %v17868_v40 }
 0x59f   :  { %v17828_v12 = vpop.permute.xlu1 %7388  ;;  %v17887_v58 = vpop.permute.xlu0 %7496 }
 0x5a0   :  { %5390 = vmatmul.mubr.bf16.gmra.mrb[72].mxu0 %v12832_v53  ;;  %10846 = vperm.xlu1 %14013, %v10625_v31   ;;  %21411 = vst [vmem:[#allocation94_spill] sm:$0xff] %v17828_v12  ;;  %21418 = vst [vmem:[#allocation97_spill] sm:$0xff] %v17887_v58  ;;  %v10639_v31 = vld [vmem:[%s20092_s10 + $0x7c] sm:$0xf]  ;;  %v11611_v58 = vld [vmem:[%s20093_s12 + $0x24] sm:$0xf] }
 0x5a1   :  { %5399 = vmatprep.mubr.bf16.mxu0 %v12841_v37  ;;  %v11616_v12 = vld [vmem:[%s20093_s12 + $0x38] sm:$0xf] }
 0x5a2   :  { %6802 = vmatmul.mubr.bf16.gmra.mrb[72].mxu1 %v12832_v53  ;;  %v10626_v53 = vld [vmem:[%s20092_s10 + $0x48] sm:$0xf] }
 0x5a3   :  { %6811 = vmatprep.mubr.bf16.mxu1 %v12841_v37  ;;  %v2785_v37 = vld [vmem:[%s20087_s3 + $0x658] sm:$0xff]  ;;  %10858 = vperm.xlu0 %14012, %v10626_v53   ;;  %v17847_v28 = vpop.permute.xlu1 %7412 }
 0x5a4   :  { %v12889_v63 = vcombine.high %v2785_v37, %v2789_v38  ;;  %v12888_v51 = vcombine.low %v2785_v37, %v2789_v38  ;;  %21413 = vst [vmem:[#allocation103_spill] sm:$0xff] %v17847_v28 }
 0x5a7   :  { %10882 = vperm.xlu0 %14012, %v10628_v17   ;;  %v17866_v36 = vpop.permute.xlu1 %7436 }
 0x5a8   :  { %5400 = vmatmul.mubr.bf16.gmra.mrb[76].mxu0 %v12840_v49  ;;  %21415 = vst [vmem:[#allocation104_spill] sm:$0xff] %v17866_v36 }
 0x5a9   :  { %5409 = vmatprep.mubr.bf16.mxu0 %v12849_v18 }
 0x5aa   :  { %6812 = vmatmul.mubr.bf16.gmra.mrb[76].mxu1 %v12840_v49  ;;  %v10627_v49 = vld [vmem:[%s20092_s10 + $0x4c] sm:$0xf] }
 0x5ab   :  { %6821 = vmatprep.mubr.bf16.mxu1 %v12849_v18  ;;  %10870 = vperm.xlu1 %14013, %v10627_v49   ;;  %v10630_v18 = vld [vmem:[%s20092_s10 + $0x58] sm:$0xf]  ;;  %v17885_v34 = vpop.permute.xlu1 %7460 }
 0x5ac   :  { %10906 = vperm.xlu0 %14012, %v10630_v18   ;;  %21417 = vst [vmem:[#allocation101_spill] sm:$0xff] %v17885_v34 }
 0x5af   :  { %10894 = vperm.xlu1 %14013, %v10629_v44   ;;  %v11609_v44 = vld [vmem:[%s20093_s12 + $0x1c] sm:$0xf] }
 0x5b0   :  { %5410 = vmatmul.mubr.bf16.gmra.mrb[80].mxu0 %v12848_v15 }
 0x5b1   :  { %5419 = vmatprep.mubr.bf16.mxu0 %v12857_v32 }
 0x5b2   :  { %6822 = vmatmul.mubr.bf16.gmra.mrb[80].mxu1 %v12848_v15  ;;  %v10632_v15 = vld [vmem:[%s20092_s10 + $0x60] sm:$0xf] }
 0x5b3   :  { %6831 = vmatprep.mubr.bf16.mxu1 %v12857_v32  ;;  %v10631_v32 = vld [vmem:[%s20092_s10 + $0x5c] sm:$0xf]  ;;  %10930 = vperm.xlu0 %14012, %v10632_v15   ;;  %v11603_v15 = vld [vmem:[%s20093_s12 + $0x4] sm:$0xf] }
 0x5b4   :  { %10918 = vperm.xlu1 %14013, %v10631_v32   ;;  %v2821_v32 = vld [vmem:[%s20087_s3 + $0x778] sm:$0xff] }
 0x5b7   :  { %10954 = vperm.xlu0 %14012, %v10634_v43   ;;  %v17933_v43 = vpop.permute.xlu0 %7520 }
 0x5b8   :  { %5420 = vmatmul.mubr.bf16.gmra.mrb[84].mxu0 %v12856_v19  ;;  %10942 = vperm.xlu1 %14013, %v10633_v21   ;;  %21420 = vst [vmem:[#allocation98_spill] sm:$0xff] %v17933_v43 }
 0x5b9   :  { %5429 = vmatprep.mubr.bf16.mxu0 %v12865_v16 }
 0x5ba   :  { %6832 = vmatmul.mubr.bf16.gmra.mrb[84].mxu1 %v12856_v19  ;;  %v2801_v19 = vld [vmem:[%s20087_s3 + $0x6d8] sm:$0xff] }
 0x5bb   :  { %6841 = vmatprep.mubr.bf16.mxu1 %v12865_v16  ;;  %v10636_v16 = vld [vmem:[%s20092_s10 + $0x70] sm:$0xf]  ;;  %v12905_v54 = vcombine.high %v2801_v19, %v2805_v33  ;;  %v12904_v53 = vcombine.low %v2801_v19, %v2805_v33 }
 0x5bc   :  { %10978 = vperm.xlu0 %14012, %v10636_v16   ;;  %10966 = vperm.xlu1 %14013, %v10635_v13   ;;  %v11606_v33 = vld [vmem:[%s20093_s12 + $0x10] sm:$0xf] }
 0x5c0   :  { %5430 = vmatmul.mubr.bf16.gmra.mrb[88].mxu0 %v12864_v29  ;;  %10990 = vperm.xlu1 %14013, %v10637_v20  }
 0x5c1   :  { %5439 = vmatprep.mubr.bf16.mxu0 %v12873_v24 }
 0x5c2   :  { %6842 = vmatmul.mubr.bf16.gmra.mrb[88].mxu1 %v12864_v29  ;;  %v10638_v29 = vld [vmem:[%s20092_s10 + $0x78] sm:$0xf] }
 0x5c3   :  { %6851 = vmatprep.mubr.bf16.mxu1 %v12873_v24  ;;  %v2809_v24 = vld [vmem:[%s20087_s3 + $0x718] sm:$0xff]  ;;  %11002 = vperm.xlu0 %14012, %v10638_v29  }
 0x5c4   :  { %v12913_v17 = vcombine.high %v2809_v24, %v2813_v30  ;;  %11014 = vperm.xlu1 %14013, %v10639_v31   ;;  %v12912_v13 = vcombine.low %v2809_v24, %v2813_v30  ;;  %v11607_v31 = vld [vmem:[%s20093_s12 + $0x14] sm:$0xf]  ;;  %v17979_v30 = vpop.permute.xlu0 %7544 }
 0x5c5   :  { %21422 = vst [vmem:[#allocation107_spill] sm:$0xff] %v17979_v30 }
 0x5c8   :  { %5440 = vmatmul.mubr.bf16.gmra.mrb[92].mxu0 %v12872_v61  ;;  %11632 = vperm.xlu1 %14013, %v11603_v15   ;;  %v11608_v15 = vld [vmem:[%s20093_s12 + $0x18] sm:$0xf] }
 0x5c9   :  { %5449 = vmatprep.mubr.bf16.mxu0 %v12881_v22 }
 0x5ca   :  { %6852 = vmatmul.mubr.bf16.gmra.mrb[92].mxu1 %v12872_v61  ;;  %v11602_v61 = vld [vmem:[%s20093_s12] sm:$0xf] }
 0x5cb   :  { %6861 = vmatprep.mubr.bf16.mxu1 %v12881_v22  ;;  %11620 = vperm.xlu0 %14012, %v11602_v61  }
 0x5cf   :  { %11644 = vperm.xlu0 %14012, %v11604_v6  }
 0x5d0   :  { %5450 = vmatmul.mubr.bf16.gmra.mrb[96].mxu0 %v12880_v48 }
 0x5d1   :  { %5459 = vmatprep.mubr.bf16.mxu0 %v12889_v63 }
 0x5d2   :  { %6862 = vmatmul.mubr.bf16.gmra.mrb[96].mxu1 %v12880_v48 }
 0x5d3   :  { %6871 = vmatprep.mubr.bf16.mxu1 %v12889_v63  ;;  %11668 = vperm.xlu0 %14012, %v11606_v33   ;;  %v2825_v33 = vld [vmem:[%s20087_s3 + $0x798] sm:$0xff] }
 0x5d7   :  { %11692 = vperm.xlu0 %14012, %v11608_v15  }
 0x5d8   :  { %5460 = vmatmul.mubr.bf16.gmra.mrb[100].mxu0 %v12888_v51 }
 0x5d9   :  { %5469 = vmatprep.mubr.bf16.mxu0 %v12897_v35 }
 0x5da   :  { %6872 = vmatmul.mubr.bf16.gmra.mrb[100].mxu1 %v12888_v51  ;;  %v2817_v51 = vld [vmem:[%s20087_s3 + $0x758] sm:$0xff] }
 0x5db   :  { %6881 = vmatprep.mubr.bf16.mxu1 %v12897_v35  ;;  %v17931_v35 = vpop.permute.xlu1 %7484  ;;  %v12921_v61 = vcombine.high %v2817_v51, %v2821_v32  ;;  %v12920_v3 = vcombine.low %v2817_v51, %v2821_v32  ;;  %v18025_v32 = vpop.permute.xlu0 %7568 }
 0x5dc   :  { %21419 = vst [vmem:[#allocation102_spill] sm:$0xff] %v17931_v35  ;;  %v11612_v35 = vld [vmem:[%s20093_s12 + $0x28] sm:$0xf]  ;;  %21424 = vst [vmem:[#allocation108_spill] sm:$0xff] %v18025_v32 }
 0x5e0   :  { %5470 = vmatmul.mubr.bf16.gmra.mrb[104].mxu0 %v12896_v39 }
 0x5e1   :  { %5479 = vmatprep.mubr.bf16.mxu0 %v12905_v54 }
 0x5e2   :  { %6882 = vmatmul.mubr.bf16.gmra.mrb[104].mxu1 %v12896_v39 }
 0x5e3   :  { %6891 = vmatprep.mubr.bf16.mxu1 %v12905_v54  ;;  %v17889_v62 = vpop.f32.mrb[0].mxu0  ;;  %v11605_v54 = vld [vmem:[%s20093_s12 + $0xc] sm:$0xf] }
 0x5e4   :  { %v17896_v11 = vpop.f32.mrb[1].mxu0  ;;  %11656 = vperm.xlu1 %14013, %v11605_v54   ;;  %v2829_v54 = vld [vmem:[%s20087_s3 + $0x7b8] sm:$0xff] }
 0x5e5   :  { %v17891_v5 = vpop.f32.mrb[0].mxu1  ;;  %v17903_v37 = vpop.f32.mrb[2].mxu0  ;;  %v12929_v43 = vcombine.high %v2825_v33, %v2829_v54  ;;  %v12928_v26 = vcombine.low %v2825_v33, %v2829_v54 }
 0x5e6   :  { %v17898_v22 = vpop.f32.mrb[1].mxu1  ;;  %v17911_v63 = vpop.f32.mrb[3].mxu0 }
 0x5e7   :  { %v17905_v38 = vpop.f32.mrb[2].mxu1 }
 0x5e8   :  { %v17913_v18 = vpop.f32.mrb[3].mxu1  ;;  %5480 = vmatmul.mubr.bf16.gmra.mrb[108].mxu0 %v12904_v53  ;;  %11680 = vperm.xlu1 %14013, %v11607_v31  }
 0x5e9   :  { %5489 = vmatprep.mubr.bf16.mxu0 %v12913_v17 }
 0x5ea   :  { %6892 = vmatmul.mubr.bf16.gmra.mrb[108].mxu1 %v12904_v53  ;;  %v17977_v53 = vpop.permute.xlu1 %7508 }
 0x5eb   :  { %6901 = vmatprep.mubr.bf16.mxu1 %v12913_v17  ;;  %v17935_v21 = vpop.f32.mrb[4].mxu0  ;;  %21421 = vst [vmem:[#allocation111_spill] sm:$0xff] %v17977_v53 }
 0x5ec   :  { %v17942_v16 = vpop.f32.mrb[5].mxu0  ;;  %11704 = vperm.xlu1 %14013, %v11609_v44   ;;  %v2837_v44 = vld [vmem:[%s20087_s3 + $0x7f8] sm:$0xff] }
 0x5ed   :  { %v17937_v19 = vpop.f32.mrb[4].mxu1  ;;  %v17949_v29 = vpop.f32.mrb[6].mxu0 }
 0x5ee   :  { %v17944_v39 = vpop.f32.mrb[5].mxu1  ;;  %v17957_v17 = vpop.f32.mrb[7].mxu0 }
 0x5ef   :  { %v17951_v20 = vpop.f32.mrb[6].mxu1  ;;  %v18023_v31 = vpop.permute.xlu1 %7532 }
 0x5f0   :  { %v17959_v6 = vpop.f32.mrb[7].mxu1  ;;  %5490 = vmatmul.mubr.bf16.gmra.mrb[112].mxu0 %v12912_v13  ;;  %21423 = vst [vmem:[#allocation112_spill] sm:$0xff] %v18023_v31  ;;  %11728 = vperm.xlu1 %14013, %v11611_v58   ;;  %v11613_v31 = vld [vmem:[%s20093_s12 + $0x2c] sm:$0xf]  ;;  %v18065_v58 = vpop.permute.xlu0 %7592 }
 0x5f1   :  { %5499 = vmatprep.mubr.bf16.mxu0 %v12921_v61  ;;  %21428 = vst [vmem:[#allocation106_spill] sm:$0xff] %v18065_v58 }
 0x5f2   :  { %6902 = vmatmul.mubr.bf16.gmra.mrb[112].mxu1 %v12912_v13 }
 0x5f3   :  { %6911 = vmatprep.mubr.bf16.mxu1 %v12921_v61  ;;  %v17981_v13 = vpop.f32.mrb[8].mxu0  ;;  %v11610_v61 = vld [vmem:[%s20093_s12 + $0x20] sm:$0xf] }
 0x5f4   :  { %v17988_v49 = vpop.f32.mrb[9].mxu0  ;;  %11716 = vperm.xlu0 %14012, %v11610_v61   ;;  %v2833_v61 = vld [vmem:[%s20087_s3 + $0x7d8] sm:$0xff]  ;;  %11752 = vperm.xlu1 %14013, %v11613_v31  }
 0x5f5   :  { %v17983_v24 = vpop.f32.mrb[8].mxu1  ;;  %v17995_v30 = vpop.f32.mrb[10].mxu0  ;;  %v12937_v36 = vcombine.high %v2833_v61, %v2837_v44  ;;  %v12936_v0 = vcombine.low %v2833_v61, %v2837_v44 }
 0x5f6   :  { %v17990_v48 = vpop.f32.mrb[9].mxu1  ;;  %v18003_v53 = vpop.f32.mrb[11].mxu0 }
 0x5f7   :  { %v17997_v15 = vpop.f32.mrb[10].mxu1 }
 0x5f8   :  { %v18005_v40 = vpop.f32.mrb[11].mxu1  ;;  %5500 = vmatmul.mubr.bf16.gmra.mrb[116].mxu0 %v12920_v3  ;;  %11740 = vperm.xlu0 %14012, %v11612_v35  }
 0x5f9   :  { %5509 = vmatprep.mubr.bf16.mxu0 %v12929_v43  ;;  %11776 = vperm.xlu1 %14013, %v11615_v60   ;;  %v18107_v60 = vpop.permute.xlu0 %7616 }
 0x5fa   :  { %6912 = vmatmul.mubr.bf16.gmra.mrb[116].mxu1 %v12920_v3  ;;  %21438 = vst [vmem:[#allocation121_spill] sm:$0xff] %v18107_v60 }
 0x5fb   :  { %6921 = vmatprep.mubr.bf16.mxu1 %v12929_v43  ;;  %v18027_v3 = vpop.f32.mrb[12].mxu0  ;;  %v11614_v43 = vld [vmem:[%s20093_s12 + $0x30] sm:$0xf] }
 0x5fc   :  { %v18034_v45 = vpop.f32.mrb[13].mxu0  ;;  %11764 = vperm.xlu0 %14012, %v11614_v43   ;;  %v18063_v43 = vpop.permute.xlu1 %7556 }
 0x5fd   :  { %v18029_v51 = vpop.f32.mrb[12].mxu1  ;;  %v18041_v32 = vpop.f32.mrb[14].mxu0  ;;  %21427 = vst [vmem:[#allocation110_spill] sm:$0xff] %v18063_v43  ;;  %v12117_v43 = vld [vmem:[%s20094_s14 + $0x4] sm:$0xf] }
 0x5fe   :  { %21425 = vst [vmem:[#allocation109_spill] sm:$0xff] %v18029_v51  ;;  %v18036_v34 = vpop.f32.mrb[13].mxu1  ;;  %v18049_v28 = vpop.f32.mrb[15].mxu0 }
 0x5ff   :  { %v18043_v35 = vpop.f32.mrb[14].mxu1 }
 0x600   :  { %21426 = vst [vmem:[#allocation105_spill] sm:$0xff] %v18043_v35  ;;  %v18051_v50 = vpop.f32.mrb[15].mxu1  ;;  %5510 = vmatmul.mubr.bf16.gmra.mrb[120].mxu0 %v12928_v26  ;;  %11788 = vperm.xlu0 %14012, %v11616_v12  }
 0x601   :  { %5519 = vmatprep.mubr.bf16.mxu0 %v12937_v36 }
 0x602   :  { %6922 = vmatmul.mubr.bf16.gmra.mrb[120].mxu1 %v12928_v26  ;;  %v12116_v26 = vld [vmem:[%s20094_s14] sm:$0xf] }
 0x603   :  { %6931 = vmatprep.mubr.bf16.mxu1 %v12937_v36  ;;  %v18067_v33 = vpop.f32.mrb[16].mxu0  ;;  %v11617_v36 = vld [vmem:[%s20093_s12 + $0x3c] sm:$0xf] }
 0x604   :  { %21429 = vst [vmem:[#allocation119_spill] sm:$0xff] %v18067_v33  ;;  %v18074_v54 = vpop.f32.mrb[17].mxu0  ;;  %12126 = vperm.xlu0 %14012, %v12116_v26   ;;  %11800 = vperm.xlu1 %14013, %v11617_v36   ;;  %v18105_v26 = vpop.permute.xlu1 %7580  ;;  %v12121_v33 = vld [vmem:[%s20094_s14 + $0x14] sm:$0xf] }
 0x605   :  { %v18069_v31 = vpop.f32.mrb[16].mxu1  ;;  %21431 = vst [vmem:[#allocation120_spill] sm:$0xff] %v18074_v54  ;;  %v18081_v58 = vpop.f32.mrb[18].mxu0  ;;  %21437 = vst [vmem:[#allocation122_spill] sm:$0xff] %v18105_v26  ;;  %v14090_v26 = vld [vmem:[%s20091_s5] sm:$0xff]  }
 0x606   :  { %21430 = vst [vmem:[#allocation115_spill] sm:$0xff] %v18069_v31  ;;  %v18076_v10 = vpop.f32.mrb[17].mxu1  ;;  %21433 = vst [vmem:[#allocation117_spill] sm:$0xff] %v18081_v58  ;;  %v18089_v46 = vpop.f32.mrb[19].mxu0  ;;  %v12122_v54 = vld [vmem:[%s20094_s14 + $0x18] sm:$0xf] }
 0x607   :  { %21432 = vst [vmem:[#allocation116_spill] sm:$0xff] %v18076_v10  ;;  %v18083_v12 = vpop.f32.mrb[18].mxu1  ;;  %21435 = vst [vmem:[#allocation118_spill] sm:$0xff] %v18089_v46 }
 0x608   :  { %21434 = vst [vmem:[#allocation113_spill] sm:$0xff] %v18083_v12  ;;  %v18091_v55 = vpop.f32.mrb[19].mxu1  ;;  %5520 = vmatmul.mubr.bf16.gmra.mrb[124].mxu0 %v12936_v0  ;;  %12150 = vperm.xlu0 %14012, %v12118_v8   ;;  %v12119_v8 = vld [vmem:[%s20094_s14 + $0xc] sm:$0xf] }
 0x609   :  { %21436 = vst [vmem:[#allocation114_spill] sm:$0xff] %v18091_v55  ;;  %8486 = vmatprep.mubr.bf16.mxu0 %v20642_v42  ;;  %12138 = vperm.xlu1 %14013, %v12117_v43   ;;  %v18154_v43 = vpop.permute.xlu0 %7640 }
 0x60a   :  { %6932 = vmatmul.mubr.bf16.gmra.mrb[124].mxu1 %v12936_v0  ;;  %v12120_v0 = vld [vmem:[%s20094_s14 + $0x10] sm:$0xf]  ;;  %21448 = vst [vmem:[#allocation12_spill] sm:$0xff] %v18154_v43 }
 0x60b   :  { %8599 = vmatprep.mubr.bf16.mxu1 %v20642_v42  ;;  %v18109_v36 = vpop.f32.mrb[20].mxu0 }
 0x60c   :  { %21439 = vst [vmem:[#allocation6_spill] sm:$0xff] %v18109_v36  ;;  %v18116_v61 = vpop.f32.mrb[21].mxu0  ;;  %12174 = vperm.xlu0 %14012, %v12120_v0   ;;  %v18152_v0 = vpop.permute.xlu1 %7604 }
 0x60d   :  { %v18111_v44 = vpop.f32.mrb[20].mxu1  ;;  %21441 = vst [vmem:[#allocation8_spill] sm:$0xff] %v18116_v61  ;;  %v18126_v60 = vpop.f32.mrb[22].mxu0  ;;  %12162 = vperm.xlu1 %14013, %v12119_v8   ;;  %21447 = vst [vmem:[#allocation16_spill] sm:$0xff] %v18152_v0  ;;  %v14091_v0 = vld [vmem:[%s20091_s5 + $0x8] sm:$0xff]  }
 0x60e   :  { %21440 = vst [vmem:[#allocation3_spill] sm:$0xff] %v18111_v44  ;;  %v18118_v31 = vpop.f32.mrb[21].mxu1  ;;  %21443 = vst [vmem:[#allocation5_spill] sm:$0xff] %v18126_v60  ;;  %v18134_v58 = vpop.f32.mrb[23].mxu0  ;;  %v12309_v60 = vld [vmem:[%s20095_s15 + $0x8] sm:$0xff] }
 0x60f   :  { %21442 = vst [vmem:[#allocation7_spill] sm:$0xff] %v18118_v31  ;;  %v18128_v12 = vpop.f32.mrb[22].mxu1  ;;  %21445 = vst [vmem:[#allocation11_spill] sm:$0xff] %v18134_v58  ;;  %v18204_v36 = vpop.permute.xlu0 %7664 }
 0x610   :  { %21444 = vst [vmem:[#allocation9_spill] sm:$0xff] %v18128_v12  ;;  %v18136_v7 = vpop.f32.mrb[23].mxu1  ;;  %12982 = vmatmul.mubr.msk.bf16.vlgmr.msra.gmra.mrb[128].mxu0 %vm531_vm0, %v14090_v26  ;;  %12198 = vperm.xlu0 %14012, %v12122_v54   ;;  %v12123_v54 = vld [vmem:[%s20094_s14 + $0x1c] sm:$0xf]  ;;  %21458 = vst [vmem:[#allocation21_spill] sm:$0xff] %v18204_v36 }
 0x611   :  { %21446 = vst [vmem:[#allocation14_spill] sm:$0xff] %v18136_v7  ;;  %8496 = vmatprep.mubr.bf16.mxu0 %v20642_v42  ;;  %12186 = vperm.xlu1 %14013, %v12121_v33   ;;  %v22_v33 = vstv %s20096_s16 }
 0x612   :  { %12990 = vmatmul.mubr.msk.bf16.vlgmr.msra.gmra.mrb[128].mxu1 %vm531_vm0, %v14090_v26  ;;  %v12308_v26 = vld [vmem:[%s20095_s15] sm:$0xff]  ;;  %23 = vst [vmem:[#allocation2] sm:$0x1] %v22_v33  ;;  %v12310_v33 = vld [vmem:[%s20095_s15 + $0x10] sm:$0xff] }
 0x613   :  { %8609 = vmatprep.mubr.bf16.mxu1 %v20642_v42  ;;  %v18156_v8 = vpop.f32.mrb[24].mxu0 }
 0x614   :  { %21449 = vst [vmem:[#allocation4_spill] sm:$0xff] %v18156_v8  ;;  %v18163_v10 = vpop.f32.mrb[25].mxu0  ;;  %12318 = vperm.xlu0 %14012, %v12308_v26   ;;  %v18202_v26 = vpop.permute.xlu1 %7628  ;;  %v12313_v8 = vld [vmem:[%s20095_s15 + $0x28] sm:$0xff] }
 0x615   :  { %v18158_v55 = vpop.f32.mrb[24].mxu1  ;;  %21451 = vst [vmem:[#allocation15_spill] sm:$0xff] %v18163_v10  ;;  %v18176_v43 = vpop.f32.mrb[26].mxu0  ;;  %12210 = vperm.xlu1 %14013, %v12123_v54   ;;  %21457 = vst [vmem:[#allocation10_spill] sm:$0xff] %v18202_v26  ;;  %v14092_v26 = vld [vmem:[%s20091_s5 + $0x10] sm:$0xff]  }
 0x616   :  { %21450 = vst [vmem:[#allocation13_spill] sm:$0xff] %v18158_v55  ;;  %v18165_v44 = vpop.f32.mrb[25].mxu1  ;;  %21453 = vst [vmem:[#allocation19_spill] sm:$0xff] %v18176_v43  ;;  %v18184_v31 = vpop.f32.mrb[27].mxu0 }
 0x617   :  { %21452 = vst [vmem:[#allocation17_spill] sm:$0xff] %v18165_v44  ;;  %v18178_v12 = vpop.f32.mrb[26].mxu1  ;;  %21455 = vst [vmem:[#allocation24_spill] sm:$0xff] %v18184_v31  ;;  %v12314_v31 = vld [vmem:[%s20095_s15 + $0x30] sm:$0xff] }
 0x618   :  { %21454 = vst [vmem:[#allocation22_spill] sm:$0xff] %v18178_v12  ;;  %v18186_v7 = vpop.f32.mrb[27].mxu1  ;;  %12983 = vmatmul.mubr.msk.bf16.gmra.mrb[132].mxu0 %vm531_vm0, %v14091_v0  ;;  %12328 = vperm.xlu0 %14012, %v12310_v33   ;;  %v12311_v33 = vld [vmem:[%s20095_s15 + $0x18] sm:$0xff] }
 0x619   :  { %21456 = vst [vmem:[#allocation20_spill] sm:$0xff] %v18186_v7  ;;  %8506 = vmatprep.mubr.bf16.mxu0 %v20642_v42  ;;  %12323 = vperm.xlu1 %14013, %v12309_v60   ;;  %v18251_v60 = vpop.permute.xlu0 %7688  ;;  %v12440_v7 = vld [vmem:[#allocation2] sm:$0x1] }
 0x61a   :  { %12991 = vmatmul.mubr.msk.bf16.gmra.mrb[132].mxu1 %vm531_vm0, %v14091_v0  ;;  %v12312_v0 = vld [vmem:[%s20095_s15 + $0x20] sm:$0xff]  ;;  %21468 = vst [vmem:[#allocation37_spill] sm:$0xff] %v18251_v60 }
 0x61b   :  { %8619 = vmatprep.mubr.bf16.mxu1 %v20642_v42  ;;  %v18206_v54 = vpop.f32.mrb[28].mxu0 }
 0x61c   :  { %21459 = vst [vmem:[#allocation23_spill] sm:$0xff] %v18206_v54  ;;  %v18213_v61 = vpop.f32.mrb[29].mxu0  ;;  %12338 = vperm.xlu0 %14012, %v12312_v0   ;;  %v18249_v0 = vpop.permute.xlu1 %7652 }
 0x61d   :  { %v18208_v58 = vpop.f32.mrb[28].mxu1  ;;  %21461 = vst [vmem:[#allocation27_spill] sm:$0xff] %v18213_v61  ;;  %v18223_v36 = vpop.f32.mrb[30].mxu0  ;;  %12333 = vperm.xlu1 %14013, %v12311_v33   ;;  %21467 = vst [vmem:[#allocation26_spill] sm:$0xff] %v18249_v0  ;;  %v12315_v0 = vld [vmem:[%s20095_s15 + $0x38] sm:$0xff] }
 0x61e   :  { %21460 = vst [vmem:[#allocation29_spill] sm:$0xff] %v18208_v58  ;;  %v18215_v55 = vpop.f32.mrb[29].mxu1  ;;  %21463 = vst [vmem:[#allocation18_spill] sm:$0xff] %v18223_v36  ;;  %v18231_v43 = vpop.f32.mrb[31].mxu0 }
 0x61f   :  { %21462 = vst [vmem:[#allocation32_spill] sm:$0xff] %v18215_v55  ;;  %v18225_v12 = vpop.f32.mrb[30].mxu1  ;;  %21465 = vst [vmem:[#allocation31_spill] sm:$0xff] %v18231_v43 }
 0x620   :  { %21464 = vst [vmem:[#allocation28_spill] sm:$0xff] %v18225_v12  ;;  %v18233_v44 = vpop.f32.mrb[31].mxu1  ;;  %12984 = vmatmul.mubr.msk.bf16.gmra.mrb[136].mxu0 %vm531_vm0, %v14092_v26  ;;  %12348 = vperm.xlu0 %14012, %v12314_v31   ;;  %v14093_v12 = vld [vmem:[%s20091_s5 + $0x18] sm:$0xff]   ;;  %v18283_v43 = vpop.permute.xlu1 %7676 }
 0x621   :  { %21466 = vst [vmem:[#allocation36_spill] sm:$0xff] %v18233_v44  ;;  %8516 = vmatprep.mubr.bf16.mxu0 %v20642_v42  ;;  %12343 = vperm.xlu1 %14013, %v12313_v8   ;;  %21477 = vst [vmem:[#allocation47_spill] sm:$0xff] %v18283_v43 }
 0x622   :  { %12992 = vmatmul.mubr.msk.bf16.gmra.mrb[136].mxu1 %vm531_vm0, %v14092_v26 }
 0x623   :  { %8629 = vmatprep.mubr.bf16.mxu1 %v20642_v42  ;;  %v18253_v33 = vpop.f32.mrb[32].mxu0 }
 0x624   :  { %21469 = vst [vmem:[#allocation39_spill] sm:$0xff] %v18253_v33  ;;  %v18257_v26 = vpop.f32.mrb[33].mxu0  ;;  %12443 = vperm.xlu0 %14012, %v12440_v7  }
 0x625   :  { %v18255_v10 = vpop.f32.mrb[32].mxu1  ;;  %21471 = vst [vmem:[#allocation25_spill] sm:$0xff] %v18257_v26  ;;  %v18267_v60 = vpop.f32.mrb[34].mxu0  ;;  %12353 = vperm.xlu1 %14013, %v12315_v0   ;;  %v14094_v0 = vld [vmem:[%s20091_s5 + $0x20] sm:$0xff]  }
 0x626   :  { %21470 = vst [vmem:[#allocation35_spill] sm:$0xff] %v18255_v10  ;;  %v18259_v58 = vpop.f32.mrb[33].mxu1  ;;  %21473 = vst [vmem:[#allocation30_spill] sm:$0xff] %v18267_v60  ;;  %v18275_v36 = vpop.f32.mrb[35].mxu0 }
 0x627   :  { %21472 = vst [vmem:[#allocation40_spill] sm:$0xff] %v18259_v58  ;;  %v18269_v31 = vpop.f32.mrb[34].mxu1  ;;  %21475 = vst [vmem:[#allocation34_spill] sm:$0xff] %v18275_v36  ;;  %v14095_v58 = vld [vmem:[%s20091_s5 + $0x28] sm:$0xff]  }
 0x628   :  { %21474 = vst [vmem:[#allocation44_spill] sm:$0xff] %v18269_v31  ;;  %v18277_v55 = vpop.f32.mrb[35].mxu1  ;;  %12985 = vmatmul.mubr.msk.bf16.gmra.mrb[140].mxu0 %vm531_vm0, %v14093_v12 }
 0x629   :  { %21476 = vst [vmem:[#allocation45_spill] sm:$0xff] %v18277_v55  ;;  %8526 = vmatprep.mubr.bf16.mxu0 %v20642_v42 }
 0x62a   :  { %12993 = vmatmul.mubr.msk.bf16.gmra.mrb[140].mxu1 %vm531_vm0, %v14093_v12 }
 0x62b   :  { %8639 = vmatprep.mubr.bf16.mxu1 %v20642_v42  ;;  %v18289_v54 = vpop.f32.mrb[36].mxu0 }
 0x62c   :  { %21478 = vst [vmem:[#allocation43_spill] sm:$0xff] %v18289_v54  ;;  %v18293_v8 = vpop.f32.mrb[37].mxu0 }
 0x62d   :  { %v18291_v7 = vpop.f32.mrb[36].mxu1  ;;  %21480 = vst [vmem:[#allocation48_spill] sm:$0xff] %v18293_v8  ;;  %v18300_v61 = vpop.f32.mrb[38].mxu0 }
 0x62e   :  { %21479 = vst [vmem:[#allocation33_spill] sm:$0xff] %v18291_v7  ;;  %v18295_v44 = vpop.f32.mrb[37].mxu1  ;;  %21482 = vst [vmem:[#allocation52_spill] sm:$0xff] %v18300_v61  ;;  %v18308_v31 = vpop.f32.mrb[39].mxu0 }
 0x62f   :  { %21481 = vst [vmem:[#allocation38_spill] sm:$0xff] %v18295_v44  ;;  %v18302_v43 = vpop.f32.mrb[38].mxu1  ;;  %21484 = vst [vmem:[#allocation53_spill] sm:$0xff] %v18308_v31  ;;  %v14096_v31 = vld [vmem:[%s20091_s5 + $0x30] sm:$0xff]  }
 0x630   :  { %21483 = vst [vmem:[#allocation42_spill] sm:$0xff] %v18302_v43  ;;  %v18310_v33 = vpop.f32.mrb[39].mxu1  ;;  %12986 = vmatmul.mubr.msk.bf16.gmra.mrb[144].mxu0 %vm531_vm0, %v14094_v0 }
 0x631   :  { %21485 = vst [vmem:[#allocation55_spill] sm:$0xff] %v18310_v33  ;;  %8536 = vmatprep.mubr.bf16.mxu0 %v20642_v42 }
 0x632   :  { %12994 = vmatmul.mubr.msk.bf16.gmra.mrb[144].mxu1 %vm531_vm0, %v14094_v0 }
 0x633   :  { %8649 = vmatprep.mubr.bf16.mxu1 %v20642_v42  ;;  %v18320_v12 = vpop.f32.mrb[40].mxu0 }
 0x634   :  { %21486 = vst [vmem:[#allocation51_spill] sm:$0xff] %v18320_v12  ;;  %v18324_v7 = vpop.f32.mrb[41].mxu0 }
 0x635   :  { %v18322_v10 = vpop.f32.mrb[40].mxu1  ;;  %21488 = vst [vmem:[#allocation56_spill] sm:$0xff] %v18324_v7  ;;  %v18331_v60 = vpop.f32.mrb[42].mxu0 }
 0x636   :  { %21487 = vst [vmem:[#allocation41_spill] sm:$0xff] %v18322_v10  ;;  %v18326_v43 = vpop.f32.mrb[41].mxu1  ;;  %21490 = vst [vmem:[#allocation60_spill] sm:$0xff] %v18331_v60  ;;  %v18339_v44 = vpop.f32.mrb[43].mxu0 }
 0x637   :  { %21489 = vst [vmem:[#allocation46_spill] sm:$0xff] %v18326_v43  ;;  %v18333_v54 = vpop.f32.mrb[42].mxu1  ;;  %21492 = vst [vmem:[#allocation61_spill] sm:$0xff] %v18339_v44  ;;  %v14097_v44 = vld [vmem:[%s20091_s5 + $0x38] sm:$0xff]  }
 0x638   :  { %21491 = vst [vmem:[#allocation50_spill] sm:$0xff] %v18333_v54  ;;  %v18341_v33 = vpop.f32.mrb[43].mxu1  ;;  %12987 = vmatmul.mubr.msk.bf16.gmra.mrb[148].mxu0 %vm531_vm0, %v14095_v58 }
 0x639   :  { %21493 = vst [vmem:[#allocation63_spill] sm:$0xff] %v18341_v33  ;;  %8546 = vmatprep.mubr.bf16.mxu0 %v20642_v42 }
 0x63a   :  { %12995 = vmatmul.mubr.msk.bf16.gmra.mrb[148].mxu1 %vm531_vm0, %v14095_v58 }
 0x63b   :  { %8659 = vmatprep.mubr.bf16.mxu1 %v20642_v42  ;;  %v18351_v0 = vpop.f32.mrb[44].mxu0 }
 0x63c   :  { %21494 = vst [vmem:[#allocation59_spill] sm:$0xff] %v18351_v0  ;;  %v18355_v10 = vpop.f32.mrb[45].mxu0 }
 0x63d   :  { %v18353_v61 = vpop.f32.mrb[44].mxu1  ;;  %21496 = vst [vmem:[#allocation64_spill] sm:$0xff] %v18355_v10  ;;  %v18362_v8 = vpop.f32.mrb[46].mxu0 }
 0x63e   :  { %21495 = vst [vmem:[#allocation49_spill] sm:$0xff] %v18353_v61  ;;  %v18357_v54 = vpop.f32.mrb[45].mxu1  ;;  %21498 = vst [vmem:[#allocation68_spill] sm:$0xff] %v18362_v8  ;;  %v18370_v43 = vpop.f32.mrb[47].mxu0 }
 0x63f   :  { %21497 = vst [vmem:[#allocation54_spill] sm:$0xff] %v18357_v54  ;;  %v18364_v12 = vpop.f32.mrb[46].mxu1  ;;  %21500 = vst [vmem:[#allocation69_spill] sm:$0xff] %v18370_v43 }
 0x640   :  { %21499 = vst [vmem:[#allocation58_spill] sm:$0xff] %v18364_v12  ;;  %v18372_v33 = vpop.f32.mrb[47].mxu1  ;;  %12988 = vmatmul.mubr.msk.bf16.gmra.mrb[152].mxu0 %vm531_vm0, %v14096_v31 }
 0x641   :  { %21501 = vst [vmem:[#allocation71_spill] sm:$0xff] %v18372_v33  ;;  %8556 = vmatprep.mubr.bf16.mxu0 %v20642_v42 }
 0x642   :  { %12996 = vmatmul.mubr.msk.bf16.gmra.mrb[152].mxu1 %vm531_vm0, %v14096_v31 }
 0x643   :  { %8669 = vmatprep.mubr.bf16.mxu1 %v20642_v42  ;;  %v18382_v58 = vpop.f32.mrb[48].mxu0 }
 0x644   :  { %21502 = vst [vmem:[#allocation67_spill] sm:$0xff] %v18382_v58  ;;  %v18386_v61 = vpop.f32.mrb[49].mxu0 }
 0x645   :  { %v18384_v60 = vpop.f32.mrb[48].mxu1  ;;  %21504 = vst [vmem:[#allocation72_spill] sm:$0xff] %v18386_v61  ;;  %v18393_v7 = vpop.f32.mrb[50].mxu0 }
 0x646   :  { %21503 = vst [vmem:[#allocation57_spill] sm:$0xff] %v18384_v60  ;;  %v18388_v12 = vpop.f32.mrb[49].mxu1  ;;  %21506 = vst [vmem:[#allocation76_spill] sm:$0xff] %v18393_v7  ;;  %v18401_v54 = vpop.f32.mrb[51].mxu0 }
 0x647   :  { %21505 = vst [vmem:[#allocation62_spill] sm:$0xff] %v18388_v12  ;;  %v18395_v0 = vpop.f32.mrb[50].mxu1  ;;  %21508 = vst [vmem:[#allocation77_spill] sm:$0xff] %v18401_v54 }
 0x648   :  { %21507 = vst [vmem:[#allocation66_spill] sm:$0xff] %v18395_v0  ;;  %v18403_v33 = vpop.f32.mrb[51].mxu1  ;;  %12989 = vmatmul.mubr.msk.bf16.gmra.mrb[156].mxu0 %vm531_vm0, %v14097_v44 }
 0x649   :  { %21509 = vst [vmem:[#allocation79_spill] sm:$0xff] %v18403_v33  ;;  %8872 = vmatprep.mubr.bf16.mxu0 %v20642_v42 }
 0x64a   :  { %12997 = vmatmul.mubr.msk.bf16.gmra.mrb[156].mxu1 %vm531_vm0, %v14097_v44 }
 0x64b   :  { %8985 = vmatprep.mubr.bf16.mxu1 %v20642_v42  ;;  %v18413_v31 = vpop.f32.mrb[52].mxu0 }
 0x64c   :  { %21510 = vst [vmem:[#allocation75_spill] sm:$0xff] %v18413_v31  ;;  %v18417_v60 = vpop.f32.mrb[53].mxu0 }
 0x64d   :  { %v18415_v8 = vpop.f32.mrb[52].mxu1  ;;  %21512 = vst [vmem:[#allocation80_spill] sm:$0xff] %v18417_v60  ;;  %v18421_v10 = vpop.f32.mrb[54].mxu0 }
 0x64e   :  { %21511 = vst [vmem:[#allocation65_spill] sm:$0xff] %v18415_v8  ;;  %v18419_v0 = vpop.f32.mrb[53].mxu1  ;;  %21514 = vst [vmem:[#allocation84_spill] sm:$0xff] %v18421_v10  ;;  %v18429_v7 = vpop.f32.mrb[55].mxu0 }
 0x64f   :  { %21513 = vst [vmem:[#allocation70_spill] sm:$0xff] %v18419_v0  ;;  %v18423_v58 = vpop.f32.mrb[54].mxu1  ;;  %21516 = vst [vmem:[#allocation123_spill] sm:$0xff] %v18429_v7 }
 0x650   :  { %21515 = vst [vmem:[#allocation74_spill] sm:$0xff] %v18423_v58  ;;  %v18431_v12 = vpop.f32.mrb[55].mxu1 }
 0x651   :  { %21517 = vst [vmem:[#allocation87_spill] sm:$0xff] %v18431_v12 }
 0x653   :  { %v18437_v54 = vpop.f32.mrb[56].mxu0 }
 0x654   :  { %21518 = vst [vmem:[#allocation83_spill] sm:$0xff] %v18437_v54  ;;  %v18441_v26 = vpop.f32.mrb[57].mxu0 }
 0x655   :  { %v18439_v55 = vpop.f32.mrb[56].mxu1  ;;  %21520 = vst [vmem:[#allocation88_spill] sm:$0xff] %v18441_v26  ;;  %v18445_v31 = vpop.f32.mrb[58].mxu0 }
 0x656   :  { %21519 = vst [vmem:[#allocation73_spill] sm:$0xff] %v18439_v55  ;;  %v18443_v43 = vpop.f32.mrb[57].mxu1  ;;  %21522 = vst [vmem:[#allocation130_spill] sm:$0xff] %v18445_v31  ;;  %v18453_v58 = vpop.f32.mrb[59].mxu0 }
 0x657   :  { %21521 = vst [vmem:[#allocation78_spill] sm:$0xff] %v18443_v43  ;;  %v18447_v44 = vpop.f32.mrb[58].mxu1  ;;  %21524 = vst [vmem:[#allocation131_spill] sm:$0xff] %v18453_v58 }
 0x658   :  { %21523 = vst [vmem:[#allocation126_spill] sm:$0xff] %v18447_v44  ;;  %v18455_v61 = vpop.f32.mrb[59].mxu1 }
 0x659   :  { %21525 = vst [vmem:[#allocation127_spill] sm:$0xff] %v18455_v61 }
 0x65b   :  { %v18461_v12 = vpop.f32.mrb[60].mxu0 }
 0x65c   :  { %21526 = vst [vmem:[#allocation128_spill] sm:$0xff] %v18461_v12  ;;  %v18465_v7 = vpop.f32.mrb[61].mxu0 }
 0x65d   :  { %v18463_v60 = vpop.f32.mrb[60].mxu1  ;;  %21528 = vst [vmem:[#allocation129_spill] sm:$0xff] %v18465_v7  ;;  %v18469_v54 = vpop.f32.mrb[62].mxu0 }
 0x65e   :  { %21527 = vst [vmem:[#allocation124_spill] sm:$0xff] %v18463_v60  ;;  %v18467_v8 = vpop.f32.mrb[61].mxu1  ;;  %21530 = vst [vmem:[#allocation138_spill] sm:$0xff] %v18469_v54  ;;  %v18477_v44 = vpop.f32.mrb[63].mxu0 }
 0x65f   :  { %21529 = vst [vmem:[#allocation125_spill] sm:$0xff] %v18467_v8  ;;  %v18471_v33 = vpop.f32.mrb[62].mxu1  ;;  %21532 = vst [vmem:[#allocation139_spill] sm:$0xff] %v18477_v44 }
 0x660   :  { %21531 = vst [vmem:[#allocation134_spill] sm:$0xff] %v18471_v33  ;;  %v18479_v0 = vpop.f32.mrb[63].mxu1 }
 0x661   :  { %21533 = vst [vmem:[#allocation135_spill] sm:$0xff] %v18479_v0 }
 0x663   :  { %v18485_v61 = vpop.f32.mrb[64].mxu0 }
 0x664   :  { %21534 = vst [vmem:[#allocation136_spill] sm:$0xff] %v18485_v61  ;;  %v18489_v58 = vpop.f32.mrb[65].mxu0 }
 0x665   :  { %v18487_v26 = vpop.f32.mrb[64].mxu1  ;;  %21536 = vst [vmem:[#allocation137_spill] sm:$0xff] %v18489_v58  ;;  %v18493_v12 = vpop.f32.mrb[66].mxu0 }
 0x666   :  { %21535 = vst [vmem:[#allocation132_spill] sm:$0xff] %v18487_v26  ;;  %v18491_v55 = vpop.f32.mrb[65].mxu1  ;;  %21538 = vst [vmem:[#allocation146_spill] sm:$0xff] %v18493_v12  ;;  %v18501_v33 = vpop.f32.mrb[67].mxu0 }
 0x667   :  { %21537 = vst [vmem:[#allocation133_spill] sm:$0xff] %v18491_v55  ;;  %v18495_v10 = vpop.f32.mrb[66].mxu1  ;;  %21540 = vst [vmem:[#allocation147_spill] sm:$0xff] %v18501_v33 }
 0x668   :  { %21539 = vst [vmem:[#allocation142_spill] sm:$0xff] %v18495_v10  ;;  %v18503_v43 = vpop.f32.mrb[67].mxu1 }
 0x669   :  { %21541 = vst [vmem:[#allocation143_spill] sm:$0xff] %v18503_v43 }
 0x66b   :  { %v18509_v0 = vpop.f32.mrb[68].mxu0 }
 0x66c   :  { %21542 = vst [vmem:[#allocation144_spill] sm:$0xff] %v18509_v0  ;;  %v18513_v44 = vpop.f32.mrb[69].mxu0 }
 0x66d   :  { %v18511_v7 = vpop.f32.mrb[68].mxu1  ;;  %21544 = vst [vmem:[#allocation145_spill] sm:$0xff] %v18513_v44  ;;  %v18517_v61 = vpop.f32.mrb[70].mxu0 }
 0x66e   :  { %21543 = vst [vmem:[#allocation140_spill] sm:$0xff] %v18511_v7  ;;  %v18515_v60 = vpop.f32.mrb[69].mxu1  ;;  %21546 = vst [vmem:[#allocation154_spill] sm:$0xff] %v18517_v61  ;;  %v18525_v10 = vpop.f32.mrb[71].mxu0 }
 0x66f   :  { %21545 = vst [vmem:[#allocation141_spill] sm:$0xff] %v18515_v60  ;;  %v18519_v31 = vpop.f32.mrb[70].mxu1  ;;  %21548 = vst [vmem:[#allocation155_spill] sm:$0xff] %v18525_v10 }
 0x670   :  { %21547 = vst [vmem:[#allocation150_spill] sm:$0xff] %v18519_v31  ;;  %v18527_v8 = vpop.f32.mrb[71].mxu1 }
 0x671   :  { %21549 = vst [vmem:[#allocation151_spill] sm:$0xff] %v18527_v8 }
 0x673   :  { %v18533_v43 = vpop.f32.mrb[72].mxu0 }
 0x674   :  { %21550 = vst [vmem:[#allocation152_spill] sm:$0xff] %v18533_v43  ;;  %v18537_v33 = vpop.f32.mrb[73].mxu0 }
 0x675   :  { %v18535_v58 = vpop.f32.mrb[72].mxu1  ;;  %21552 = vst [vmem:[#allocation153_spill] sm:$0xff] %v18537_v33  ;;  %v18541_v0 = vpop.f32.mrb[74].mxu0 }
 0x676   :  { %21551 = vst [vmem:[#allocation148_spill] sm:$0xff] %v18535_v58  ;;  %v18539_v26 = vpop.f32.mrb[73].mxu1  ;;  %21554 = vst [vmem:[#allocation162_spill] sm:$0xff] %v18541_v0  ;;  %v18549_v31 = vpop.f32.mrb[75].mxu0 }
 0x677   :  { %21553 = vst [vmem:[#allocation149_spill] sm:$0xff] %v18539_v26  ;;  %v18543_v54 = vpop.f32.mrb[74].mxu1  ;;  %21556 = vst [vmem:[#allocation163_spill] sm:$0xff] %v18549_v31 }
 0x678   :  { %21555 = vst [vmem:[#allocation158_spill] sm:$0xff] %v18543_v54  ;;  %v18551_v55 = vpop.f32.mrb[75].mxu1 }
 0x679   :  { %21557 = vst [vmem:[#allocation159_spill] sm:$0xff] %v18551_v55 }
 0x67b   :  { %v18557_v8 = vpop.f32.mrb[76].mxu0 }
 0x67c   :  { %21558 = vst [vmem:[#allocation160_spill] sm:$0xff] %v18557_v8  ;;  %v18561_v10 = vpop.f32.mrb[77].mxu0 }
 0x67d   :  { %v18559_v44 = vpop.f32.mrb[76].mxu1  ;;  %21560 = vst [vmem:[#allocation161_spill] sm:$0xff] %v18561_v10  ;;  %v18565_v43 = vpop.f32.mrb[78].mxu0 }
 0x67e   :  { %21559 = vst [vmem:[#allocation156_spill] sm:$0xff] %v18559_v44  ;;  %v18563_v7 = vpop.f32.mrb[77].mxu1  ;;  %21562 = vst [vmem:[#allocation170_spill] sm:$0xff] %v18565_v43  ;;  %v18573_v54 = vpop.f32.mrb[79].mxu0 }
 0x67f   :  { %21561 = vst [vmem:[#allocation157_spill] sm:$0xff] %v18563_v7  ;;  %v18567_v12 = vpop.f32.mrb[78].mxu1  ;;  %21564 = vst [vmem:[#allocation171_spill] sm:$0xff] %v18573_v54 }
 0x680   :  { %21563 = vst [vmem:[#allocation166_spill] sm:$0xff] %v18567_v12  ;;  %v18575_v60 = vpop.f32.mrb[79].mxu1 }
 0x681   :  { %21565 = vst [vmem:[#allocation167_spill] sm:$0xff] %v18575_v60 }
 0x683   :  { %v18581_v55 = vpop.f32.mrb[80].mxu0 }
 0x684   :  { %21566 = vst [vmem:[#allocation168_spill] sm:$0xff] %v18581_v55  ;;  %v18585_v31 = vpop.f32.mrb[81].mxu0 }
 0x685   :  { %v18583_v33 = vpop.f32.mrb[80].mxu1  ;;  %21568 = vst [vmem:[#allocation169_spill] sm:$0xff] %v18585_v31  ;;  %v18589_v8 = vpop.f32.mrb[82].mxu0 }
 0x686   :  { %21567 = vst [vmem:[#allocation164_spill] sm:$0xff] %v18583_v33  ;;  %v18587_v58 = vpop.f32.mrb[81].mxu1  ;;  %21570 = vst [vmem:[#allocation178_spill] sm:$0xff] %v18589_v8  ;;  %v18597_v12 = vpop.f32.mrb[83].mxu0 }
 0x687   :  { %21569 = vst [vmem:[#allocation165_spill] sm:$0xff] %v18587_v58  ;;  %v18591_v61 = vpop.f32.mrb[82].mxu1  ;;  %21572 = vst [vmem:[#allocation179_spill] sm:$0xff] %v18597_v12 }
 0x688   :  { %21571 = vst [vmem:[#allocation174_spill] sm:$0xff] %v18591_v61  ;;  %v18599_v26 = vpop.f32.mrb[83].mxu1 }
 0x689   :  { %21573 = vst [vmem:[#allocation175_spill] sm:$0xff] %v18599_v26 }
 0x68b   :  { %v18605_v60 = vpop.f32.mrb[84].mxu0 }
 0x68c   :  { %21574 = vst [vmem:[#allocation176_spill] sm:$0xff] %v18605_v60  ;;  %v18609_v54 = vpop.f32.mrb[85].mxu0 }
 0x68d   :  { %v18607_v10 = vpop.f32.mrb[84].mxu1  ;;  %21576 = vst [vmem:[#allocation177_spill] sm:$0xff] %v18609_v54  ;;  %v18613_v55 = vpop.f32.mrb[86].mxu0 }
 0x68e   :  { %21575 = vst [vmem:[#allocation172_spill] sm:$0xff] %v18607_v10  ;;  %v18611_v44 = vpop.f32.mrb[85].mxu1  ;;  %21578 = vst [vmem:[#allocation186_spill] sm:$0xff] %v18613_v55  ;;  %v18621_v61 = vpop.f32.mrb[87].mxu0 }
 0x68f   :  { %21577 = vst [vmem:[#allocation173_spill] sm:$0xff] %v18611_v44  ;;  %v18615_v0 = vpop.f32.mrb[86].mxu1  ;;  %21580 = vst [vmem:[#allocation187_spill] sm:$0xff] %v18621_v61 }
 0x690   :  { %21579 = vst [vmem:[#allocation182_spill] sm:$0xff] %v18615_v0  ;;  %v18623_v7 = vpop.f32.mrb[87].mxu1 }
 0x691   :  { %21581 = vst [vmem:[#allocation183_spill] sm:$0xff] %v18623_v7 }
 0x693   :  { %v18629_v26 = vpop.f32.mrb[88].mxu0 }
 0x694   :  { %21582 = vst [vmem:[#allocation184_spill] sm:$0xff] %v18629_v26  ;;  %v18633_v12 = vpop.f32.mrb[89].mxu0 }
 0x695   :  { %v18631_v31 = vpop.f32.mrb[88].mxu1  ;;  %21584 = vst [vmem:[#allocation185_spill] sm:$0xff] %v18633_v12  ;;  %v18637_v60 = vpop.f32.mrb[90].mxu0 }
 0x696   :  { %21583 = vst [vmem:[#allocation180_spill] sm:$0xff] %v18631_v31  ;;  %v18635_v33 = vpop.f32.mrb[89].mxu1  ;;  %21586 = vst [vmem:[#allocation194_spill] sm:$0xff] %v18637_v60  ;;  %v18645_v0 = vpop.f32.mrb[91].mxu0 }
 0x697   :  { %21585 = vst [vmem:[#allocation181_spill] sm:$0xff] %v18635_v33  ;;  %v18639_v43 = vpop.f32.mrb[90].mxu1  ;;  %21588 = vst [vmem:[#allocation195_spill] sm:$0xff] %v18645_v0 }
 0x698   :  { %21587 = vst [vmem:[#allocation190_spill] sm:$0xff] %v18639_v43  ;;  %v18647_v58 = vpop.f32.mrb[91].mxu1 }
 0x699   :  { %21589 = vst [vmem:[#allocation191_spill] sm:$0xff] %v18647_v58 }
 0x69b   :  { %v18653_v7 = vpop.f32.mrb[92].mxu0 }
 0x69c   :  { %21590 = vst [vmem:[#allocation192_spill] sm:$0xff] %v18653_v7  ;;  %v18657_v61 = vpop.f32.mrb[93].mxu0 }
 0x69d   :  { %v18655_v54 = vpop.f32.mrb[92].mxu1  ;;  %21592 = vst [vmem:[#allocation193_spill] sm:$0xff] %v18657_v61  ;;  %v18661_v26 = vpop.f32.mrb[94].mxu0 }
 0x69e   :  { %21591 = vst [vmem:[#allocation188_spill] sm:$0xff] %v18655_v54  ;;  %v18659_v10 = vpop.f32.mrb[93].mxu1  ;;  %21594 = vst [vmem:[#allocation202_spill] sm:$0xff] %v18661_v26  ;;  %v18669_v43 = vpop.f32.mrb[95].mxu0 }
 0x69f   :  { %21593 = vst [vmem:[#allocation189_spill] sm:$0xff] %v18659_v10  ;;  %v18663_v8 = vpop.f32.mrb[94].mxu1  ;;  %21596 = vst [vmem:[#allocation203_spill] sm:$0xff] %v18669_v43 }
 0x6a0   :  { %21595 = vst [vmem:[#allocation198_spill] sm:$0xff] %v18663_v8  ;;  %v18671_v44 = vpop.f32.mrb[95].mxu1 }
 0x6a1   :  { %21597 = vst [vmem:[#allocation199_spill] sm:$0xff] %v18671_v44 }
 0x6a3   :  { %v18677_v58 = vpop.f32.mrb[96].mxu0 }
 0x6a4   :  { %21598 = vst [vmem:[#allocation200_spill] sm:$0xff] %v18677_v58  ;;  %v18681_v0 = vpop.f32.mrb[97].mxu0 }
 0x6a5   :  { %v18679_v12 = vpop.f32.mrb[96].mxu1  ;;  %21600 = vst [vmem:[#allocation201_spill] sm:$0xff] %v18681_v0  ;;  %v18685_v7 = vpop.f32.mrb[98].mxu0 }
 0x6a6   :  { %21599 = vst [vmem:[#allocation196_spill] sm:$0xff] %v18679_v12  ;;  %v18683_v31 = vpop.f32.mrb[97].mxu1  ;;  %21602 = vst [vmem:[#allocation210_spill] sm:$0xff] %v18685_v7  ;;  %v18693_v8 = vpop.f32.mrb[99].mxu0 }
 0x6a7   :  { %21601 = vst [vmem:[#allocation197_spill] sm:$0xff] %v18683_v31  ;;  %v18687_v55 = vpop.f32.mrb[98].mxu1  ;;  %21604 = vst [vmem:[#allocation211_spill] sm:$0xff] %v18693_v8 }
 0x6a8   :  { %21603 = vst [vmem:[#allocation206_spill] sm:$0xff] %v18687_v55  ;;  %v18695_v33 = vpop.f32.mrb[99].mxu1 }
 0x6a9   :  { %21605 = vst [vmem:[#allocation207_spill] sm:$0xff] %v18695_v33 }
 0x6ab   :  { %v18701_v44 = vpop.f32.mrb[100].mxu0 }
 0x6ac   :  { %21606 = vst [vmem:[#allocation208_spill] sm:$0xff] %v18701_v44  ;;  %v18705_v43 = vpop.f32.mrb[101].mxu0 }
 0x6ad   :  { %v18703_v61 = vpop.f32.mrb[100].mxu1  ;;  %21608 = vst [vmem:[#allocation209_spill] sm:$0xff] %v18705_v43  ;;  %v18709_v58 = vpop.f32.mrb[102].mxu0 }
 0x6ae   :  { %21607 = vst [vmem:[#allocation204_spill] sm:$0xff] %v18703_v61  ;;  %v18707_v54 = vpop.f32.mrb[101].mxu1  ;;  %21610 = vst [vmem:[#allocation212_spill] sm:$0xff] %v18709_v58  ;;  %v18717_v55 = vpop.f32.mrb[103].mxu0 }
 0x6af   :  { %21609 = vst [vmem:[#allocation205_spill] sm:$0xff] %v18707_v54  ;;  %v18711_v60 = vpop.f32.mrb[102].mxu1  ;;  %21612 = vst [vmem:[#allocation214_spill] sm:$0xff] %v18717_v55 }
 0x6b0   :  { %21611 = vst [vmem:[#allocation213_spill] sm:$0xff] %v18711_v60  ;;  %v18719_v10 = vpop.f32.mrb[103].mxu1 }
 0x6b1   :  { %21613 = vst [vmem:[#allocation215_spill] sm:$0xff] %v18719_v10 }
 0x6b3   :  { %v18725_v33 = vpop.f32.mrb[104].mxu0 }
 0x6b4   :  { %21614 = vst [vmem:[#allocation216_spill] sm:$0xff] %v18725_v33  ;;  %v18729_v8 = vpop.f32.mrb[105].mxu0 }
 0x6b5   :  { %v18727_v0 = vpop.f32.mrb[104].mxu1  ;;  %21616 = vst [vmem:[#allocation218_spill] sm:$0xff] %v18729_v8  ;;  %v18733_v44 = vpop.f32.mrb[106].mxu0 }
 0x6b6   :  { %21615 = vst [vmem:[#allocation217_spill] sm:$0xff] %v18727_v0  ;;  %v18731_v12 = vpop.f32.mrb[105].mxu1  ;;  %21618 = vst [vmem:[#allocation220_spill] sm:$0xff] %v18733_v44  ;;  %v18741_v60 = vpop.f32.mrb[107].mxu0 }
 0x6b7   :  { %21617 = vst [vmem:[#allocation219_spill] sm:$0xff] %v18731_v12  ;;  %v18735_v26 = vpop.f32.mrb[106].mxu1  ;;  %21620 = vst [vmem:[#allocation222_spill] sm:$0xff] %v18741_v60 }
 0x6b8   :  { %21619 = vst [vmem:[#allocation221_spill] sm:$0xff] %v18735_v26  ;;  %v18743_v31 = vpop.f32.mrb[107].mxu1 }
 0x6b9   :  { %21621 = vst [vmem:[#allocation223_spill] sm:$0xff] %v18743_v31 }
 0x6bb   :  { %v18749_v10 = vpop.f32.mrb[108].mxu0 }
 0x6bc   :  { %21622 = vst [vmem:[#allocation224_spill] sm:$0xff] %v18749_v10  ;;  %v18753_v55 = vpop.f32.mrb[109].mxu0 }
 0x6bd   :  { %v18751_v43 = vpop.f32.mrb[108].mxu1  ;;  %21624 = vst [vmem:[#allocation226_spill] sm:$0xff] %v18753_v55  ;;  %v18757_v33 = vpop.f32.mrb[110].mxu0 }
 0x6be   :  { %21623 = vst [vmem:[#allocation225_spill] sm:$0xff] %v18751_v43  ;;  %v18755_v61 = vpop.f32.mrb[109].mxu1  ;;  %21626 = vst [vmem:[#allocation228_spill] sm:$0xff] %v18757_v33  ;;  %v18765_v26 = vpop.f32.mrb[111].mxu0 }
 0x6bf   :  { %21625 = vst [vmem:[#allocation227_spill] sm:$0xff] %v18755_v61  ;;  %v18759_v7 = vpop.f32.mrb[110].mxu1  ;;  %21628 = vst [vmem:[#allocation230_spill] sm:$0xff] %v18765_v26 }
 0x6c0   :  { %21627 = vst [vmem:[#allocation229_spill] sm:$0xff] %v18759_v7  ;;  %v18767_v54 = vpop.f32.mrb[111].mxu1 }
 0x6c1   :  { %21629 = vst [vmem:[#allocation231_spill] sm:$0xff] %v18767_v54 }
 0x6c3   :  { %v18773_v31 = vpop.f32.mrb[112].mxu0 }
 0x6c4   :  { %21630 = vst [vmem:[#allocation232_spill] sm:$0xff] %v18773_v31  ;;  %v18777_v60 = vpop.f32.mrb[113].mxu0 }
 0x6c5   :  { %v18775_v8 = vpop.f32.mrb[112].mxu1  ;;  %21632 = vst [vmem:[#allocation234_spill] sm:$0xff] %v18777_v60  ;;  %v18781_v10 = vpop.f32.mrb[114].mxu0 }
 0x6c6   :  { %21631 = vst [vmem:[#allocation233_spill] sm:$0xff] %v18775_v8  ;;  %v18779_v0 = vpop.f32.mrb[113].mxu1  ;;  %21634 = vst [vmem:[#allocation236_spill] sm:$0xff] %v18781_v10  ;;  %v18789_v7 = vpop.f32.mrb[115].mxu0 }
 0x6c7   :  { %21633 = vst [vmem:[#allocation235_spill] sm:$0xff] %v18779_v0  ;;  %v18783_v58 = vpop.f32.mrb[114].mxu1  ;;  %21636 = vst [vmem:[#allocation238_spill] sm:$0xff] %v18789_v7 }
 0x6c8   :  { %21635 = vst [vmem:[#allocation237_spill] sm:$0xff] %v18783_v58  ;;  %v18791_v12 = vpop.f32.mrb[115].mxu1 }
 0x6c9   :  { %21637 = vst [vmem:[#allocation239_spill] sm:$0xff] %v18791_v12 }
 0x6cb   :  { %v18797_v54 = vpop.f32.mrb[116].mxu0 }
 0x6cc   :  { %21638 = vst [vmem:[#allocation240_spill] sm:$0xff] %v18797_v54  ;;  %v18801_v26 = vpop.f32.mrb[117].mxu0 }
 0x6cd   :  { %v18799_v55 = vpop.f32.mrb[116].mxu1  ;;  %21640 = vst [vmem:[#allocation242_spill] sm:$0xff] %v18801_v26  ;;  %v18805_v31 = vpop.f32.mrb[118].mxu0 }
 0x6ce   :  { %21639 = vst [vmem:[#allocation241_spill] sm:$0xff] %v18799_v55  ;;  %v18803_v43 = vpop.f32.mrb[117].mxu1  ;;  %21642 = vst [vmem:[#allocation244_spill] sm:$0xff] %v18805_v31  ;;  %v18813_v58 = vpop.f32.mrb[119].mxu0 }
 0x6cf   :  { %21641 = vst [vmem:[#allocation243_spill] sm:$0xff] %v18803_v43  ;;  %v18807_v44 = vpop.f32.mrb[118].mxu1  ;;  %21644 = vst [vmem:[#allocation246_spill] sm:$0xff] %v18813_v58 }
 0x6d0   :  { %21643 = vst [vmem:[#allocation245_spill] sm:$0xff] %v18807_v44  ;;  %v18815_v61 = vpop.f32.mrb[119].mxu1 }
 0x6d1   :  { %21645 = vst [vmem:[#allocation247_spill] sm:$0xff] %v18815_v61 }
 0x6d3   :  { %v18821_v12 = vpop.f32.mrb[120].mxu0 }
 0x6d4   :  { %21646 = vst [vmem:[#allocation248_spill] sm:$0xff] %v18821_v12  ;;  %v18825_v7 = vpop.f32.mrb[121].mxu0 }
 0x6d5   :  { %v18823_v60 = vpop.f32.mrb[120].mxu1  ;;  %21648 = vst [vmem:[#allocation250_spill] sm:$0xff] %v18825_v7  ;;  %v18829_v54 = vpop.f32.mrb[122].mxu0 }
 0x6d6   :  { %21647 = vst [vmem:[#allocation249_spill] sm:$0xff] %v18823_v60  ;;  %v18827_v8 = vpop.f32.mrb[121].mxu1  ;;  %21650 = vst [vmem:[#allocation252_spill] sm:$0xff] %v18829_v54  ;;  %v18837_v44 = vpop.f32.mrb[123].mxu0 }
 0x6d7   :  { %21649 = vst [vmem:[#allocation251_spill] sm:$0xff] %v18827_v8  ;;  %v18831_v33 = vpop.f32.mrb[122].mxu1  ;;  %21652 = vst [vmem:[#allocation254_spill] sm:$0xff] %v18837_v44 }
 0x6d8   :  { %21651 = vst [vmem:[#allocation253_spill] sm:$0xff] %v18831_v33  ;;  %v18839_v0 = vpop.f32.mrb[123].mxu1 }
 0x6d9   :  { %21653 = vst [vmem:[#allocation255_spill] sm:$0xff] %v18839_v0 }
 0x6db   :  { %v18845_v61 = vpop.f32.mrb[124].mxu0 }
 0x6dc   :  { %21654 = vst [vmem:[#allocation256_spill] sm:$0xff] %v18845_v61  ;;  %v18849_v58 = vpop.f32.mrb[125].mxu0 }
 0x6dd   :  { %v18847_v26 = vpop.f32.mrb[124].mxu1  ;;  %21656 = vst [vmem:[#allocation258_spill] sm:$0xff] %v18849_v58  ;;  %v18853_v12 = vpop.f32.mrb[126].mxu0 }
 0x6de   :  { %21655 = vst [vmem:[#allocation257_spill] sm:$0xff] %v18847_v26  ;;  %v18851_v55 = vpop.f32.mrb[125].mxu1  ;;  %21658 = vst [vmem:[#allocation260_spill] sm:$0xff] %v18853_v12  ;;  %v18861_v33 = vpop.f32.mrb[127].mxu0 }
 0x6df   :  { %21657 = vst [vmem:[#allocation259_spill] sm:$0xff] %v18851_v55  ;;  %v18855_v10 = vpop.f32.mrb[126].mxu1  ;;  %21660 = vst [vmem:[#allocation262_spill] sm:$0xff] %v18861_v33 }
 0x6e0   :  { %21659 = vst [vmem:[#allocation261_spill] sm:$0xff] %v18855_v10  ;;  %v18863_v43 = vpop.f32.mrb[127].mxu1 }
 0x6e1   :  { %21661 = vst [vmem:[#allocation263_spill] sm:$0xff] %v18863_v43 }
 0x6e3   :  { %v8488_v0 = vpop.f32.mrb[128].mxu0 }
 0x6e4   :  { %v8490_v44 = vpop.f32.mrb[129].mxu0 }
 0x6e5   :  { %v8601_v7 = vpop.f32.mrb[128].mxu1  ;;  %v8492_v46 = vpop.f32.mrb[130].mxu0 }
 0x6e6   :  { %v8603_v36 = vpop.f32.mrb[129].mxu1  ;;  %v8680_v60 = vpack.c.bf16 %v8492_v46, %v8488_v0  ;;  %v8494_v12 = vpop.f32.mrb[131].mxu0 }
 0x6e7   :  { %v8605_v1 = vpop.f32.mrb[130].mxu1  ;;  %v8681_v26 = vpack.c.bf16 %v8494_v12, %v8490_v44 }
 0x6e8   :  { %v8682_v61 = vpack.c.bf16 %v8605_v1, %v8601_v7  ;;  %v8607_v31 = vpop.f32.mrb[131].mxu1  ;;  %v8712_v54 = vmax.bf16 %v20642_v42, %v8680_v60 }
 0x6e9   :  { %v8683_v10 = vpack.c.bf16 %v8607_v31, %v8603_v36  ;;  %v8713_v56 = vmax.bf16 %v20642_v42, %v8681_v26 }
 0x6ea   :  { %v8714_v8 = vmax.bf16 %v20642_v42, %v8682_v61 }
 0x6eb   :  { %v8715_v51 = vmax.bf16 %v20642_v42, %v8683_v10  ;;  %v8498_v55 = vpop.f32.mrb[132].mxu0  ;;  %8840 = vmatprep.subr.bf16.mxu0 %v8713_v56 }
 0x6ec   :  { %v8500_v58 = vpop.f32.mrb[133].mxu0  ;;  %8841 = vmatpush1.bf16.msra.mxu0 %v8712_v54 }
 0x6ed   :  { %v8611_v43 = vpop.f32.mrb[132].mxu1  ;;  %8953 = vmatprep.subr.bf16.mxu1 %v8715_v51  ;;  %v8502_v1 = vpop.f32.mrb[134].mxu0 }
 0x6ee   :  { %v8613_v33 = vpop.f32.mrb[133].mxu1  ;;  %8954 = vmatpush1.bf16.msra.mxu1 %v8714_v8  ;;  %v8684_v7 = vpack.c.bf16 %v8502_v1, %v8498_v55  ;;  %v8504_v12 = vpop.f32.mrb[135].mxu0 }
 0x6ef   :  { %v8615_v46 = vpop.f32.mrb[134].mxu1  ;;  %v8685_v0 = vpack.c.bf16 %v8504_v12, %v8500_v58 }
 0x6f0   :  { %v8686_v36 = vpack.c.bf16 %v8615_v46, %v8611_v43  ;;  %v8617_v26 = vpop.f32.mrb[135].mxu1  ;;  %v8716_v31 = vmax.bf16 %v20642_v42, %v8684_v7 }
 0x6f1   :  { %v8687_v10 = vpack.c.bf16 %v8617_v26, %v8613_v33  ;;  %v8717_v60 = vmax.bf16 %v20642_v42, %v8685_v0 }
 0x6f2   :  { %v8718_v56 = vmax.bf16 %v20642_v42, %v8686_v36 }
 0x6f3   :  { %v8719_v61 = vmax.bf16 %v20642_v42, %v8687_v10  ;;  %v8508_v51 = vpop.f32.mrb[136].mxu0  ;;  %8842 = vmatprep.subr.bf16.mxu0 %v8717_v60 }
 0x6f4   :  { %v8510_v54 = vpop.f32.mrb[137].mxu0  ;;  %8843 = vmatpush1.bf16.msra.mxu0 %v8716_v31 }
 0x6f5   :  { %v8621_v44 = vpop.f32.mrb[136].mxu1  ;;  %8955 = vmatprep.subr.bf16.mxu1 %v8719_v61  ;;  %v8512_v55 = vpop.f32.mrb[138].mxu0 }
 0x6f6   :  { %v8623_v8 = vpop.f32.mrb[137].mxu1  ;;  %8956 = vmatpush1.bf16.msra.mxu1 %v8718_v56  ;;  %v8688_v58 = vpack.c.bf16 %v8512_v55, %v8508_v51  ;;  %v8514_v1 = vpop.f32.mrb[139].mxu0 }
 0x6f7   :  { %v8625_v43 = vpop.f32.mrb[138].mxu1  ;;  %v8689_v12 = vpack.c.bf16 %v8514_v1, %v8510_v54 }
 0x6f8   :  { %v8690_v33 = vpack.c.bf16 %v8625_v43, %v8621_v44  ;;  %v8627_v46 = vpop.f32.mrb[139].mxu1  ;;  %v8720_v0 = vmax.bf16 %v20642_v42, %v8688_v58 }
 0x6f9   :  { %v8691_v26 = vpack.c.bf16 %v8627_v46, %v8623_v8  ;;  %v8721_v7 = vmax.bf16 %v20642_v42, %v8689_v12 }
 0x6fa   :  { %v8722_v10 = vmax.bf16 %v20642_v42, %v8690_v33 }
 0x6fb   :  { %v8723_v36 = vmax.bf16 %v20642_v42, %v8691_v26  ;;  %v8518_v60 = vpop.f32.mrb[140].mxu0  ;;  %8844 = vmatprep.subr.bf16.mxu0 %v8721_v7 }
 0x6fc   :  { %v8520_v31 = vpop.f32.mrb[141].mxu0  ;;  %8845 = vmatpush1.bf16.msra.mxu0 %v8720_v0 }
 0x6fd   :  { %v8631_v61 = vpop.f32.mrb[140].mxu1  ;;  %8957 = vmatprep.subr.bf16.mxu1 %v8723_v36  ;;  %v8522_v51 = vpop.f32.mrb[142].mxu0 }
 0x6fe   :  { %v8633_v56 = vpop.f32.mrb[141].mxu1  ;;  %8958 = vmatpush1.bf16.msra.mxu1 %v8722_v10  ;;  %v8692_v54 = vpack.c.bf16 %v8522_v51, %v8518_v60  ;;  %v8524_v55 = vpop.f32.mrb[143].mxu0 }
 0x6ff   :  { %v8635_v44 = vpop.f32.mrb[142].mxu1  ;;  %v8693_v1 = vpack.c.bf16 %v8524_v55, %v8520_v31 }
 0x700   :  { %v8694_v8 = vpack.c.bf16 %v8635_v44, %v8631_v61  ;;  %v8637_v43 = vpop.f32.mrb[143].mxu1  ;;  %v8724_v12 = vmax.bf16 %v20642_v42, %v8692_v54 }
 0x701   :  { %v8695_v46 = vpack.c.bf16 %v8637_v43, %v8633_v56  ;;  %v8725_v58 = vmax.bf16 %v20642_v42, %v8693_v1 }
 0x702   :  { %v8726_v26 = vmax.bf16 %v20642_v42, %v8694_v8 }
 0x703   :  { %v8727_v33 = vmax.bf16 %v20642_v42, %v8695_v46  ;;  %v8528_v7 = vpop.f32.mrb[144].mxu0  ;;  %8846 = vmatprep.subr.bf16.mxu0 %v8725_v58  ;;  %v14215_v58 = vmov 839922192  }
 0x704   :  { %v8530_v0 = vpop.f32.mrb[145].mxu0  ;;  %8847 = vmatpush1.bf16.msra.mxu0 %v8724_v12  ;;  %v7142_v12 = vlaneseq }
 0x705   :  { %v8641_v36 = vpop.f32.mrb[144].mxu1  ;;  %8959 = vmatprep.subr.bf16.mxu1 %v8727_v33  ;;  %v8532_v60 = vpop.f32.mrb[146].mxu0  ;;  %v7140_v33 = vunpack.c.l.s4 %v14215_v58 }
 0x706   :  { %v8643_v10 = vpop.f32.mrb[145].mxu1  ;;  %8960 = vmatpush1.bf16.msra.mxu1 %v8726_v26  ;;  %v8696_v31 = vpack.c.bf16 %v8532_v60, %v8528_v7  ;;  %v8534_v51 = vpop.f32.mrb[147].mxu0 }
 0x707   :  { %v8645_v61 = vpop.f32.mrb[146].mxu1  ;;  %v8697_v55 = vpack.c.bf16 %v8534_v51, %v8530_v0 }
 0x708   :  { %v8698_v56 = vpack.c.bf16 %v8645_v61, %v8641_v36  ;;  %v8647_v44 = vpop.f32.mrb[147].mxu1  ;;  %v8728_v1 = vmax.bf16 %v20642_v42, %v8696_v31  ;;  %v7141_v31 = vunpack.c.0.s8 %v7140_v33 }
 0x709   :  { %v8699_v43 = vpack.c.bf16 %v8647_v44, %v8643_v10  ;;  %v8729_v54 = vmax.bf16 %v20642_v42, %v8697_v55  ;;  %v18889_v55 = vshrl.u32 %v7142_v12, 7 }
 0x70a   :  { %v8730_v46 = vmax.bf16 %v20642_v42, %v8698_v56 }
 0x70b   :  { %v8731_v8 = vmax.bf16 %v20642_v42, %v8699_v43  ;;  %v8538_v26 = vpop.f32.mrb[148].mxu0  ;;  %8848 = vmatprep.subr.bf16.mxu0 %v8729_v54 }
 0x70c   :  { %v8540_v7 = vpop.f32.mrb[149].mxu0  ;;  %8849 = vmatpush1.bf16.msra.mxu0 %v8728_v1 }
 0x70d   :  { %v8651_v35 = vpop.f32.mrb[148].mxu1  ;;  %8961 = vmatprep.subr.bf16.mxu1 %v8731_v8  ;;  %v8542_v0 = vpop.f32.mrb[150].mxu0 }
 0x70e   :  { %v8653_v36 = vpop.f32.mrb[149].mxu1  ;;  %8962 = vmatpush1.bf16.msra.mxu1 %v8730_v46  ;;  %v8700_v60 = vpack.c.bf16 %v8542_v0, %v8538_v26  ;;  %v8544_v51 = vpop.f32.mrb[151].mxu0  ;;  %v18896_v46 = vsub.s32 %v7141_v31, %v18889_v55 }
 0x70f   :  { %v8655_v10 = vpop.f32.mrb[150].mxu1  ;;  %v8701_v56 = vpack.c.bf16 %v8544_v51, %v8540_v7 }
 0x710   :  { %v8702_v61 = vpack.c.bf16 %v8655_v10, %v8651_v35  ;;  %v8657_v44 = vpop.f32.mrb[151].mxu1  ;;  %v8732_v8 = vmax.bf16 %v20642_v42, %v8700_v60  ;;  %v7145_v60 = vrot.slane %v17652_v57, %v18896_v46 }
 0x711   :  { %v8703_v43 = vpack.c.bf16 %v8657_v44, %v8653_v36  ;;  %v8733_v58 = vmax.bf16 %v20642_v42, %v8701_v56 }
 0x712   :  { %v8734_v1 = vmax.bf16 %v20642_v42, %v8702_v61  ;;  %v7157_v61 = vrot.slane %v17660_v14, %v18896_v46 }
 0x713   :  { %v8735_v54 = vmax.bf16 %v20642_v42, %v8703_v43  ;;  %v8548_v26 = vpop.f32.mrb[152].mxu0  ;;  %8850 = vmatprep.subr.bf16.mxu0 %v8733_v58 }
 0x714   :  { %v8550_v33 = vpop.f32.mrb[153].mxu0  ;;  %8851 = vmatpush1.bf16.msra.mxu0 %v8732_v8  ;;  %v7181_v8 = vrot.slane %v17706_v4, %v18896_v46  ;;  %v12938_v57 = vcombine.low %v7145_v60, %v7157_v61  ;;  %v21662_v61 = vpack.c.bf16 %v17911_v63, %v17896_v11 }
 0x715   :  { %v8661_v35 = vpop.f32.mrb[152].mxu1  ;;  %8963 = vmatprep.subr.bf16.mxu1 %v8735_v54  ;;  %v8552_v7 = vpop.f32.mrb[154].mxu0  ;;  %v7169_v54 = vrot.slane %v17693_v9, %v18896_v46  ;;  %v7193_v9 = vrot.slane %v17674_v23, %v18896_v46  ;;  %v7229_v23 = vrot.slane %v17732_v47, %v18896_v46 }
 0x716   :  { %v8663_v12 = vpop.f32.mrb[153].mxu1  ;;  %8964 = vmatpush1.bf16.msra.mxu1 %v8734_v1  ;;  %v8704_v0 = vpack.c.bf16 %v8552_v7, %v8548_v26  ;;  %v8554_v51 = vpop.f32.mrb[155].mxu0 }
 0x717   :  { %v8665_v36 = vpop.f32.mrb[154].mxu1  ;;  %v8705_v31 = vpack.c.bf16 %v8554_v51, %v8550_v33 }
 0x718   :  { %v8706_v10 = vpack.c.bf16 %v8665_v36, %v8661_v35  ;;  %v8667_v44 = vpop.f32.mrb[155].mxu1  ;;  %v8736_v1 = vmax.bf16 %v20642_v42, %v8704_v0  ;;  %v12939_v0 = vcombine.low %v7169_v54, %v7181_v8  ;;  %v7217_v54 = vrot.slane %v17682_v59, %v18896_v46 }
 0x719   :  { %v8707_v56 = vpack.c.bf16 %v8667_v44, %v8663_v12  ;;  %v8737_v43 = vmax.bf16 %v20642_v42, %v8705_v31  ;;  %v7205_v12 = vrot.slane %v17722_v41, %v18896_v46  ;;  %v8095_v31 = vadd.bf16 %v12938_v57, %v21662_v61 }
 0x71a   :  { %v8738_v26 = vmax.bf16 %v20642_v42, %v8706_v10  ;;  %v21664_v8 = vpack.c.bf16 %v17903_v37, %v17889_v62  ;;  %v21667_v62 = vpack.c.bf16 %v17959_v6, %v17944_v39  ;;  %v21669_v39 = vpack.c.bf16 %v17951_v20, %v17937_v19 }
 0x71b   :  { %v8739_v58 = vmax.bf16 %v20642_v42, %v8707_v56  ;;  %v8558_v35 = vpop.f32.mrb[156].mxu0  ;;  %8852 = vmatprep.subr.bf16.mxu0 %v8737_v43  ;;  %v21663_v56 = vpack.c.bf16 %v17913_v18, %v17898_v22  ;;  %v21665_v22 = vpack.c.bf16 %v17905_v38, %v17891_v5  ;;  %v14098_v5 = vld [vmem:[%s20097_s7] sm:$0xff]   ;;  %v12941_v38 = vcombine.low %v7217_v54, %v7229_v23 }
 0x71c   :  { %v8560_v14 = vpop.f32.mrb[157].mxu0  ;;  %8853 = vmatpush1.bf16.msra.mxu0 %v8736_v1  ;;  %v8094_v1 = vadd.bf16 %v12938_v57, %v21664_v8  ;;  %v8101_v37 = vadd.bf16 %v12939_v0, %v21667_v62  ;;  %v8100_v6 = vadd.bf16 %v12939_v0, %v21669_v39  ;;  %v21671_v19 = vpack.c.bf16 %v18005_v40, %v17990_v48  ;;  %v21689_v62 = vld [vmem:[#allocation81_spill] sm:$0xff] }
 0x71d   :  { %v8671_v7 = vpop.f32.mrb[156].mxu1  ;;  %8965 = vmatprep.subr.bf16.mxu1 %v8739_v58  ;;  %v8562_v4 = vpop.f32.mrb[158].mxu0  ;;  %v8097_v43 = vadd.bf16 %v12938_v57, %v21663_v56  ;;  %v8096_v18 = vadd.bf16 %v12938_v57, %v21665_v22  ;;  %v7253_v57 = vrot.slane %v17748_v25, %v18896_v46  ;;  %v21672_v40 = vpack.c.bf16 %v17995_v30, %v17981_v13  ;;  %v21678_v56 = vld [vmem:[#allocation109_spill] sm:$0xff]  ;;  %v21686_v22 = vld [vmem:[#allocation116_spill] sm:$0xff] }
 0x71e   :  { %v8673_v33 = vpop.f32.mrb[157].mxu1  ;;  %8966 = vmatpush1.bf16.msra.mxu1 %v8738_v26  ;;  %v8708_v51 = vpack.c.bf16 %v8562_v4, %v8558_v35  ;;  %v8564_v44 = vpop.f32.mrb[159].mxu0  ;;  %v12940_v26 = vcombine.low %v7193_v9, %v7205_v12  ;;  %v21666_v35 = vpack.c.bf16 %v17957_v17, %v17942_v16  ;;  %v21668_v16 = vpack.c.bf16 %v17949_v29, %v17935_v21  ;;  %v21693_v39 = vld [vmem:[#allocation113_spill] sm:$0xff] }
 0x71f   :  { %v8675_v36 = vpop.f32.mrb[158].mxu1  ;;  %v8709_v58 = vpack.c.bf16 %v8564_v44, %v8560_v14  ;;  %v8223_v14 = vmax.bf16 %v20642_v42, %v8095_v31  ;;  %v7241_v12 = vrot.slane %v17698_v52, %v18896_v46  ;;  %v8222_v9 = vmax.bf16 %v20642_v42, %v8094_v1  ;;  %v21677_v31 = vld [vmem:[#allocation105_spill] sm:$0xff] }
 0x720   :  { %v8710_v10 = vpack.c.bf16 %v8675_v36, %v8671_v7  ;;  %v8677_v60 = vpop.f32.mrb[159].mxu1  ;;  %v8099_v47 = vadd.bf16 %v12939_v0, %v21666_v35  ;;  %v8740_v7 = vmax.bf16 %v20642_v42, %v8708_v51  ;;  %v8098_v17 = vadd.bf16 %v12939_v0, %v21668_v16 }
 0x721   :  { %v8711_v41 = vpack.c.bf16 %v8677_v60, %v8673_v33  ;;  %v8741_v11 = vmax.bf16 %v20642_v42, %v8709_v58  ;;  %v8225_v33 = vmax.bf16 %v20642_v42, %v8097_v43  ;;  %v8224_v4 = vmax.bf16 %v20642_v42, %v8096_v18  ;;  %v21680_v43 = vld [vmem:[#allocation82_spill] sm:$0xff] }
 0x722   :  { %v8742_v59 = vmax.bf16 %v20642_v42, %v8710_v10  ;;  %v8227_v36 = vmax.bf16 %v20642_v42, %v8099_v47  ;;  %v21670_v21 = vpack.c.bf16 %v18003_v53, %v17988_v49  ;;  %v8105_v20 = vadd.bf16 %v12940_v26, %v21671_v19  ;;  %v21700_v19 = vld [vmem:[#allocation7_spill] sm:$0xff] }
 0x723   :  { %v8743_v63 = vmax.bf16 %v20642_v42, %v8711_v41  ;;  %8854 = vmatprep.subr.bf16.mxu0 %v8741_v11  ;;  %v8229_v25 = vmax.bf16 %v20642_v42, %v8101_v37  ;;  %v7277_v52 = vrot.slane %v17756_v27, %v18896_v46  ;;  %v7265_v0 = vrot.slane %v17708_v2, %v18896_v46  ;;  %v21681_v41 = vld [vmem:[#allocation85_spill] sm:$0xff] }
 0x724   :  { %8855 = vmatpush1.bf16.msra.mxu0 %v8740_v7  ;;  %v8103_v29 = vadd.bf16 %v12940_v26, %v21670_v21  ;;  %v8226_v49 = vmax.bf16 %v20642_v42, %v8098_v17  ;;  %v8228_v53 = vmax.bf16 %v20642_v42, %v8100_v6  ;;  %v8102_v48 = vadd.bf16 %v12940_v26, %v21672_v40  ;;  %v21688_v7 = vld [vmem:[#allocation91_spill] sm:$0xff] }
 0x725   :  { %8967 = vmatprep.subr.bf16.mxu1 %v8743_v63  ;;  %9226 = vmatprep.subr.bf16.mxu0 %v8223_v14  ;;  %v21673_v51 = vpack.c.bf16 %v17997_v15, %v17983_v24  ;;  %v21674_v27 = vpack.c.bf16 %v18049_v28, %v18034_v45  ;;  %v21675_v44 = vpack.c.bf16 %v18051_v50, %v18036_v34  ;;  %v14099_v24 = vld [vmem:[%s20097_s7 + $0x8] sm:$0xff]   ;;  %v21685_v63 = vld [vmem:[#allocation114_spill] sm:$0xff] }
 0x726   :  { %8968 = vmatpush1.bf16.msra.mxu1 %v8742_v59  ;;  %v12942_v61 = vcombine.low %v7241_v12, %v7253_v57  ;;  %v8231_v30 = vmax.bf16 %v20642_v42, %v8103_v29  ;;  %v8233_v13 = vmax.bf16 %v20642_v42, %v8105_v20  ;;  %v12943_v15 = vcombine.low %v7265_v0, %v7277_v52  ;;  %v21694_v6 = vld [vmem:[#allocation115_spill] sm:$0xff]  ;;  %v21699_v29 = vld [vmem:[#allocation14_spill] sm:$0xff] }
 0x727   :  { %9452 = vmatprep.subr.bf16.mxu1 %v8225_v33  ;;  %8873 = vmatmul.mubr.bf16.vlgmr.msra.gmra.mrb[160].mxu0 %v14098_v5  ;;  %v8104_v10 = vadd.bf16 %v12940_v26, %v21673_v51  ;;  %v8107_v2 = vadd.bf16 %v12941_v38, %v21674_v27  ;;  %v8109_v60 = vadd.bf16 %v12941_v38, %v21675_v44  ;;  %v21703_v51 = vld [vmem:[#allocation6_spill] sm:$0xff]  ;;  %v21706_v44 = vld [vmem:[#allocation3_spill] sm:$0xff] }
 0x728   :  { %9227 = vmatpush1.bf16.msra.mxu0 %v8222_v9  ;;  %8882 = vmatprep.mubr.bf16.mxu0 %v20642_v42  ;;  %v21676_v28 = vpack.c.bf16 %v18041_v32, %v18027_v3  ;;  %v21679_v50 = vpack.c.bf16 %v21677_v31, %v21678_v56  ;;  %v7301_v58 = vrot.slane %v21680_v43, %v18896_v46  ;;  %v21682_v32 = vld [vmem:[#allocation118_spill] sm:$0xff]  ;;  %v21683_v3 = vld [vmem:[#allocation120_spill] sm:$0xff]  ;;  %v21696_v9 = vld [vmem:[#allocation11_spill] sm:$0xff] }
 0x729   :  { %8986 = vmatmul.mubr.bf16.vlgmr.msra.gmra.mrb[160].mxu1 %v14098_v5  ;;  %9228 = vmatprep.subr.bf16.mxu0 %v8227_v36  ;;  %v7289_v23 = vrot.slane %v21681_v41, %v18896_v46  ;;  %v8230_v54 = vmax.bf16 %v20642_v42, %v8102_v48  ;;  %v8232_v8 = vmax.bf16 %v20642_v42, %v8104_v10  ;;  %v21690_v5 = vld [vmem:[#allocation117_spill] sm:$0xff]  ;;  %v21713_v41 = vld [vmem:[#allocation20_spill] sm:$0xff] }
 0x72a   :  { %9453 = vmatpush1.bf16.msra.mxu1 %v8224_v4  ;;  %8995 = vmatprep.mubr.bf16.mxu1 %v20642_v42  ;;  %v8106_v45 = vadd.bf16 %v12941_v38, %v21676_v28  ;;  %v8108_v34 = vadd.bf16 %v12941_v38, %v21679_v50  ;;  %v8235_v1 = vmax.bf16 %v20642_v42, %v8107_v2  ;;  %v21691_v38 = vld [vmem:[#allocation119_spill] sm:$0xff]  ;;  %v21697_v4 = vld [vmem:[#allocation8_spill] sm:$0xff]  ;;  %v21702_v48 = vld [vmem:[#allocation5_spill] sm:$0xff] }
 0x72b   :  { %9454 = vmatprep.subr.bf16.mxu1 %v8229_v25  ;;  %v21684_v26 = vpack.c.bf16 %v21682_v32, %v21683_v3  ;;  %v21687_v18 = vpack.c.bf16 %v21685_v63, %v21686_v22  ;;  %v8237_v47 = vmax.bf16 %v20642_v42, %v8109_v60  ;;  %v7325_v59 = vrot.slane %v21688_v7, %v18896_v46  ;;  %v21705_v2 = vld [vmem:[#allocation9_spill] sm:$0xff]  ;;  %v21710_v50 = vld [vmem:[#allocation24_spill] sm:$0xff]  ;;  %v21717_v3 = vld [vmem:[#allocation95_spill] sm:$0xff] }
 0x72c   :  { %9229 = vmatpush1.bf16.msra.mxu0 %v8226_v49  ;;  %v7313_v37 = vrot.slane %v21689_v62, %v18896_v46  ;;  %v8234_v14 = vmax.bf16 %v20642_v42, %v8106_v45  ;;  %v8236_v33 = vmax.bf16 %v20642_v42, %v8108_v34  ;;  %v21692_v16 = vpack.c.bf16 %v21690_v5, %v21691_v38  ;;  %v21711_v34 = vld [vmem:[#allocation15_spill] sm:$0xff]  ;;  %v21721_v7 = vld [vmem:[#allocation22_spill] sm:$0xff] }
 0x72d   :  { %9230 = vmatprep.subr.bf16.mxu0 %v8231_v30  ;;  %v8111_v11 = vadd.bf16 %v12942_v61, %v21684_v26  ;;  %v8113_v35 = vadd.bf16 %v12942_v61, %v21687_v18  ;;  %v21695_v57 = vpack.c.bf16 %v21693_v39, %v21694_v6  ;;  %v21698_v36 = vpack.c.bf16 %v21696_v9, %v21697_v4  ;;  %v21708_v30 = vld [vmem:[#allocation86_spill] sm:$0xff]  ;;  %v21718_v22 = vld [vmem:[#allocation19_spill] sm:$0xff]  ;;  %v21719_v18 = vld [vmem:[#allocation4_spill] sm:$0xff] }
 0x72e   :  { %9455 = vmatpush1.bf16.msra.mxu1 %v8228_v53  ;;  %v8110_v17 = vadd.bf16 %v12942_v61, %v21692_v16  ;;  %v21701_v20 = vpack.c.bf16 %v21699_v29, %v21700_v19  ;;  %v12944_v52 = vcombine.low %v7289_v23, %v7301_v58  ;;  %v14100_v53 = vld [vmem:[%s20097_s7 + $0x10] sm:$0xff]   ;;  %v12945_v40 = vcombine.low %v7313_v37, %v7325_v59  ;;  %v14101_v4 = vld [vmem:[%s20097_s7 + $0x18] sm:$0xff]   ;;  %v21731_v29 = vld [vmem:[#allocation23_spill] sm:$0xff] }
 0x72f   :  { %9456 = vmatprep.subr.bf16.mxu1 %v8233_v13  ;;  %8883 = vmatmul.mubr.bf16.gmra.mrb[164].mxu0 %v14099_v24  ;;  %v8112_v12 = vadd.bf16 %v12942_v61, %v21695_v57  ;;  %v8115_v21 = vadd.bf16 %v12943_v15, %v21698_v36  ;;  %v8239_v0 = vmax.bf16 %v20642_v42, %v8111_v11  ;;  %v21722_v59 = vld [vmem:[#allocation13_spill] sm:$0xff]  ;;  %v21727_v16 = vld [vmem:[#allocation36_spill] sm:$0xff] }
 0x730   :  { %9231 = vmatpush1.bf16.msra.mxu0 %v8230_v54  ;;  %8892 = vmatprep.mubr.bf16.mxu0 %v20642_v42  ;;  %v8117_v25 = vadd.bf16 %v12943_v15, %v21701_v20  ;;  %v8241_v49 = vmax.bf16 %v20642_v42, %v8113_v35  ;;  %v21704_v10 = vpack.c.bf16 %v21702_v48, %v21703_v51  ;;  %v21737_v51 = vld [vmem:[#allocation92_spill] sm:$0xff] }
 0x731   :  { %8996 = vmatmul.mubr.bf16.gmra.mrb[164].mxu1 %v14099_v24  ;;  %9232 = vmatprep.subr.bf16.mxu0 %v8235_v1  ;;  %v21707_v60 = vpack.c.bf16 %v21705_v2, %v21706_v44  ;;  %v7337_v13 = vrot.slane %v21708_v30, %v18896_v46  ;;  %v21709_v24 = vld [vmem:[#allocation96_spill] sm:$0xff]  ;;  %v8238_v45 = vmax.bf16 %v20642_v42, %v8110_v17  ;;  %v21716_v1 = vld [vmem:[#allocation93_spill] sm:$0xff] }
 0x732   :  { %9457 = vmatpush1.bf16.msra.mxu1 %v8232_v8  ;;  %9005 = vmatprep.mubr.bf16.mxu1 %v20642_v42  ;;  %v8114_v27 = vadd.bf16 %v12943_v15, %v21704_v10  ;;  %v7349_v28 = vrot.slane %v21709_v24, %v18896_v46  ;;  %v8240_v31 = vmax.bf16 %v20642_v42, %v8112_v12  ;;  %v21728_v17 = vld [vmem:[#allocation32_spill] sm:$0xff]  ;;  %v21741_v24 = vld [vmem:[#allocation45_spill] sm:$0xff] }
 0x733   :  { %9458 = vmatprep.subr.bf16.mxu1 %v8237_v47  ;;  %v8116_v61 = vadd.bf16 %v12943_v15, %v21707_v60  ;;  %v8243_v56 = vmax.bf16 %v20642_v42, %v8115_v21  ;;  %v21712_v43 = vpack.c.bf16 %v21710_v50, %v21711_v34  ;;  %v21714_v15 = vld [vmem:[#allocation17_spill] sm:$0xff]  ;;  %v8245_v8 = vmax.bf16 %v20642_v42, %v8117_v25  ;;  %v21730_v21 = vld [vmem:[#allocation18_spill] sm:$0xff]  ;;  %v21733_v25 = vld [vmem:[#allocation28_spill] sm:$0xff] }
 0x734   :  { %9233 = vmatpush1.bf16.msra.mxu0 %v8234_v14  ;;  %v21715_v23 = vpack.c.bf16 %v21713_v41, %v21714_v15  ;;  %v7373_v32 = vrot.slane %v21716_v1, %v18896_v46  ;;  %v7361_v26 = vrot.slane %v21717_v3, %v18896_v46  ;;  %v8242_v11 = vmax.bf16 %v20642_v42, %v8114_v27  ;;  %v21724_v14 = vld [vmem:[#allocation31_spill] sm:$0xff]  ;;  %v21738_v60 = vld [vmem:[#allocation34_spill] sm:$0xff]  ;;  %v21745_v34 = vld [vmem:[#allocation89_spill] sm:$0xff] }
 0x735   :  { %9234 = vmatprep.subr.bf16.mxu0 %v8239_v0  ;;  %v8119_v58 = vadd.bf16 %v12944_v52, %v21712_v43  ;;  %v8244_v63 = vmax.bf16 %v20642_v42, %v8116_v61  ;;  %v21720_v35 = vpack.c.bf16 %v21718_v22, %v21719_v18  ;;  %v21723_v62 = vpack.c.bf16 %v21721_v7, %v21722_v59  ;;  %v21739_v61 = vld [vmem:[#allocation25_spill] sm:$0xff]  ;;  %v21746_v15 = vld [vmem:[#allocation30_spill] sm:$0xff]  ;;  %v21749_v1 = vld [vmem:[#allocation44_spill] sm:$0xff] }
 0x736   :  { %9459 = vmatpush1.bf16.msra.mxu1 %v8236_v33  ;;  %v8121_v54 = vadd.bf16 %v12944_v52, %v21715_v23  ;;  %v21725_v33 = vld [vmem:[#allocation27_spill] sm:$0xff]  ;;  %v21729_v39 = vpack.c.bf16 %v21727_v16, %v21728_v17  ;;  %v12946_v57 = vcombine.low %v7337_v13, %v7349_v28  ;;  %v12947_v36 = vcombine.low %v7361_v26, %v7373_v32 }
 0x737   :  { %9460 = vmatprep.subr.bf16.mxu1 %v8241_v49  ;;  %8893 = vmatmul.mubr.bf16.gmra.mrb[168].mxu0 %v14100_v53  ;;  %v8118_v47 = vadd.bf16 %v12944_v52, %v21720_v35  ;;  %v8120_v37 = vadd.bf16 %v12944_v52, %v21723_v62  ;;  %v21726_v5 = vpack.c.bf16 %v21724_v14, %v21725_v33  ;;  %v21734_v52 = vld [vmem:[#allocation29_spill] sm:$0xff]  ;;  %v21747_v23 = vld [vmem:[#allocation39_spill] sm:$0xff] }
 0x738   :  { %9235 = vmatpush1.bf16.msra.mxu0 %v8238_v45  ;;  %8902 = vmatprep.mubr.bf16.mxu0 %v20642_v42  ;;  %v8125_v6 = vadd.bf16 %v12945_v40, %v21729_v39  ;;  %v8247_v12 = vmax.bf16 %v20642_v42, %v8119_v58  ;;  %v8249_v9 = vmax.bf16 %v20642_v42, %v8121_v54  ;;  %v21750_v32 = vld [vmem:[#allocation35_spill] sm:$0xff] }
 0x739   :  { %9006 = vmatmul.mubr.bf16.gmra.mrb[168].mxu1 %v14100_v53  ;;  %9236 = vmatprep.subr.bf16.mxu0 %v8243_v56  ;;  %v8123_v38 = vadd.bf16 %v12945_v40, %v21726_v5  ;;  %v21732_v19 = vpack.c.bf16 %v21730_v21, %v21731_v29  ;;  %v21735_v0 = vpack.c.bf16 %v21733_v25, %v21734_v52  ;;  %v21736_v53 = vld [vmem:[#allocation94_spill] sm:$0xff]  ;;  %v21744_v56 = vld [vmem:[#allocation103_spill] sm:$0xff] }
 0x73a   :  { %9461 = vmatpush1.bf16.msra.mxu1 %v8240_v31  ;;  %9015 = vmatprep.mubr.bf16.mxu1 %v20642_v42  ;;  %v7397_v48 = vrot.slane %v21736_v53, %v18896_v46  ;;  %v7385_v10 = vrot.slane %v21737_v51, %v18896_v46  ;;  %v8246_v27 = vmax.bf16 %v20642_v42, %v8118_v47  ;;  %v21755_v35 = vld [vmem:[#allocation55_spill] sm:$0xff]  ;;  %v21756_v47 = vld [vmem:[#allocation38_spill] sm:$0xff] }
 0x73b   :  { %9462 = vmatprep.subr.bf16.mxu1 %v8245_v8  ;;  %v8122_v20 = vadd.bf16 %v12945_v40, %v21732_v19  ;;  %v8124_v49 = vadd.bf16 %v12945_v40, %v21735_v0  ;;  %v8248_v2 = vmax.bf16 %v20642_v42, %v8120_v37  ;;  %v8251_v44 = vmax.bf16 %v20642_v42, %v8123_v38  ;;  %v21742_v40 = vld [vmem:[#allocation40_spill] sm:$0xff]  ;;  %v14102_v33 = vld [vmem:[%s20097_s7 + $0x20] sm:$0xff]   ;;  %v21766_v0 = vld [vmem:[#allocation61_spill] sm:$0xff] }
 0x73c   :  { %9237 = vmatpush1.bf16.msra.mxu0 %v8242_v11  ;;  %v21740_v30 = vpack.c.bf16 %v21738_v60, %v21739_v61  ;;  %v21743_v28 = vpack.c.bf16 %v21741_v24, %v21742_v40  ;;  %v8253_v31 = vmax.bf16 %v20642_v42, %v8125_v6  ;;  %v7421_v50 = vrot.slane %v21744_v56, %v18896_v46  ;;  %v21752_v11 = vld [vmem:[#allocation53_spill] sm:$0xff]  ;;  %v21758_v38 = vld [vmem:[#allocation52_spill] sm:$0xff]  ;;  %v21759_v16 = vld [vmem:[#allocation43_spill] sm:$0xff] }
 0x73d   :  { %9238 = vmatprep.subr.bf16.mxu0 %v8247_v12  ;;  %v7409_v43 = vrot.slane %v21745_v34, %v18896_v46  ;;  %v8250_v58 = vmax.bf16 %v20642_v42, %v8122_v20  ;;  %v8252_v41 = vmax.bf16 %v20642_v42, %v8124_v49  ;;  %v21748_v54 = vpack.c.bf16 %v21746_v15, %v21747_v23  ;;  %v21761_v6 = vld [vmem:[#allocation42_spill] sm:$0xff]  ;;  %v21767_v49 = vld [vmem:[#allocation56_spill] sm:$0xff]  ;;  %v21769_v51 = vld [vmem:[#allocation63_spill] sm:$0xff] }
 0x73e   :  { %9463 = vmatpush1.bf16.msra.mxu1 %v8244_v63  ;;  %v8127_v13 = vadd.bf16 %v12946_v57, %v21740_v30  ;;  %v8129_v45 = vadd.bf16 %v12946_v57, %v21743_v28  ;;  %v21751_v3 = vpack.c.bf16 %v21749_v1, %v21750_v32  ;;  %v21753_v63 = vld [vmem:[#allocation48_spill] sm:$0xff]  ;;  %v21757_v7 = vpack.c.bf16 %v21755_v35, %v21756_v47  ;;  %v21765_v29 = vld [vmem:[#allocation90_spill] sm:$0xff]  ;;  %v21773_v61 = vld [vmem:[#allocation99_spill] sm:$0xff] }
 0x73f   :  { %9464 = vmatprep.subr.bf16.mxu1 %v8249_v9  ;;  %8903 = vmatmul.mubr.bf16.gmra.mrb[172].mxu0 %v14101_v4  ;;  %v8126_v8 = vadd.bf16 %v12946_v57, %v21748_v54  ;;  %v21754_v22 = vpack.c.bf16 %v21752_v11, %v21753_v63  ;;  %v12948_v62 = vcombine.low %v7385_v10, %v7397_v48  ;;  %v21774_v40 = vld [vmem:[#allocation60_spill] sm:$0xff]  ;;  %v21775_v28 = vld [vmem:[#allocation51_spill] sm:$0xff]  ;;  %v21777_v56 = vld [vmem:[#allocation50_spill] sm:$0xff] }
 0x740   :  { %9239 = vmatpush1.bf16.msra.mxu0 %v8246_v27  ;;  %v8128_v26 = vadd.bf16 %v12946_v57, %v21751_v3  ;;  %8912 = vmatprep.mubr.bf16.mxu0 %v20642_v42  ;;  %v8133_v59 = vadd.bf16 %v12947_v36, %v21757_v7  ;;  %v8255_v37 = vmax.bf16 %v20642_v42, %v8127_v13  ;;  %v21762_v57 = vld [vmem:[#allocation33_spill] sm:$0xff]  ;;  %v21783_v54 = vld [vmem:[#allocation71_spill] sm:$0xff] }
 0x741   :  { %9016 = vmatmul.mubr.bf16.gmra.mrb[172].mxu1 %v14101_v4  ;;  %9240 = vmatprep.subr.bf16.mxu0 %v8251_v44  ;;  %v8131_v18 = vadd.bf16 %v12947_v36, %v21754_v22  ;;  %v8257_v14 = vmax.bf16 %v20642_v42, %v8129_v45  ;;  %v12949_v5 = vcombine.low %v7409_v43, %v7421_v50  ;;  %v21764_v4 = vld [vmem:[#allocation104_spill] sm:$0xff]  ;;  %v21772_v44 = vld [vmem:[#allocation101_spill] sm:$0xff]  ;;  %v21787_v35 = vld [vmem:[#allocation59_spill] sm:$0xff] }
 0x742   :  { %9465 = vmatpush1.bf16.msra.mxu1 %v8248_v2  ;;  %9025 = vmatprep.mubr.bf16.mxu1 %v20642_v42  ;;  %v21760_v17 = vpack.c.bf16 %v21758_v38, %v21759_v16  ;;  %v21763_v12 = vpack.c.bf16 %v21761_v6, %v21762_v57  ;;  %v7445_v21 = vrot.slane %v21764_v4, %v18896_v46  ;;  %v21778_v50 = vld [vmem:[#allocation41_spill] sm:$0xff]  ;;  %v14103_v63 = vld [vmem:[%s20097_s7 + $0x28] sm:$0xff]  }
 0x743   :  { %9466 = vmatprep.subr.bf16.mxu1 %v8253_v31  ;;  %v7433_v19 = vrot.slane %v21765_v29, %v18896_v46  ;;  %v8254_v20 = vmax.bf16 %v20642_v42, %v8126_v8  ;;  %v8256_v25 = vmax.bf16 %v20642_v42, %v8128_v26  ;;  %v8259_v52 = vmax.bf16 %v20642_v42, %v8131_v18  ;;  %v21784_v8 = vld [vmem:[#allocation54_spill] sm:$0xff]  ;;  %v21786_v18 = vld [vmem:[#allocation68_spill] sm:$0xff]  ;;  %v21797_v29 = vld [vmem:[#allocation79_spill] sm:$0xff] }
 0x744   :  { %9241 = vmatpush1.bf16.msra.mxu0 %v8250_v58  ;;  %v8130_v39 = vadd.bf16 %v12947_v36, %v21760_v17  ;;  %v8132_v9 = vadd.bf16 %v12947_v36, %v21763_v12  ;;  %v21768_v53 = vpack.c.bf16 %v21766_v0, %v21767_v49  ;;  %v21770_v36 = vld [vmem:[#allocation46_spill] sm:$0xff]  ;;  %v8261_v2 = vmax.bf16 %v20642_v42, %v8133_v59  ;;  %v21780_v58 = vld [vmem:[#allocation69_spill] sm:$0xff]  ;;  %v21793_v16 = vld [vmem:[#allocation100_spill] sm:$0xff] }
 0x745   :  { %9242 = vmatprep.subr.bf16.mxu0 %v8255_v37  ;;  %v21771_v10 = vpack.c.bf16 %v21769_v51, %v21770_v36  ;;  %v7469_v60 = vrot.slane %v21772_v44, %v18896_v46  ;;  %v7457_v30 = vrot.slane %v21773_v61, %v18896_v46  ;;  %v21776_v45 = vpack.c.bf16 %v21774_v40, %v21775_v28  ;;  %v21789_v59 = vld [vmem:[#allocation58_spill] sm:$0xff]  ;;  %v21794_v12 = vld [vmem:[#allocation77_spill] sm:$0xff]  ;;  %v21802_v36 = vld [vmem:[#allocation76_spill] sm:$0xff] }
 0x746   :  { %9467 = vmatpush1.bf16.msra.mxu1 %v8252_v41  ;;  %v8135_v48 = vadd.bf16 %v12948_v62, %v21768_v53  ;;  %v8258_v13 = vmax.bf16 %v20642_v42, %v8130_v39  ;;  %v8260_v24 = vmax.bf16 %v20642_v42, %v8132_v9  ;;  %v21779_v34 = vpack.c.bf16 %v21777_v56, %v21778_v50  ;;  %v21781_v41 = vld [vmem:[#allocation64_spill] sm:$0xff]  ;;  %v21801_v49 = vld [vmem:[#allocation97_spill] sm:$0xff]  ;;  %v21805_v44 = vld [vmem:[#allocation66_spill] sm:$0xff] }
 0x747   :  { %9468 = vmatprep.subr.bf16.mxu1 %v8257_v14  ;;  %v8137_v27 = vadd.bf16 %v12948_v62, %v21771_v10  ;;  %8913 = vmatmul.mubr.bf16.gmra.mrb[176].mxu0 %v14102_v33  ;;  %v8134_v31 = vadd.bf16 %v12948_v62, %v21776_v45  ;;  %v21782_v15 = vpack.c.bf16 %v21780_v58, %v21781_v41  ;;  %v21795_v9 = vld [vmem:[#allocation72_spill] sm:$0xff]  ;;  %v21803_v10 = vld [vmem:[#allocation67_spill] sm:$0xff] }
 0x748   :  { %9243 = vmatpush1.bf16.msra.mxu0 %v8254_v20  ;;  %v8136_v43 = vadd.bf16 %v12948_v62, %v21779_v34  ;;  %8922 = vmatprep.mubr.bf16.mxu0 %v20642_v42  ;;  %v21785_v1 = vpack.c.bf16 %v21783_v54, %v21784_v8  ;;  %v12950_v3 = vcombine.low %v7433_v19, %v7445_v21  ;;  %v21790_v62 = vld [vmem:[#allocation49_spill] sm:$0xff]  ;;  %v21811_v45 = vld [vmem:[#allocation87_spill] sm:$0xff] }
 0x749   :  { %9026 = vmatmul.mubr.bf16.gmra.mrb[176].mxu1 %v14102_v33  ;;  %9244 = vmatprep.subr.bf16.mxu0 %v8259_v52  ;;  %v8139_v23 = vadd.bf16 %v12949_v5, %v21782_v15  ;;  %v8263_v26 = vmax.bf16 %v20642_v42, %v8135_v48  ;;  %v8265_v11 = vmax.bf16 %v20642_v42, %v8137_v27  ;;  %v21792_v33 = vld [vmem:[#allocation102_spill] sm:$0xff]  ;;  %v21800_v52 = vld [vmem:[#allocation111_spill] sm:$0xff]  ;;  %v14104_v41 = vld [vmem:[%s20097_s7 + $0x30] sm:$0xff]  }
 0x74a   :  { %9469 = vmatpush1.bf16.msra.mxu1 %v8256_v25  ;;  %9035 = vmatprep.mubr.bf16.mxu1 %v20642_v42  ;;  %v8141_v32 = vadd.bf16 %v12949_v5, %v21785_v1  ;;  %v12951_v22 = vcombine.low %v7457_v30, %v7469_v60  ;;  %v21788_v47 = vpack.c.bf16 %v21786_v18, %v21787_v35  ;;  %v21806_v60 = vld [vmem:[#allocation57_spill] sm:$0xff]  ;;  %v21815_v54 = vld [vmem:[#allocation75_spill] sm:$0xff] }
 0x74b   :  { %9470 = vmatprep.subr.bf16.mxu1 %v8261_v2  ;;  %v21791_v37 = vpack.c.bf16 %v21789_v59, %v21790_v62  ;;  %v7493_v38 = vrot.slane %v21792_v33, %v18896_v46  ;;  %v7481_v17 = vrot.slane %v21793_v16, %v18896_v46  ;;  %v8262_v39 = vmax.bf16 %v20642_v42, %v8134_v31  ;;  %v21812_v31 = vld [vmem:[#allocation70_spill] sm:$0xff]  ;;  %v21825_v16 = vld [vmem:[#allocation127_spill] sm:$0xff] }
 0x74c   :  { %9245 = vmatpush1.bf16.msra.mxu0 %v8258_v13  ;;  %v8138_v7 = vadd.bf16 %v12949_v5, %v21788_v47  ;;  %v8264_v6 = vmax.bf16 %v20642_v42, %v8136_v43  ;;  %v8267_v57 = vmax.bf16 %v20642_v42, %v8139_v23  ;;  %v21796_v4 = vpack.c.bf16 %v21794_v12, %v21795_v9  ;;  %v21808_v13 = vld [vmem:[#allocation123_spill] sm:$0xff]  ;;  %v21814_v23 = vld [vmem:[#allocation84_spill] sm:$0xff] }
 0x74d   :  { %v8140_v14 = vadd.bf16 %v12949_v5, %v21791_v37  ;;  %9246 = vmatprep.subr.bf16.mxu0 %v8263_v26  ;;  %v21798_v5 = vld [vmem:[#allocation62_spill] sm:$0xff]  ;;  %v8269_v25 = vmax.bf16 %v20642_v42, %v8141_v32  ;;  %v7517_v0 = vrot.slane %v21800_v52, %v18896_v46  ;;  %v7505_v53 = vrot.slane %v21801_v49, %v18896_v46  ;;  %v21822_v37 = vld [vmem:[#allocation131_spill] sm:$0xff] }
 0x74e   :  { %9471 = vmatpush1.bf16.msra.mxu1 %v8260_v24  ;;  %v8143_v21 = vadd.bf16 %v12950_v3, %v21796_v4  ;;  %v21799_v19 = vpack.c.bf16 %v21797_v29, %v21798_v5  ;;  %v8266_v48 = vmax.bf16 %v20642_v42, %v8138_v7  ;;  %v21804_v27 = vpack.c.bf16 %v21802_v36, %v21803_v10  ;;  %v21809_v24 = vld [vmem:[#allocation80_spill] sm:$0xff]  ;;  %v21817_v32 = vld [vmem:[#allocation74_spill] sm:$0xff]  ;;  %v21829_v9 = vld [vmem:[#allocation107_spill] sm:$0xff] }
 0x74f   :  { %9472 = vmatprep.subr.bf16.mxu1 %v8265_v11  ;;  %8923 = vmatmul.mubr.bf16.gmra.mrb[180].mxu0 %v14103_v63  ;;  %v8268_v51 = vmax.bf16 %v20642_v42, %v8140_v14  ;;  %v21807_v61 = vpack.c.bf16 %v21805_v44, %v21806_v60  ;;  %v21810_v40 = vpack.c.bf16 %v21808_v13, %v21809_v24  ;;  %v21821_v7 = vld [vmem:[#allocation98_spill] sm:$0xff]  ;;  %v21823_v14 = vld [vmem:[#allocation88_spill] sm:$0xff] }
 0x750   :  { %v8145_v20 = vadd.bf16 %v12950_v3, %v21799_v19  ;;  %9247 = vmatpush1.bf16.msra.mxu0 %v8262_v39  ;;  %v8142_v2 = vadd.bf16 %v12950_v3, %v21804_v27  ;;  %8932 = vmatprep.mubr.bf16.mxu0 %v20642_v42  ;;  %v21813_v56 = vpack.c.bf16 %v21811_v45, %v21812_v31  ;;  %v21830_v5 = vld [vmem:[#allocation130_spill] sm:$0xff]  ;;  %v21831_v19 = vld [vmem:[#allocation83_spill] sm:$0xff]  ;;  %v21843_v45 = vld [vmem:[#allocation128_spill] sm:$0xff] }
 0x751   :  { %9036 = vmatmul.mubr.bf16.gmra.mrb[180].mxu1 %v14103_v63  ;;  %9248 = vmatprep.subr.bf16.mxu0 %v8267_v57  ;;  %v8144_v30 = vadd.bf16 %v12950_v3, %v21807_v61  ;;  %v8147_v28 = vadd.bf16 %v12951_v22, %v21810_v40  ;;  %v12952_v34 = vcombine.low %v7481_v17, %v7493_v38  ;;  %v21818_v3 = vld [vmem:[#allocation65_spill] sm:$0xff]  ;;  %v21820_v63 = vld [vmem:[#allocation112_spill] sm:$0xff]  ;;  %v21828_v57 = vld [vmem:[#allocation110_spill] sm:$0xff] }
 0x752   :  { %9473 = vmatpush1.bf16.msra.mxu1 %v8264_v6  ;;  %9045 = vmatprep.mubr.bf16.mxu1 %v20642_v42  ;;  %v8149_v50 = vadd.bf16 %v12951_v22, %v21813_v56  ;;  %v8271_v43 = vmax.bf16 %v20642_v42, %v8143_v21  ;;  %v8273_v58 = vmax.bf16 %v20642_v42, %v8145_v20  ;;  %v21833_v52 = vld [vmem:[#allocation126_spill] sm:$0xff]  ;;  %v21839_v27 = vld [vmem:[#allocation135_spill] sm:$0xff] }
 0x753   :  { %9474 = vmatprep.subr.bf16.mxu1 %v8269_v25  ;;  %v12953_v15 = vcombine.low %v7505_v53, %v7517_v0  ;;  %v21816_v8 = vpack.c.bf16 %v21814_v23, %v21815_v54  ;;  %v21819_v26 = vpack.c.bf16 %v21817_v32, %v21818_v3  ;;  %v7541_v18 = vrot.slane %v21820_v63, %v18896_v46  ;;  %v21834_v0 = vld [vmem:[#allocation73_spill] sm:$0xff] }
 0x754   :  { %9249 = vmatpush1.bf16.msra.mxu0 %v8266_v48  ;;  %v8270_v35 = vmax.bf16 %v20642_v42, %v8142_v2  ;;  %v8272_v47 = vmax.bf16 %v20642_v42, %v8144_v30  ;;  %v7529_v59 = vrot.slane %v21821_v7, %v18896_v46  ;;  %v8275_v62 = vmax.bf16 %v20642_v42, %v8147_v28  ;;  %v21836_v48 = vld [vmem:[#allocation139_spill] sm:$0xff]  ;;  %v21840_v2 = vld [vmem:[#allocation125_spill] sm:$0xff]  ;;  %v21842_v28 = vld [vmem:[#allocation138_spill] sm:$0xff] }
 0x755   :  { %v8146_v1 = vadd.bf16 %v12951_v22, %v21816_v8  ;;  %v8148_v11 = vadd.bf16 %v12951_v22, %v21819_v26  ;;  %9250 = vmatprep.subr.bf16.mxu0 %v8271_v43  ;;  %v21824_v33 = vpack.c.bf16 %v21822_v37, %v21823_v14  ;;  %v21826_v22 = vld [vmem:[#allocation78_spill] sm:$0xff]  ;;  %v8277_v6 = vmax.bf16 %v20642_v42, %v8149_v50  ;;  %v14108_v26 = vld [vmem:[%s20098_s6 + $0x4] ss:$16 sps:$4 sm:$0xff]   ;;  %v21856_v14 = vld [vmem:[#allocation16_spill] sm:$0xff] }
 0x756   :  { %9475 = vmatpush1.bf16.msra.mxu1 %v8268_v51  ;;  %v21827_v17 = vpack.c.bf16 %v21825_v16, %v21826_v22  ;;  %v7565_v12 = vrot.slane %v21828_v57, %v18896_v46  ;;  %v7553_v4 = vrot.slane %v21829_v9, %v18896_v46  ;;  %v21832_v20 = vpack.c.bf16 %v21830_v5, %v21831_v19  ;;  %v21837_v51 = vld [vmem:[#allocation129_spill] sm:$0xff]  ;;  %v21845_v50 = vld [vmem:[#allocation134_spill] sm:$0xff]  ;;  %v21864_v5 = vld [vmem:[#allocation155_spill] sm:$0xff] }
 0x757   :  { %9476 = vmatprep.subr.bf16.mxu1 %v8273_v58  ;;  %v8151_v38 = vadd.bf16 %v12952_v34, %v21824_v33  ;;  %8933 = vmatmul.mubr.bf16.gmra.mrb[184].mxu0 %v14104_v41  ;;  %v8274_v21 = vmax.bf16 %v20642_v42, %v8146_v1  ;;  %v8276_v29 = vmax.bf16 %v20642_v42, %v8148_v11  ;;  %v14105_v24 = vld [vmem:[%s20097_s7 + $0x38] sm:$0xff]   ;;  %v21849_v1 = vld [vmem:[#allocation108_spill] sm:$0xff]  ;;  %v21850_v11 = vld [vmem:[#allocation147_spill] sm:$0xff] }
 0x758   :  { %v8153_v39 = vadd.bf16 %v12952_v34, %v21827_v17  ;;  %9251 = vmatpush1.bf16.msra.mxu0 %v8270_v35  ;;  %v8150_v25 = vadd.bf16 %v12952_v34, %v21832_v20  ;;  %v21835_v49 = vpack.c.bf16 %v21833_v52, %v21834_v0  ;;  %v21838_v36 = vpack.c.bf16 %v21836_v48, %v21837_v51  ;;  %v21853_v35 = vld [vmem:[#allocation143_spill] sm:$0xff]  ;;  %v21861_v9 = vld [vmem:[#allocation142_spill] sm:$0xff]  ;;  %v21865_v19 = vld [vmem:[#allocation145_spill] sm:$0xff] }
 0x759   :  { %9046 = vmatmul.mubr.bf16.gmra.mrb[184].mxu1 %v14104_v41  ;;  %9252 = vmatprep.subr.bf16.mxu0 %v8275_v62  ;;  %v21841_v44 = vpack.c.bf16 %v21839_v27, %v21840_v2  ;;  %v12954_v61 = vcombine.low %v7529_v59, %v7541_v18  ;;  %v8279_v30 = vmax.bf16 %v20642_v42, %v8151_v38  ;;  %v21848_v41 = vld [vmem:[#allocation122_spill] sm:$0xff]  ;;  %v19282_v62 = vpop.permute.xlu1 %7700  ;;  %v21867_v52 = vld [vmem:[#allocation151_spill] sm:$0xff]  ;;  %v21868_v0 = vld [vmem:[#allocation141_spill] sm:$0xff] }
 0x75a   :  { %9477 = vmatpush1.bf16.msra.mxu1 %v8272_v47  ;;  %v8152_v53 = vadd.bf16 %v12952_v34, %v21835_v49  ;;  %v8155_v10 = vadd.bf16 %v12953_v15, %v21838_v36  ;;  %8942 = vmatprep.mubr.bf16.mxu0 %v20642_v42  ;;  %v8281_v13 = vmax.bf16 %v20642_v42, %v8153_v39  ;;  %v21846_v34 = vld [vmem:[#allocation124_spill] sm:$0xff]  ;;  %v21854_v47 = vld [vmem:[#allocation133_spill] sm:$0xff]  ;;  %v21857_v38 = vld [vmem:[#allocation106_spill] sm:$0xff] }
 0x75b   :  { %9478 = vmatprep.subr.bf16.mxu1 %v8277_v6  ;;  %9055 = vmatprep.mubr.bf16.mxu1 %v20642_v42  ;;  %v8157_v60 = vadd.bf16 %v12953_v15, %v21841_v44  ;;  %v12955_v40 = vcombine.low %v7553_v4, %v7565_v12  ;;  %v21844_v31 = vpack.c.bf16 %v21842_v28, %v21843_v45  ;;  %v21858_v39 = vld [vmem:[#allocation146_spill] sm:$0xff]  ;;  %v21859_v6 = vld [vmem:[#allocation136_spill] sm:$0xff] }
 0x75c   :  { %9253 = vmatpush1.bf16.msra.mxu0 %v8274_v21  ;;  %v21847_v43 = vpack.c.bf16 %v21845_v50, %v21846_v34  ;;  %v7589_v23 = vrot.slane %v21848_v41, %v18896_v46  ;;  %v8278_v54 = vmax.bf16 %v20642_v42, %v8150_v25  ;;  %v8280_v8 = vmax.bf16 %v20642_v42, %v8152_v53  ;;  %v21862_v4 = vld [vmem:[#allocation132_spill] sm:$0xff]  ;;  %v21870_v2 = vld [vmem:[#allocation154_spill] sm:$0xff]  ;;  %v19322_v41 = vpop.permute.xlu0 %7712 }
 0x75d   :  { %v8154_v56 = vadd.bf16 %v12953_v15, %v21844_v31  ;;  %9254 = vmatprep.subr.bf16.mxu0 %v8279_v30  ;;  %v7577_v32 = vrot.slane %v21849_v1, %v18896_v46  ;;  %v8283_v3 = vmax.bf16 %v20642_v42, %v8155_v10  ;;  %v21855_v7 = vpack.c.bf16 %v21853_v35, %v21854_v47  ;;  %v14106_v10 = vld [vmem:[%s20098_s6] ss:$16 sps:$4 sm:$0xff]  }
 0x75e   :  { %9479 = vmatpush1.bf16.msra.mxu1 %v8276_v29  ;;  %v8156_v58 = vadd.bf16 %v12953_v15, %v21847_v43  ;;  %v21851_v15 = vld [vmem:[#allocation137_spill] sm:$0xff]  ;;  %v8285_v37 = vmax.bf16 %v20642_v42, %v8157_v60  ;;  %v7613_v33 = vrot.slane %v21856_v14, %v18896_v46  ;;  %v7601_v16 = vrot.slane %v21857_v38, %v18896_v46  ;;  %v21871_v44 = vld [vmem:[#allocation144_spill] sm:$0xff]  ;;  %v21873_v30 = vld [vmem:[#allocation150_spill] sm:$0xff] }
 0x75f   :  { %9480 = vmatprep.subr.bf16.mxu1 %v8281_v13  ;;  %v21852_v63 = vpack.c.bf16 %v21850_v11, %v21851_v15  ;;  %v8161_v59 = vadd.bf16 %v12954_v61, %v21855_v7  ;;  %8943 = vmatmul.mubr.bf16.gmra.mrb[188].mxu0 %v14105_v24  ;;  %v8282_v22 = vmax.bf16 %v20642_v42, %v8154_v56  ;;  %v21874_v13 = vld [vmem:[#allocation140_spill] sm:$0xff]  ;;  %v21876_v45 = vld [vmem:[#allocation10_spill] sm:$0xff]  ;;  %v19316_v56 = vpop.permute.xlu1 %7724  ;;  %v21877_v43 = vld [vmem:[#allocation121_spill] sm:$0xff] }
 0x760   :  { %9255 = vmatpush1.bf16.msra.mxu0 %v8278_v54  ;;  %v8284_v17 = vmax.bf16 %v20642_v42, %v8156_v58  ;;  %v21860_v57 = vpack.c.bf16 %v21858_v39, %v21859_v6  ;;  %v21863_v21 = vpack.c.bf16 %v21861_v9, %v21862_v4  ;;  %v21866_v20 = vpack.c.bf16 %v21864_v5, %v21865_v19  ;;  %v21878_v54 = vld [vmem:[#allocation163_spill] sm:$0xff]  ;;  %v21885_v47 = vld [vmem:[#allocation12_spill] sm:$0xff]  ;;  %v21886_v14 = vld [vmem:[#allocation162_spill] sm:$0xff] }
 0x761   :  { %v8159_v18 = vadd.bf16 %v12954_v61, %v21852_v63  ;;  %9056 = vmatmul.mubr.bf16.gmra.mrb[188].mxu1 %v14105_v24  ;;  %9256 = vmatprep.subr.bf16.mxu0 %v8283_v3  ;;  %v21869_v49 = vpack.c.bf16 %v21867_v52, %v21868_v0  ;;  %v12956_v48 = vcombine.low %v7577_v32, %v7589_v23  ;;  %v21881_v3 = vld [vmem:[#allocation159_spill] sm:$0xff] }
 0x762   :  { %9481 = vmatpush1.bf16.msra.mxu1 %v8280_v8  ;;  %v8158_v12 = vadd.bf16 %v12954_v61, %v21860_v57  ;;  %v8160_v29 = vadd.bf16 %v12954_v61, %v21863_v21  ;;  %v8163_v25 = vadd.bf16 %v12955_v40, %v21866_v20  ;;  %9258 = vmatprep.mubr.bf16.mxu0 %v14108_v26  ;;  %v21879_v8 = vld [vmem:[#allocation153_spill] sm:$0xff]  ;;  %v21892_v57 = vld [vmem:[#allocation171_spill] sm:$0xff] }
 0x763   :  { %9482 = vmatprep.subr.bf16.mxu1 %v8285_v37  ;;  %9484 = vmatprep.mubr.bf16.mxu1 %v14108_v26  ;;  %v8165_v53 = vadd.bf16 %v12955_v40, %v21869_v49  ;;  %v8287_v51 = vmax.bf16 %v20642_v42, %v8159_v18  ;;  %v8289_v36 = vmax.bf16 %v20642_v42, %v8161_v59  ;;  %v21882_v26 = vld [vmem:[#allocation149_spill] sm:$0xff]  ;;  %v21884_v18 = vld [vmem:[#allocation26_spill] sm:$0xff]  ;;  %v21895_v21 = vld [vmem:[#allocation167_spill] sm:$0xff] }
 0x764   :  { %v12957_v27 = vcombine.low %v7601_v16, %v7613_v33  ;;  %9257 = vmatpush1.bf16.msra.mxu0 %v8282_v22  ;;  %v21872_v60 = vpack.c.bf16 %v21870_v2, %v21871_v44  ;;  %v21875_v24 = vpack.c.bf16 %v21873_v30, %v21874_v13  ;;  %v7637_v31 = vrot.slane %v21876_v45, %v18896_v46  ;;  %v21887_v33 = vld [vmem:[#allocation152_spill] sm:$0xff]  ;;  %v21889_v22 = vld [vmem:[#allocation158_spill] sm:$0xff]  ;;  %v21904_v13 = vld [vmem:[#allocation47_spill] sm:$0xff] }
 0x765   :  { %9339 = vmatprep.subr.bf16.mxu0 %v8287_v51  ;;  %v8286_v50 = vmax.bf16 %v20642_v42, %v8158_v12  ;;  %v8288_v34 = vmax.bf16 %v20642_v42, %v8160_v29  ;;  %v7625_v58 = vrot.slane %v21877_v43, %v18896_v46  ;;  %v8291_v23 = vmax.bf16 %v20642_v42, %v8163_v25  ;;  %v21893_v12 = vld [vmem:[#allocation161_spill] sm:$0xff]  ;;  %v19353_v25 = vpop.permute.xlu1 %7748  ;;  %v21898_v51 = vld [vmem:[#allocation170_spill] sm:$0xff] }
 0x766   :  { %9483 = vmatpush1.bf16.msra.mxu1 %v8284_v17  ;;  %v8162_v61 = vadd.bf16 %v12955_v40, %v21872_v60  ;;  %v8164_v28 = vadd.bf16 %v12955_v40, %v21875_v24  ;;  %v14111_v40 = vld [vmem:[%s20098_s6 + $0x24] ss:$16 sps:$4 sm:$0xff]   ;;  %v21880_v1 = vpack.c.bf16 %v21878_v54, %v21879_v8  ;;  %v21883_v11 = vpack.c.bf16 %v21881_v3, %v21882_v26  ;;  %v21890_v17 = vld [vmem:[#allocation148_spill] sm:$0xff]  ;;  %v21901_v44 = vld [vmem:[#allocation166_spill] sm:$0xff] }
 0x767   :  { %9565 = vmatprep.subr.bf16.mxu1 %v8289_v36  ;;  %9259 = vmatmul.mubr.bf16.vlgmr.msra.gmra.mrb[160].mxu0 %v14106_v10  ;;  %v8293_v63 = vmax.bf16 %v20642_v42, %v8165_v53  ;;  %v7661_v35 = vrot.slane %v21884_v18, %v18896_v46  ;;  %v7649_v7 = vrot.slane %v21885_v47, %v18896_v46  ;;  %v21896_v29 = vld [vmem:[#allocation157_spill] sm:$0xff]  ;;  %v21899_v36 = vld [vmem:[#allocation160_spill] sm:$0xff]  ;;  %v21909_v54 = vld [vmem:[#allocation175_spill] sm:$0xff] }
 0x768   :  { %v8167_v32 = vadd.bf16 %v12956_v48, %v21880_v1  ;;  %v8169_v15 = vadd.bf16 %v12956_v48, %v21883_v11  ;;  %9340 = vmatpush1.bf16.msra.mxu0 %v8286_v50  ;;  %v8290_v59 = vmax.bf16 %v20642_v42, %v8162_v61  ;;  %v8292_v37 = vmax.bf16 %v20642_v42, %v8164_v28  ;;  %v14109_v49 = vld [vmem:[%s20098_s6 + $0x20] ss:$16 sps:$4 sm:$0xff]   ;;  %v14114_v43 = vld [vmem:[%s20098_s6 + $0x44] ss:$16 sps:$4 sm:$0xff]  }
 0x769   :  { %9485 = vmatmul.mubr.bf16.vlgmr.msra.gmra.mrb[160].mxu1 %v14106_v10  ;;  %9341 = vmatprep.subr.bf16.mxu0 %v8291_v23  ;;  %v21888_v38 = vpack.c.bf16 %v21886_v14, %v21887_v33  ;;  %v21891_v39 = vpack.c.bf16 %v21889_v22, %v21890_v17  ;;  %v21894_v9 = vpack.c.bf16 %v21892_v57, %v21893_v12  ;;  %v21902_v60 = vld [vmem:[#allocation156_spill] sm:$0xff]  ;;  %v21910_v8 = vld [vmem:[#allocation165_spill] sm:$0xff]  ;;  %v21913_v47 = vld [vmem:[#allocation178_spill] sm:$0xff] }
 0x76a   :  { %9566 = vmatpush1.bf16.msra.mxu1 %v8288_v34  ;;  %9268 = vmatprep.mubr.bf16.mxu0 %v14111_v40  ;;  %v21897_v5 = vpack.c.bf16 %v21895_v21, %v21896_v29  ;;  %v12958_v20 = vcombine.low %v7625_v58, %v7637_v31  ;;  %v8295_v52 = vmax.bf16 %v20642_v42, %v8167_v32  ;;  %v21905_v31 = vld [vmem:[#allocation21_spill] sm:$0xff]  ;;  %v21906_v58 = vld [vmem:[#allocation179_spill] sm:$0xff]  ;;  %v21916_v14 = vld [vmem:[#allocation174_spill] sm:$0xff] }
 0x76b   :  { %9567 = vmatprep.subr.bf16.mxu1 %v8293_v63  ;;  %v8166_v16 = vadd.bf16 %v12956_v48, %v21888_v38  ;;  %v8168_v6 = vadd.bf16 %v12956_v48, %v21891_v39  ;;  %v8171_v4 = vadd.bf16 %v12957_v27, %v21894_v9  ;;  %9494 = vmatprep.mubr.bf16.mxu1 %v14111_v40  ;;  %v19360_v48 = vpop.permute.xlu0 %7736  ;;  %v21912_v11 = vld [vmem:[#allocation37_spill] sm:$0xff]  ;;  %v21917_v33 = vld [vmem:[#allocation164_spill] sm:$0xff]  ;;  %v21922_v57 = vld [vmem:[#allocation183_spill] sm:$0xff] }
 0x76c   :  { %v8173_v19 = vadd.bf16 %v12957_v27, %v21897_v5  ;;  %v8297_v0 = vmax.bf16 %v20642_v42, %v8169_v15  ;;  %v12959_v53 = vcombine.low %v7649_v7, %v7661_v35  ;;  %9342 = vmatpush1.bf16.msra.mxu0 %v8290_v59  ;;  %v21900_v10 = vpack.c.bf16 %v21898_v51, %v21899_v36  ;;  %v19391_v35 = vpop.permute.xlu1 %7772  ;;  %v21914_v7 = vld [vmem:[#allocation168_spill] sm:$0xff]  ;;  %v21920_v22 = vld [vmem:[#allocation177_spill] sm:$0xff] }
 0x76d   :  { %v21903_v61 = vpack.c.bf16 %v21901_v44, %v21902_v60  ;;  %v7685_v24 = vrot.slane %v21904_v13, %v18896_v46  ;;  %9343 = vmatprep.subr.bf16.mxu0 %v8295_v52  ;;  %v8294_v28 = vmax.bf16 %v20642_v42, %v8166_v16  ;;  %v8296_v45 = vmax.bf16 %v20642_v42, %v8168_v6  ;;  %v21919_v16 = vld [vmem:[#allocation187_spill] sm:$0xff]  ;;  %v21923_v12 = vld [vmem:[#allocation173_spill] sm:$0xff]  ;;  %v21925_v52 = vld [vmem:[#allocation186_spill] sm:$0xff] }
 0x76e   :  { %9568 = vmatpush1.bf16.msra.mxu1 %v8292_v37  ;;  %v8170_v2 = vadd.bf16 %v12957_v27, %v21900_v10  ;;  %v7673_v50 = vrot.slane %v21905_v31, %v18896_v46  ;;  %v8299_v34 = vmax.bf16 %v20642_v42, %v8171_v4  ;;  %v21911_v1 = vpack.c.bf16 %v21909_v54, %v21910_v8  ;;  %v21928_v60 = vld [vmem:[#allocation182_spill] sm:$0xff] }
 0x76f   :  { %v8172_v30 = vadd.bf16 %v12957_v27, %v21903_v61  ;;  %9569 = vmatprep.subr.bf16.mxu1 %v8297_v0  ;;  %v21907_v27 = vld [vmem:[#allocation169_spill] sm:$0xff]  ;;  %9269 = vmatmul.mubr.bf16.gmra.mrb[164].mxu0 %v14109_v49  ;;  %v8301_v3 = vmax.bf16 %v20642_v42, %v8173_v19  ;;  %v7709_v26 = vrot.slane %v19282_v62, %v18896_v46  ;;  %v19402_v6 = vpop.permute.xlu0 %7760  ;;  %v21926_v0 = vld [vmem:[#allocation176_spill] sm:$0xff] }
 0x770   :  { %v21908_v23 = vpack.c.bf16 %v21906_v58, %v21907_v27  ;;  %v8177_v32 = vadd.bf16 %v12958_v20, %v21911_v1  ;;  %v7697_v15 = vrot.slane %v21912_v11, %v18896_v46  ;;  %9344 = vmatpush1.bf16.msra.mxu0 %v8294_v28  ;;  %v8298_v63 = vmax.bf16 %v20642_v42, %v8170_v2  ;;  %v14112_v19 = vld [vmem:[%s20098_s6 + $0x40] ss:$16 sps:$4 sm:$0xff]   ;;  %v14117_v28 = vld [vmem:[%s20098_s6 + $0x64] ss:$16 sps:$4 sm:$0xff]   ;;  %v19434_v27 = vpop.permute.xlu1 %7796 }
 0x771   :  { %9495 = vmatmul.mubr.bf16.gmra.mrb[164].mxu1 %v14109_v49  ;;  %v8300_v18 = vmax.bf16 %v20642_v42, %v8172_v30  ;;  %9345 = vmatprep.subr.bf16.mxu0 %v8299_v34  ;;  %v21915_v59 = vpack.c.bf16 %v21913_v47, %v21914_v7  ;;  %v21918_v62 = vpack.c.bf16 %v21916_v14, %v21917_v33  ;;  %v21929_v61 = vld [vmem:[#allocation172_spill] sm:$0xff]  ;;  %v21935_v34 = vld [vmem:[#allocation181_spill] sm:$0xff]  ;;  %v21946_v14 = vld [vmem:[#allocation199_spill] sm:$0xff] }
 0x772   :  { %v8175_v40 = vadd.bf16 %v12958_v20, %v21908_v23  ;;  %9570 = vmatpush1.bf16.msra.mxu1 %v8296_v45  ;;  %v21921_v17 = vpack.c.bf16 %v21919_v16, %v21920_v22  ;;  %9278 = vmatprep.mubr.bf16.mxu0 %v14114_v43  ;;  %v21924_v9 = vpack.c.bf16 %v21922_v57, %v21923_v12  ;;  %v21932_v45 = vld [vmem:[#allocation185_spill] sm:$0xff]  ;;  %v21949_v57 = vld [vmem:[#allocation202_spill] sm:$0xff]  ;;  %v21950_v12 = vld [vmem:[#allocation192_spill] sm:$0xff] }
 0x773   :  { %9571 = vmatprep.subr.bf16.mxu1 %v8301_v3  ;;  %v8174_v37 = vadd.bf16 %v12958_v20, %v21915_v59  ;;  %v8176_v38 = vadd.bf16 %v12958_v20, %v21918_v62  ;;  %9504 = vmatprep.mubr.bf16.mxu1 %v14114_v43  ;;  %v12960_v21 = vcombine.low %v7673_v50, %v7685_v24  ;;  %v21934_v50 = vld [vmem:[#allocation191_spill] sm:$0xff]  ;;  %v7785_v54 = vpop.permute.xlu0 %7784  ;;  %v21937_v3 = vld [vmem:[#allocation194_spill] sm:$0xff]  ;;  %v21944_v7 = vld [vmem:[#allocation193_spill] sm:$0xff] }
 0x774   :  { %v8179_v39 = vadd.bf16 %v12959_v53, %v21921_v17  ;;  %v8181_v4 = vadd.bf16 %v12959_v53, %v21924_v9  ;;  %v8303_v29 = vmax.bf16 %v20642_v42, %v8175_v40  ;;  %v8305_v5 = vmax.bf16 %v20642_v42, %v8177_v32  ;;  %9346 = vmatpush1.bf16.msra.mxu0 %v8298_v63  ;;  %v21940_v63 = vld [vmem:[#allocation190_spill] sm:$0xff]  ;;  %v21947_v33 = vld [vmem:[#allocation189_spill] sm:$0xff] }
 0x775   :  { %v12961_v20 = vcombine.low %v7697_v15, %v7709_v26  ;;  %v21927_v49 = vpack.c.bf16 %v21925_v52, %v21926_v0  ;;  %v7733_v36 = vrot.slane %v19316_v56, %v18896_v46  ;;  %v7721_v10 = vrot.slane %v19322_v41, %v18896_v46  ;;  %v21931_v56 = vld [vmem:[#allocation195_spill] sm:$0xff]  ;;  %v21938_v26 = vld [vmem:[#allocation184_spill] sm:$0xff]  ;;  %v19468_v0 = vpop.permute.xlu1 %7820 }
 0x776   :  { %9572 = vmatpush1.bf16.msra.mxu1 %v8300_v18  ;;  %9347 = vmatprep.subr.bf16.mxu0 %v8303_v29  ;;  %v8302_v2 = vmax.bf16 %v20642_v42, %v8174_v37  ;;  %v8304_v44 = vmax.bf16 %v20642_v42, %v8176_v38  ;;  %v21930_v30 = vpack.c.bf16 %v21928_v60, %v21929_v61  ;;  %v21941_v18 = vld [vmem:[#allocation180_spill] sm:$0xff] }
 0x777   :  { %v8178_v51 = vadd.bf16 %v12959_v53, %v21927_v49  ;;  %9573 = vmatprep.subr.bf16.mxu1 %v8305_v5  ;;  %v8307_v24 = vmax.bf16 %v20642_v42, %v8179_v39  ;;  %v21933_v31 = vpack.c.bf16 %v21931_v56, %v21932_v45  ;;  %v21936_v43 = vpack.c.bf16 %v21934_v50, %v21935_v34  ;;  %v14115_v17 = vld [vmem:[%s20098_s6 + $0x60] ss:$16 sps:$4 sm:$0xff]   ;;  %v7809_v61 = vpop.permute.xlu0 %7808 }
 0x778   :  { %v8180_v13 = vadd.bf16 %v12959_v53, %v21930_v30  ;;  %9279 = vmatmul.mubr.bf16.gmra.mrb[168].mxu0 %v14112_v19  ;;  %v8309_v53 = vmax.bf16 %v20642_v42, %v8181_v4  ;;  %v7757_v23 = vrot.slane %v19353_v25, %v18896_v46  ;;  %v7745_v40 = vrot.slane %v19360_v48, %v18896_v46  ;;  %v21943_v48 = vld [vmem:[#allocation203_spill] sm:$0xff]  ;;  %v21953_v29 = vld [vmem:[#allocation188_spill] sm:$0xff]  ;;  %v21959_v30 = vld [vmem:[#allocation197_spill] sm:$0xff] }
 0x779   :  { %v8183_v41 = vadd.bf16 %v12960_v21, %v21933_v31  ;;  %v8185_v58 = vadd.bf16 %v12960_v21, %v21936_v43  ;;  %9505 = vmatmul.mubr.bf16.gmra.mrb[168].mxu1 %v14112_v19  ;;  %9348 = vmatpush1.bf16.msra.mxu0 %v8302_v2  ;;  %v8306_v8 = vmax.bf16 %v20642_v42, %v8178_v51  ;;  %v21961_v50 = vld [vmem:[#allocation210_spill] sm:$0xff]  ;;  %v21962_v34 = vld [vmem:[#allocation200_spill] sm:$0xff] }
 0x77a   :  { %9574 = vmatpush1.bf16.msra.mxu1 %v8304_v44  ;;  %v12962_v1 = vcombine.low %v7721_v10, %v7733_v36  ;;  %9349 = vmatprep.subr.bf16.mxu0 %v8307_v24  ;;  %v8308_v32 = vmax.bf16 %v20642_v42, %v8180_v13  ;;  %v21939_v11 = vpack.c.bf16 %v21937_v3, %v21938_v26  ;;  %v21955_v36 = vld [vmem:[#allocation211_spill] sm:$0xff]  ;;  %v21956_v10 = vld [vmem:[#allocation201_spill] sm:$0xff] }
 0x77b   :  { %9575 = vmatprep.subr.bf16.mxu1 %v8309_v53  ;;  %v21942_v25 = vpack.c.bf16 %v21940_v63, %v21941_v18  ;;  %9288 = vmatprep.mubr.bf16.mxu0 %v14117_v28  ;;  %v21945_v59 = vpack.c.bf16 %v21943_v48, %v21944_v7  ;;  %v21948_v62 = vpack.c.bf16 %v21946_v14, %v21947_v33  ;;  %v21964_v53 = vld [vmem:[#allocation206_spill] sm:$0xff]  ;;  %v21970_v26 = vld [vmem:[#allocation215_spill] sm:$0xff]  ;;  %v21974_v14 = vld [vmem:[#allocation208_spill] sm:$0xff] }
 0x77c   :  { %v8182_v15 = vadd.bf16 %v12960_v21, %v21939_v11  ;;  %9514 = vmatprep.mubr.bf16.mxu1 %v14117_v28  ;;  %v8311_v16 = vmax.bf16 %v20642_v42, %v8183_v41  ;;  %v8313_v22 = vmax.bf16 %v20642_v42, %v8185_v58  ;;  %v12963_v39 = vcombine.low %v7745_v40, %v7757_v23  ;;  %v21965_v23 = vld [vmem:[#allocation196_spill] sm:$0xff]  ;;  %v21971_v11 = vld [vmem:[#allocation205_spill] sm:$0xff] }
 0x77d   :  { %v8184_v47 = vadd.bf16 %v12960_v21, %v21942_v25  ;;  %v8187_v37 = vadd.bf16 %v12961_v20, %v21945_v59  ;;  %v8189_v38 = vadd.bf16 %v12961_v20, %v21948_v62  ;;  %9350 = vmatpush1.bf16.msra.mxu0 %v8306_v8  ;;  %v21951_v9 = vpack.c.bf16 %v21949_v57, %v21950_v12  ;;  %v21952_v21 = vld [vmem:[#allocation198_spill] sm:$0xff]  ;;  %v7845_v25 = vpop.permute.xlu1 %7844  ;;  %v7833_v59 = vpop.permute.xlu0 %7832 }
 0x77e   :  { %9576 = vmatpush1.bf16.msra.mxu1 %v8308_v32  ;;  %v21954_v5 = vpack.c.bf16 %v21952_v21, %v21953_v29  ;;  %v7781_v52 = vrot.slane %v19391_v35, %v18896_v46  ;;  %9351 = vmatprep.subr.bf16.mxu0 %v8311_v16  ;;  %v8310_v49 = vmax.bf16 %v20642_v42, %v8182_v15  ;;  %v14120_v35 = vld [vmem:[%s20098_s6 + $0x84] ss:$16 sps:$4 sm:$0xff]   ;;  %v21967_v32 = vld [vmem:[#allocation214_spill] sm:$0xff]  ;;  %v21977_v16 = vld [vmem:[#allocation204_spill] sm:$0xff] }
 0x77f   :  { %v8186_v4 = vadd.bf16 %v12961_v20, %v21951_v9  ;;  %9577 = vmatprep.subr.bf16.mxu1 %v8313_v22  ;;  %v8312_v51 = vmax.bf16 %v20642_v42, %v8184_v47  ;;  %v21957_v2 = vpack.c.bf16 %v21955_v36, %v21956_v10  ;;  %v7769_v60 = vrot.slane %v19402_v6, %v18896_v46  ;;  %v14123_v29 = vld [vmem:[%s20098_s6 + $0xa4] ss:$16 sps:$4 sm:$0xff]  }
 0x780   :  { %v8188_v19 = vadd.bf16 %v12961_v20, %v21954_v5  ;;  %v21958_v20 = vld [vmem:[#allocation207_spill] sm:$0xff]  ;;  %9289 = vmatmul.mubr.bf16.gmra.mrb[172].mxu0 %v14115_v17  ;;  %v8315_v28 = vmax.bf16 %v20642_v42, %v8187_v37  ;;  %v8317_v56 = vmax.bf16 %v20642_v42, %v8189_v38  ;;  %v7805_v45 = vrot.slane %v19434_v27, %v18896_v46  ;;  %v21968_v27 = vld [vmem:[#allocation209_spill] sm:$0xff]  ;;  %v21973_v37 = vld [vmem:[#allocation212_spill] sm:$0xff] }
 0x781   :  { %v8191_v44 = vadd.bf16 %v12962_v1, %v21957_v2  ;;  %v21960_v13 = vpack.c.bf16 %v21958_v20, %v21959_v30  ;;  %9515 = vmatmul.mubr.bf16.gmra.mrb[172].mxu1 %v14115_v17  ;;  %v7793_v6 = vrot.slane %v7785_v54, %v18896_v46  ;;  %9352 = vmatpush1.bf16.msra.mxu0 %v8310_v49  ;;  %v21976_v38 = vld [vmem:[#allocation213_spill] sm:$0xff]  ;;  %v21979_v5 = vld [vmem:[#allocation222_spill] sm:$0xff]  ;;  %v21982_v49 = vld [vmem:[#allocation223_spill] sm:$0xff] }
 0x782   :  { %9578 = vmatpush1.bf16.msra.mxu1 %v8312_v51  ;;  %v8314_v31 = vmax.bf16 %v20642_v42, %v8186_v4  ;;  %v8316_v41 = vmax.bf16 %v20642_v42, %v8188_v19  ;;  %9353 = vmatprep.subr.bf16.mxu0 %v8315_v28  ;;  %v21963_v43 = vpack.c.bf16 %v21961_v50, %v21962_v34  ;;  %v21980_v19 = vld [vmem:[#allocation218_spill] sm:$0xff]  ;;  %v21985_v20 = vld [vmem:[#allocation220_spill] sm:$0xff]  ;;  %v21988_v28 = vld [vmem:[#allocation221_spill] sm:$0xff] }
 0x783   :  { %v8193_v24 = vadd.bf16 %v12962_v1, %v21960_v13  ;;  %9579 = vmatprep.subr.bf16.mxu1 %v8317_v56  ;;  %v21966_v40 = vpack.c.bf16 %v21964_v53, %v21965_v23  ;;  %v21969_v3 = vpack.c.bf16 %v21967_v32, %v21968_v27  ;;  %9298 = vmatprep.mubr.bf16.mxu0 %v14120_v35  ;;  %v21986_v30 = vld [vmem:[#allocation216_spill] sm:$0xff]  ;;  %v21989_v56 = vld [vmem:[#allocation217_spill] sm:$0xff]  ;;  %v21995_v53 = vld [vmem:[#allocation227_spill] sm:$0xff] }
 0x784   :  { %v8190_v58 = vadd.bf16 %v12962_v1, %v21963_v43  ;;  %9524 = vmatprep.mubr.bf16.mxu1 %v14120_v35  ;;  %v21972_v15 = vpack.c.bf16 %v21970_v26, %v21971_v11  ;;  %v12964_v18 = vcombine.low %v7769_v60, %v7781_v52  ;;  %v8319_v47 = vmax.bf16 %v20642_v42, %v8191_v44  ;;  %v7869_v35 = vpop.permute.xlu1 %7868  ;;  %v7857_v43 = vpop.permute.xlu0 %7856  ;;  %v21997_v26 = vld [vmem:[#allocation228_spill] sm:$0xff] }
 0x785   :  { %v8192_v8 = vadd.bf16 %v12962_v1, %v21966_v40  ;;  %v8195_v54 = vadd.bf16 %v12963_v39, %v21969_v3  ;;  %v8321_v48 = vmax.bf16 %v20642_v42, %v8193_v24  ;;  %v14118_v1 = vld [vmem:[%s20098_s6 + $0x80] ss:$16 sps:$4 sm:$0xff]   ;;  %v12965_v7 = vcombine.low %v7793_v6, %v7805_v45  ;;  %9354 = vmatpush1.bf16.msra.mxu0 %v8314_v31 }
 0x786   :  { %v8197_v63 = vadd.bf16 %v12963_v39, %v21972_v15  ;;  %9580 = vmatpush1.bf16.msra.mxu1 %v8316_v41  ;;  %v21975_v33 = vpack.c.bf16 %v21973_v37, %v21974_v14  ;;  %v21978_v22 = vpack.c.bf16 %v21976_v38, %v21977_v16  ;;  %v7829_v57 = vrot.slane %v19468_v0, %v18896_v46  ;;  %v21983_v0 = vld [vmem:[#allocation219_spill] sm:$0xff]  ;;  %v21991_v31 = vld [vmem:[#allocation230_spill] sm:$0xff]  ;;  %v21998_v11 = vld [vmem:[#allocation224_spill] sm:$0xff] }
 0x787   :  { %9355 = vmatprep.subr.bf16.mxu0 %v8319_v47  ;;  %9581 = vmatprep.subr.bf16.mxu1 %v8321_v48  ;;  %v8318_v12 = vmax.bf16 %v20642_v42, %v8190_v58  ;;  %v8320_v9 = vmax.bf16 %v20642_v42, %v8192_v8  ;;  %v7817_v4 = vrot.slane %v7809_v61, %v18896_v46  ;;  %v21992_v41 = vld [vmem:[#allocation226_spill] sm:$0xff]  ;;  %v21994_v58 = vld [vmem:[#allocation231_spill] sm:$0xff] }
 0x788   :  { %v8194_v62 = vadd.bf16 %v12963_v39, %v21975_v33  ;;  %v8196_v17 = vadd.bf16 %v12963_v39, %v21978_v22  ;;  %v8323_v21 = vmax.bf16 %v20642_v42, %v8195_v54  ;;  %v21981_v39 = vpack.c.bf16 %v21979_v5, %v21980_v19  ;;  %9299 = vmatmul.mubr.bf16.gmra.mrb[176].mxu0 %v14118_v1  ;;  %v14121_v3 = vld [vmem:[%s20098_s6 + $0xa0] ss:$16 sps:$4 sm:$0xff]   ;;  %v7881_v5 = vpop.permute.xlu0 %7880 }
 0x789   :  { %v21984_v51 = vpack.c.bf16 %v21982_v49, %v21983_v0  ;;  %9525 = vmatmul.mubr.bf16.gmra.mrb[176].mxu1 %v14118_v1  ;;  %v8325_v10 = vmax.bf16 %v20642_v42, %v8197_v63  ;;  %v7853_v2 = vrot.slane %v7845_v25, %v18896_v46  ;;  %v7841_v44 = vrot.slane %v7833_v59, %v18896_v46  ;;  %v22001_v25 = vld [vmem:[#allocation225_spill] sm:$0xff]  ;;  %v22003_v38 = vld [vmem:[#allocation238_spill] sm:$0xff]  ;;  %v22009_v49 = vld [vmem:[#allocation236_spill] sm:$0xff] }
 0x78a   :  { %v8199_v52 = vadd.bf16 %v12964_v18, %v21981_v39  ;;  %9356 = vmatpush1.bf16.msra.mxu0 %v8318_v12  ;;  %9582 = vmatpush1.bf16.msra.mxu1 %v8320_v9  ;;  %v8322_v60 = vmax.bf16 %v20642_v42, %v8194_v62  ;;  %v8324_v61 = vmax.bf16 %v20642_v42, %v8196_v17  ;;  %v14126_v62 = vld [vmem:[%s20098_s6 + $0xc4] ss:$16 sps:$4 sm:$0xff]   ;;  %v22004_v16 = vld [vmem:[#allocation234_spill] sm:$0xff]  ;;  %v22010_v0 = vld [vmem:[#allocation232_spill] sm:$0xff] }
 0x78b   :  { %v8201_v36 = vadd.bf16 %v12964_v18, %v21984_v51  ;;  %9357 = vmatprep.subr.bf16.mxu0 %v8323_v21  ;;  %9583 = vmatprep.subr.bf16.mxu1 %v8325_v10  ;;  %v21987_v13 = vpack.c.bf16 %v21985_v20, %v21986_v30  ;;  %v21990_v45 = vpack.c.bf16 %v21988_v28, %v21989_v56  ;;  %v22006_v17 = vld [vmem:[#allocation239_spill] sm:$0xff]  ;;  %v22012_v10 = vld [vmem:[#allocation237_spill] sm:$0xff] }
 0x78c   :  { %v21993_v50 = vpack.c.bf16 %v21991_v31, %v21992_v41  ;;  %9308 = vmatprep.mubr.bf16.mxu0 %v14123_v29  ;;  %9534 = vmatprep.mubr.bf16.mxu1 %v14123_v29  ;;  %v21996_v23 = vpack.c.bf16 %v21994_v58, %v21995_v53  ;;  %v12966_v8 = vcombine.low %v7817_v4, %v7829_v57  ;;  %v22007_v57 = vld [vmem:[#allocation235_spill] sm:$0xff]  ;;  %v7893_v4 = vpop.permute.xlu1 %7892 }
 0x78d   :  { %v8198_v24 = vadd.bf16 %v12964_v18, %v21987_v13  ;;  %v8200_v6 = vadd.bf16 %v12964_v18, %v21990_v45  ;;  %v8327_v32 = vmax.bf16 %v20642_v42, %v8199_v52  ;;  %v8329_v27 = vmax.bf16 %v20642_v42, %v8201_v36  ;;  %v22000_v18 = vld [vmem:[#allocation229_spill] sm:$0xff]  ;;  %v22018_v13 = vld [vmem:[#allocation247_spill] sm:$0xff] }
 0x78e   :  { %v8203_v34 = vadd.bf16 %v12965_v7, %v21993_v50  ;;  %v8205_v40 = vadd.bf16 %v12965_v7, %v21996_v23  ;;  %v12967_v54 = vcombine.low %v7841_v44, %v7853_v2  ;;  %9358 = vmatpush1.bf16.msra.mxu0 %v8322_v60  ;;  %9584 = vmatpush1.bf16.msra.mxu1 %v8324_v61  ;;  %v22013_v2 = vld [vmem:[#allocation233_spill] sm:$0xff]  ;;  %v22015_v61 = vld [vmem:[#allocation246_spill] sm:$0xff]  ;;  %v22021_v50 = vld [vmem:[#allocation244_spill] sm:$0xff] }
 0x78f   :  { %v21999_v15 = vpack.c.bf16 %v21997_v26, %v21998_v11  ;;  %v22002_v47 = vpack.c.bf16 %v22000_v18, %v22001_v25  ;;  %v7877_v1 = vrot.slane %v7869_v35, %v18896_v46  ;;  %9359 = vmatprep.subr.bf16.mxu0 %v8327_v32  ;;  %9585 = vmatprep.subr.bf16.mxu1 %v8329_v27  ;;  %v22016_v35 = vld [vmem:[#allocation242_spill] sm:$0xff]  ;;  %v22025_v32 = vld [vmem:[#allocation241_spill] sm:$0xff] }
 0x790   :  { %v8326_v59 = vmax.bf16 %v20642_v42, %v8198_v24  ;;  %v8328_v37 = vmax.bf16 %v20642_v42, %v8200_v6  ;;  %v7865_v14 = vrot.slane %v7857_v43, %v18896_v46  ;;  %v8331_v33 = vmax.bf16 %v20642_v42, %v8203_v34  ;;  %9309 = vmatmul.mubr.bf16.gmra.mrb[180].mxu0 %v14121_v3  ;;  %v22019_v24 = vld [vmem:[#allocation243_spill] sm:$0xff]  ;;  %v22022_v34 = vld [vmem:[#allocation240_spill] sm:$0xff] }
 0x791   :  { %v8202_v63 = vadd.bf16 %v12965_v7, %v21999_v15  ;;  %v8204_v48 = vadd.bf16 %v12965_v7, %v22002_v47  ;;  %v22005_v22 = vpack.c.bf16 %v22003_v38, %v22004_v16  ;;  %v22008_v12 = vpack.c.bf16 %v22006_v17, %v22007_v57  ;;  %9535 = vmatmul.mubr.bf16.gmra.mrb[180].mxu1 %v14121_v3  ;;  %v14124_v41 = vld [vmem:[%s20098_s6 + $0xc0] ss:$16 sps:$4 sm:$0xff]   ;;  %v14129_v11 = vld [vmem:[%s20098_s6 + $0xe4] ss:$16 sps:$4 sm:$0xff]  }
 0x792   :  { %v8333_v21 = vmax.bf16 %v20642_v42, %v8205_v40  ;;  %v7901_v29 = vrot.slane %v7893_v4, %v18896_v46  ;;  %9360 = vmatpush1.bf16.msra.mxu0 %v8326_v59  ;;  %9586 = vmatpush1.bf16.msra.mxu1 %v8328_v37  ;;  %v7889_v52 = vrot.slane %v7881_v5, %v18896_v46  ;;  %v22027_v15 = vld [vmem:[#allocation254_spill] sm:$0xff]  ;;  %v22030_v47 = vld [vmem:[#allocation255_spill] sm:$0xff] }
 0x793   :  { %v8207_v7 = vadd.bf16 %v12966_v8, %v22005_v22  ;;  %v8209_v9 = vadd.bf16 %v12966_v8, %v22008_v12  ;;  %v8330_v19 = vmax.bf16 %v20642_v42, %v8202_v63  ;;  %v8332_v39 = vmax.bf16 %v20642_v42, %v8204_v48  ;;  %9361 = vmatprep.subr.bf16.mxu0 %v8331_v33  ;;  %v22028_v63 = vld [vmem:[#allocation250_spill] sm:$0xff]  ;;  %v22031_v48 = vld [vmem:[#allocation251_spill] sm:$0xff]  ;;  %v22033_v33 = vld [vmem:[#allocation252_spill] sm:$0xff] }
 0x794   :  { %9587 = vmatprep.subr.bf16.mxu1 %v8333_v21  ;;  %v22011_v51 = vpack.c.bf16 %v22009_v49, %v22010_v0  ;;  %v22014_v44 = vpack.c.bf16 %v22012_v10, %v22013_v2  ;;  %v22017_v20 = vpack.c.bf16 %v22015_v61, %v22016_v35  ;;  %9318 = vmatprep.mubr.bf16.mxu0 %v14126_v62  ;;  %v22036_v22 = vld [vmem:[#allocation253_spill] sm:$0xff]  ;;  %v22039_v12 = vld [vmem:[#allocation262_spill] sm:$0xff]  ;;  %v22043_v5 = vld [vmem:[#allocation259_spill] sm:$0xff] }
 0x795   :  { %9544 = vmatprep.mubr.bf16.mxu1 %v14126_v62  ;;  %v22020_v28 = vpack.c.bf16 %v22018_v13, %v22019_v24  ;;  %v12968_v45 = vcombine.low %v7865_v14, %v7877_v1  ;;  %v8335_v6 = vmax.bf16 %v20642_v42, %v8207_v7  ;;  %v8337_v31 = vmax.bf16 %v20642_v42, %v8209_v9  ;;  %v22034_v62 = vld [vmem:[#allocation248_spill] sm:$0xff]  ;;  %v22037_v7 = vld [vmem:[#allocation249_spill] sm:$0xff]  ;;  %v22040_v9 = vld [vmem:[#allocation258_spill] sm:$0xff] }
 0x796   :  { %v8206_v36 = vadd.bf16 %v12966_v8, %v22011_v51  ;;  %v8208_v60 = vadd.bf16 %v12966_v8, %v22014_v44  ;;  %v8211_v30 = vadd.bf16 %v12967_v54, %v22017_v20  ;;  %9362 = vmatpush1.bf16.msra.mxu0 %v8330_v19  ;;  %9588 = vmatpush1.bf16.msra.mxu1 %v8332_v39  ;;  %v22024_v8 = vld [vmem:[#allocation245_spill] sm:$0xff]  ;;  %v22045_v10 = vld [vmem:[#allocation260_spill] sm:$0xff] }
 0x797   :  { %v8213_v56 = vadd.bf16 %v12967_v54, %v22020_v28  ;;  %v22023_v43 = vpack.c.bf16 %v22021_v50, %v22022_v34  ;;  %v12969_v53 = vcombine.low %v7889_v52, %v7901_v29  ;;  %9363 = vmatprep.subr.bf16.mxu0 %v8335_v6  ;;  %9589 = vmatprep.subr.bf16.mxu1 %v8337_v31  ;;  %v22042_v29 = vld [vmem:[#allocation263_spill] sm:$0xff]  ;;  %v22046_v2 = vld [vmem:[#allocation256_spill] sm:$0xff]  ;;  %v22048_v61 = vld [vmem:[#allocation261_spill] sm:$0xff] }
 0x798   :  { %v8334_v23 = vmax.bf16 %v20642_v42, %v8206_v36  ;;  %v8336_v40 = vmax.bf16 %v20642_v42, %v8208_v60  ;;  %v22026_v27 = vpack.c.bf16 %v22024_v8, %v22025_v32  ;;  %v8339_v26 = vmax.bf16 %v20642_v42, %v8211_v30  ;;  %9319 = vmatmul.mubr.bf16.gmra.mrb[184].mxu0 %v14124_v41  ;;  %v14127_v0 = vld [vmem:[%s20098_s6 + $0xe0] ss:$16 sps:$4 sm:$0xff]   ;;  %v14132_v13 = vld [vmem:[%s20098_s6 + $0xc] ss:$16 sps:$4 sm:$0xff]   ;;  %v14130_v6 = vld [vmem:[%s20098_s6 + $0x8] ss:$16 sps:$4 sm:$0xff]  }
 0x799   :  { %v8210_v58 = vadd.bf16 %v12967_v54, %v22023_v43  ;;  %v22029_v18 = vpack.c.bf16 %v22027_v15, %v22028_v63  ;;  %v22032_v1 = vpack.c.bf16 %v22030_v47, %v22031_v48  ;;  %9545 = vmatmul.mubr.bf16.gmra.mrb[184].mxu1 %v14124_v41  ;;  %v8341_v37 = vmax.bf16 %v20642_v42, %v8213_v56  ;;  %v22049_v35 = vld [vmem:[#allocation257_spill] sm:$0xff]  ;;  %v14135_v31 = vld [vmem:[%s20098_s6 + $0x2c] ss:$16 sps:$4 sm:$0xff]   ;;  %v9741_v15 = vpop.permute.xlu1 %9740 }
 0x79a   :  { %v8212_v3 = vadd.bf16 %v12967_v54, %v22026_v27  ;;  %9364 = vmatpush1.bf16.msra.mxu0 %v8334_v23  ;;  %9590 = vmatpush1.bf16.msra.mxu1 %v8336_v40  ;;  %v22035_v38 = vpack.c.bf16 %v22033_v33, %v22034_v62  ;;  %v22038_v17 = vpack.c.bf16 %v22036_v22, %v22037_v7  ;;  %v14133_v41 = vld [vmem:[%s20098_s6 + $0x28] ss:$16 sps:$4 sm:$0xff]   ;;  %v14138_v50 = vld [vmem:[%s20098_s6 + $0x4c] ss:$16 sps:$4 sm:$0xff]  }
 0x79b   :  { %v8215_v25 = vadd.bf16 %v12968_v45, %v22029_v18  ;;  %v8217_v59 = vadd.bf16 %v12968_v45, %v22032_v1  ;;  %v8338_v54 = vmax.bf16 %v20642_v42, %v8210_v58  ;;  %9365 = vmatprep.subr.bf16.mxu0 %v8339_v26  ;;  %9591 = vmatprep.subr.bf16.mxu1 %v8341_v37  ;;  %v14136_v34 = vld [vmem:[%s20098_s6 + $0x48] ss:$16 sps:$4 sm:$0xff]   ;;  %v14141_v43 = vld [vmem:[%s20098_s6 + $0x6c] ss:$16 sps:$4 sm:$0xff]  }
 0x79c   :  { %v8340_v14 = vmax.bf16 %v20642_v42, %v8212_v3  ;;  %v8214_v16 = vadd.bf16 %v12968_v45, %v22035_v38  ;;  %v8216_v57 = vadd.bf16 %v12968_v45, %v22038_v17  ;;  %9328 = vmatprep.mubr.bf16.mxu0 %v14129_v11  ;;  %9554 = vmatprep.mubr.bf16.mxu1 %v14129_v11  ;;  %v14139_v58 = vld [vmem:[%s20098_s6 + $0x68] ss:$16 sps:$4 sm:$0xff]   ;;  %v14147_v40 = vld [vmem:[%s20098_s6 + $0xac] ss:$16 sps:$4 sm:$0xff]   ;;  %v9729_v11 = vpop.permute.xlu0 %9728 }
 0x79d   :  { %v22041_v4 = vpack.c.bf16 %v22039_v12, %v22040_v9  ;;  %v22044_v19 = vpack.c.bf16 %v22042_v29, %v22043_v5  ;;  %v8343_v52 = vmax.bf16 %v20642_v42, %v8215_v25  ;;  %v8345_v49 = vmax.bf16 %v20642_v42, %v8217_v59  ;;  %v14142_v23 = vld [vmem:[%s20098_s6 + $0x88] ss:$16 sps:$4 sm:$0xff]   ;;  %v14150_v32 = vld [vmem:[%s20098_s6 + $0xcc] ss:$16 sps:$4 sm:$0xff]   ;;  %v9765_v12 = vpop.permute.xlu1 %9764 }
 0x79e   :  { %9366 = vmatpush1.bf16.msra.mxu0 %v8338_v54  ;;  %9592 = vmatpush1.bf16.msra.mxu1 %v8340_v14  ;;  %v8342_v51 = vmax.bf16 %v20642_v42, %v8214_v16  ;;  %v8344_v36 = vmax.bf16 %v20642_v42, %v8216_v57  ;;  %v22047_v44 = vpack.c.bf16 %v22045_v10, %v22046_v2  ;;  %v14145_v8 = vld [vmem:[%s20098_s6 + $0xa8] ss:$16 sps:$4 sm:$0xff]   ;;  %v14153_v3 = vld [vmem:[%s20098_s6 + $0xec] ss:$16 sps:$4 sm:$0xff]  }
 0x79f   :  { %v8219_v21 = vadd.bf16 %v12969_v53, %v22041_v4  ;;  %v8221_v39 = vadd.bf16 %v12969_v53, %v22044_v19  ;;  %9367 = vmatprep.subr.bf16.mxu0 %v8343_v52  ;;  %9593 = vmatprep.subr.bf16.mxu1 %v8345_v49  ;;  %v22050_v20 = vpack.c.bf16 %v22048_v61, %v22049_v35  ;;  %v14148_v27 = vld [vmem:[%s20098_s6 + $0xc8] ss:$16 sps:$4 sm:$0xff]  }
 0x7a0   :  { %v8218_v60 = vadd.bf16 %v12969_v53, %v22047_v44  ;;  %9329 = vmatmul.mubr.bf16.gmra.mrb[188].mxu0 %v14127_v0  ;;  %v14151_v26 = vld [vmem:[%s20098_s6 + $0xe8] ss:$16 sps:$4 sm:$0xff]   ;;  %v9737_v63 = vrot.slane %v9729_v11, %v18896_v46  ;;  %v9749_v18 = vrot.slane %v9741_v15, %v18896_v46  ;;  %v9753_v57 = vpop.permute.xlu0 %9752  ;;  %v9773_v29 = vrot.slane %v9765_v12, %v18896_v46 }
 0x7a1   :  { %v8220_v30 = vadd.bf16 %v12969_v53, %v22050_v20  ;;  %9555 = vmatmul.mubr.bf16.gmra.mrb[188].mxu1 %v14127_v0  ;;  %v8347_v24 = vmax.bf16 %v20642_v42, %v8219_v21  ;;  %v8349_v28 = vmax.bf16 %v20642_v42, %v8221_v39  ;;  %9371 = vmatprep.mubr.bf16.mxu0 %v14132_v13  ;;  %v14144_v53 = vld [vmem:[%s20098_s6 + $0x8c] ss:$16 sps:$4 sm:$0xff]  }
 0x7a2   :  { %9368 = vmatpush1.bf16.msra.mxu0 %v8342_v51  ;;  %9594 = vmatpush1.bf16.msra.mxu1 %v8344_v36  ;;  %v8346_v56 = vmax.bf16 %v20642_v42, %v8218_v60  ;;  %v13038_v54 = vcombine.low %v9737_v63, %v9749_v18  ;;  %v9761_v21 = vrot.slane %v9753_v57, %v18896_v46 }
 0x7a3   :  { %9369 = vmatprep.subr.bf16.mxu0 %v8347_v24  ;;  %9595 = vmatprep.subr.bf16.mxu1 %v8349_v28  ;;  %v8348_v45 = vmax.bf16 %v20642_v42, %v8220_v30 }
 0x7a4   :  { %9597 = vmatprep.mubr.bf16.mxu1 %v14132_v13  ;;  %v13039_v44 = vcombine.low %v9761_v21, %v9773_v29 }
 0x7a6   :  { %9370 = vmatpush1.bf16.msra.mxu0 %v8346_v56  ;;  %9596 = vmatpush1.bf16.msra.mxu1 %v8348_v45  ;;  %v9777_v56 = vpop.permute.xlu0 %9776  ;;  %v9789_v45 = vpop.permute.xlu1 %9788 }
 0x7a9   :  { %9372 = vmatmul.mubr.bf16.vlgmr.msra.gmra.mrb[160].mxu0 %v14130_v6  ;;  %9598 = vmatmul.mubr.bf16.vlgmr.msra.gmra.mrb[160].mxu1 %v14130_v6 }
 0x7aa   :  { %9381 = vmatprep.mubr.bf16.mxu0 %v14135_v31  ;;  %9607 = vmatprep.mubr.bf16.mxu1 %v14135_v31 }
 0x7b1   :  { %9382 = vmatmul.mubr.bf16.gmra.mrb[164].mxu0 %v14133_v41  ;;  %9608 = vmatmul.mubr.bf16.gmra.mrb[164].mxu1 %v14133_v41  ;;  %v9785_v41 = vrot.slane %v9777_v56, %v18896_v46 }
 0x7b2   :  { %9391 = vmatprep.mubr.bf16.mxu0 %v14138_v50  ;;  %9617 = vmatprep.mubr.bf16.mxu1 %v14138_v50  ;;  %v9797_v50 = vrot.slane %v9789_v45, %v18896_v46 }
 0x7b9   :  { %9392 = vmatmul.mubr.bf16.gmra.mrb[168].mxu0 %v14136_v34  ;;  %9618 = vmatmul.mubr.bf16.gmra.mrb[168].mxu1 %v14136_v34 }
 0x7ba   :  { %9401 = vmatprep.mubr.bf16.mxu0 %v14141_v43  ;;  %9627 = vmatprep.mubr.bf16.mxu1 %v14141_v43 }
 0x7c1   :  { %9402 = vmatmul.mubr.bf16.gmra.mrb[172].mxu0 %v14139_v58  ;;  %9628 = vmatmul.mubr.bf16.gmra.mrb[172].mxu1 %v14139_v58 }
 0x7c2   :  { %9411 = vmatprep.mubr.bf16.mxu0 %v14144_v53  ;;  %9637 = vmatprep.mubr.bf16.mxu1 %v14144_v53 }
 0x7c9   :  { %9412 = vmatmul.mubr.bf16.gmra.mrb[176].mxu0 %v14142_v23  ;;  %9638 = vmatmul.mubr.bf16.gmra.mrb[176].mxu1 %v14142_v23 }
 0x7ca   :  { %9421 = vmatprep.mubr.bf16.mxu0 %v14147_v40  ;;  %9647 = vmatprep.mubr.bf16.mxu1 %v14147_v40 }
 0x7d1   :  { %9422 = vmatmul.mubr.bf16.gmra.mrb[180].mxu0 %v14145_v8  ;;  %9648 = vmatmul.mubr.bf16.gmra.mrb[180].mxu1 %v14145_v8 }
 0x7d2   :  { %9431 = vmatprep.mubr.bf16.mxu0 %v14150_v32  ;;  %9657 = vmatprep.mubr.bf16.mxu1 %v14150_v32 }
 0x7d9   :  { %9432 = vmatmul.mubr.bf16.gmra.mrb[184].mxu0 %v14148_v27  ;;  %9658 = vmatmul.mubr.bf16.gmra.mrb[184].mxu1 %v14148_v27 }
 0x7da   :  { %9441 = vmatprep.mubr.bf16.mxu0 %v14153_v3  ;;  %9667 = vmatprep.mubr.bf16.mxu1 %v14153_v3 }
 0x7e1   :  { %9442 = vmatmul.mubr.bf16.gmra.mrb[188].mxu0 %v14151_v26  ;;  %9668 = vmatmul.mubr.bf16.gmra.mrb[188].mxu1 %v14151_v26  ;;  %v13040_v26 = vcombine.low %v9785_v41, %v9797_v50 }
 0x7e2   :  { %10190 = vmatprep.mubr.bf16.mxu0 %v20642_v42  ;;  %10383 = vmatprep.mubr.bf16.mxu1 %v20642_v42 }
 0x87c   :  { %v9373_v25 = vpop.f32.mrb[160].mxu0  ;;  %v9599_v47 = vpop.f32.mrb[160].mxu1 }
 0x87d   :  { %v9375_v48 = vpop.f32.mrb[161].mxu0  ;;  %v9601_v1 = vpop.f32.mrb[161].mxu1 }
 0x87e   :  { %v9377_v59 = vpop.f32.mrb[162].mxu0  ;;  %v9603_v37 = vpop.f32.mrb[162].mxu1 }
 0x87f   :  { %v9678_v14 = vpack.c.bf16 %v9377_v59, %v9373_v25  ;;  %v9680_v33 = vpack.c.bf16 %v9603_v37, %v9599_v47  ;;  %v9379_v62 = vpop.f32.mrb[163].mxu0  ;;  %v9605_v38 = vpop.f32.mrb[163].mxu1 }
 0x880   :  { %v9679_v16 = vpack.c.bf16 %v9379_v62, %v9375_v48  ;;  %v9681_v22 = vpack.c.bf16 %v9605_v38, %v9601_v1  ;;  %v9801_v59 = vpop.permute.xlu0 %9800  ;;  %v9813_v37 = vpop.permute.xlu1 %9812 }
 0x881   :  { %v9966_v7 = vadd.bf16 %v13038_v54, %v9678_v14  ;;  %v9968_v17 = vadd.bf16 %v13038_v54, %v9680_v33  ;;  %v9809_v33 = vrot.slane %v9801_v59, %v18896_v46  ;;  %v9821_v62 = vrot.slane %v9813_v37, %v18896_v46 }
 0x882   :  { %v9967_v9 = vadd.bf16 %v13038_v54, %v9679_v16  ;;  %v9969_v4 = vadd.bf16 %v13038_v54, %v9681_v22 }
 0x883   :  { %v9998_v49 = vmax.bf16 %v20642_v42, %v9966_v7  ;;  %v10000_v0 = vmax.bf16 %v20642_v42, %v9968_v17  ;;  %v13041_v29 = vcombine.low %v9809_v33, %v9821_v62 }
 0x884   :  { %v9383_v5 = vpop.f32.mrb[164].mxu0  ;;  %v9609_v19 = vpop.f32.mrb[164].mxu1  ;;  %v9999_v39 = vmax.bf16 %v20642_v42, %v9967_v9  ;;  %v10001_v52 = vmax.bf16 %v20642_v42, %v9969_v4 }
 0x885   :  { %v9385_v51 = vpop.f32.mrb[165].mxu0  ;;  %v9611_v36 = vpop.f32.mrb[165].mxu1 }
 0x886   :  { %v9387_v10 = vpop.f32.mrb[166].mxu0  ;;  %v9613_v2 = vpop.f32.mrb[166].mxu1  ;;  %10158 = vmatprep.subr.bf16.mxu0 %v9999_v39  ;;  %10351 = vmatprep.subr.bf16.mxu1 %v10001_v52 }
 0x887   :  { %v9682_v60 = vpack.c.bf16 %v9387_v10, %v9383_v5  ;;  %v9684_v61 = vpack.c.bf16 %v9613_v2, %v9609_v19  ;;  %v9389_v35 = vpop.f32.mrb[167].mxu0  ;;  %v9615_v20 = vpop.f32.mrb[167].mxu1  ;;  %10159 = vmatpush1.bf16.msra.mxu0 %v9998_v49  ;;  %10352 = vmatpush1.bf16.msra.mxu1 %v10000_v0 }
 0x888   :  { %v9683_v30 = vpack.c.bf16 %v9389_v35, %v9385_v51  ;;  %v9685_v13 = vpack.c.bf16 %v9615_v20, %v9611_v36  ;;  %v9825_v10 = vpop.permute.xlu0 %9824  ;;  %v9837_v2 = vpop.permute.xlu1 %9836 }
 0x889   :  { %v9970_v24 = vadd.bf16 %v13039_v44, %v9682_v60  ;;  %v9972_v28 = vadd.bf16 %v13039_v44, %v9684_v61  ;;  %v9833_v61 = vrot.slane %v9825_v10, %v18896_v46  ;;  %v9845_v35 = vrot.slane %v9837_v2, %v18896_v46 }
 0x88a   :  { %v9971_v6 = vadd.bf16 %v13039_v44, %v9683_v30  ;;  %v9973_v31 = vadd.bf16 %v13039_v44, %v9685_v13 }
 0x88b   :  { %v10002_v23 = vmax.bf16 %v20642_v42, %v9970_v24  ;;  %v10004_v40 = vmax.bf16 %v20642_v42, %v9972_v28  ;;  %v13042_v50 = vcombine.low %v9833_v61, %v9845_v35 }
 0x88c   :  { %v9393_v34 = vpop.f32.mrb[168].mxu0  ;;  %v9619_v43 = vpop.f32.mrb[168].mxu1  ;;  %v10003_v58 = vmax.bf16 %v20642_v42, %v9971_v6  ;;  %v10005_v53 = vmax.bf16 %v20642_v42, %v9973_v31 }
 0x88d   :  { %v9395_v8 = vpop.f32.mrb[169].mxu0  ;;  %v9621_v32 = vpop.f32.mrb[169].mxu1 }
 0x88e   :  { %v9397_v27 = vpop.f32.mrb[170].mxu0  ;;  %v9623_v3 = vpop.f32.mrb[170].mxu1  ;;  %10160 = vmatprep.subr.bf16.mxu0 %v10003_v58  ;;  %10353 = vmatprep.subr.bf16.mxu1 %v10005_v53 }
 0x88f   :  { %v9686_v11 = vpack.c.bf16 %v9397_v27, %v9393_v34  ;;  %v9688_v15 = vpack.c.bf16 %v9623_v3, %v9619_v43  ;;  %v9399_v63 = vpop.f32.mrb[171].mxu0  ;;  %v9625_v18 = vpop.f32.mrb[171].mxu1  ;;  %10161 = vmatpush1.bf16.msra.mxu0 %v10002_v23  ;;  %10354 = vmatpush1.bf16.msra.mxu1 %v10004_v40 }
 0x890   :  { %v9687_v25 = vpack.c.bf16 %v9399_v63, %v9395_v8  ;;  %v9689_v47 = vpack.c.bf16 %v9625_v18, %v9621_v32  ;;  %v9849_v27 = vpop.permute.xlu0 %9848  ;;  %v9861_v3 = vpop.permute.xlu1 %9860 }
 0x891   :  { %v9974_v48 = vadd.bf16 %v13040_v26, %v9686_v11  ;;  %v9976_v1 = vadd.bf16 %v13040_v26, %v9688_v15  ;;  %v9857_v15 = vrot.slane %v9849_v27, %v18896_v46  ;;  %v9869_v63 = vrot.slane %v9861_v3, %v18896_v46 }
 0x892   :  { %v9975_v54 = vadd.bf16 %v13040_v26, %v9687_v25  ;;  %v9977_v14 = vadd.bf16 %v13040_v26, %v9689_v47 }
 0x893   :  { %v10006_v17 = vmax.bf16 %v20642_v42, %v9974_v48  ;;  %v10008_v57 = vmax.bf16 %v20642_v42, %v9976_v1  ;;  %v13043_v62 = vcombine.low %v9857_v15, %v9869_v63 }
 0x894   :  { %v9403_v38 = vpop.f32.mrb[172].mxu0  ;;  %v9629_v16 = vpop.f32.mrb[172].mxu1  ;;  %v10007_v22 = vmax.bf16 %v20642_v42, %v9975_v54  ;;  %v10009_v7 = vmax.bf16 %v20642_v42, %v9977_v14 }
 0x895   :  { %v9405_v12 = vpop.f32.mrb[173].mxu0  ;;  %v9631_v9 = vpop.f32.mrb[173].mxu1 }
 0x896   :  { %v9407_v4 = vpop.f32.mrb[174].mxu0  ;;  %v9633_v21 = vpop.f32.mrb[174].mxu1  ;;  %10162 = vmatprep.subr.bf16.mxu0 %v10007_v22  ;;  %10355 = vmatprep.subr.bf16.mxu1 %v10009_v7 }
 0x897   :  { %v9690_v5 = vpack.c.bf16 %v9407_v4, %v9403_v38  ;;  %v9692_v19 = vpack.c.bf16 %v9633_v21, %v9629_v16  ;;  %v9409_v39 = vpop.f32.mrb[175].mxu0  ;;  %v9635_v52 = vpop.f32.mrb[175].mxu1  ;;  %10163 = vmatpush1.bf16.msra.mxu0 %v10006_v17  ;;  %10356 = vmatpush1.bf16.msra.mxu1 %v10008_v57 }
 0x898   :  { %v9691_v49 = vpack.c.bf16 %v9409_v39, %v9405_v12  ;;  %v9693_v0 = vpack.c.bf16 %v9635_v52, %v9631_v9  ;;  %v9873_v4 = vpop.permute.xlu0 %9872  ;;  %v9885_v21 = vpop.permute.xlu1 %9884 }
 0x899   :  { %v9978_v51 = vadd.bf16 %v13041_v29, %v9690_v5  ;;  %v9980_v36 = vadd.bf16 %v13041_v29, %v9692_v19  ;;  %v9881_v19 = vrot.slane %v9873_v4, %v18896_v46  ;;  %v9893_v39 = vrot.slane %v9885_v21, %v18896_v46  ;;  %v14159_v4 = vld [vmem:[%s20099_s9 + $0x28] sm:$0xff]   ;;  %v14160_v21 = vld [vmem:[%s20099_s9 + $0x30] sm:$0xff]  }
 0x89a   :  { %v9979_v44 = vadd.bf16 %v13041_v29, %v9691_v49  ;;  %v9981_v60 = vadd.bf16 %v13041_v29, %v9693_v0 }
 0x89b   :  { %v10010_v28 = vmax.bf16 %v20642_v42, %v9978_v51  ;;  %v10012_v56 = vmax.bf16 %v20642_v42, %v9980_v36  ;;  %v13044_v35 = vcombine.low %v9881_v19, %v9893_v39  ;;  %v14163_v19 = vld [vmem:[%s20099_s9 + $0x48] sm:$0xff]   ;;  %v14164_v39 = vld [vmem:[%s20099_s9 + $0x50] sm:$0xff]  }
 0x89c   :  { %v9413_v20 = vpop.f32.mrb[176].mxu0  ;;  %v9639_v30 = vpop.f32.mrb[176].mxu1  ;;  %v10011_v13 = vmax.bf16 %v20642_v42, %v9979_v44  ;;  %v10013_v24 = vmax.bf16 %v20642_v42, %v9981_v60 }
 0x89d   :  { %v9415_v45 = vpop.f32.mrb[177].mxu0  ;;  %v9641_v6 = vpop.f32.mrb[177].mxu1 }
 0x89e   :  { %v9417_v31 = vpop.f32.mrb[178].mxu0  ;;  %v9643_v41 = vpop.f32.mrb[178].mxu1  ;;  %10164 = vmatprep.subr.bf16.mxu0 %v10011_v13  ;;  %10357 = vmatprep.subr.bf16.mxu1 %v10013_v24 }
 0x89f   :  { %v9694_v34 = vpack.c.bf16 %v9417_v31, %v9413_v20  ;;  %v9696_v43 = vpack.c.bf16 %v9643_v41, %v9639_v30  ;;  %v9419_v58 = vpop.f32.mrb[179].mxu0  ;;  %v9645_v53 = vpop.f32.mrb[179].mxu1  ;;  %10165 = vmatpush1.bf16.msra.mxu0 %v10010_v28  ;;  %10358 = vmatpush1.bf16.msra.mxu1 %v10012_v56 }
 0x8a0   :  { %v9695_v23 = vpack.c.bf16 %v9419_v58, %v9415_v45  ;;  %v9697_v40 = vpack.c.bf16 %v9645_v53, %v9641_v6  ;;  %v9897_v31 = vpop.permute.xlu0 %9896  ;;  %v9909_v41 = vpop.permute.xlu1 %9908 }
 0x8a1   :  { %v9982_v8 = vadd.bf16 %v13042_v50, %v9694_v34  ;;  %v9984_v32 = vadd.bf16 %v13042_v50, %v9696_v43  ;;  %v9905_v43 = vrot.slane %v9897_v31, %v18896_v46  ;;  %v9917_v58 = vrot.slane %v9909_v41, %v18896_v46 }
 0x8a2   :  { %v9983_v26 = vadd.bf16 %v13042_v50, %v9695_v23  ;;  %v9985_v11 = vadd.bf16 %v13042_v50, %v9697_v40 }
 0x8a3   :  { %v10014_v1 = vmax.bf16 %v20642_v42, %v9982_v8  ;;  %v10016_v59 = vmax.bf16 %v20642_v42, %v9984_v32  ;;  %v13045_v63 = vcombine.low %v9905_v43, %v9917_v58  ;;  %v14172_v58 = vld [vmem:[%s20100_s11 + $0x4] ss:$8 sps:$4 sm:$0xff]  }
 0x8a4   :  { %v9423_v18 = vpop.f32.mrb[180].mxu0  ;;  %v9649_v25 = vpop.f32.mrb[180].mxu1  ;;  %v10015_v47 = vmax.bf16 %v20642_v42, %v9983_v26  ;;  %v10017_v48 = vmax.bf16 %v20642_v42, %v9985_v11 }
 0x8a5   :  { %v9425_v37 = vpop.f32.mrb[181].mxu0  ;;  %v9651_v54 = vpop.f32.mrb[181].mxu1 }
 0x8a6   :  { %v9427_v14 = vpop.f32.mrb[182].mxu0  ;;  %v9653_v33 = vpop.f32.mrb[182].mxu1  ;;  %10166 = vmatprep.subr.bf16.mxu0 %v10015_v47  ;;  %10359 = vmatprep.subr.bf16.mxu1 %v10017_v48 }
 0x8a7   :  { %v9698_v38 = vpack.c.bf16 %v9427_v14, %v9423_v18  ;;  %v9700_v16 = vpack.c.bf16 %v9653_v33, %v9649_v25  ;;  %v9429_v22 = vpop.f32.mrb[183].mxu0  ;;  %v9655_v7 = vpop.f32.mrb[183].mxu1  ;;  %10167 = vmatpush1.bf16.msra.mxu0 %v10014_v1  ;;  %10360 = vmatpush1.bf16.msra.mxu1 %v10016_v59 }
 0x8a8   :  { %v9699_v17 = vpack.c.bf16 %v9429_v22, %v9425_v37  ;;  %v9701_v57 = vpack.c.bf16 %v9655_v7, %v9651_v54  ;;  %v14154_v7 = vld [vmem:[%s20099_s9] sm:$0xff]  }
 0x8a9   :  { %v9986_v12 = vadd.bf16 %v13043_v62, %v9698_v38  ;;  %v9988_v9 = vadd.bf16 %v13043_v62, %v9700_v16 }
 0x8aa   :  { %v9987_v29 = vadd.bf16 %v13043_v62, %v9699_v17  ;;  %v9989_v5 = vadd.bf16 %v13043_v62, %v9701_v57  ;;  %v14155_v17 = vld [vmem:[%s20099_s9 + $0x8] sm:$0xff]   ;;  %v14156_v57 = vld [vmem:[%s20099_s9 + $0x10] sm:$0xff]  }
 0x8ab   :  { %v10018_v36 = vmax.bf16 %v20642_v42, %v9986_v12  ;;  %v10020_v10 = vmax.bf16 %v20642_v42, %v9988_v9  ;;  %v14157_v12 = vld [vmem:[%s20099_s9 + $0x18] sm:$0xff]   ;;  %v14158_v9 = vld [vmem:[%s20099_s9 + $0x20] sm:$0xff]  }
 0x8ac   :  { %v9433_v52 = vpop.f32.mrb[184].mxu0  ;;  %v9659_v49 = vpop.f32.mrb[184].mxu1  ;;  %v10019_v0 = vmax.bf16 %v20642_v42, %v9987_v29  ;;  %v10021_v51 = vmax.bf16 %v20642_v42, %v9989_v5  ;;  %v14161_v29 = vld [vmem:[%s20099_s9 + $0x38] sm:$0xff]   ;;  %v14162_v5 = vld [vmem:[%s20099_s9 + $0x40] sm:$0xff]  }
 0x8ad   :  { %v9435_v2 = vpop.f32.mrb[185].mxu0  ;;  %v9661_v44 = vpop.f32.mrb[185].mxu1 }
 0x8ae   :  { %v9437_v60 = vpop.f32.mrb[186].mxu0  ;;  %v9663_v61 = vpop.f32.mrb[186].mxu1  ;;  %10168 = vmatprep.subr.bf16.mxu0 %v10019_v0  ;;  %10361 = vmatprep.subr.bf16.mxu1 %v10021_v51  ;;  %v14167_v0 = vld [vmem:[%s20099_s9 + $0x68] sm:$0xff]   ;;  %v14168_v51 = vld [vmem:[%s20099_s9 + $0x70] sm:$0xff]  }
 0x8af   :  { %v9702_v20 = vpack.c.bf16 %v9437_v60, %v9433_v52  ;;  %v9704_v30 = vpack.c.bf16 %v9663_v61, %v9659_v49  ;;  %v9439_v13 = vpop.f32.mrb[187].mxu0  ;;  %v9665_v24 = vpop.f32.mrb[187].mxu1  ;;  %10169 = vmatpush1.bf16.msra.mxu0 %v10018_v36  ;;  %10362 = vmatpush1.bf16.msra.mxu1 %v10020_v10  ;;  %v14165_v52 = vld [vmem:[%s20099_s9 + $0x58] sm:$0xff]   ;;  %v14166_v49 = vld [vmem:[%s20099_s9 + $0x60] sm:$0xff]  }
 0x8b0   :  { %v9703_v28 = vpack.c.bf16 %v9439_v13, %v9435_v2  ;;  %v9705_v56 = vpack.c.bf16 %v9665_v24, %v9661_v44  ;;  %v14169_v36 = vld [vmem:[%s20099_s9 + $0x78] sm:$0xff]   ;;  %v10643_v10 = vpop.permute.xlu0 %10642  ;;  %v10655_v2 = vpop.permute.xlu1 %10654 }
 0x8b1   :  { %v9990_v45 = vadd.bf16 %v13044_v35, %v9702_v20  ;;  %v9992_v6 = vadd.bf16 %v13044_v35, %v9704_v30  ;;  %v10651_v44 = vrot.slane %v10643_v10, %v18896_v46  ;;  %v10663_v60 = vrot.slane %v10655_v2, %v18896_v46 }
 0x8b2   :  { %v9991_v50 = vadd.bf16 %v13044_v35, %v9703_v28  ;;  %v9993_v34 = vadd.bf16 %v13044_v35, %v9705_v56 }
 0x8b3   :  { %v10022_v32 = vmax.bf16 %v20642_v42, %v9990_v45  ;;  %v10024_v27 = vmax.bf16 %v20642_v42, %v9992_v6  ;;  %v13062_v28 = vcombine.low %v10651_v44, %v10663_v60 }
 0x8b4   :  { %v9443_v53 = vpop.f32.mrb[188].mxu0  ;;  %v9669_v23 = vpop.f32.mrb[188].mxu1  ;;  %v10023_v40 = vmax.bf16 %v20642_v42, %v9991_v50  ;;  %v10025_v8 = vmax.bf16 %v20642_v42, %v9993_v34 }
 0x8b5   :  { %v9445_v3 = vpop.f32.mrb[189].mxu0  ;;  %v9671_v26 = vpop.f32.mrb[189].mxu1 }
 0x8b6   :  { %v9447_v11 = vpop.f32.mrb[190].mxu0  ;;  %v9673_v15 = vpop.f32.mrb[190].mxu1  ;;  %10170 = vmatprep.subr.bf16.mxu0 %v10023_v40  ;;  %10363 = vmatprep.subr.bf16.mxu1 %v10025_v8 }
 0x8b7   :  { %v9706_v18 = vpack.c.bf16 %v9447_v11, %v9443_v53  ;;  %v9708_v25 = vpack.c.bf16 %v9673_v15, %v9669_v23  ;;  %v9449_v47 = vpop.f32.mrb[191].mxu0  ;;  %v9675_v48 = vpop.f32.mrb[191].mxu1  ;;  %10171 = vmatpush1.bf16.msra.mxu0 %v10022_v32  ;;  %10364 = vmatpush1.bf16.msra.mxu1 %v10024_v27 }
 0x8b8   :  { %v9707_v1 = vpack.c.bf16 %v9449_v47, %v9445_v3  ;;  %v9709_v59 = vpack.c.bf16 %v9675_v48, %v9671_v26  ;;  %v10667_v53 = vpop.permute.xlu0 %10666  ;;  %v10679_v23 = vpop.permute.xlu1 %10678 }
 0x8b9   :  { %v9994_v37 = vadd.bf16 %v13045_v63, %v9706_v18  ;;  %v9996_v54 = vadd.bf16 %v13045_v63, %v9708_v25  ;;  %v10675_v32 = vrot.slane %v10667_v53, %v18896_v46  ;;  %v10687_v27 = vrot.slane %v10679_v23, %v18896_v46 }
 0x8ba   :  { %v9995_v14 = vadd.bf16 %v13045_v63, %v9707_v1  ;;  %v9997_v33 = vadd.bf16 %v13045_v63, %v9709_v59 }
 0x8bb   :  { %v10026_v16 = vmax.bf16 %v20642_v42, %v9994_v37  ;;  %v10028_v22 = vmax.bf16 %v20642_v42, %v9996_v54  ;;  %v13063_v59 = vcombine.low %v10675_v32, %v10687_v27 }
 0x8bc   :  { %v10027_v62 = vmax.bf16 %v20642_v42, %v9995_v14  ;;  %v10029_v38 = vmax.bf16 %v20642_v42, %v9997_v33 }
 0x8be   :  { %10172 = vmatprep.subr.bf16.mxu0 %v10027_v62  ;;  %10365 = vmatprep.subr.bf16.mxu1 %v10029_v38 }
 0x8bf   :  { %10173 = vmatpush1.bf16.msra.mxu0 %v10026_v16  ;;  %10366 = vmatpush1.bf16.msra.mxu1 %v10028_v22 }
 0x8c2   :  { %10191 = vmatmul.mubr.bf16.vlgmr.msra.gmra.mrb[192].mxu0 %v14154_v7  ;;  %10384 = vmatmul.mubr.bf16.vlgmr.msra.gmra.mrb[192].mxu1 %v14154_v7  ;;  %v10691_v7 = vpop.permute.xlu0 %10690 }
 0x8c3   :  { %10200 = vmatprep.mubr.bf16.mxu0 %v20642_v42  ;;  %10393 = vmatprep.mubr.bf16.mxu1 %v20642_v42 }
 0x8ca   :  { %10201 = vmatmul.mubr.bf16.gmra.mrb[196].mxu0 %v14155_v17  ;;  %10394 = vmatmul.mubr.bf16.gmra.mrb[196].mxu1 %v14155_v17  ;;  %v10703_v17 = vpop.permute.xlu1 %10702 }
 0x8cb   :  { %10210 = vmatprep.mubr.bf16.mxu0 %v20642_v42  ;;  %10403 = vmatprep.mubr.bf16.mxu1 %v20642_v42 }
 0x8d2   :  { %10211 = vmatmul.mubr.bf16.gmra.mrb[200].mxu0 %v14156_v57  ;;  %10404 = vmatmul.mubr.bf16.gmra.mrb[200].mxu1 %v14156_v57 }
 0x8d3   :  { %10220 = vmatprep.mubr.bf16.mxu0 %v20642_v42  ;;  %10413 = vmatprep.mubr.bf16.mxu1 %v20642_v42 }
 0x8da   :  { %10221 = vmatmul.mubr.bf16.gmra.mrb[204].mxu0 %v14157_v12  ;;  %10414 = vmatmul.mubr.bf16.gmra.mrb[204].mxu1 %v14157_v12 }
 0x8db   :  { %10230 = vmatprep.mubr.bf16.mxu0 %v20642_v42  ;;  %10423 = vmatprep.mubr.bf16.mxu1 %v20642_v42 }
 0x8e2   :  { %10231 = vmatmul.mubr.bf16.gmra.mrb[208].mxu0 %v14158_v9  ;;  %10424 = vmatmul.mubr.bf16.gmra.mrb[208].mxu1 %v14158_v9  ;;  %v10699_v9 = vrot.slane %v10691_v7, %v18896_v46 }
 0x8e3   :  { %10240 = vmatprep.mubr.bf16.mxu0 %v20642_v42  ;;  %10433 = vmatprep.mubr.bf16.mxu1 %v20642_v42 }
 0x8ea   :  { %10241 = vmatmul.mubr.bf16.gmra.mrb[212].mxu0 %v14159_v4  ;;  %10434 = vmatmul.mubr.bf16.gmra.mrb[212].mxu1 %v14159_v4  ;;  %v10711_v4 = vrot.slane %v10703_v17, %v18896_v46 }
 0x8eb   :  { %10250 = vmatprep.mubr.bf16.mxu0 %v20642_v42  ;;  %10443 = vmatprep.mubr.bf16.mxu1 %v20642_v42 }
 0x8ec   :  { %v13064_v10 = vcombine.low %v10699_v9, %v10711_v4 }
 0x8f2   :  { %10251 = vmatmul.mubr.bf16.gmra.mrb[216].mxu0 %v14160_v21  ;;  %10444 = vmatmul.mubr.bf16.gmra.mrb[216].mxu1 %v14160_v21 }
 0x8f3   :  { %10260 = vmatprep.mubr.bf16.mxu0 %v20642_v42  ;;  %10453 = vmatprep.mubr.bf16.mxu1 %v20642_v42 }
 0x8fa   :  { %10261 = vmatmul.mubr.bf16.gmra.mrb[220].mxu0 %v14161_v29  ;;  %10454 = vmatmul.mubr.bf16.gmra.mrb[220].mxu1 %v14161_v29 }
 0x8fb   :  { %10270 = vmatprep.mubr.bf16.mxu0 %v20642_v42  ;;  %10463 = vmatprep.mubr.bf16.mxu1 %v20642_v42 }
 0x902   :  { %10271 = vmatmul.mubr.bf16.gmra.mrb[224].mxu0 %v14162_v5  ;;  %10464 = vmatmul.mubr.bf16.gmra.mrb[224].mxu1 %v14162_v5 }
 0x903   :  { %10280 = vmatprep.mubr.bf16.mxu0 %v20642_v42  ;;  %10473 = vmatprep.mubr.bf16.mxu1 %v20642_v42 }
 0x90a   :  { %10281 = vmatmul.mubr.bf16.gmra.mrb[228].mxu0 %v14163_v19  ;;  %10474 = vmatmul.mubr.bf16.gmra.mrb[228].mxu1 %v14163_v19 }
 0x90b   :  { %10290 = vmatprep.mubr.bf16.mxu0 %v20642_v42  ;;  %10483 = vmatprep.mubr.bf16.mxu1 %v20642_v42 }
 0x912   :  { %10291 = vmatmul.mubr.bf16.gmra.mrb[232].mxu0 %v14164_v39  ;;  %10484 = vmatmul.mubr.bf16.gmra.mrb[232].mxu1 %v14164_v39 }
 0x913   :  { %10300 = vmatprep.mubr.bf16.mxu0 %v20642_v42  ;;  %10493 = vmatprep.mubr.bf16.mxu1 %v20642_v42 }
 0x91a   :  { %10301 = vmatmul.mubr.bf16.gmra.mrb[236].mxu0 %v14165_v52  ;;  %10494 = vmatmul.mubr.bf16.gmra.mrb[236].mxu1 %v14165_v52 }
 0x91b   :  { %10310 = vmatprep.mubr.bf16.mxu0 %v20642_v42  ;;  %10503 = vmatprep.mubr.bf16.mxu1 %v20642_v42 }
 0x922   :  { %10311 = vmatmul.mubr.bf16.gmra.mrb[240].mxu0 %v14166_v49  ;;  %10504 = vmatmul.mubr.bf16.gmra.mrb[240].mxu1 %v14166_v49 }
 0x923   :  { %10320 = vmatprep.mubr.bf16.mxu0 %v20642_v42  ;;  %10513 = vmatprep.mubr.bf16.mxu1 %v20642_v42 }
 0x92a   :  { %10321 = vmatmul.mubr.bf16.gmra.mrb[244].mxu0 %v14167_v0  ;;  %10514 = vmatmul.mubr.bf16.gmra.mrb[244].mxu1 %v14167_v0 }
 0x92b   :  { %10330 = vmatprep.mubr.bf16.mxu0 %v20642_v42  ;;  %10523 = vmatprep.mubr.bf16.mxu1 %v20642_v42 }
 0x932   :  { %10331 = vmatmul.mubr.bf16.gmra.mrb[248].mxu0 %v14168_v51  ;;  %10524 = vmatmul.mubr.bf16.gmra.mrb[248].mxu1 %v14168_v51 }
 0x933   :  { %10340 = vmatprep.mubr.bf16.mxu0 %v20642_v42  ;;  %10533 = vmatprep.mubr.bf16.mxu1 %v20642_v42 }
 0x93a   :  { %10341 = vmatmul.mubr.bf16.gmra.mrb[252].mxu0 %v14169_v36  ;;  %10534 = vmatmul.mubr.bf16.gmra.mrb[252].mxu1 %v14169_v36 }
 0x93b   :  { %11376 = vmatprep.mubr.bf16.mxu0 %v14172_v58  ;;  %11489 = vmatprep.mubr.bf16.mxu1 %v14172_v58 }
 0x995   :  { %v10192_v61 = vpop.f32.mrb[192].mxu0  ;;  %v10385_v35 = vpop.f32.mrb[192].mxu1 }
 0x996   :  { %v10194_v20 = vpop.f32.mrb[193].mxu0  ;;  %v10387_v30 = vpop.f32.mrb[193].mxu1 }
 0x997   :  { %v10196_v13 = vpop.f32.mrb[194].mxu0  ;;  %v10389_v24 = vpop.f32.mrb[194].mxu1 }
 0x998   :  { %v10544_v56 = vpack.c.bf16 %v10196_v13, %v10192_v61  ;;  %v10546_v45 = vpack.c.bf16 %v10389_v24, %v10385_v35  ;;  %v10198_v6 = vpop.f32.mrb[195].mxu0  ;;  %v10391_v31 = vpop.f32.mrb[195].mxu1 }
 0x999   :  { %v10545_v41 = vpack.c.bf16 %v10198_v6, %v10194_v20  ;;  %v10547_v50 = vpack.c.bf16 %v10391_v31, %v10387_v30  ;;  %v10715_v24 = vpop.permute.xlu0 %10714 }
 0x99a   :  { %v11120_v34 = vadd.bf16 %v13062_v28, %v10544_v56  ;;  %v11122_v43 = vadd.bf16 %v13062_v28, %v10546_v45  ;;  %v10723_v6 = vrot.slane %v10715_v24, %v18896_v46 }
 0x99b   :  { %v11121_v40 = vadd.bf16 %v13062_v28, %v10545_v41  ;;  %v11123_v8 = vadd.bf16 %v13062_v28, %v10547_v50  ;;  %v10727_v28 = vpop.permute.xlu1 %10726 }
 0x99c   :  { %v11184_v63 = vmax.bf16 %v20642_v42, %v11120_v34  ;;  %v11186_v18 = vmax.bf16 %v20642_v42, %v11122_v43  ;;  %v10735_v31 = vrot.slane %v10727_v28, %v18896_v46 }
 0x99d   :  { %v10202_v3 = vpop.f32.mrb[196].mxu0  ;;  %v10395_v26 = vpop.f32.mrb[196].mxu1  ;;  %v11185_v11 = vmax.bf16 %v20642_v42, %v11121_v40  ;;  %v11187_v15 = vmax.bf16 %v20642_v42, %v11123_v8 }
 0x99e   :  { %v10204_v25 = vpop.f32.mrb[197].mxu0  ;;  %v10397_v47 = vpop.f32.mrb[197].mxu1  ;;  %v13065_v27 = vcombine.low %v10723_v6, %v10735_v31 }
 0x99f   :  { %v10206_v48 = vpop.f32.mrb[198].mxu0  ;;  %v10399_v1 = vpop.f32.mrb[198].mxu1  ;;  %11344 = vmatprep.subr.bf16.mxu0 %v11185_v11  ;;  %11457 = vmatprep.subr.bf16.mxu1 %v11187_v15 }
 0x9a0   :  { %v10548_v37 = vpack.c.bf16 %v10206_v48, %v10202_v3  ;;  %v10550_v54 = vpack.c.bf16 %v10399_v1, %v10395_v26  ;;  %v10208_v14 = vpop.f32.mrb[199].mxu0  ;;  %v10401_v33 = vpop.f32.mrb[199].mxu1  ;;  %11345 = vmatpush1.bf16.msra.mxu0 %v11184_v63  ;;  %11458 = vmatpush1.bf16.msra.mxu1 %v11186_v18 }
 0x9a1   :  { %v10549_v62 = vpack.c.bf16 %v10208_v14, %v10204_v25  ;;  %v10551_v38 = vpack.c.bf16 %v10401_v33, %v10397_v47  ;;  %v10739_v48 = vpop.permute.xlu0 %10738  ;;  %v10751_v1 = vpop.permute.xlu1 %10750 }
 0x9a2   :  { %v11124_v16 = vadd.bf16 %v13063_v59, %v10548_v37  ;;  %v11126_v22 = vadd.bf16 %v13063_v59, %v10550_v54  ;;  %v10747_v54 = vrot.slane %v10739_v48, %v18896_v46  ;;  %v10759_v14 = vrot.slane %v10751_v1, %v18896_v46 }
 0x9a3   :  { %v11125_v57 = vadd.bf16 %v13063_v59, %v10549_v62  ;;  %v11127_v12 = vadd.bf16 %v13063_v59, %v10551_v38 }
 0x9a4   :  { %v11188_v39 = vmax.bf16 %v20642_v42, %v11124_v16  ;;  %v11190_v52 = vmax.bf16 %v20642_v42, %v11126_v22  ;;  %v13066_v4 = vcombine.low %v10747_v54, %v10759_v14 }
 0x9a5   :  { %v10212_v21 = vpop.f32.mrb[200].mxu0  ;;  %v10405_v29 = vpop.f32.mrb[200].mxu1  ;;  %v11189_v5 = vmax.bf16 %v20642_v42, %v11125_v57  ;;  %v11191_v19 = vmax.bf16 %v20642_v42, %v11127_v12 }
 0x9a6   :  { %v10214_v49 = vpop.f32.mrb[201].mxu0  ;;  %v10407_v0 = vpop.f32.mrb[201].mxu1 }
 0x9a7   :  { %v10216_v51 = vpop.f32.mrb[202].mxu0  ;;  %v10409_v36 = vpop.f32.mrb[202].mxu1  ;;  %11346 = vmatprep.subr.bf16.mxu0 %v11189_v5  ;;  %11459 = vmatprep.subr.bf16.mxu1 %v11191_v19 }
 0x9a8   :  { %v10552_v2 = vpack.c.bf16 %v10216_v51, %v10212_v21  ;;  %v10554_v44 = vpack.c.bf16 %v10409_v36, %v10405_v29  ;;  %v10218_v60 = vpop.f32.mrb[203].mxu0  ;;  %v10411_v61 = vpop.f32.mrb[203].mxu1  ;;  %11347 = vmatpush1.bf16.msra.mxu0 %v11188_v39  ;;  %11460 = vmatpush1.bf16.msra.mxu1 %v11190_v52 }
 0x9a9   :  { %v10553_v35 = vpack.c.bf16 %v10218_v60, %v10214_v49  ;;  %v10555_v20 = vpack.c.bf16 %v10411_v61, %v10407_v0  ;;  %v10763_v51 = vpop.permute.xlu0 %10762  ;;  %v10775_v36 = vpop.permute.xlu1 %10774 }
 0x9aa   :  { %v11128_v30 = vadd.bf16 %v13064_v10, %v10552_v2  ;;  %v11130_v13 = vadd.bf16 %v13064_v10, %v10554_v44  ;;  %v10771_v44 = vrot.slane %v10763_v51, %v18896_v46  ;;  %v10783_v60 = vrot.slane %v10775_v36, %v18896_v46 }
 0x9ab   :  { %v11129_v56 = vadd.bf16 %v13064_v10, %v10553_v35  ;;  %v11131_v45 = vadd.bf16 %v13064_v10, %v10555_v20 }
 0x9ac   :  { %v11192_v58 = vmax.bf16 %v20642_v42, %v11128_v30  ;;  %v11194_v53 = vmax.bf16 %v20642_v42, %v11130_v13  ;;  %v13067_v31 = vcombine.low %v10771_v44, %v10783_v60 }
 0x9ad   :  { %v10222_v41 = vpop.f32.mrb[204].mxu0  ;;  %v10415_v50 = vpop.f32.mrb[204].mxu1  ;;  %v11193_v34 = vmax.bf16 %v20642_v42, %v11129_v56  ;;  %v11195_v43 = vmax.bf16 %v20642_v42, %v11131_v45 }
 0x9ae   :  { %v10224_v23 = vpop.f32.mrb[205].mxu0  ;;  %v10417_v40 = vpop.f32.mrb[205].mxu1 }
 0x9af   :  { %v10226_v8 = vpop.f32.mrb[206].mxu0  ;;  %v10419_v32 = vpop.f32.mrb[206].mxu1  ;;  %11348 = vmatprep.subr.bf16.mxu0 %v11193_v34  ;;  %11461 = vmatprep.subr.bf16.mxu1 %v11195_v43 }
 0x9b0   :  { %v10556_v3 = vpack.c.bf16 %v10226_v8, %v10222_v41  ;;  %v10558_v26 = vpack.c.bf16 %v10419_v32, %v10415_v50  ;;  %v10228_v11 = vpop.f32.mrb[207].mxu0  ;;  %v10421_v15 = vpop.f32.mrb[207].mxu1  ;;  %11349 = vmatpush1.bf16.msra.mxu0 %v11192_v58  ;;  %11462 = vmatpush1.bf16.msra.mxu1 %v11194_v53 }
 0x9b1   :  { %v10557_v63 = vpack.c.bf16 %v10228_v11, %v10224_v23  ;;  %v10559_v18 = vpack.c.bf16 %v10421_v15, %v10417_v40  ;;  %v10787_v8 = vpop.permute.xlu0 %10786  ;;  %v10799_v32 = vpop.permute.xlu1 %10798 }
 0x9b2   :  { %v11132_v25 = vadd.bf16 %v13065_v27, %v10556_v3  ;;  %v11134_v47 = vadd.bf16 %v13065_v27, %v10558_v26  ;;  %v10795_v26 = vrot.slane %v10787_v8, %v18896_v46  ;;  %v10807_v11 = vrot.slane %v10799_v32, %v18896_v46 }
 0x9b3   :  { %v11133_v59 = vadd.bf16 %v13065_v27, %v10557_v63  ;;  %v11135_v37 = vadd.bf16 %v13065_v27, %v10559_v18 }
 0x9b4   :  { %v11196_v22 = vmax.bf16 %v20642_v42, %v11132_v25  ;;  %v11198_v7 = vmax.bf16 %v20642_v42, %v11134_v47  ;;  %v13068_v14 = vcombine.low %v10795_v26, %v10807_v11 }
 0x9b5   :  { %v10232_v33 = vpop.f32.mrb[208].mxu0  ;;  %v10425_v62 = vpop.f32.mrb[208].mxu1  ;;  %v11197_v38 = vmax.bf16 %v20642_v42, %v11133_v59  ;;  %v11199_v16 = vmax.bf16 %v20642_v42, %v11135_v37 }
 0x9b6   :  { %v10234_v17 = vpop.f32.mrb[209].mxu0  ;;  %v10427_v57 = vpop.f32.mrb[209].mxu1 }
 0x9b7   :  { %v10236_v12 = vpop.f32.mrb[210].mxu0  ;;  %v10429_v9 = vpop.f32.mrb[210].mxu1  ;;  %11350 = vmatprep.subr.bf16.mxu0 %v11197_v38  ;;  %11463 = vmatprep.subr.bf16.mxu1 %v11199_v16 }
 0x9b8   :  { %v10560_v21 = vpack.c.bf16 %v10236_v12, %v10232_v33  ;;  %v10562_v29 = vpack.c.bf16 %v10429_v9, %v10425_v62  ;;  %v10238_v5 = vpop.f32.mrb[211].mxu0  ;;  %v10431_v19 = vpop.f32.mrb[211].mxu1  ;;  %11351 = vmatpush1.bf16.msra.mxu0 %v11196_v22  ;;  %11464 = vmatpush1.bf16.msra.mxu1 %v11198_v7 }
 0x9b9   :  { %v10561_v39 = vpack.c.bf16 %v10238_v5, %v10234_v17  ;;  %v10563_v52 = vpack.c.bf16 %v10431_v19, %v10427_v57  ;;  %v10811_v12 = vpop.permute.xlu0 %10810  ;;  %v10823_v9 = vpop.permute.xlu1 %10822 }
 0x9ba   :  { %v11136_v49 = vadd.bf16 %v13066_v4, %v10560_v21  ;;  %v11138_v0 = vadd.bf16 %v13066_v4, %v10562_v29  ;;  %v10819_v29 = vrot.slane %v10811_v12, %v18896_v46  ;;  %v10831_v5 = vrot.slane %v10823_v9, %v18896_v46 }
 0x9bb   :  { %v11137_v10 = vadd.bf16 %v13066_v4, %v10561_v39  ;;  %v11139_v2 = vadd.bf16 %v13066_v4, %v10563_v52 }
 0x9bc   :  { %v11200_v13 = vmax.bf16 %v20642_v42, %v11136_v49  ;;  %v11202_v24 = vmax.bf16 %v20642_v42, %v11138_v0  ;;  %v13069_v60 = vcombine.low %v10819_v29, %v10831_v5 }
 0x9bd   :  { %v10242_v61 = vpop.f32.mrb[212].mxu0  ;;  %v10435_v35 = vpop.f32.mrb[212].mxu1  ;;  %v11201_v20 = vmax.bf16 %v20642_v42, %v11137_v10  ;;  %v11203_v30 = vmax.bf16 %v20642_v42, %v11139_v2 }
 0x9be   :  { %v10244_v28 = vpop.f32.mrb[213].mxu0  ;;  %v10437_v56 = vpop.f32.mrb[213].mxu1 }
 0x9bf   :  { %v10246_v45 = vpop.f32.mrb[214].mxu0  ;;  %v10439_v6 = vpop.f32.mrb[214].mxu1  ;;  %11352 = vmatprep.subr.bf16.mxu0 %v11201_v20  ;;  %11465 = vmatprep.subr.bf16.mxu1 %v11203_v30 }
 0x9c0   :  { %v10564_v41 = vpack.c.bf16 %v10246_v45, %v10242_v61  ;;  %v10566_v50 = vpack.c.bf16 %v10439_v6, %v10435_v35  ;;  %v10248_v34 = vpop.f32.mrb[215].mxu0  ;;  %v10441_v43 = vpop.f32.mrb[215].mxu1  ;;  %11353 = vmatpush1.bf16.msra.mxu0 %v11200_v13  ;;  %11466 = vmatpush1.bf16.msra.mxu1 %v11202_v24 }
 0x9c1   :  { %v10565_v58 = vpack.c.bf16 %v10248_v34, %v10244_v28  ;;  %v10567_v53 = vpack.c.bf16 %v10441_v43, %v10437_v56  ;;  %v10835_v45 = vpop.permute.xlu0 %10834  ;;  %v10847_v6 = vpop.permute.xlu1 %10846 }
 0x9c2   :  { %v11140_v23 = vadd.bf16 %v13067_v31, %v10564_v41  ;;  %v11142_v40 = vadd.bf16 %v13067_v31, %v10566_v50  ;;  %v10843_v50 = vrot.slane %v10835_v45, %v18896_v46  ;;  %v10855_v34 = vrot.slane %v10847_v6, %v18896_v46 }
 0x9c3   :  { %v11141_v27 = vadd.bf16 %v13067_v31, %v10565_v58  ;;  %v11143_v3 = vadd.bf16 %v13067_v31, %v10567_v53 }
 0x9c4   :  { %v11204_v47 = vmax.bf16 %v20642_v42, %v11140_v23  ;;  %v11206_v48 = vmax.bf16 %v20642_v42, %v11142_v40  ;;  %v13070_v11 = vcombine.low %v10843_v50, %v10855_v34 }
 0x9c5   :  { %v10252_v15 = vpop.f32.mrb[216].mxu0  ;;  %v10445_v63 = vpop.f32.mrb[216].mxu1  ;;  %v11205_v18 = vmax.bf16 %v20642_v42, %v11141_v27  ;;  %v11207_v25 = vmax.bf16 %v20642_v42, %v11143_v3 }
 0x9c6   :  { %v10254_v1 = vpop.f32.mrb[217].mxu0  ;;  %v10447_v59 = vpop.f32.mrb[217].mxu1 }
 0x9c7   :  { %v10256_v37 = vpop.f32.mrb[218].mxu0  ;;  %v10449_v54 = vpop.f32.mrb[218].mxu1  ;;  %11354 = vmatprep.subr.bf16.mxu0 %v11205_v18  ;;  %11467 = vmatprep.subr.bf16.mxu1 %v11207_v25 }
 0x9c8   :  { %v10568_v33 = vpack.c.bf16 %v10256_v37, %v10252_v15  ;;  %v10570_v62 = vpack.c.bf16 %v10449_v54, %v10445_v63  ;;  %v10258_v38 = vpop.f32.mrb[219].mxu0  ;;  %v10451_v16 = vpop.f32.mrb[219].mxu1  ;;  %11355 = vmatpush1.bf16.msra.mxu0 %v11204_v47  ;;  %11468 = vmatpush1.bf16.msra.mxu1 %v11206_v48 }
 0x9c9   :  { %v10569_v22 = vpack.c.bf16 %v10258_v38, %v10254_v1  ;;  %v10571_v7 = vpack.c.bf16 %v10451_v16, %v10447_v59  ;;  %v10859_v37 = vpop.permute.xlu0 %10858  ;;  %v10871_v54 = vpop.permute.xlu1 %10870 }
 0x9ca   :  { %v11144_v17 = vadd.bf16 %v13068_v14, %v10568_v33  ;;  %v11146_v57 = vadd.bf16 %v13068_v14, %v10570_v62  ;;  %v10867_v62 = vrot.slane %v10859_v37, %v18896_v46  ;;  %v10879_v38 = vrot.slane %v10871_v54, %v18896_v46 }
 0x9cb   :  { %v11145_v4 = vadd.bf16 %v13068_v14, %v10569_v22  ;;  %v11147_v21 = vadd.bf16 %v13068_v14, %v10571_v7 }
 0x9cc   :  { %v11208_v0 = vmax.bf16 %v20642_v42, %v11144_v17  ;;  %v11210_v51 = vmax.bf16 %v20642_v42, %v11146_v57  ;;  %v13071_v5 = vcombine.low %v10867_v62, %v10879_v38 }
 0x9cd   :  { %v10262_v19 = vpop.f32.mrb[220].mxu0  ;;  %v10455_v39 = vpop.f32.mrb[220].mxu1  ;;  %v11209_v52 = vmax.bf16 %v20642_v42, %v11145_v4  ;;  %v11211_v49 = vmax.bf16 %v20642_v42, %v11147_v21 }
 0x9ce   :  { %v10264_v36 = vpop.f32.mrb[221].mxu0  ;;  %v10457_v10 = vpop.f32.mrb[221].mxu1 }
 0x9cf   :  { %v10266_v2 = vpop.f32.mrb[222].mxu0  ;;  %v10459_v44 = vpop.f32.mrb[222].mxu1  ;;  %11356 = vmatprep.subr.bf16.mxu0 %v11209_v52  ;;  %11469 = vmatprep.subr.bf16.mxu1 %v11211_v49 }
 0x9d0   :  { %v10572_v61 = vpack.c.bf16 %v10266_v2, %v10262_v19  ;;  %v10574_v35 = vpack.c.bf16 %v10459_v44, %v10455_v39  ;;  %v10268_v20 = vpop.f32.mrb[223].mxu0  ;;  %v10461_v30 = vpop.f32.mrb[223].mxu1  ;;  %11357 = vmatpush1.bf16.msra.mxu0 %v11208_v0  ;;  %11470 = vmatpush1.bf16.msra.mxu1 %v11210_v51 }
 0x9d1   :  { %v10573_v13 = vpack.c.bf16 %v10268_v20, %v10264_v36  ;;  %v10575_v24 = vpack.c.bf16 %v10461_v30, %v10457_v10  ;;  %v10883_v2 = vpop.permute.xlu0 %10882  ;;  %v10895_v44 = vpop.permute.xlu1 %10894 }
 0x9d2   :  { %v11148_v28 = vadd.bf16 %v13069_v60, %v10572_v61  ;;  %v11150_v56 = vadd.bf16 %v13069_v60, %v10574_v35  ;;  %v10891_v35 = vrot.slane %v10883_v2, %v18896_v46  ;;  %v10903_v20 = vrot.slane %v10895_v44, %v18896_v46 }
 0x9d3   :  { %v11149_v31 = vadd.bf16 %v13069_v60, %v10573_v13  ;;  %v11151_v41 = vadd.bf16 %v13069_v60, %v10575_v24 }
 0x9d4   :  { %v11212_v40 = vmax.bf16 %v20642_v42, %v11148_v28  ;;  %v11214_v8 = vmax.bf16 %v20642_v42, %v11150_v56  ;;  %v13072_v34 = vcombine.low %v10891_v35, %v10903_v20 }
 0x9d5   :  { %v10272_v43 = vpop.f32.mrb[224].mxu0  ;;  %v10465_v58 = vpop.f32.mrb[224].mxu1  ;;  %v11213_v53 = vmax.bf16 %v20642_v42, %v11149_v31  ;;  %v11215_v23 = vmax.bf16 %v20642_v42, %v11151_v41 }
 0x9d6   :  { %v10274_v32 = vpop.f32.mrb[225].mxu0  ;;  %v10467_v27 = vpop.f32.mrb[225].mxu1 }
 0x9d7   :  { %v10276_v3 = vpop.f32.mrb[226].mxu0  ;;  %v10469_v26 = vpop.f32.mrb[226].mxu1  ;;  %11358 = vmatprep.subr.bf16.mxu0 %v11213_v53  ;;  %11471 = vmatprep.subr.bf16.mxu1 %v11215_v23 }
 0x9d8   :  { %v10576_v15 = vpack.c.bf16 %v10276_v3, %v10272_v43  ;;  %v10578_v63 = vpack.c.bf16 %v10469_v26, %v10465_v58  ;;  %v10278_v18 = vpop.f32.mrb[227].mxu0  ;;  %v10471_v25 = vpop.f32.mrb[227].mxu1  ;;  %11359 = vmatpush1.bf16.msra.mxu0 %v11212_v40  ;;  %11472 = vmatpush1.bf16.msra.mxu1 %v11214_v8 }
 0x9d9   :  { %v10577_v47 = vpack.c.bf16 %v10278_v18, %v10274_v32  ;;  %v10579_v48 = vpack.c.bf16 %v10471_v25, %v10467_v27  ;;  %v10907_v3 = vpop.permute.xlu0 %10906  ;;  %v10919_v26 = vpop.permute.xlu1 %10918 }
 0x9da   :  { %v11152_v1 = vadd.bf16 %v13070_v11, %v10576_v15  ;;  %v11154_v59 = vadd.bf16 %v13070_v11, %v10578_v63  ;;  %v10915_v63 = vrot.slane %v10907_v3, %v18896_v46  ;;  %v10927_v18 = vrot.slane %v10919_v26, %v18896_v46 }
 0x9db   :  { %v11153_v14 = vadd.bf16 %v13070_v11, %v10577_v47  ;;  %v11155_v33 = vadd.bf16 %v13070_v11, %v10579_v48 }
 0x9dc   :  { %v11216_v57 = vmax.bf16 %v20642_v42, %v11152_v1  ;;  %v11218_v12 = vmax.bf16 %v20642_v42, %v11154_v59  ;;  %v13073_v38 = vcombine.low %v10915_v63, %v10927_v18 }
 0x9dd   :  { %v10282_v16 = vpop.f32.mrb[228].mxu0  ;;  %v10475_v22 = vpop.f32.mrb[228].mxu1  ;;  %v11217_v7 = vmax.bf16 %v20642_v42, %v11153_v14  ;;  %v11219_v17 = vmax.bf16 %v20642_v42, %v11155_v33 }
 0x9de   :  { %v10284_v9 = vpop.f32.mrb[229].mxu0  ;;  %v10477_v4 = vpop.f32.mrb[229].mxu1 }
 0x9df   :  { %v10286_v21 = vpop.f32.mrb[230].mxu0  ;;  %v10479_v29 = vpop.f32.mrb[230].mxu1  ;;  %11360 = vmatprep.subr.bf16.mxu0 %v11217_v7  ;;  %11473 = vmatprep.subr.bf16.mxu1 %v11219_v17 }
 0x9e0   :  { %v10580_v19 = vpack.c.bf16 %v10286_v21, %v10282_v16  ;;  %v10582_v39 = vpack.c.bf16 %v10479_v29, %v10475_v22  ;;  %v10288_v52 = vpop.f32.mrb[231].mxu0  ;;  %v10481_v49 = vpop.f32.mrb[231].mxu1  ;;  %11361 = vmatpush1.bf16.msra.mxu0 %v11216_v57  ;;  %11474 = vmatpush1.bf16.msra.mxu1 %v11218_v12 }
 0x9e1   :  { %v10581_v0 = vpack.c.bf16 %v10288_v52, %v10284_v9  ;;  %v10583_v51 = vpack.c.bf16 %v10481_v49, %v10477_v4  ;;  %v10931_v21 = vpop.permute.xlu0 %10930  ;;  %v10943_v29 = vpop.permute.xlu1 %10942 }
 0x9e2   :  { %v11156_v36 = vadd.bf16 %v13071_v5, %v10580_v19  ;;  %v11158_v10 = vadd.bf16 %v13071_v5, %v10582_v39  ;;  %v10939_v39 = vrot.slane %v10931_v21, %v18896_v46  ;;  %v10951_v52 = vrot.slane %v10943_v29, %v18896_v46 }
 0x9e3   :  { %v11157_v60 = vadd.bf16 %v13071_v5, %v10581_v0  ;;  %v11159_v61 = vadd.bf16 %v13071_v5, %v10583_v51 }
 0x9e4   :  { %v11220_v56 = vmax.bf16 %v20642_v42, %v11156_v36  ;;  %v11222_v45 = vmax.bf16 %v20642_v42, %v11158_v10  ;;  %v13074_v20 = vcombine.low %v10939_v39, %v10951_v52 }
 0x9e5   :  { %v10292_v30 = vpop.f32.mrb[232].mxu0  ;;  %v10485_v13 = vpop.f32.mrb[232].mxu1  ;;  %v11221_v24 = vmax.bf16 %v20642_v42, %v11157_v60  ;;  %v11223_v28 = vmax.bf16 %v20642_v42, %v11159_v61 }
 0x9e6   :  { %v10294_v6 = vpop.f32.mrb[233].mxu0  ;;  %v10487_v31 = vpop.f32.mrb[233].mxu1 }
 0x9e7   :  { %v10296_v41 = vpop.f32.mrb[234].mxu0  ;;  %v10489_v50 = vpop.f32.mrb[234].mxu1  ;;  %11362 = vmatprep.subr.bf16.mxu0 %v11221_v24  ;;  %11475 = vmatprep.subr.bf16.mxu1 %v11223_v28 }
 0x9e8   :  { %v10584_v43 = vpack.c.bf16 %v10296_v41, %v10292_v30  ;;  %v10586_v58 = vpack.c.bf16 %v10489_v50, %v10485_v13  ;;  %v10298_v53 = vpop.f32.mrb[235].mxu0  ;;  %v10491_v23 = vpop.f32.mrb[235].mxu1  ;;  %11363 = vmatpush1.bf16.msra.mxu0 %v11220_v56  ;;  %11476 = vmatpush1.bf16.msra.mxu1 %v11222_v45 }
 0x9e9   :  { %v10585_v40 = vpack.c.bf16 %v10298_v53, %v10294_v6  ;;  %v10587_v8 = vpack.c.bf16 %v10491_v23, %v10487_v31  ;;  %v10955_v41 = vpop.permute.xlu0 %10954  ;;  %v10967_v50 = vpop.permute.xlu1 %10966 }
 0x9ea   :  { %v11160_v32 = vadd.bf16 %v13072_v34, %v10584_v43  ;;  %v11162_v27 = vadd.bf16 %v13072_v34, %v10586_v58  ;;  %v10963_v58 = vrot.slane %v10955_v41, %v18896_v46  ;;  %v10975_v53 = vrot.slane %v10967_v50, %v18896_v46 }
 0x9eb   :  { %v11161_v11 = vadd.bf16 %v13072_v34, %v10585_v40  ;;  %v11163_v15 = vadd.bf16 %v13072_v34, %v10587_v8 }
 0x9ec   :  { %v11224_v59 = vmax.bf16 %v20642_v42, %v11160_v32  ;;  %v11226_v37 = vmax.bf16 %v20642_v42, %v11162_v27  ;;  %v13075_v18 = vcombine.low %v10963_v58, %v10975_v53 }
 0x9ed   :  { %v10302_v25 = vpop.f32.mrb[236].mxu0  ;;  %v10495_v47 = vpop.f32.mrb[236].mxu1  ;;  %v11225_v48 = vmax.bf16 %v20642_v42, %v11161_v11  ;;  %v11227_v1 = vmax.bf16 %v20642_v42, %v11163_v15 }
 0x9ee   :  { %v10304_v54 = vpop.f32.mrb[237].mxu0  ;;  %v10497_v14 = vpop.f32.mrb[237].mxu1 }
 0x9ef   :  { %v10306_v33 = vpop.f32.mrb[238].mxu0  ;;  %v10499_v62 = vpop.f32.mrb[238].mxu1  ;;  %11364 = vmatprep.subr.bf16.mxu0 %v11225_v48  ;;  %11477 = vmatprep.subr.bf16.mxu1 %v11227_v1 }
 0x9f0   :  { %v10588_v16 = vpack.c.bf16 %v10306_v33, %v10302_v25  ;;  %v10590_v22 = vpack.c.bf16 %v10499_v62, %v10495_v47  ;;  %v10308_v7 = vpop.f32.mrb[239].mxu0  ;;  %v10501_v17 = vpop.f32.mrb[239].mxu1  ;;  %11365 = vmatpush1.bf16.msra.mxu0 %v11224_v59  ;;  %11478 = vmatpush1.bf16.msra.mxu1 %v11226_v37 }
 0x9f1   :  { %v10589_v57 = vpack.c.bf16 %v10308_v7, %v10304_v54  ;;  %v10591_v12 = vpack.c.bf16 %v10501_v17, %v10497_v14  ;;  %v10979_v33 = vpop.permute.xlu0 %10978  ;;  %v10991_v62 = vpop.permute.xlu1 %10990 }
 0x9f2   :  { %v11164_v9 = vadd.bf16 %v13073_v38, %v10588_v16  ;;  %v11166_v4 = vadd.bf16 %v13073_v38, %v10590_v22  ;;  %v10987_v22 = vrot.slane %v10979_v33, %v18896_v46  ;;  %v10999_v7 = vrot.slane %v10991_v62, %v18896_v46  ;;  %v14181_v33 = vld [vmem:[%s20100_s11 + $0x34] ss:$8 sps:$4 sm:$0xff]   ;;  %v14179_v62 = vld [vmem:[%s20100_s11 + $0x30] ss:$8 sps:$4 sm:$0xff]  }
 0x9f3   :  { %v11165_v5 = vadd.bf16 %v13073_v38, %v10589_v57  ;;  %v11167_v19 = vadd.bf16 %v13073_v38, %v10591_v12 }
 0x9f4   :  { %v11228_v10 = vmax.bf16 %v20642_v42, %v11164_v9  ;;  %v11230_v2 = vmax.bf16 %v20642_v42, %v11166_v4  ;;  %v13076_v52 = vcombine.low %v10987_v22, %v10999_v7  ;;  %v14187_v22 = vld [vmem:[%s20100_s11 + $0x54] ss:$8 sps:$4 sm:$0xff]   ;;  %v14185_v7 = vld [vmem:[%s20100_s11 + $0x50] ss:$8 sps:$4 sm:$0xff]  }
 0x9f5   :  { %v10312_v49 = vpop.f32.mrb[240].mxu0  ;;  %v10505_v0 = vpop.f32.mrb[240].mxu1  ;;  %v11229_v51 = vmax.bf16 %v20642_v42, %v11165_v5  ;;  %v11231_v36 = vmax.bf16 %v20642_v42, %v11167_v19 }
 0x9f6   :  { %v10314_v44 = vpop.f32.mrb[241].mxu0  ;;  %v10507_v60 = vpop.f32.mrb[241].mxu1 }
 0x9f7   :  { %v10316_v61 = vpop.f32.mrb[242].mxu0  ;;  %v10509_v35 = vpop.f32.mrb[242].mxu1  ;;  %11366 = vmatprep.subr.bf16.mxu0 %v11229_v51  ;;  %11479 = vmatprep.subr.bf16.mxu1 %v11231_v36 }
 0x9f8   :  { %v10592_v30 = vpack.c.bf16 %v10316_v61, %v10312_v49  ;;  %v10594_v13 = vpack.c.bf16 %v10509_v35, %v10505_v0  ;;  %v10318_v24 = vpop.f32.mrb[243].mxu0  ;;  %v10511_v28 = vpop.f32.mrb[243].mxu1  ;;  %11367 = vmatpush1.bf16.msra.mxu0 %v11228_v10  ;;  %11480 = vmatpush1.bf16.msra.mxu1 %v11230_v2 }
 0x9f9   :  { %v10593_v56 = vpack.c.bf16 %v10318_v24, %v10314_v44  ;;  %v10595_v45 = vpack.c.bf16 %v10511_v28, %v10507_v60  ;;  %v11003_v61 = vpop.permute.xlu0 %11002  ;;  %v11015_v35 = vpop.permute.xlu1 %11014 }
 0x9fa   :  { %v11168_v6 = vadd.bf16 %v13074_v20, %v10592_v30  ;;  %v11170_v31 = vadd.bf16 %v13074_v20, %v10594_v13  ;;  %v11011_v13 = vrot.slane %v11003_v61, %v18896_v46  ;;  %v11023_v24 = vrot.slane %v11015_v35, %v18896_v46 }
 0x9fb   :  { %v11169_v34 = vadd.bf16 %v13074_v20, %v10593_v56  ;;  %v11171_v43 = vadd.bf16 %v13074_v20, %v10595_v45 }
 0x9fc   :  { %v11232_v27 = vmax.bf16 %v20642_v42, %v11168_v6  ;;  %v11234_v3 = vmax.bf16 %v20642_v42, %v11170_v31  ;;  %v13077_v53 = vcombine.low %v11011_v13, %v11023_v24 }
 0x9fd   :  { %v10322_v23 = vpop.f32.mrb[244].mxu0  ;;  %v10515_v40 = vpop.f32.mrb[244].mxu1  ;;  %v11233_v8 = vmax.bf16 %v20642_v42, %v11169_v34  ;;  %v11235_v32 = vmax.bf16 %v20642_v42, %v11171_v43 }
 0x9fe   :  { %v10324_v26 = vpop.f32.mrb[245].mxu0  ;;  %v10517_v11 = vpop.f32.mrb[245].mxu1 }
 0x9ff   :  { %v10326_v15 = vpop.f32.mrb[246].mxu0  ;;  %v10519_v63 = vpop.f32.mrb[246].mxu1  ;;  %11368 = vmatprep.subr.bf16.mxu0 %v11233_v8  ;;  %11481 = vmatprep.subr.bf16.mxu1 %v11235_v32 }
 0xa00   :  { %v10596_v25 = vpack.c.bf16 %v10326_v15, %v10322_v23  ;;  %v10598_v47 = vpack.c.bf16 %v10519_v63, %v10515_v40  ;;  %v10328_v48 = vpop.f32.mrb[247].mxu0  ;;  %v10521_v1 = vpop.f32.mrb[247].mxu1  ;;  %11369 = vmatpush1.bf16.msra.mxu0 %v11232_v27  ;;  %11482 = vmatpush1.bf16.msra.mxu1 %v11234_v3 }
 0xa01   :  { %v10597_v59 = vpack.c.bf16 %v10328_v48, %v10324_v26  ;;  %v10599_v37 = vpack.c.bf16 %v10521_v1, %v10517_v11  ;;  %v14170_v1 = vld [vmem:[%s20100_s11] ss:$8 sps:$4 sm:$0xff]  }
 0xa02   :  { %v11172_v54 = vadd.bf16 %v13075_v18, %v10596_v25  ;;  %v11174_v14 = vadd.bf16 %v13075_v18, %v10598_v47 }
 0xa03   :  { %v11173_v38 = vadd.bf16 %v13075_v18, %v10597_v59  ;;  %v11175_v16 = vadd.bf16 %v13075_v18, %v10599_v37  ;;  %v14175_v59 = vld [vmem:[%s20100_s11 + $0x14] ss:$8 sps:$4 sm:$0xff]   ;;  %v14173_v37 = vld [vmem:[%s20100_s11 + $0x10] ss:$8 sps:$4 sm:$0xff]  }
 0xa04   :  { %v11236_v4 = vmax.bf16 %v20642_v42, %v11172_v54  ;;  %v11238_v21 = vmax.bf16 %v20642_v42, %v11174_v14  ;;  %v14178_v54 = vld [vmem:[%s20100_s11 + $0x24] ss:$8 sps:$4 sm:$0xff]   ;;  %v14176_v14 = vld [vmem:[%s20100_s11 + $0x20] ss:$8 sps:$4 sm:$0xff]  }
 0xa05   :  { %v10332_v17 = vpop.f32.mrb[248].mxu0  ;;  %v10525_v57 = vpop.f32.mrb[248].mxu1  ;;  %v11237_v12 = vmax.bf16 %v20642_v42, %v11173_v38  ;;  %v11239_v9 = vmax.bf16 %v20642_v42, %v11175_v16  ;;  %v14184_v38 = vld [vmem:[%s20100_s11 + $0x44] ss:$8 sps:$4 sm:$0xff]   ;;  %v14182_v16 = vld [vmem:[%s20100_s11 + $0x40] ss:$8 sps:$4 sm:$0xff]  }
 0xa06   :  { %v10334_v29 = vpop.f32.mrb[249].mxu0  ;;  %v10527_v5 = vpop.f32.mrb[249].mxu1 }
 0xa07   :  { %v10336_v19 = vpop.f32.mrb[250].mxu0  ;;  %v10529_v39 = vpop.f32.mrb[250].mxu1  ;;  %11370 = vmatprep.subr.bf16.mxu0 %v11237_v12  ;;  %11483 = vmatprep.subr.bf16.mxu1 %v11239_v9  ;;  %v14193_v12 = vld [vmem:[%s20100_s11 + $0x74] ss:$8 sps:$4 sm:$0xff]   ;;  %v14191_v9 = vld [vmem:[%s20100_s11 + $0x70] ss:$8 sps:$4 sm:$0xff]  }
 0xa08   :  { %v10600_v49 = vpack.c.bf16 %v10336_v19, %v10332_v17  ;;  %v10602_v0 = vpack.c.bf16 %v10529_v39, %v10525_v57  ;;  %v10338_v51 = vpop.f32.mrb[251].mxu0  ;;  %v10531_v36 = vpop.f32.mrb[251].mxu1  ;;  %11371 = vmatpush1.bf16.msra.mxu0 %v11236_v4  ;;  %11484 = vmatpush1.bf16.msra.mxu1 %v11238_v21  ;;  %v14190_v17 = vld [vmem:[%s20100_s11 + $0x64] ss:$8 sps:$4 sm:$0xff]   ;;  %v14188_v57 = vld [vmem:[%s20100_s11 + $0x60] ss:$8 sps:$4 sm:$0xff]  }
 0xa09   :  { %v10601_v10 = vpack.c.bf16 %v10338_v51, %v10334_v29  ;;  %v10603_v2 = vpack.c.bf16 %v10531_v36, %v10527_v5  ;;  %v11621_v4 = vpop.permute.xlu0 %11620  ;;  %v11633_v21 = vpop.permute.xlu1 %11632 }
 0xa0a   :  { %v11176_v44 = vadd.bf16 %v13076_v52, %v10600_v49  ;;  %v11178_v60 = vadd.bf16 %v13076_v52, %v10602_v0  ;;  %v11629_v29 = vrot.slane %v11621_v4, %v18896_v46  ;;  %v11641_v5 = vrot.slane %v11633_v21, %v18896_v46 }
 0xa0b   :  { %v11177_v20 = vadd.bf16 %v13076_v52, %v10601_v10  ;;  %v11179_v30 = vadd.bf16 %v13076_v52, %v10603_v2 }
 0xa0c   :  { %v11240_v31 = vmax.bf16 %v20642_v42, %v11176_v44  ;;  %v11242_v41 = vmax.bf16 %v20642_v42, %v11178_v60  ;;  %v13094_v36 = vcombine.low %v11629_v29, %v11641_v5 }
 0xa0d   :  { %v10342_v28 = vpop.f32.mrb[252].mxu0  ;;  %v10535_v56 = vpop.f32.mrb[252].mxu1  ;;  %v11241_v45 = vmax.bf16 %v20642_v42, %v11177_v20  ;;  %v11243_v6 = vmax.bf16 %v20642_v42, %v11179_v30 }
 0xa0e   :  { %v10344_v50 = vpop.f32.mrb[253].mxu0  ;;  %v10537_v34 = vpop.f32.mrb[253].mxu1 }
 0xa0f   :  { %v10346_v43 = vpop.f32.mrb[254].mxu0  ;;  %v10539_v58 = vpop.f32.mrb[254].mxu1  ;;  %11372 = vmatprep.subr.bf16.mxu0 %v11241_v45  ;;  %11485 = vmatprep.subr.bf16.mxu1 %v11243_v6 }
 0xa10   :  { %v10604_v23 = vpack.c.bf16 %v10346_v43, %v10342_v28  ;;  %v10606_v40 = vpack.c.bf16 %v10539_v58, %v10535_v56  ;;  %v10348_v8 = vpop.f32.mrb[255].mxu0  ;;  %v10541_v32 = vpop.f32.mrb[255].mxu1  ;;  %11373 = vmatpush1.bf16.msra.mxu0 %v11240_v31  ;;  %11486 = vmatpush1.bf16.msra.mxu1 %v11242_v41 }
 0xa11   :  { %v10605_v27 = vpack.c.bf16 %v10348_v8, %v10344_v50  ;;  %v10607_v3 = vpack.c.bf16 %v10541_v32, %v10537_v34  ;;  %v11645_v13 = vpop.permute.xlu0 %11644  ;;  %v11657_v24 = vpop.permute.xlu1 %11656 }
 0xa12   :  { %v11180_v26 = vadd.bf16 %v13077_v53, %v10604_v23  ;;  %v11182_v11 = vadd.bf16 %v13077_v53, %v10606_v40  ;;  %v11653_v45 = vrot.slane %v11645_v13, %v18896_v46  ;;  %v11665_v6 = vrot.slane %v11657_v24, %v18896_v46 }
 0xa13   :  { %v11181_v15 = vadd.bf16 %v13077_v53, %v10605_v27  ;;  %v11183_v63 = vadd.bf16 %v13077_v53, %v10607_v3 }
 0xa14   :  { %v11244_v47 = vmax.bf16 %v20642_v42, %v11180_v26  ;;  %v11246_v48 = vmax.bf16 %v20642_v42, %v11182_v11  ;;  %v13095_v32 = vcombine.low %v11653_v45, %v11665_v6 }
 0xa15   :  { %v11245_v18 = vmax.bf16 %v20642_v42, %v11181_v15  ;;  %v11247_v25 = vmax.bf16 %v20642_v42, %v11183_v63 }
 0xa17   :  { %11374 = vmatprep.subr.bf16.mxu0 %v11245_v18  ;;  %11487 = vmatprep.subr.bf16.mxu1 %v11247_v25 }
 0xa18   :  { %11375 = vmatpush1.bf16.msra.mxu0 %v11244_v47  ;;  %11488 = vmatpush1.bf16.msra.mxu1 %v11246_v48  ;;  %v11669_v47 = vpop.permute.xlu0 %11668  ;;  %v11681_v48 = vpop.permute.xlu1 %11680 }
 0xa1b   :  { %11377 = vmatmul.mubr.bf16.vlgmr.msra.gmra.mrb[0].mxu0 %v14170_v1  ;;  %11490 = vmatmul.mubr.bf16.vlgmr.msra.gmra.mrb[0].mxu1 %v14170_v1 }
 0xa1c   :  { %11386 = vmatprep.mubr.bf16.mxu0 %v14175_v59  ;;  %11499 = vmatprep.mubr.bf16.mxu1 %v14175_v59 }
 0xa23   :  { %11387 = vmatmul.mubr.bf16.gmra.mrb[4].mxu0 %v14173_v37  ;;  %11500 = vmatmul.mubr.bf16.gmra.mrb[4].mxu1 %v14173_v37  ;;  %v11677_v37 = vrot.slane %v11669_v47, %v18896_v46 }
 0xa24   :  { %11396 = vmatprep.mubr.bf16.mxu0 %v14178_v54  ;;  %11509 = vmatprep.mubr.bf16.mxu1 %v14178_v54  ;;  %v11689_v54 = vrot.slane %v11681_v48, %v18896_v46 }
 0xa2b   :  { %11397 = vmatmul.mubr.bf16.gmra.mrb[8].mxu0 %v14176_v14  ;;  %11510 = vmatmul.mubr.bf16.gmra.mrb[8].mxu1 %v14176_v14 }
 0xa2c   :  { %11406 = vmatprep.mubr.bf16.mxu0 %v14181_v33  ;;  %11519 = vmatprep.mubr.bf16.mxu1 %v14181_v33 }
 0xa33   :  { %11407 = vmatmul.mubr.bf16.gmra.mrb[12].mxu0 %v14179_v62  ;;  %11520 = vmatmul.mubr.bf16.gmra.mrb[12].mxu1 %v14179_v62 }
 0xa34   :  { %11416 = vmatprep.mubr.bf16.mxu0 %v14184_v38  ;;  %11529 = vmatprep.mubr.bf16.mxu1 %v14184_v38 }
 0xa3b   :  { %11417 = vmatmul.mubr.bf16.gmra.mrb[16].mxu0 %v14182_v16  ;;  %11530 = vmatmul.mubr.bf16.gmra.mrb[16].mxu1 %v14182_v16 }
 0xa3c   :  { %11426 = vmatprep.mubr.bf16.mxu0 %v14187_v22  ;;  %11539 = vmatprep.mubr.bf16.mxu1 %v14187_v22 }
 0xa43   :  { %11427 = vmatmul.mubr.bf16.gmra.mrb[20].mxu0 %v14185_v7  ;;  %11540 = vmatmul.mubr.bf16.gmra.mrb[20].mxu1 %v14185_v7 }
 0xa44   :  { %11436 = vmatprep.mubr.bf16.mxu0 %v14190_v17  ;;  %11549 = vmatprep.mubr.bf16.mxu1 %v14190_v17 }
 0xa4b   :  { %11437 = vmatmul.mubr.bf16.gmra.mrb[24].mxu0 %v14188_v57  ;;  %11550 = vmatmul.mubr.bf16.gmra.mrb[24].mxu1 %v14188_v57 }
 0xa4c   :  { %11446 = vmatprep.mubr.bf16.mxu0 %v14193_v12  ;;  %11559 = vmatprep.mubr.bf16.mxu1 %v14193_v12 }
 0xa53   :  { %11447 = vmatmul.mubr.bf16.gmra.mrb[28].mxu0 %v14191_v9  ;;  %11560 = vmatmul.mubr.bf16.gmra.mrb[28].mxu1 %v14191_v9  ;;  %v13096_v9 = vcombine.low %v11677_v37, %v11689_v54 }
 0xa54   :  { %11986 = vmatprep.mubr.bf16.mxu0 %v20642_v42  ;;  %12059 = vmatprep.mubr.bf16.mxu1 %v20642_v42 }
 0xaee   :  { %v11378_v19 = vpop.f32.mrb[0].mxu0  ;;  %v11491_v39 = vpop.f32.mrb[0].mxu1 }
 0xaef   :  { %v11380_v52 = vpop.f32.mrb[1].mxu0  ;;  %v11493_v49 = vpop.f32.mrb[1].mxu1 }
 0xaf0   :  { %v11382_v0 = vpop.f32.mrb[2].mxu0  ;;  %v11495_v51 = vpop.f32.mrb[2].mxu1 }
 0xaf1   :  { %v11570_v10 = vpack.c.bf16 %v11382_v0, %v11378_v19  ;;  %v11572_v2 = vpack.c.bf16 %v11495_v51, %v11491_v39  ;;  %v11384_v44 = vpop.f32.mrb[3].mxu0  ;;  %v11497_v60 = vpop.f32.mrb[3].mxu1 }
 0xaf2   :  { %v11571_v61 = vpack.c.bf16 %v11384_v44, %v11380_v52  ;;  %v11573_v35 = vpack.c.bf16 %v11497_v60, %v11493_v49  ;;  %v11693_v0 = vpop.permute.xlu0 %11692  ;;  %v11705_v51 = vpop.permute.xlu1 %11704 }
 0xaf3   :  { %v11858_v20 = vadd.bf16 %v13094_v36, %v11570_v10  ;;  %v11860_v30 = vadd.bf16 %v13094_v36, %v11572_v2  ;;  %v11701_v2 = vrot.slane %v11693_v0, %v18896_v46  ;;  %v11713_v44 = vrot.slane %v11705_v51, %v18896_v46 }
 0xaf4   :  { %v11859_v28 = vadd.bf16 %v13094_v36, %v11571_v61  ;;  %v11861_v56 = vadd.bf16 %v13094_v36, %v11573_v35 }
 0xaf5   :  { %v11890_v43 = vmax.bf16 %v20642_v42, %v11858_v20  ;;  %v11892_v58 = vmax.bf16 %v20642_v42, %v11860_v30  ;;  %v13097_v6 = vcombine.low %v11701_v2, %v11713_v44 }
 0xaf6   :  { %v11388_v31 = vpop.f32.mrb[4].mxu0  ;;  %v11501_v41 = vpop.f32.mrb[4].mxu1  ;;  %v11891_v50 = vmax.bf16 %v20642_v42, %v11859_v28  ;;  %v11893_v34 = vmax.bf16 %v20642_v42, %v11861_v56 }
 0xaf7   :  { %v11390_v53 = vpop.f32.mrb[5].mxu0  ;;  %v11503_v23 = vpop.f32.mrb[5].mxu1 }
 0xaf8   :  { %v11392_v40 = vpop.f32.mrb[6].mxu0  ;;  %v11505_v8 = vpop.f32.mrb[6].mxu1  ;;  %11954 = vmatprep.subr.bf16.mxu0 %v11891_v50  ;;  %12027 = vmatprep.subr.bf16.mxu1 %v11893_v34 }
 0xaf9   :  { %v11574_v27 = vpack.c.bf16 %v11392_v40, %v11388_v31  ;;  %v11576_v3 = vpack.c.bf16 %v11505_v8, %v11501_v41  ;;  %v11394_v26 = vpop.f32.mrb[7].mxu0  ;;  %v11507_v11 = vpop.f32.mrb[7].mxu1  ;;  %11955 = vmatpush1.bf16.msra.mxu0 %v11890_v43  ;;  %12028 = vmatpush1.bf16.msra.mxu1 %v11892_v58 }
 0xafa   :  { %v11575_v15 = vpack.c.bf16 %v11394_v26, %v11390_v53  ;;  %v11577_v63 = vpack.c.bf16 %v11507_v11, %v11503_v23  ;;  %v11717_v40 = vpop.permute.xlu0 %11716  ;;  %v11729_v8 = vpop.permute.xlu1 %11728 }
 0xafb   :  { %v11862_v18 = vadd.bf16 %v13095_v32, %v11574_v27  ;;  %v11864_v25 = vadd.bf16 %v13095_v32, %v11576_v3  ;;  %v11725_v3 = vrot.slane %v11717_v40, %v18896_v46  ;;  %v11737_v26 = vrot.slane %v11729_v8, %v18896_v46 }
 0xafc   :  { %v11863_v1 = vadd.bf16 %v13095_v32, %v11575_v15  ;;  %v11865_v59 = vadd.bf16 %v13095_v32, %v11577_v63 }
 0xafd   :  { %v11894_v16 = vmax.bf16 %v20642_v42, %v11862_v18  ;;  %v11896_v22 = vmax.bf16 %v20642_v42, %v11864_v25  ;;  %v13098_v54 = vcombine.low %v11725_v3, %v11737_v26 }
 0xafe   :  { %v11398_v14 = vpop.f32.mrb[8].mxu0  ;;  %v11511_v33 = vpop.f32.mrb[8].mxu1  ;;  %v11895_v62 = vmax.bf16 %v20642_v42, %v11863_v1  ;;  %v11897_v38 = vmax.bf16 %v20642_v42, %v11865_v59 }
 0xaff   :  { %v11400_v7 = vpop.f32.mrb[9].mxu0  ;;  %v11513_v17 = vpop.f32.mrb[9].mxu1 }
 0xb00   :  { %v11402_v57 = vpop.f32.mrb[10].mxu0  ;;  %v11515_v12 = vpop.f32.mrb[10].mxu1  ;;  %11956 = vmatprep.subr.bf16.mxu0 %v11895_v62  ;;  %12029 = vmatprep.subr.bf16.mxu1 %v11897_v38 }
 0xb01   :  { %v11578_v4 = vpack.c.bf16 %v11402_v57, %v11398_v14  ;;  %v11580_v21 = vpack.c.bf16 %v11515_v12, %v11511_v33  ;;  %v11404_v29 = vpop.f32.mrb[11].mxu0  ;;  %v11517_v5 = vpop.f32.mrb[11].mxu1  ;;  %11957 = vmatpush1.bf16.msra.mxu0 %v11894_v16  ;;  %12030 = vmatpush1.bf16.msra.mxu1 %v11896_v22 }
 0xb02   :  { %v11579_v19 = vpack.c.bf16 %v11404_v29, %v11400_v7  ;;  %v11581_v39 = vpack.c.bf16 %v11517_v5, %v11513_v17  ;;  %v11741_v57 = vpop.permute.xlu0 %11740  ;;  %v11753_v12 = vpop.permute.xlu1 %11752 }
 0xb03   :  { %v11866_v52 = vadd.bf16 %v13096_v9, %v11578_v4  ;;  %v11868_v49 = vadd.bf16 %v13096_v9, %v11580_v21  ;;  %v11749_v21 = vrot.slane %v11741_v57, %v18896_v46  ;;  %v11761_v29 = vrot.slane %v11753_v12, %v18896_v46 }
 0xb04   :  { %v11867_v36 = vadd.bf16 %v13096_v9, %v11579_v19  ;;  %v11869_v10 = vadd.bf16 %v13096_v9, %v11581_v39 }
 0xb05   :  { %v11898_v30 = vmax.bf16 %v20642_v42, %v11866_v52  ;;  %v11900_v13 = vmax.bf16 %v20642_v42, %v11868_v49  ;;  %v13099_v44 = vcombine.low %v11749_v21, %v11761_v29 }
 0xb06   :  { %v11408_v60 = vpop.f32.mrb[12].mxu0  ;;  %v11521_v61 = vpop.f32.mrb[12].mxu1  ;;  %v11899_v35 = vmax.bf16 %v20642_v42, %v11867_v36  ;;  %v11901_v20 = vmax.bf16 %v20642_v42, %v11869_v10 }
 0xb07   :  { %v11410_v24 = vpop.f32.mrb[13].mxu0  ;;  %v11523_v28 = vpop.f32.mrb[13].mxu1 }
 0xb08   :  { %v11412_v56 = vpop.f32.mrb[14].mxu0  ;;  %v11525_v45 = vpop.f32.mrb[14].mxu1  ;;  %11958 = vmatprep.subr.bf16.mxu0 %v11899_v35  ;;  %12031 = vmatprep.subr.bf16.mxu1 %v11901_v20 }
 0xb09   :  { %v11582_v31 = vpack.c.bf16 %v11412_v56, %v11408_v60  ;;  %v11584_v41 = vpack.c.bf16 %v11525_v45, %v11521_v61  ;;  %v11414_v50 = vpop.f32.mrb[15].mxu0  ;;  %v11527_v34 = vpop.f32.mrb[15].mxu1  ;;  %11959 = vmatpush1.bf16.msra.mxu0 %v11898_v30  ;;  %12032 = vmatpush1.bf16.msra.mxu1 %v11900_v13 }
 0xb0a   :  { %v11583_v43 = vpack.c.bf16 %v11414_v50, %v11410_v24  ;;  %v11585_v58 = vpack.c.bf16 %v11527_v34, %v11523_v28  ;;  %v11765_v56 = vpop.permute.xlu0 %11764  ;;  %v11777_v45 = vpop.permute.xlu1 %11776 }
 0xb0b   :  { %v11870_v53 = vadd.bf16 %v13097_v6, %v11582_v31  ;;  %v11872_v23 = vadd.bf16 %v13097_v6, %v11584_v41  ;;  %v11773_v41 = vrot.slane %v11765_v56, %v18896_v46  ;;  %v11785_v50 = vrot.slane %v11777_v45, %v18896_v46 }
 0xb0c   :  { %v11871_v32 = vadd.bf16 %v13097_v6, %v11583_v43  ;;  %v11873_v27 = vadd.bf16 %v13097_v6, %v11585_v58 }
 0xb0d   :  { %v11902_v25 = vmax.bf16 %v20642_v42, %v11870_v53  ;;  %v11904_v47 = vmax.bf16 %v20642_v42, %v11872_v23  ;;  %v13100_v26 = vcombine.low %v11773_v41, %v11785_v50 }
 0xb0e   :  { %v11418_v11 = vpop.f32.mrb[16].mxu0  ;;  %v11531_v15 = vpop.f32.mrb[16].mxu1  ;;  %v11903_v63 = vmax.bf16 %v20642_v42, %v11871_v32  ;;  %v11905_v18 = vmax.bf16 %v20642_v42, %v11873_v27 }
 0xb0f   :  { %v11420_v48 = vpop.f32.mrb[17].mxu0  ;;  %v11533_v1 = vpop.f32.mrb[17].mxu1 }
 0xb10   :  { %v11422_v59 = vpop.f32.mrb[18].mxu0  ;;  %v11535_v37 = vpop.f32.mrb[18].mxu1  ;;  %11960 = vmatprep.subr.bf16.mxu0 %v11903_v63  ;;  %12033 = vmatprep.subr.bf16.mxu1 %v11905_v18 }
 0xb11   :  { %v11586_v14 = vpack.c.bf16 %v11422_v59, %v11418_v11  ;;  %v11588_v33 = vpack.c.bf16 %v11535_v37, %v11531_v15  ;;  %v11424_v62 = vpop.f32.mrb[19].mxu0  ;;  %v11537_v38 = vpop.f32.mrb[19].mxu1  ;;  %11961 = vmatpush1.bf16.msra.mxu0 %v11902_v25  ;;  %12034 = vmatpush1.bf16.msra.mxu1 %v11904_v47 }
 0xb12   :  { %v11587_v16 = vpack.c.bf16 %v11424_v62, %v11420_v48  ;;  %v11589_v22 = vpack.c.bf16 %v11537_v38, %v11533_v1  ;;  %v11789_v59 = vpop.permute.xlu0 %11788  ;;  %v11801_v37 = vpop.permute.xlu1 %11800 }
 0xb13   :  { %v11874_v7 = vadd.bf16 %v13098_v54, %v11586_v14  ;;  %v11876_v17 = vadd.bf16 %v13098_v54, %v11588_v33  ;;  %v11797_v33 = vrot.slane %v11789_v59, %v18896_v46  ;;  %v11809_v62 = vrot.slane %v11801_v37, %v18896_v46 }
 0xb14   :  { %v11875_v9 = vadd.bf16 %v13098_v54, %v11587_v16  ;;  %v11877_v4 = vadd.bf16 %v13098_v54, %v11589_v22 }
 0xb15   :  { %v11906_v49 = vmax.bf16 %v20642_v42, %v11874_v7  ;;  %v11908_v0 = vmax.bf16 %v20642_v42, %v11876_v17  ;;  %v13101_v29 = vcombine.low %v11797_v33, %v11809_v62 }
 0xb16   :  { %v11428_v5 = vpop.f32.mrb[20].mxu0  ;;  %v11541_v19 = vpop.f32.mrb[20].mxu1  ;;  %v11907_v39 = vmax.bf16 %v20642_v42, %v11875_v9  ;;  %v11909_v52 = vmax.bf16 %v20642_v42, %v11877_v4 }
 0xb17   :  { %v11430_v51 = vpop.f32.mrb[21].mxu0  ;;  %v11543_v36 = vpop.f32.mrb[21].mxu1 }
 0xb18   :  { %v11432_v10 = vpop.f32.mrb[22].mxu0  ;;  %v11545_v2 = vpop.f32.mrb[22].mxu1  ;;  %11962 = vmatprep.subr.bf16.mxu0 %v11907_v39  ;;  %12035 = vmatprep.subr.bf16.mxu1 %v11909_v52 }
 0xb19   :  { %v11590_v60 = vpack.c.bf16 %v11432_v10, %v11428_v5  ;;  %v11592_v61 = vpack.c.bf16 %v11545_v2, %v11541_v19  ;;  %v11434_v35 = vpop.f32.mrb[23].mxu0  ;;  %v11547_v20 = vpop.f32.mrb[23].mxu1  ;;  %11963 = vmatpush1.bf16.msra.mxu0 %v11906_v49  ;;  %12036 = vmatpush1.bf16.msra.mxu1 %v11908_v0 }
 0xb1a   :  { %v11591_v30 = vpack.c.bf16 %v11434_v35, %v11430_v51  ;;  %v11593_v13 = vpack.c.bf16 %v11547_v20, %v11543_v36  ;;  %v14194_v20 = vld [vmem:[%s20101_s13] sm:$0xff]   ;;  %v12139_v56 = vpop.permute.xlu1 %12138 }
 0xb1b   :  { %v11878_v24 = vadd.bf16 %v13099_v44, %v11590_v60  ;;  %v11880_v28 = vadd.bf16 %v13099_v44, %v11592_v61 }
 0xb1c   :  { %v11879_v6 = vadd.bf16 %v13099_v44, %v11591_v30  ;;  %v11881_v31 = vadd.bf16 %v13099_v44, %v11593_v13  ;;  %v14195_v30 = vld [vmem:[%s20101_s13 + $0x8] sm:$0xff]   ;;  %v14196_v13 = vld [vmem:[%s20101_s13 + $0x10] sm:$0xff]  }
 0xb1d   :  { %v11910_v23 = vmax.bf16 %v20642_v42, %v11878_v24  ;;  %v11912_v40 = vmax.bf16 %v20642_v42, %v11880_v28  ;;  %v14197_v24 = vld [vmem:[%s20101_s13 + $0x18] sm:$0xff]   ;;  %v12127_v28 = vpop.permute.xlu0 %12126 }
 0xb1e   :  { %v11438_v34 = vpop.f32.mrb[24].mxu0  ;;  %v11551_v43 = vpop.f32.mrb[24].mxu1  ;;  %v11911_v58 = vmax.bf16 %v20642_v42, %v11879_v6  ;;  %v11913_v53 = vmax.bf16 %v20642_v42, %v11881_v31  ;;  %v12135_v50 = vrot.slane %v12127_v28, %v18896_v46 }
 0xb1f   :  { %v11440_v8 = vpop.f32.mrb[25].mxu0  ;;  %v11553_v32 = vpop.f32.mrb[25].mxu1 }
 0xb20   :  { %v11442_v27 = vpop.f32.mrb[26].mxu0  ;;  %v11555_v3 = vpop.f32.mrb[26].mxu1  ;;  %11964 = vmatprep.subr.bf16.mxu0 %v11911_v58  ;;  %12037 = vmatprep.subr.bf16.mxu1 %v11913_v53 }
 0xb21   :  { %v11594_v11 = vpack.c.bf16 %v11442_v27, %v11438_v34  ;;  %v11596_v15 = vpack.c.bf16 %v11555_v3, %v11551_v43  ;;  %v11444_v63 = vpop.f32.mrb[27].mxu0  ;;  %v11557_v18 = vpop.f32.mrb[27].mxu1  ;;  %11965 = vmatpush1.bf16.msra.mxu0 %v11910_v23  ;;  %12038 = vmatpush1.bf16.msra.mxu1 %v11912_v40  ;;  %v12147_v34 = vrot.slane %v12139_v56, %v18896_v46 }
 0xb22   :  { %v11595_v25 = vpack.c.bf16 %v11444_v63, %v11440_v8  ;;  %v11597_v47 = vpack.c.bf16 %v11557_v18, %v11553_v32  ;;  %v12151_v45 = vpop.permute.xlu0 %12150  ;;  %v12163_v6 = vpop.permute.xlu1 %12162 }
 0xb23   :  { %v11882_v48 = vadd.bf16 %v13100_v26, %v11594_v11  ;;  %v11884_v1 = vadd.bf16 %v13100_v26, %v11596_v15  ;;  %v13106_v3 = vcombine.low %v12135_v50, %v12147_v34  ;;  %v12159_v37 = vrot.slane %v12151_v45, %v18896_v46 }
 0xb24   :  { %v11883_v54 = vadd.bf16 %v13100_v26, %v11595_v25  ;;  %v11885_v14 = vadd.bf16 %v13100_v26, %v11597_v47 }
 0xb25   :  { %v11914_v17 = vmax.bf16 %v20642_v42, %v11882_v48  ;;  %v11916_v57 = vmax.bf16 %v20642_v42, %v11884_v1 }
 0xb26   :  { %v11448_v38 = vpop.f32.mrb[28].mxu0  ;;  %v11561_v16 = vpop.f32.mrb[28].mxu1  ;;  %v11915_v22 = vmax.bf16 %v20642_v42, %v11883_v54  ;;  %v11917_v7 = vmax.bf16 %v20642_v42, %v11885_v14  ;;  %v12171_v54 = vrot.slane %v12163_v6, %v18896_v46 }
 0xb27   :  { %v11450_v12 = vpop.f32.mrb[29].mxu0  ;;  %v11563_v9 = vpop.f32.mrb[29].mxu1 }
 0xb28   :  { %v11452_v4 = vpop.f32.mrb[30].mxu0  ;;  %v11565_v21 = vpop.f32.mrb[30].mxu1  ;;  %11966 = vmatprep.subr.bf16.mxu0 %v11915_v22  ;;  %12039 = vmatprep.subr.bf16.mxu1 %v11917_v7 }
 0xb29   :  { %v11598_v5 = vpack.c.bf16 %v11452_v4, %v11448_v38  ;;  %v11600_v19 = vpack.c.bf16 %v11565_v21, %v11561_v16  ;;  %v11454_v39 = vpop.f32.mrb[31].mxu0  ;;  %v11567_v52 = vpop.f32.mrb[31].mxu1  ;;  %11967 = vmatpush1.bf16.msra.mxu0 %v11914_v17  ;;  %12040 = vmatpush1.bf16.msra.mxu1 %v11916_v57 }
 0xb2a   :  { %v11599_v49 = vpack.c.bf16 %v11454_v39, %v11450_v12  ;;  %v11601_v0 = vpack.c.bf16 %v11567_v52, %v11563_v9  ;;  %v20030_v31 = vpop.permute.xlu0 %12174  ;;  %v20032_v41 = vpop.permute.xlu1 %12186 }
 0xb2b   :  { %v11886_v51 = vadd.bf16 %v13101_v29, %v11598_v5  ;;  %v11888_v36 = vadd.bf16 %v13101_v29, %v11600_v19  ;;  %v12183_v16 = vrot.slane %v20030_v31, %v18896_v46 }
 0xb2c   :  { %v11887_v10 = vadd.bf16 %v13101_v29, %v11599_v49  ;;  %v11889_v2 = vadd.bf16 %v13101_v29, %v11601_v0 }
 0xb2d   :  { %v11918_v61 = vmax.bf16 %v20642_v42, %v11886_v51  ;;  %v11920_v35 = vmax.bf16 %v20642_v42, %v11888_v36  ;;  %v13107_v36 = vcombine.low %v12159_v37, %v12171_v54 }
 0xb2e   :  { %v11919_v44 = vmax.bf16 %v20642_v42, %v11887_v10  ;;  %v11921_v60 = vmax.bf16 %v20642_v42, %v11889_v2  ;;  %v20036_v43 = vpop.permute.xlu0 %12198  ;;  %v20038_v58 = vpop.permute.xlu1 %12210  ;;  %v12195_v2 = vrot.slane %v20032_v41, %v18896_v46 }
 0xb2f   :  { %v12207_v10 = vrot.slane %v20036_v43, %v18896_v46 }
 0xb30   :  { %11968 = vmatprep.subr.bf16.mxu0 %v11919_v44  ;;  %12041 = vmatprep.subr.bf16.mxu1 %v11921_v60  ;;  %v12219_v44 = vrot.slane %v20038_v58, %v18896_v46  ;;  %v13108_v41 = vcombine.low %v12183_v16, %v12195_v2 }
 0xb31   :  { %11969 = vmatpush1.bf16.msra.mxu0 %v11918_v61  ;;  %12042 = vmatpush1.bf16.msra.mxu1 %v11920_v35 }
 0xb32   :  { %v12319_v14 = vpop.permute.xlu0 %12318  ;;  %v12324_v33 = vpop.permute.xlu1 %12323 }
 0xb34   :  { %11987 = vmatmul.mubr.bf16.vlgmr.msra.gmra.mrb[32].mxu0 %v14194_v20  ;;  %12060 = vmatmul.mubr.bf16.vlgmr.msra.gmra.mrb[32].mxu1 %v14194_v20 }
 0xb35   :  { %11996 = vmatprep.mubr.bf16.mxu0 %v20642_v42  ;;  %12069 = vmatprep.mubr.bf16.mxu1 %v20642_v42 }
 0xb36   :  { %v12334_v16 = vpop.permute.xlu1 %12333 }
 0xb3c   :  { %11997 = vmatmul.mubr.bf16.gmra.mrb[36].mxu0 %v14195_v30  ;;  %12070 = vmatmul.mubr.bf16.gmra.mrb[36].mxu1 %v14195_v30 }
 0xb3d   :  { %12006 = vmatprep.mubr.bf16.mxu0 %v20642_v42  ;;  %12079 = vmatprep.mubr.bf16.mxu1 %v20642_v42 }
 0xb44   :  { %12007 = vmatmul.mubr.bf16.gmra.mrb[40].mxu0 %v14196_v13  ;;  %12080 = vmatmul.mubr.bf16.gmra.mrb[40].mxu1 %v14196_v13 }
 0xb45   :  { %12016 = vmatprep.mubr.bf16.mxu0 %v20642_v42  ;;  %12089 = vmatprep.mubr.bf16.mxu1 %v20642_v42 }
 0xb4c   :  { %12017 = vmatmul.mubr.bf16.gmra.mrb[44].mxu0 %v14197_v24  ;;  %12090 = vmatmul.mubr.bf16.gmra.mrb[44].mxu1 %v14197_v24 }
 0xc07   :  { %v11988_v53 = vpop.f32.mrb[32].mxu0  ;;  %v12061_v23 = vpop.f32.mrb[32].mxu1 }
 0xc08   :  { %v11990_v40 = vpop.f32.mrb[33].mxu0  ;;  %v12063_v8 = vpop.f32.mrb[33].mxu1 }
 0xc09   :  { %v11992_v32 = vpop.f32.mrb[34].mxu0  ;;  %v12065_v27 = vpop.f32.mrb[34].mxu1 }
 0xc0a   :  { %v12100_v26 = vpack.c.bf16 %v11992_v32, %v11988_v53  ;;  %v12102_v11 = vpack.c.bf16 %v12065_v27, %v12061_v23  ;;  %v11994_v15 = vpop.f32.mrb[35].mxu0  ;;  %v12067_v63 = vpop.f32.mrb[35].mxu1  ;;  %v20054_v23 = vcombine.low %v12207_v10, %v12219_v44 }
 0xc0b   :  { %v12101_v18 = vpack.c.bf16 %v11994_v15, %v11990_v40  ;;  %v12103_v25 = vpack.c.bf16 %v12067_v63, %v12063_v8 }
 0xc0c   :  { %v12244_v47 = vadd.bf16 %v13106_v3, %v12100_v26  ;;  %v12246_v48 = vadd.bf16 %v13106_v3, %v12102_v11 }
 0xc0d   :  { %v12245_v1 = vadd.bf16 %v13106_v3, %v12101_v18  ;;  %v12247_v59 = vadd.bf16 %v13106_v3, %v12103_v25 }
 0xc0e   :  { %v12260_v62 = vmax.bf16 %v20642_v42, %v12244_v47  ;;  %v12262_v38 = vmax.bf16 %v20642_v42, %v12246_v48 }
 0xc0f   :  { %v12261_v22 = vmax.bf16 %v20642_v42, %v12245_v1  ;;  %v12263_v7 = vmax.bf16 %v20642_v42, %v12247_v59  ;;  %v11998_v17 = vpop.f32.mrb[36].mxu0  ;;  %v12071_v57 = vpop.f32.mrb[36].mxu1 }
 0xc10   :  { %v12276_v12 = vunpack.c.l.bf16 %v12260_v62  ;;  %v12280_v9 = vunpack.c.h.bf16 %v12260_v62  ;;  %v12278_v4 = vunpack.c.l.bf16 %v12262_v38  ;;  %v12282_v21 = vunpack.c.h.bf16 %v12262_v38  ;;  %v12000_v29 = vpop.f32.mrb[37].mxu0  ;;  %v12073_v5 = vpop.f32.mrb[37].mxu1 }
 0xc11   :  { %v12277_v19 = vunpack.c.l.bf16 %v12261_v22  ;;  %v12281_v39 = vunpack.c.h.bf16 %v12261_v22  ;;  %v12279_v52 = vunpack.c.l.bf16 %v12263_v7  ;;  %v12283_v49 = vunpack.c.h.bf16 %v12263_v7  ;;  %v12002_v0 = vpop.f32.mrb[38].mxu0  ;;  %v12075_v51 = vpop.f32.mrb[38].mxu1 }
 0xc12   :  { %v12004_v60 = vpop.f32.mrb[39].mxu0  ;;  %v12077_v61 = vpop.f32.mrb[39].mxu1  ;;  %v12356_v35 = vmul.f32 %v12319_v14, %v12276_v12  ;;  %v12360_v20 = vmul.f32 %v12324_v33, %v12280_v9  ;;  %v12358_v30 = vmul.f32 %v12319_v14, %v12278_v4  ;;  %v12362_v13 = vmul.f32 %v12324_v33, %v12282_v21 }
 0xc13   :  { %v12357_v24 = vmul.f32 %v12319_v14, %v12277_v19  ;;  %v12361_v28 = vmul.f32 %v12324_v33, %v12281_v39  ;;  %v12104_v56 = vpack.c.bf16 %v12002_v0, %v11998_v17  ;;  %v12106_v45 = vpack.c.bf16 %v12075_v51, %v12071_v57  ;;  %v12329_v38 = vpop.permute.xlu0 %12328 }
 0xc14   :  { %v12359_v6 = vmul.f32 %v12319_v14, %v12279_v52  ;;  %v12363_v31 = vmul.f32 %v12324_v33, %v12283_v49  ;;  %v12105_v50 = vpack.c.bf16 %v12004_v60, %v12000_v29  ;;  %v12107_v34 = vpack.c.bf16 %v12077_v61, %v12073_v5 }
 0xc15   :  { %v12248_v43 = vadd.bf16 %v13107_v36, %v12104_v56  ;;  %v12250_v53 = vadd.bf16 %v13107_v36, %v12106_v45  ;;  %v12388_v32 = vadd.f32 %v12360_v20, %v12356_v35  ;;  %v12414_v27 = vadd.f32 %v12362_v13, %v12358_v30 }
 0xc16   :  { %v12249_v46 = vadd.bf16 %v13107_v36, %v12105_v50  ;;  %v12251_v58 = vadd.bf16 %v13107_v36, %v12107_v34  ;;  %v12401_v63 = vadd.f32 %v12361_v28, %v12357_v24  ;;  %v12427_v18 = vadd.f32 %v12363_v31, %v12359_v6 }
 0xc17   :  { %v12008_v40 = vpop.f32.mrb[40].mxu0  ;;  %v12081_v8 = vpop.f32.mrb[40].mxu1  ;;  %v12264_v3 = vmax.bf16 %v20642_v42, %v12248_v43  ;;  %v12266_v26 = vmax.bf16 %v20642_v42, %v12250_v53 }
 0xc18   :  { %v12010_v11 = vpop.f32.mrb[41].mxu0  ;;  %v12083_v15 = vpop.f32.mrb[41].mxu1  ;;  %v12265_v25 = vmax.bf16 %v20642_v42, %v12249_v46  ;;  %v12267_v47 = vmax.bf16 %v20642_v42, %v12251_v58 }
 0xc19   :  { %v12012_v48 = vpop.f32.mrb[42].mxu0  ;;  %v12085_v1 = vpop.f32.mrb[42].mxu1  ;;  %v12284_v59 = vunpack.c.l.bf16 %v12264_v3  ;;  %v12288_v37 = vunpack.c.h.bf16 %v12264_v3  ;;  %v12286_v54 = vunpack.c.l.bf16 %v12266_v26  ;;  %v12290_v14 = vunpack.c.h.bf16 %v12266_v26 }
 0xc1a   :  { %v12014_v33 = vpop.f32.mrb[43].mxu0  ;;  %v12087_v62 = vpop.f32.mrb[43].mxu1  ;;  %v12285_v22 = vunpack.c.l.bf16 %v12265_v25  ;;  %v12289_v7 = vunpack.c.h.bf16 %v12265_v25  ;;  %v12287_v17 = vunpack.c.l.bf16 %v12267_v47  ;;  %v12291_v57 = vunpack.c.h.bf16 %v12267_v47 }
 0xc1b   :  { %v12364_v12 = vmul.f32 %v12329_v38, %v12284_v59  ;;  %v12368_v9 = vmul.f32 %v12334_v16, %v12288_v37  ;;  %v12366_v4 = vmul.f32 %v12329_v38, %v12286_v54  ;;  %v12370_v21 = vmul.f32 %v12334_v16, %v12290_v14  ;;  %v12344_v25 = vpop.permute.xlu1 %12343 }
 0xc1c   :  { %v12365_v29 = vmul.f32 %v12329_v38, %v12285_v22  ;;  %v12369_v5 = vmul.f32 %v12334_v16, %v12289_v7  ;;  %v12367_v19 = vmul.f32 %v12329_v38, %v12287_v17  ;;  %v12371_v39 = vmul.f32 %v12334_v16, %v12291_v57 }
 0xc1d   :  { %v12389_v52 = vadd.f32 %v12388_v32, %v12364_v12  ;;  %v12415_v49 = vadd.f32 %v12414_v27, %v12366_v4  ;;  %v12108_v0 = vpack.c.bf16 %v12012_v48, %v12008_v40  ;;  %v12110_v51 = vpack.c.bf16 %v12085_v1, %v12081_v8 }
 0xc1e   :  { %v12402_v36 = vadd.f32 %v12401_v63, %v12365_v29  ;;  %v12428_v10 = vadd.f32 %v12427_v18, %v12367_v19  ;;  %v12109_v2 = vpack.c.bf16 %v12014_v33, %v12010_v11  ;;  %v12111_v44 = vpack.c.bf16 %v12087_v62, %v12083_v15  ;;  %v12339_v18 = vpop.permute.xlu0 %12338 }
 0xc1f   :  { %v12018_v60 = vpop.f32.mrb[44].mxu0  ;;  %v12091_v61 = vpop.f32.mrb[44].mxu1  ;;  %v12390_v35 = vadd.f32 %v12389_v52, %v12368_v9  ;;  %v12416_v20 = vadd.f32 %v12415_v49, %v12370_v21  ;;  %v12252_v30 = vadd.bf16 %v13108_v41, %v12108_v0  ;;  %v12254_v13 = vadd.bf16 %v13108_v41, %v12110_v51 }
 0xc20   :  { %v12020_v24 = vpop.f32.mrb[45].mxu0  ;;  %v12093_v28 = vpop.f32.mrb[45].mxu1  ;;  %v12403_v56 = vadd.f32 %v12402_v36, %v12369_v5  ;;  %v12429_v45 = vadd.f32 %v12428_v10, %v12371_v39  ;;  %v12253_v6 = vadd.bf16 %v13108_v41, %v12109_v2  ;;  %v12255_v31 = vadd.bf16 %v13108_v41, %v12111_v44 }
 0xc21   :  { %v12022_v50 = vpop.f32.mrb[46].mxu0  ;;  %v12095_v34 = vpop.f32.mrb[46].mxu1  ;;  %v12268_v43 = vmax.bf16 %v20642_v42, %v12252_v30  ;;  %v12270_v53 = vmax.bf16 %v20642_v42, %v12254_v13 }
 0xc22   :  { %v12112_v46 = vpack.c.bf16 %v12022_v50, %v12018_v60  ;;  %v12114_v58 = vpack.c.bf16 %v12095_v34, %v12091_v61  ;;  %v12024_v40 = vpop.f32.mrb[47].mxu0  ;;  %v12097_v8 = vpop.f32.mrb[47].mxu1  ;;  %v12269_v32 = vmax.bf16 %v20642_v42, %v12253_v6  ;;  %v12271_v27 = vmax.bf16 %v20642_v42, %v12255_v31 }
 0xc23   :  { %v12113_v3 = vpack.c.bf16 %v12024_v40, %v12020_v24  ;;  %v12115_v26 = vpack.c.bf16 %v12097_v8, %v12093_v28  ;;  %v12292_v11 = vunpack.c.l.bf16 %v12268_v43  ;;  %v12296_v15 = vunpack.c.h.bf16 %v12268_v43  ;;  %v12349_v61 = vpop.permute.xlu0 %12348  ;;  %v12354_v28 = vpop.permute.xlu1 %12353 }
 0xc24   :  { %v12294_v63 = vunpack.c.l.bf16 %v12270_v53  ;;  %v12298_v41 = vunpack.c.h.bf16 %v12270_v53  ;;  %v12293_v47 = vunpack.c.l.bf16 %v12269_v32  ;;  %v12297_v48 = vunpack.c.h.bf16 %v12269_v32 }
 0xc25   :  { %v12295_v1 = vunpack.c.l.bf16 %v12271_v27  ;;  %v12299_v59 = vunpack.c.h.bf16 %v12271_v27  ;;  %v12372_v37 = vmul.f32 %v12339_v18, %v12292_v11  ;;  %v12376_v54 = vmul.f32 %v12344_v25, %v12296_v15 }
 0xc26   :  { %v12374_v14 = vmul.f32 %v12339_v18, %v12294_v63  ;;  %v12378_v33 = vmul.f32 %v12344_v25, %v12298_v41  ;;  %v12373_v62 = vmul.f32 %v12339_v18, %v12293_v47  ;;  %v12377_v38 = vmul.f32 %v12344_v25, %v12297_v48 }
 0xc27   :  { %v12375_v16 = vmul.f32 %v12339_v18, %v12295_v1  ;;  %v12379_v22 = vmul.f32 %v12344_v25, %v12299_v59  ;;  %v12391_v7 = vadd.f32 %v12390_v35, %v12372_v37  ;;  %v12256_v57 = vadd.bf16 %v20054_v23, %v12112_v46 }
 0xc28   :  { %v12417_v17 = vadd.f32 %v12416_v20, %v12374_v14  ;;  %v12258_v12 = vadd.bf16 %v20054_v23, %v12114_v58  ;;  %v12404_v9 = vadd.f32 %v12403_v56, %v12373_v62  ;;  %v12257_v21 = vadd.bf16 %v20054_v23, %v12113_v3  ;;  %v12444_v14 = vpop.permute.xlu0 %12443 }
 0xc29   :  { %v12430_v4 = vadd.f32 %v12429_v45, %v12375_v16  ;;  %v12259_v29 = vadd.bf16 %v20054_v23, %v12115_v26  ;;  %v12392_v5 = vadd.f32 %v12391_v7, %v12376_v54  ;;  %v12272_v39 = vmax.bf16 %v20642_v42, %v12256_v57 }
 0xc2a   :  { %v12418_v19 = vadd.f32 %v12417_v17, %v12378_v33  ;;  %v12274_v52 = vmax.bf16 %v20642_v42, %v12258_v12  ;;  %v12405_v49 = vadd.f32 %v12404_v9, %v12377_v38  ;;  %v12273_v51 = vmax.bf16 %v20642_v42, %v12257_v21 }
 0xc2b   :  { %v12431_v0 = vadd.f32 %v12430_v4, %v12379_v22  ;;  %v12275_v36 = vmax.bf16 %v20642_v42, %v12259_v29  ;;  %v12300_v10 = vunpack.c.l.bf16 %v12272_v39  ;;  %v12304_v2 = vunpack.c.h.bf16 %v12272_v39 }
 0xc2c   :  { %v12302_v44 = vunpack.c.l.bf16 %v12274_v52  ;;  %v12306_v60 = vunpack.c.h.bf16 %v12274_v52  ;;  %v12301_v35 = vunpack.c.l.bf16 %v12273_v51  ;;  %v12305_v20 = vunpack.c.h.bf16 %v12273_v51 }
 0xc2d   :  { %v12303_v23 = vunpack.c.l.bf16 %v12275_v36  ;;  %v12307_v30 = vunpack.c.h.bf16 %v12275_v36  ;;  %v12380_v13 = vmul.f32 %v12349_v61, %v12300_v10  ;;  %v12384_v6 = vmul.f32 %v12354_v28, %v12304_v2 }
 0xc2e   :  { %v12382_v24 = vmul.f32 %v12349_v61, %v12302_v44  ;;  %v12381_v56 = vmul.f32 %v12349_v61, %v12301_v35  ;;  %v12386_v50 = vmul.f32 %v12354_v28, %v12306_v60  ;;  %v12385_v43 = vmul.f32 %v12354_v28, %v12305_v20 }
 0xc2f   :  { %v12383_v45 = vmul.f32 %v12349_v61, %v12303_v23  ;;  %v12393_v31 = vadd.f32 %v12392_v5, %v12380_v13  ;;  %v12387_v53 = vmul.f32 %v12354_v28, %v12307_v30  ;;  %v12448_v59 = vsub.s32 0, %v18889_v55 }
 0xc30   :  { %v12419_v34 = vadd.f32 %v12418_v19, %v12382_v24  ;;  %v12406_v42 = vadd.f32 %v12405_v49, %v12381_v56 }
 0xc31   :  { %v12432_v46 = vadd.f32 %v12431_v0, %v12383_v45  ;;  %v12394_v58 = vadd.f32 %v12393_v31, %v12384_v6  ;;  %v12449_v17 = vrot.slane %v12444_v14, %v12448_v59 }
 0xc32   :  { %v12420_v40 = vadd.f32 %v12419_v34, %v12386_v50  ;;  %v12407_v8 = vadd.f32 %v12406_v42, %v12385_v43 }
 0xc33   :  { %v12433_v32 = vadd.f32 %v12432_v46, %v12387_v53  ;;  %v12395_v27 = vrot.slane %v12394_v58, 4 }
 0xc34   :  { %v12421_v3 = vrot.slane %v12420_v40, 4  ;;  %v12408_v26 = vrot.slane %v12407_v8, 4 }
 0xc35   :  { %v12434_v11 = vrot.slane %v12433_v32, 4  ;;  %v12396_v15 = vadd.f32 %v12395_v27, %v12394_v58 }
 0xc36   :  { %v12422_v63 = vadd.f32 %v12421_v3, %v12420_v40  ;;  %v12409_v41 = vadd.f32 %v12408_v26, %v12407_v8 }
 0xc37   :  { %v12435_v18 = vadd.f32 %v12434_v11, %v12433_v32  ;;  %v12397_v25 = vrot.slane %v12396_v15, 2 }
 0xc38   :  { %v12423_v47 = vrot.slane %v12422_v63, 2  ;;  %v12410_v48 = vrot.slane %v12409_v41, 2 }
 0xc39   :  { %v12436_v1 = vrot.slane %v12435_v18, 2  ;;  %v12398_v37 = vadd.f32 %v12397_v25, %v12396_v15 }
 0xc3a   :  { %v12424_v54 = vadd.f32 %v12423_v47, %v12422_v63  ;;  %v12411_v33 = vadd.f32 %v12410_v48, %v12409_v41 }
 0xc3b   :  { %v12437_v62 = vadd.f32 %v12436_v1, %v12435_v18  ;;  %v12399_v38 = vrot.slane %v12398_v37, 1 }
 0xc3c   :  { %v12425_v16 = vrot.slane %v12424_v54, 1  ;;  %v12412_v22 = vrot.slane %v12411_v33, 1 }
 0xc3d   :  { %v12438_v7 = vrot.slane %v12437_v62, 1  ;;  %v12400_v57 = vadd.f32 %v12399_v38, %v12398_v37 }
 0xc3e   :  { %v12426_v12 = vadd.f32 %v12425_v16, %v12424_v54  ;;  %v12413_v9 = vadd.f32 %v12412_v22, %v12411_v33 }
 0xc3f   :  { %v12439_v4 = vadd.f32 %v12438_v7, %v12437_v62  ;;  %v12450_v21 = vadd.f32 %v12449_v17, %v12400_v57 }
 0xc40   :  { %v12452_v29 = vadd.f32 %v12449_v17, %v12426_v12  ;;  %v12451_v5 = vadd.f32 %v12449_v17, %v12413_v9 }
 0xc41   :  { %v12453_v19 = vadd.f32 %v12449_v17, %v12439_v4  ;;  %v13110_v39 = vmul.f32 -1.442695, %v12450_v21 }
 0xc42   :  { %v13112_v55 = vmul.f32 -1.442695, %v12452_v29  ;;  %v13111_v52 = vmul.f32 -1.442695, %v12451_v5 }
 0xc43   :  { %v13113_v49 = vmul.f32 -1.442695, %v12453_v19  ;;  %14198 = vpow2.f32 %v13110_v39 }
 0xc44   :  { %14200 = vpow2.f32 %v13112_v55 }
 0xc45   :  { %14202 = vpow2.f32 %v13111_v52 }
 0xc46   :  { %14204 = vpow2.f32 %v13113_v49 }
 0xc4d   :  { %v14199_v0 = vpop.eup %14198 }
 0xc4e   :  { %v14201_v51 = vpop.eup %14200  ;;  %v12466_v36 = vadd.f32 1.0, %v14199_v0 }
 0xc4f   :  { %v14203_v10 = vpop.eup %14202  ;;  %v12468_v2 = vadd.f32 1.0, %v14201_v51 }
 0xc50   :  { %v14205_v44 = vpop.eup %14204  ;;  %14206 = vrcp.f32 %v12466_v36  ;;  %v12467_v60 = vadd.f32 1.0, %v14203_v10 }
 0xc51   :  { %14208 = vrcp.f32 %v12468_v2  ;;  %v12469_v61 = vadd.f32 1.0, %v14205_v44 }
 0xc52   :  { %14210 = vrcp.f32 %v12467_v60 }
 0xc53   :  { %14212 = vrcp.f32 %v12469_v61 }
 0xc5a   :  { %v14207_v35 = vpop.eup %14206 }
 0xc5b   :  { %v14209_v20 = vpop.eup %14208  ;;  %12478 = vst [vmem:[%s20102_s17] sm:$0xff] %v14207_v35 }
 0xc5c   :  { %v14211_v23 = vpop.eup %14210  ;;  %12480 = vst [vmem:[%s20102_s17 + $0x10] sm:$0xff] %v14209_v20 }
 0xc5d   :  { %v14213_v30 = vpop.eup %14212  ;;  %12479 = vst [vmem:[%s20102_s17 + $0x8] sm:$0xff] %v14211_v23 }
 0xc5e   :  { %12481 = vst [vmem:[%s20102_s17 + $0x18] sm:$0xff] %v14213_v30 }

</bundles_post_ra>
